<compile_context>
chip_gen: v7x
topology: tpu7x:2x2x1
jax: 0.10.0
libtpu: 0.0.40
codegen_flags: <defaults>
</compile_context>

<pallas_src>
import functools

import jax
import jax.numpy as jnp
from jax.experimental import pallas as pl
from jax.experimental.pallas import tpu as pltpu

_TM_CAP = 512          # rows per grid step (multiple of 8 sublanes / MXU height)
_LANE = 128


def _round_up(x, m):
    return ((x + m - 1) // m) * m


# --------------------------------------------------------------------------
# Fused GEMM kernel:  out = act(x @ w + b [+ res])
# --------------------------------------------------------------------------
def _gemm_kernel(x_ref, w_ref, b_ref, *rest, act, has_res):
    if has_res:
        res_ref, o_ref = rest
    else:
        (o_ref,) = rest
    acc = jnp.dot(x_ref[...], w_ref[...], preferred_element_type=jnp.float32)
    acc = acc + b_ref[...]                    # f32 bias add (fast VPU path)
    if has_res:
        acc = acc + res_ref[...]
    if act == "relu":
        acc = jnp.maximum(acc, 0.0)
    elif act == "sigmoid":
        acc = 1.0 / (1.0 + jnp.exp(-acc))     # exp goes to the EUP
    o_ref[...] = acc.astype(o_ref.dtype)


def _gemm_bias_act(x, w, b, *, act="none", res=None):
    """act(x:(M,K) @ w:(K,Cout) + b [+ res:(M,Cout)]) via a tiled Pallas GEMM."""
    m, k = x.shape
    kw, cout = w.shape
    assert k == kw, (k, kw)

    # Pad contraction dim to a lane multiple (zero rows/cols contribute zero).
    kp = _round_up(k, _LANE)
    if kp != k:
        x = jnp.pad(x, ((0, 0), (0, kp - k)))
        w = jnp.pad(w, ((0, kp - k), (0, 0)))

    # Tile the row dim; pad M so every grid step sees a full (tm, kp) block.
    tm = min(_TM_CAP, _round_up(m, 8))
    mp = _round_up(m, tm)
    if mp != m:
        x = jnp.pad(x, ((0, mp - m), (0, 0)))
        if res is not None:
            res = jnp.pad(res, ((0, mp - m), (0, 0)))

    b2 = b.reshape(1, cout).astype(jnp.float32)
    has_res = res is not None

    in_specs = [
        pl.BlockSpec((tm, kp), lambda i: (i, 0)),
        pl.BlockSpec((kp, cout), lambda i: (0, 0)),
        pl.BlockSpec((1, cout), lambda i: (0, 0)),
    ]
    args = [x.astype(jnp.float32), w.astype(jnp.float32), b2]
    if has_res:
        in_specs.append(pl.BlockSpec((tm, cout), lambda i: (i, 0)))
        args.append(res.astype(jnp.float32))

    cost = pl.CostEstimate(
        flops=2 * mp * kp * cout,
        transcendentals=mp * cout if act == "sigmoid" else 0,
        bytes_accessed=4 * (mp * kp + kp * cout + cout
                            + mp * cout * (2 if has_res else 1)),
    )
    out = pl.pallas_call(
        functools.partial(_gemm_kernel, act=act, has_res=has_res),
        out_shape=jax.ShapeDtypeStruct((mp, cout), jnp.float32),
        grid=(mp // tm,),
        in_specs=in_specs,
        out_specs=pl.BlockSpec((tm, cout), lambda i: (i, 0)),
        compiler_params=pltpu.CompilerParams(dimension_semantics=("parallel",)),
        cost_estimate=cost,
    )(*args)
    return out[:m]


# --------------------------------------------------------------------------
# 2x2 stride-2 max pool: elementwise max of the four window taps
# --------------------------------------------------------------------------
def _max4_kernel(a_ref, b_ref, c_ref, d_ref, o_ref):
    o_ref[...] = jnp.maximum(jnp.maximum(a_ref[...], b_ref[...]),
                             jnp.maximum(c_ref[...], d_ref[...]))


def _maxpool2x2(x):
    """nn.MaxPool2d(kernel=2, stride=2) on NHWC via a tiled Pallas max kernel."""
    n, h, w, c = x.shape
    ho, wo = h // 2, w // 2
    x = x[:, :2 * ho, :2 * wo, :]                       # floor mode: drop odd row/col
    taps = [x[:, dy::2, dx::2, :].reshape(n * ho * wo, c)
            for dy in range(2) for dx in range(2)]      # wrapper glue (data movement)

    m = n * ho * wo
    tm = min(_TM_CAP, _round_up(m, 8))
    mp = _round_up(m, tm)
    taps = [jnp.pad(t, ((0, mp - m), (0, 0))) for t in taps]

    spec = pl.BlockSpec((tm, c), lambda i: (i, 0))
    out = pl.pallas_call(
        _max4_kernel,
        out_shape=jax.ShapeDtypeStruct((mp, c), jnp.float32),
        grid=(mp // tm,),
        in_specs=[spec] * 4,
        out_specs=spec,
        compiler_params=pltpu.CompilerParams(dimension_semantics=("parallel",)),
    )(*taps)
    return out[:m].reshape(n, ho, wo, c)


# --------------------------------------------------------------------------
# 3x3 conv (stride 1) = im2col (wrapper glue) + fused Pallas GEMM
# --------------------------------------------------------------------------
def _conv3x3(x, w, b, *, padding, act, residual=None):
    """x: (N,H,W,Cin) NHWC, w: (3,3,Cin,Cout) HWIO."""
    if padding == "same":
        x = jnp.pad(x, ((0, 0), (1, 1), (1, 1), (0, 0)))
    n, h, wd, cin = x.shape
    ho, wo = h - 2, wd - 2
    # im2col: tap order (dy, dx, cin) matches w.reshape(9*cin, cout) below.
    cols = [x[:, dy:dy + ho, dx:dx + wo, :] for dy in range(3) for dx in range(3)]
    patches = jnp.concatenate(cols, axis=-1).reshape(n * ho * wo, 9 * cin)
    w2d = w.reshape(9 * cin, -1)
    cout = w2d.shape[1]
    res2d = None if residual is None else residual.reshape(n * ho * wo, cout)
    out = _gemm_bias_act(patches, w2d, b, act=act, res=res2d)
    return out.reshape(n, ho, wo, cout)


# --------------------------------------------------------------------------
# Full myResNet forward
# --------------------------------------------------------------------------
def myresnet_forward(x, params):
    """x: (N,1,28,28) NCHW like PyTorch, or (1,28,28) unbatched."""
    squeeze = x.ndim == 3
    if squeeze:
        x = x[None]
    x = jnp.transpose(x, (0, 2, 3, 1)).astype(jnp.float32)        # NCHW -> NHWC

    y = _conv3x3(x, params["w1"], params["b1"], padding="valid", act="relu")
    y1 = y                                                        # residual branch
    y = _conv3x3(y, params["w2"], params["b2"], padding="same", act="relu")
    y = _conv3x3(y, params["w2_5"], params["b2_5"], padding="same",
                 act="relu", residual=y1)                         # relu(x1 + x2), fused
    y = _maxpool2x2(y)                                            # PL3
    y = _conv3x3(y, params["w4"], params["b4"], padding="valid", act="relu")
    y = _conv3x3(y, params["w5"], params["b5"], padding="valid", act="relu")
    y = _maxpool2x2(y)                                            # PL6

    n = y.shape[0]
    # torch.flatten flattens NCHW order: channels first, then spatial.
    flat = jnp.transpose(y, (0, 3, 1, 2)).reshape(n, -1)          # (N, 1024)

    h = _gemm_bias_act(flat, params["w7"], params["b7"], act="relu")
    # Pad the 10-way head to 128 output lanes (lane-dense store), slice after.
    w8, b8 = params["w8"], params["b8"]
    out_dim = w8.shape[1]
    w8p = jnp.pad(w8, ((0, 0), (0, _LANE - out_dim)))
    b8p = jnp.pad(b8, (0, _LANE - out_dim))
    out = _gemm_bias_act(h, w8p, b8p, act="sigmoid")[:, :out_dim]
    return out[0] if squeeze else out


# --------------------------------------------------------------------------
# Params (mirror PyTorch default init: U(-1/sqrt(fan_in), +1/sqrt(fan_in)))
# --------------------------------------------------------------------------
def init_params(key):
    ks = jax.random.split(key, 14)

    def conv_init(kw, kb, cin, cout):
        bound = 1.0 / (cin * 9) ** 0.5
        w = jax.random.uniform(kw, (3, 3, cin, cout), jnp.float32, -bound, bound)
        b = jax.random.uniform(kb, (cout,), jnp.float32, -bound, bound)
        return w, b

    def lin_init(kw, kb, fin, fout):
        bound = 1.0 / fin ** 0.5
        w = jax.random.uniform(kw, (fin, fout), jnp.float32, -bound, bound)  # (in, out)
        b = jax.random.uniform(kb, (fout,), jnp.float32, -bound, bound)
        return w, b

    p = {}
    p["w1"], p["b1"] = conv_init(ks[0], ks[1], 1, 32)
    p["w2"], p["b2"] = conv_init(ks[2], ks[3], 32, 32)
    p["w2_5"], p["b2_5"] = conv_init(ks[4], ks[5], 32, 32)
    p["w4"], p["b4"] = conv_init(ks[6], ks[7], 32, 64)
    p["w5"], p["b5"] = conv_init(ks[8], ks[9], 64, 64)
    p["w7"], p["b7"] = lin_init(ks[10], ks[11], 1024, 128)
    p["w8"], p["b8"] = lin_init(ks[12], ks[13], 128, 10)
    return p


# --------------------------------------------------------------------------
# Pure-JAX reference for the self-check
# --------------------------------------------------------------------------
def _ref_forward(x_nhwc, p):
    dn = ("NHWC", "HWIO", "NHWC")

    def conv(z, w, b, padding):
        z = jax.lax.conv_general_dilated(z, w, (1, 1), padding, dimension_numbers=dn)
        return z + b.reshape(1, 1, 1, -1)

    def pool(z):
        return jax.lax.reduce_window(z, -jnp.inf, jax.lax.max,
                                     (1, 2, 2, 1), (1, 2, 2, 1), "VALID")

    y = jax.nn.relu(conv(x_nhwc, p["w1"], p["b1"], "VALID"))
    y1 = y
    y = jax.nn.relu(conv(y, p["w2"], p["b2"], "SAME"))
    y = conv(y, p["w2_5"], p["b2_5"], "SAME")
    y = jax.nn.relu(y1 + y)
    y = pool(y)
    y = jax.nn.relu(conv(y, p["w4"], p["b4"], "VALID"))
    y = jax.nn.relu(conv(y, p["w5"], p["b5"], "VALID"))
    y = pool(y)
    flat = jnp.transpose(y, (0, 3, 1, 2)).reshape(y.shape[0], -1)
    h = jax.nn.relu(flat @ p["w7"] + p["b7"])
    return jax.nn.sigmoid(h @ p["w8"] + p["b8"])


if __name__ == "__main__":
    key = jax.random.PRNGKey(0)
    k_x, k_p = jax.random.split(key)

    batch = 2
    # 28x28 single-channel input is required by Linear(in_features=1024).
    x = jax.random.normal(k_x, (batch, 1, 28, 28), jnp.float32)   # NCHW like PyTorch
    params = init_params(k_p)

    fwd = jax.jit(myresnet_forward)
    out = jax.block_until_ready(fwd(x, params))
    assert out.shape == (batch, 10), out.shape

    ref = _ref_forward(jnp.transpose(x, (0, 2, 3, 1)), params)
    max_err = float(jnp.max(jnp.abs(out - ref)))
    assert jnp.allclose(out, ref, atol=5e-2, rtol=5e-2), max_err

    print("KERNEL_OK")
</pallas_src>

<mosaic_0001>
module attributes {stable_mosaic.version = 11 : i64} {
  func.func @_gemm_kernel(%arg0: i32, %arg1: memref<512x128xf32, #tpu.memory_space<vmem>>, %arg2: memref<128x32xf32, #tpu.memory_space<vmem>>, %arg3: memref<1x32xf32, #tpu.memory_space<vmem>>, %arg4: memref<512x32xf32, #tpu.memory_space<vmem>>) attributes {dimension_semantics = [#tpu.dimension_semantics<parallel>], iteration_bounds = array<i64: 3>, scalar_prefetch = 0 : i64, scratch_operands = 0 : i64, tpu.core_type = #tpu.core_type<tc>, window_params = [{transform_indices = @transform_0, window_bounds = array<i64: 512, 128>}, {pipeline_mode = #tpu.pipeline_mode<synchronous>, transform_indices = @transform_1, window_bounds = array<i64: 128, 32>}, {pipeline_mode = #tpu.pipeline_mode<synchronous>, transform_indices = @transform_2, window_bounds = array<i64: 1, 32>}, {transform_indices = @transform_3, window_bounds = array<i64: 512, 32>}]} {
    %c0 = arith.constant 0 : index
    %c0_0 = arith.constant 0 : index
    %0 = vector.load %arg1[%c0, %c0_0] : memref<512x128xf32, #tpu.memory_space<vmem>>, vector<512x128xf32>
    %c0_1 = arith.constant 0 : index
    %c0_2 = arith.constant 0 : index
    %1 = vector.load %arg2[%c0_1, %c0_2] : memref<128x32xf32, #tpu.memory_space<vmem>>, vector<128x32xf32>
    %cst = arith.constant dense<0.000000e+00> : vector<512x32xf32>
    %2 = tpu.matmul %0, %1, %cst {dimension_numbers = #tpu.dot_dimension_numbers<[1], [0], [0], [1], [0, 0, 1, 1], [], []>} : vector<512x128xf32>, vector<128x32xf32>, vector<512x32xf32> -> vector<512x32xf32>
    %c0_3 = arith.constant 0 : index
    %c0_4 = arith.constant 0 : index
    %3 = vector.load %arg3[%c0_3, %c0_4] : memref<1x32xf32, #tpu.memory_space<vmem>>, vector<1x32xf32>
    %4 = vector.broadcast %3 : vector<1x32xf32> to vector<512x32xf32>
    %5 = arith.addf %2, %4 : vector<512x32xf32>
    %cst_5 = arith.constant 0.000000e+00 : f32
    %6 = vector.broadcast %cst_5 : f32 to vector<512x32xf32>
    %7 = arith.maximumf %5, %6 : vector<512x32xf32>
    %c0_6 = arith.constant 0 : index
    %c0_7 = arith.constant 0 : index
    %8 = vector.load %arg4[%c0_6, %c0_7] : memref<512x32xf32, #tpu.memory_space<vmem>>, vector<512x32xf32>
    tpu.vector_store %arg4[%c0_6, %c0_7], %7 {strides = array<i32>} : memref<512x32xf32, #tpu.memory_space<vmem>>, vector<512x32xf32>,
    return
  }
  func.func @transform_0(%arg0: i32) -> (i32, i32) {
    %c0_i32 = arith.constant 0 : i32
    %c0_i32_0 = arith.constant 0 : i32
    return %arg0, %c0_i32 : i32, i32
  }
  func.func @transform_1(%arg0: i32) -> (i32, i32) {
    %c0_i32 = arith.constant 0 : i32
    %c0_i32_0 = arith.constant 0 : i32
    %c0_i32_1 = arith.constant 0 : i32
    return %c0_i32, %c0_i32_0 : i32, i32
  }
  func.func @transform_2(%arg0: i32) -> (i32, i32) {
    %c0_i32 = arith.constant 0 : i32
    %c0_i32_0 = arith.constant 0 : i32
    %c0_i32_1 = arith.constant 0 : i32
    return %c0_i32, %c0_i32_0 : i32, i32
  }
  func.func @transform_3(%arg0: i32) -> (i32, i32) {
    %c0_i32 = arith.constant 0 : i32
    %c0_i32_0 = arith.constant 0 : i32
    return %arg0, %c0_i32 : i32, i32
  }
}

module attributes {stable_mosaic.version = 11 : i64} {
  func.func @_gemm_kernel(%arg0: i32, %arg1: memref<512x384xf32, #tpu.memory_space<vmem>>, %arg2: memref<384x32xf32, #tpu.memory_space<vmem>>, %arg3: memref<1x32xf32, #tpu.memory_space<vmem>>, %arg4: memref<512x32xf32, #tpu.memory_space<vmem>>) attributes {dimension_semantics = [#tpu.dimension_semantics<parallel>], iteration_bounds = array<i64: 3>, scalar_prefetch = 0 : i64, scratch_operands = 0 : i64, tpu.core_type = #tpu.core_type<tc>, window_params = [{transform_indices = @transform_0, window_bounds = array<i64: 512, 384>}, {pipeline_mode = #tpu.pipeline_mode<synchronous>, transform_indices = @transform_1, window_bounds = array<i64: 384, 32>}, {pipeline_mode = #tpu.pipeline_mode<synchronous>, transform_indices = @transform_2, window_bounds = array<i64: 1, 32>}, {transform_indices = @transform_3, window_bounds = array<i64: 512, 32>}]} {
    %c0 = arith.constant 0 : index
    %c0_0 = arith.constant 0 : index
    %0 = vector.load %arg1[%c0, %c0_0] : memref<512x384xf32, #tpu.memory_space<vmem>>, vector<512x384xf32>
    %c0_1 = arith.constant 0 : index
    %c0_2 = arith.constant 0 : index
    %1 = vector.load %arg2[%c0_1, %c0_2] : memref<384x32xf32, #tpu.memory_space<vmem>>, vector<384x32xf32>
    %cst = arith.constant dense<0.000000e+00> : vector<512x32xf32>
    %2 = tpu.matmul %0, %1, %cst {dimension_numbers = #tpu.dot_dimension_numbers<[1], [0], [0], [1], [0, 0, 1, 1], [], []>} : vector<512x384xf32>, vector<384x32xf32>, vector<512x32xf32> -> vector<512x32xf32>
    %c0_3 = arith.constant 0 : index
    %c0_4 = arith.constant 0 : index
    %3 = vector.load %arg3[%c0_3, %c0_4] : memref<1x32xf32, #tpu.memory_space<vmem>>, vector<1x32xf32>
    %4 = vector.broadcast %3 : vector<1x32xf32> to vector<512x32xf32>
    %5 = arith.addf %2, %4 : vector<512x32xf32>
    %cst_5 = arith.constant 0.000000e+00 : f32
    %6 = vector.broadcast %cst_5 : f32 to vector<512x32xf32>
    %7 = arith.maximumf %5, %6 : vector<512x32xf32>
    %c0_6 = arith.constant 0 : index
    %c0_7 = arith.constant 0 : index
    %8 = vector.load %arg4[%c0_6, %c0_7] : memref<512x32xf32, #tpu.memory_space<vmem>>, vector<512x32xf32>
    tpu.vector_store %arg4[%c0_6, %c0_7], %7 {strides = array<i32>} : memref<512x32xf32, #tpu.memory_space<vmem>>, vector<512x32xf32>,
    return
  }
  func.func @transform_0(%arg0: i32) -> (i32, i32) {
    %c0_i32 = arith.constant 0 : i32
    %c0_i32_0 = arith.constant 0 : i32
    return %arg0, %c0_i32 : i32, i32
  }
  func.func @transform_1(%arg0: i32) -> (i32, i32) {
    %c0_i32 = arith.constant 0 : i32
    %c0_i32_0 = arith.constant 0 : i32
    %c0_i32_1 = arith.constant 0 : i32
    return %c0_i32, %c0_i32_0 : i32, i32
  }
  func.func @transform_2(%arg0: i32) -> (i32, i32) {
    %c0_i32 = arith.constant 0 : i32
    %c0_i32_0 = arith.constant 0 : i32
    %c0_i32_1 = arith.constant 0 : i32
    return %c0_i32, %c0_i32_0 : i32, i32
  }
  func.func @transform_3(%arg0: i32) -> (i32, i32) {
    %c0_i32 = arith.constant 0 : i32
    %c0_i32_0 = arith.constant 0 : i32
    return %arg0, %c0_i32 : i32, i32
  }
}

module attributes {stable_mosaic.version = 11 : i64} {
  func.func @_gemm_kernel(%arg0: i32, %arg1: memref<512x384xf32, #tpu.memory_space<vmem>>, %arg2: memref<384x32xf32, #tpu.memory_space<vmem>>, %arg3: memref<1x32xf32, #tpu.memory_space<vmem>>, %arg4: memref<512x32xf32, #tpu.memory_space<vmem>>, %arg5: memref<512x32xf32, #tpu.memory_space<vmem>>) attributes {dimension_semantics = [#tpu.dimension_semantics<parallel>], iteration_bounds = array<i64: 3>, scalar_prefetch = 0 : i64, scratch_operands = 0 : i64, tpu.core_type = #tpu.core_type<tc>, window_params = [{transform_indices = @transform_0, window_bounds = array<i64: 512, 384>}, {pipeline_mode = #tpu.pipeline_mode<synchronous>, transform_indices = @transform_1, window_bounds = array<i64: 384, 32>}, {pipeline_mode = #tpu.pipeline_mode<synchronous>, transform_indices = @transform_2, window_bounds = array<i64: 1, 32>}, {transform_indices = @transform_3, window_bounds = array<i64: 512, 32>}, {transform_indices = @transform_4, window_bounds = array<i64: 512, 32>}]} {
    %c0 = arith.constant 0 : index
    %c0_0 = arith.constant 0 : index
    %0 = vector.load %arg1[%c0, %c0_0] : memref<512x384xf32, #tpu.memory_space<vmem>>, vector<512x384xf32>
    %c0_1 = arith.constant 0 : index
    %c0_2 = arith.constant 0 : index
    %1 = vector.load %arg2[%c0_1, %c0_2] : memref<384x32xf32, #tpu.memory_space<vmem>>, vector<384x32xf32>
    %cst = arith.constant dense<0.000000e+00> : vector<512x32xf32>
    %2 = tpu.matmul %0, %1, %cst {dimension_numbers = #tpu.dot_dimension_numbers<[1], [0], [0], [1], [0, 0, 1, 1], [], []>} : vector<512x384xf32>, vector<384x32xf32>, vector<512x32xf32> -> vector<512x32xf32>
    %c0_3 = arith.constant 0 : index
    %c0_4 = arith.constant 0 : index
    %3 = vector.load %arg3[%c0_3, %c0_4] : memref<1x32xf32, #tpu.memory_space<vmem>>, vector<1x32xf32>
    %4 = vector.broadcast %3 : vector<1x32xf32> to vector<512x32xf32>
    %5 = arith.addf %2, %4 : vector<512x32xf32>
    %c0_5 = arith.constant 0 : index
    %c0_6 = arith.constant 0 : index
    %6 = vector.load %arg4[%c0_5, %c0_6] : memref<512x32xf32, #tpu.memory_space<vmem>>, vector<512x32xf32>
    %7 = arith.addf %5, %6 : vector<512x32xf32>
    %cst_7 = arith.constant 0.000000e+00 : f32
    %8 = vector.broadcast %cst_7 : f32 to vector<512x32xf32>
    %9 = arith.maximumf %7, %8 : vector<512x32xf32>
    %c0_8 = arith.constant 0 : index
    %c0_9 = arith.constant 0 : index
    %10 = vector.load %arg5[%c0_8, %c0_9] : memref<512x32xf32, #tpu.memory_space<vmem>>, vector<512x32xf32>
    tpu.vector_store %arg5[%c0_8, %c0_9], %9 {strides = array<i32>} : memref<512x32xf32, #tpu.memory_space<vmem>>, vector<512x32xf32>,
    return
  }
  func.func @transform_0(%arg0: i32) -> (i32, i32) {
    %c0_i32 = arith.constant 0 : i32
    %c0_i32_0 = arith.constant 0 : i32
    return %arg0, %c0_i32 : i32, i32
  }
  func.func @transform_1(%arg0: i32) -> (i32, i32) {
    %c0_i32 = arith.constant 0 : i32
    %c0_i32_0 = arith.constant 0 : i32
    %c0_i32_1 = arith.constant 0 : i32
    return %c0_i32, %c0_i32_0 : i32, i32
  }
  func.func @transform_2(%arg0: i32) -> (i32, i32) {
    %c0_i32 = arith.constant 0 : i32
    %c0_i32_0 = arith.constant 0 : i32
    %c0_i32_1 = arith.constant 0 : i32
    return %c0_i32, %c0_i32_0 : i32, i32
  }
  func.func @transform_3(%arg0: i32) -> (i32, i32) {
    %c0_i32 = arith.constant 0 : i32
    %c0_i32_0 = arith.constant 0 : i32
    return %arg0, %c0_i32 : i32, i32
  }
  func.func @transform_4(%arg0: i32) -> (i32, i32) {
    %c0_i32 = arith.constant 0 : i32
    %c0_i32_0 = arith.constant 0 : i32
    return %arg0, %c0_i32 : i32, i32
  }
}

module attributes {stable_mosaic.version = 11 : i64} {
  func.func @_max4_kernel(%arg0: i32, %arg1: memref<344x32xf32, #tpu.memory_space<vmem>>, %arg2: memref<344x32xf32, #tpu.memory_space<vmem>>, %arg3: memref<344x32xf32, #tpu.memory_space<vmem>>, %arg4: memref<344x32xf32, #tpu.memory_space<vmem>>, %arg5: memref<344x32xf32, #tpu.memory_space<vmem>>) attributes {dimension_semantics = [#tpu.dimension_semantics<parallel>], iteration_bounds = array<i64: 1>, scalar_prefetch = 0 : i64, scratch_operands = 0 : i64, tpu.core_type = #tpu.core_type<tc>, window_params = [{transform_indices = @transform_0, window_bounds = array<i64: 344, 32>}, {transform_indices = @transform_1, window_bounds = array<i64: 344, 32>}, {transform_indices = @transform_2, window_bounds = array<i64: 344, 32>}, {transform_indices = @transform_3, window_bounds = array<i64: 344, 32>}, {transform_indices = @transform_4, window_bounds = array<i64: 344, 32>}]} {
    %c0 = arith.constant 0 : index
    %c0_0 = arith.constant 0 : index
    %0 = vector.load %arg1[%c0, %c0_0] : memref<344x32xf32, #tpu.memory_space<vmem>>, vector<344x32xf32>
    %c0_1 = arith.constant 0 : index
    %c0_2 = arith.constant 0 : index
    %1 = vector.load %arg2[%c0_1, %c0_2] : memref<344x32xf32, #tpu.memory_space<vmem>>, vector<344x32xf32>
    %2 = arith.maximumf %0, %1 : vector<344x32xf32>
    %c0_3 = arith.constant 0 : index
    %c0_4 = arith.constant 0 : index
    %3 = vector.load %arg3[%c0_3, %c0_4] : memref<344x32xf32, #tpu.memory_space<vmem>>, vector<344x32xf32>
    %c0_5 = arith.constant 0 : index
    %c0_6 = arith.constant 0 : index
    %4 = vector.load %arg4[%c0_5, %c0_6] : memref<344x32xf32, #tpu.memory_space<vmem>>, vector<344x32xf32>
    %5 = arith.maximumf %3, %4 : vector<344x32xf32>
    %6 = arith.maximumf %2, %5 : vector<344x32xf32>
    %c0_7 = arith.constant 0 : index
    %c0_8 = arith.constant 0 : index
    %7 = vector.load %arg5[%c0_7, %c0_8] : memref<344x32xf32, #tpu.memory_space<vmem>>, vector<344x32xf32>
    tpu.vector_store %arg5[%c0_7, %c0_8], %6 {strides = array<i32>} : memref<344x32xf32, #tpu.memory_space<vmem>>, vector<344x32xf32>,
    return
  }
  func.func @transform_0(%arg0: i32) -> (i32, i32) {
    %c0_i32 = arith.constant 0 : i32
    %c0_i32_0 = arith.constant 0 : i32
    return %arg0, %c0_i32 : i32, i32
  }
  func.func @transform_1(%arg0: i32) -> (i32, i32) {
    %c0_i32 = arith.constant 0 : i32
    %c0_i32_0 = arith.constant 0 : i32
    return %arg0, %c0_i32 : i32, i32
  }
  func.func @transform_2(%arg0: i32) -> (i32, i32) {
    %c0_i32 = arith.constant 0 : i32
    %c0_i32_0 = arith.constant 0 : i32
    return %arg0, %c0_i32 : i32, i32
  }
  func.func @transform_3(%arg0: i32) -> (i32, i32) {
    %c0_i32 = arith.constant 0 : i32
    %c0_i32_0 = arith.constant 0 : i32
    return %arg0, %c0_i32 : i32, i32
  }
  func.func @transform_4(%arg0: i32) -> (i32, i32) {
    %c0_i32 = arith.constant 0 : i32
    %c0_i32_0 = arith.constant 0 : i32
    return %arg0, %c0_i32 : i32, i32
  }
}

module attributes {stable_mosaic.version = 11 : i64} {
  func.func @_gemm_kernel(%arg0: i32, %arg1: memref<248x384xf32, #tpu.memory_space<vmem>>, %arg2: memref<384x64xf32, #tpu.memory_space<vmem>>, %arg3: memref<1x64xf32, #tpu.memory_space<vmem>>, %arg4: memref<248x64xf32, #tpu.memory_space<vmem>>) attributes {dimension_semantics = [#tpu.dimension_semantics<parallel>], iteration_bounds = array<i64: 1>, scalar_prefetch = 0 : i64, scratch_operands = 0 : i64, tpu.core_type = #tpu.core_type<tc>, window_params = [{transform_indices = @transform_0, window_bounds = array<i64: 248, 384>}, {pipeline_mode = #tpu.pipeline_mode<synchronous>, transform_indices = @transform_1, window_bounds = array<i64: 384, 64>}, {pipeline_mode = #tpu.pipeline_mode<synchronous>, transform_indices = @transform_2, window_bounds = array<i64: 1, 64>}, {transform_indices = @transform_3, window_bounds = array<i64: 248, 64>}]} {
    %c0 = arith.constant 0 : index
    %c0_0 = arith.constant 0 : index
    %0 = vector.load %arg1[%c0, %c0_0] : memref<248x384xf32, #tpu.memory_space<vmem>>, vector<248x384xf32>
    %c0_1 = arith.constant 0 : index
    %c0_2 = arith.constant 0 : index
    %1 = vector.load %arg2[%c0_1, %c0_2] : memref<384x64xf32, #tpu.memory_space<vmem>>, vector<384x64xf32>
    %cst = arith.constant dense<0.000000e+00> : vector<248x64xf32>
    %2 = tpu.matmul %0, %1, %cst {dimension_numbers = #tpu.dot_dimension_numbers<[1], [0], [0], [1], [0, 0, 1, 1], [], []>} : vector<248x384xf32>, vector<384x64xf32>, vector<248x64xf32> -> vector<248x64xf32>
    %c0_3 = arith.constant 0 : index
    %c0_4 = arith.constant 0 : index
    %3 = vector.load %arg3[%c0_3, %c0_4] : memref<1x64xf32, #tpu.memory_space<vmem>>, vector<1x64xf32>
    %4 = vector.broadcast %3 : vector<1x64xf32> to vector<248x64xf32>
    %5 = arith.addf %2, %4 : vector<248x64xf32>
    %cst_5 = arith.constant 0.000000e+00 : f32
    %6 = vector.broadcast %cst_5 : f32 to vector<248x64xf32>
    %7 = arith.maximumf %5, %6 : vector<248x64xf32>
    %c0_6 = arith.constant 0 : index
    %c0_7 = arith.constant 0 : index
    %8 = vector.load %arg4[%c0_6, %c0_7] : memref<248x64xf32, #tpu.memory_space<vmem>>, vector<248x64xf32>
    tpu.vector_store %arg4[%c0_6, %c0_7], %7 {strides = array<i32>} : memref<248x64xf32, #tpu.memory_space<vmem>>, vector<248x64xf32>,
    return
  }
  func.func @transform_0(%arg0: i32) -> (i32, i32) {
    %c0_i32 = arith.constant 0 : i32
    %c0_i32_0 = arith.constant 0 : i32
    return %arg0, %c0_i32 : i32, i32
  }
  func.func @transform_1(%arg0: i32) -> (i32, i32) {
    %c0_i32 = arith.constant 0 : i32
    %c0_i32_0 = arith.constant 0 : i32
    %c0_i32_1 = arith.constant 0 : i32
    return %c0_i32, %c0_i32_0 : i32, i32
  }
  func.func @transform_2(%arg0: i32) -> (i32, i32) {
    %c0_i32 = arith.constant 0 : i32
    %c0_i32_0 = arith.constant 0 : i32
    %c0_i32_1 = arith.constant 0 : i32
    return %c0_i32, %c0_i32_0 : i32, i32
  }
  func.func @transform_3(%arg0: i32) -> (i32, i32) {
    %c0_i32 = arith.constant 0 : i32
    %c0_i32_0 = arith.constant 0 : i32
    return %arg0, %c0_i32 : i32, i32
  }
}

module attributes {stable_mosaic.version = 11 : i64} {
  func.func @_gemm_kernel(%arg0: i32, %arg1: memref<168x640xf32, #tpu.memory_space<vmem>>, %arg2: memref<640x64xf32, #tpu.memory_space<vmem>>, %arg3: memref<1x64xf32, #tpu.memory_space<vmem>>, %arg4: memref<168x64xf32, #tpu.memory_space<vmem>>) attributes {dimension_semantics = [#tpu.dimension_semantics<parallel>], iteration_bounds = array<i64: 1>, scalar_prefetch = 0 : i64, scratch_operands = 0 : i64, tpu.core_type = #tpu.core_type<tc>, window_params = [{transform_indices = @transform_0, window_bounds = array<i64: 168, 640>}, {pipeline_mode = #tpu.pipeline_mode<synchronous>, transform_indices = @transform_1, window_bounds = array<i64: 640, 64>}, {pipeline_mode = #tpu.pipeline_mode<synchronous>, transform_indices = @transform_2, window_bounds = array<i64: 1, 64>}, {transform_indices = @transform_3, window_bounds = array<i64: 168, 64>}]} {
    %c0 = arith.constant 0 : index
    %c0_0 = arith.constant 0 : index
    %0 = vector.load %arg1[%c0, %c0_0] : memref<168x640xf32, #tpu.memory_space<vmem>>, vector<168x640xf32>
    %c0_1 = arith.constant 0 : index
    %c0_2 = arith.constant 0 : index
    %1 = vector.load %arg2[%c0_1, %c0_2] : memref<640x64xf32, #tpu.memory_space<vmem>>, vector<640x64xf32>
    %cst = arith.constant dense<0.000000e+00> : vector<168x64xf32>
    %2 = tpu.matmul %0, %1, %cst {dimension_numbers = #tpu.dot_dimension_numbers<[1], [0], [0], [1], [0, 0, 1, 1], [], []>} : vector<168x640xf32>, vector<640x64xf32>, vector<168x64xf32> -> vector<168x64xf32>
    %c0_3 = arith.constant 0 : index
    %c0_4 = arith.constant 0 : index
    %3 = vector.load %arg3[%c0_3, %c0_4] : memref<1x64xf32, #tpu.memory_space<vmem>>, vector<1x64xf32>
    %4 = vector.broadcast %3 : vector<1x64xf32> to vector<168x64xf32>
    %5 = arith.addf %2, %4 : vector<168x64xf32>
    %cst_5 = arith.constant 0.000000e+00 : f32
    %6 = vector.broadcast %cst_5 : f32 to vector<168x64xf32>
    %7 = arith.maximumf %5, %6 : vector<168x64xf32>
    %c0_6 = arith.constant 0 : index
    %c0_7 = arith.constant 0 : index
    %8 = vector.load %arg4[%c0_6, %c0_7] : memref<168x64xf32, #tpu.memory_space<vmem>>, vector<168x64xf32>
    tpu.vector_store %arg4[%c0_6, %c0_7], %7 {strides = array<i32>} : memref<168x64xf32, #tpu.memory_space<vmem>>, vector<168x64xf32>,
    return
  }
  func.func @transform_0(%arg0: i32) -> (i32, i32) {
    %c0_i32 = arith.constant 0 : i32
    %c0_i32_0 = arith.constant 0 : i32
    return %arg0, %c0_i32 : i32, i32
  }
  func.func @transform_1(%arg0: i32) -> (i32, i32) {
    %c0_i32 = arith.constant 0 : i32
    %c0_i32_0 = arith.constant 0 : i32
    %c0_i32_1 = arith.constant 0 : i32
    return %c0_i32, %c0_i32_0 : i32, i32
  }
  func.func @transform_2(%arg0: i32) -> (i32, i32) {
    %c0_i32 = arith.constant 0 : i32
    %c0_i32_0 = arith.constant 0 : i32
    %c0_i32_1 = arith.constant 0 : i32
    return %c0_i32, %c0_i32_0 : i32, i32
  }
  func.func @transform_3(%arg0: i32) -> (i32, i32) {
    %c0_i32 = arith.constant 0 : i32
    %c0_i32_0 = arith.constant 0 : i32
    return %arg0, %c0_i32 : i32, i32
  }
}

module attributes {stable_mosaic.version = 11 : i64} {
  func.func @_max4_kernel(%arg0: i32, %arg1: memref<32x64xf32, #tpu.memory_space<vmem>>, %arg2: memref<32x64xf32, #tpu.memory_space<vmem>>, %arg3: memref<32x64xf32, #tpu.memory_space<vmem>>, %arg4: memref<32x64xf32, #tpu.memory_space<vmem>>, %arg5: memref<32x64xf32, #tpu.memory_space<vmem>>) attributes {dimension_semantics = [#tpu.dimension_semantics<parallel>], iteration_bounds = array<i64: 1>, scalar_prefetch = 0 : i64, scratch_operands = 0 : i64, tpu.core_type = #tpu.core_type<tc>, window_params = [{transform_indices = @transform_0, window_bounds = array<i64: 32, 64>}, {transform_indices = @transform_1, window_bounds = array<i64: 32, 64>}, {transform_indices = @transform_2, window_bounds = array<i64: 32, 64>}, {transform_indices = @transform_3, window_bounds = array<i64: 32, 64>}, {transform_indices = @transform_4, window_bounds = array<i64: 32, 64>}]} {
    %c0 = arith.constant 0 : index
    %c0_0 = arith.constant 0 : index
    %0 = vector.load %arg1[%c0, %c0_0] : memref<32x64xf32, #tpu.memory_space<vmem>>, vector<32x64xf32>
    %c0_1 = arith.constant 0 : index
    %c0_2 = arith.constant 0 : index
    %1 = vector.load %arg2[%c0_1, %c0_2] : memref<32x64xf32, #tpu.memory_space<vmem>>, vector<32x64xf32>
    %2 = arith.maximumf %0, %1 : vector<32x64xf32>
    %c0_3 = arith.constant 0 : index
    %c0_4 = arith.constant 0 : index
    %3 = vector.load %arg3[%c0_3, %c0_4] : memref<32x64xf32, #tpu.memory_space<vmem>>, vector<32x64xf32>
    %c0_5 = arith.constant 0 : index
    %c0_6 = arith.constant 0 : index
    %4 = vector.load %arg4[%c0_5, %c0_6] : memref<32x64xf32, #tpu.memory_space<vmem>>, vector<32x64xf32>
    %5 = arith.maximumf %3, %4 : vector<32x64xf32>
    %6 = arith.maximumf %2, %5 : vector<32x64xf32>
    %c0_7 = arith.constant 0 : index
    %c0_8 = arith.constant 0 : index
    %7 = vector.load %arg5[%c0_7, %c0_8] : memref<32x64xf32, #tpu.memory_space<vmem>>, vector<32x64xf32>
    tpu.vector_store %arg5[%c0_7, %c0_8], %6 {strides = array<i32>} : memref<32x64xf32, #tpu.memory_space<vmem>>, vector<32x64xf32>,
    return
  }
  func.func @transform_0(%arg0: i32) -> (i32, i32) {
    %c0_i32 = arith.constant 0 : i32
    %c0_i32_0 = arith.constant 0 : i32
    return %arg0, %c0_i32 : i32, i32
  }
  func.func @transform_1(%arg0: i32) -> (i32, i32) {
    %c0_i32 = arith.constant 0 : i32
    %c0_i32_0 = arith.constant 0 : i32
    return %arg0, %c0_i32 : i32, i32
  }
  func.func @transform_2(%arg0: i32) -> (i32, i32) {
    %c0_i32 = arith.constant 0 : i32
    %c0_i32_0 = arith.constant 0 : i32
    return %arg0, %c0_i32 : i32, i32
  }
  func.func @transform_3(%arg0: i32) -> (i32, i32) {
    %c0_i32 = arith.constant 0 : i32
    %c0_i32_0 = arith.constant 0 : i32
    return %arg0, %c0_i32 : i32, i32
  }
  func.func @transform_4(%arg0: i32) -> (i32, i32) {
    %c0_i32 = arith.constant 0 : i32
    %c0_i32_0 = arith.constant 0 : i32
    return %arg0, %c0_i32 : i32, i32
  }
}

module attributes {stable_mosaic.version = 11 : i64} {
  func.func @_gemm_kernel(%arg0: i32, %arg1: memref<8x1024xf32, #tpu.memory_space<vmem>>, %arg2: memref<1024x128xf32, #tpu.memory_space<vmem>>, %arg3: memref<1x128xf32, #tpu.memory_space<vmem>>, %arg4: memref<8x128xf32, #tpu.memory_space<vmem>>) attributes {dimension_semantics = [#tpu.dimension_semantics<parallel>], iteration_bounds = array<i64: 1>, scalar_prefetch = 0 : i64, scratch_operands = 0 : i64, tpu.core_type = #tpu.core_type<tc>, window_params = [{transform_indices = @transform_0, window_bounds = array<i64: 8, 1024>}, {pipeline_mode = #tpu.pipeline_mode<synchronous>, transform_indices = @transform_1, window_bounds = array<i64: 1024, 128>}, {pipeline_mode = #tpu.pipeline_mode<synchronous>, transform_indices = @transform_2, window_bounds = array<i64: 1, 128>}, {transform_indices = @transform_3, window_bounds = array<i64: 8, 128>}]} {
    %c0 = arith.constant 0 : index
    %c0_0 = arith.constant 0 : index
    %0 = vector.load %arg1[%c0, %c0_0] : memref<8x1024xf32, #tpu.memory_space<vmem>>, vector<8x1024xf32>
    %c0_1 = arith.constant 0 : index
    %c0_2 = arith.constant 0 : index
    %1 = vector.load %arg2[%c0_1, %c0_2] : memref<1024x128xf32, #tpu.memory_space<vmem>>, vector<1024x128xf32>
    %cst = arith.constant dense<0.000000e+00> : vector<8x128xf32>
    %2 = tpu.matmul %0, %1, %cst {dimension_numbers = #tpu.dot_dimension_numbers<[1], [0], [0], [1], [0, 0, 1, 1], [], []>} : vector<8x1024xf32>, vector<1024x128xf32>, vector<8x128xf32> -> vector<8x128xf32>
    %c0_3 = arith.constant 0 : index
    %c0_4 = arith.constant 0 : index
    %3 = vector.load %arg3[%c0_3, %c0_4] : memref<1x128xf32, #tpu.memory_space<vmem>>, vector<1x128xf32>
    %4 = vector.broadcast %3 : vector<1x128xf32> to vector<8x128xf32>
    %5 = arith.addf %2, %4 : vector<8x128xf32>
    %cst_5 = arith.constant 0.000000e+00 : f32
    %6 = vector.broadcast %cst_5 : f32 to vector<8x128xf32>
    %7 = arith.maximumf %5, %6 : vector<8x128xf32>
    %c0_6 = arith.constant 0 : index
    %c0_7 = arith.constant 0 : index
    %8 = vector.load %arg4[%c0_6, %c0_7] : memref<8x128xf32, #tpu.memory_space<vmem>>, vector<8x128xf32>
    tpu.vector_store %arg4[%c0_6, %c0_7], %7 {strides = array<i32>} : memref<8x128xf32, #tpu.memory_space<vmem>>, vector<8x128xf32>,
    return
  }
  func.func @transform_0(%arg0: i32) -> (i32, i32) {
    %c0_i32 = arith.constant 0 : i32
    %c0_i32_0 = arith.constant 0 : i32
    return %arg0, %c0_i32 : i32, i32
  }
  func.func @transform_1(%arg0: i32) -> (i32, i32) {
    %c0_i32 = arith.constant 0 : i32
    %c0_i32_0 = arith.constant 0 : i32
    %c0_i32_1 = arith.constant 0 : i32
    return %c0_i32, %c0_i32_0 : i32, i32
  }
  func.func @transform_2(%arg0: i32) -> (i32, i32) {
    %c0_i32 = arith.constant 0 : i32
    %c0_i32_0 = arith.constant 0 : i32
    %c0_i32_1 = arith.constant 0 : i32
    return %c0_i32, %c0_i32_0 : i32, i32
  }
  func.func @transform_3(%arg0: i32) -> (i32, i32) {
    %c0_i32 = arith.constant 0 : i32
    %c0_i32_0 = arith.constant 0 : i32
    return %arg0, %c0_i32 : i32, i32
  }
}

module attributes {stable_mosaic.version = 11 : i64} {
  func.func @_gemm_kernel(%arg0: i32, %arg1: memref<8x128xf32, #tpu.memory_space<vmem>>, %arg2: memref<128x128xf32, #tpu.memory_space<vmem>>, %arg3: memref<1x128xf32, #tpu.memory_space<vmem>>, %arg4: memref<8x128xf32, #tpu.memory_space<vmem>>) attributes {dimension_semantics = [#tpu.dimension_semantics<parallel>], iteration_bounds = array<i64: 1>, scalar_prefetch = 0 : i64, scratch_operands = 0 : i64, tpu.core_type = #tpu.core_type<tc>, window_params = [{transform_indices = @transform_0, window_bounds = array<i64: 8, 128>}, {pipeline_mode = #tpu.pipeline_mode<synchronous>, transform_indices = @transform_1, window_bounds = array<i64: 128, 128>}, {pipeline_mode = #tpu.pipeline_mode<synchronous>, transform_indices = @transform_2, window_bounds = array<i64: 1, 128>}, {transform_indices = @transform_3, window_bounds = array<i64: 8, 128>}]} {
    %c0 = arith.constant 0 : index
    %c0_0 = arith.constant 0 : index
    %0 = vector.load %arg1[%c0, %c0_0] : memref<8x128xf32, #tpu.memory_space<vmem>>, vector<8x128xf32>
    %c0_1 = arith.constant 0 : index
    %c0_2 = arith.constant 0 : index
    %1 = vector.load %arg2[%c0_1, %c0_2] : memref<128x128xf32, #tpu.memory_space<vmem>>, vector<128x128xf32>
    %cst = arith.constant dense<0.000000e+00> : vector<8x128xf32>
    %2 = tpu.matmul %0, %1, %cst {dimension_numbers = #tpu.dot_dimension_numbers<[1], [0], [0], [1], [0, 0, 1, 1], [], []>} : vector<8x128xf32>, vector<128x128xf32>, vector<8x128xf32> -> vector<8x128xf32>
    %c0_3 = arith.constant 0 : index
    %c0_4 = arith.constant 0 : index
    %3 = vector.load %arg3[%c0_3, %c0_4] : memref<1x128xf32, #tpu.memory_space<vmem>>, vector<1x128xf32>
    %4 = vector.broadcast %3 : vector<1x128xf32> to vector<8x128xf32>
    %5 = arith.addf %2, %4 : vector<8x128xf32>
    %cst_5 = arith.constant 0.000000e+00 : f32
    %6 = vector.broadcast %cst_5 : f32 to vector<8x128xf32>
    %7 = arith.subf %6, %5 : vector<8x128xf32>
    %8 = math.exp %7 : vector<8x128xf32>
    %cst_6 = arith.constant 1.000000e+00 : f32
    %9 = vector.broadcast %cst_6 : f32 to vector<8x128xf32>
    %10 = arith.addf %9, %8 : vector<8x128xf32>
    %cst_7 = arith.constant 1.000000e+00 : f32
    %11 = vector.broadcast %cst_7 : f32 to vector<8x128xf32>
    %12 = arith.divf %11, %10 : vector<8x128xf32>
    %c0_8 = arith.constant 0 : index
    %c0_9 = arith.constant 0 : index
    %13 = vector.load %arg4[%c0_8, %c0_9] : memref<8x128xf32, #tpu.memory_space<vmem>>, vector<8x128xf32>
    tpu.vector_store %arg4[%c0_8, %c0_9], %12 {strides = array<i32>} : memref<8x128xf32, #tpu.memory_space<vmem>>, vector<8x128xf32>,
    return
  }
  func.func @transform_0(%arg0: i32) -> (i32, i32) {
    %c0_i32 = arith.constant 0 : i32
    %c0_i32_0 = arith.constant 0 : i32
    return %arg0, %c0_i32 : i32, i32
  }
  func.func @transform_1(%arg0: i32) -> (i32, i32) {
    %c0_i32 = arith.constant 0 : i32
    %c0_i32_0 = arith.constant 0 : i32
    %c0_i32_1 = arith.constant 0 : i32
    return %c0_i32, %c0_i32_0 : i32, i32
  }
  func.func @transform_2(%arg0: i32) -> (i32, i32) {
    %c0_i32 = arith.constant 0 : i32
    %c0_i32_0 = arith.constant 0 : i32
    %c0_i32_1 = arith.constant 0 : i32
    return %c0_i32, %c0_i32_0 : i32, i32
  }
  func.func @transform_3(%arg0: i32) -> (i32, i32) {
    %c0_i32 = arith.constant 0 : i32
    %c0_i32_0 = arith.constant 0 : i32
    return %arg0, %c0_i32 : i32, i32
  }
}

</mosaic_0001>

<bundles_post_ra>
// kernel: myresnet_forward.9
= control target key start
LH: loop header
LB: loop body
LE: loop exit
PB: predicated region body
PF: predicated region fallthrough
CT: control target
= control target key end

     0   :  { %s1135_s12 = smov 0   ;;  %s1472_s0 = inlined_call_operand.vmem [shape: f32[1536,128], index: 0, kind: input, shape index: {}]   ;;  %s1473_s1 = inlined_call_operand.vmem [shape: f32[128,32], index: 1, kind: input, shape index: {}]   ;;  %s1474_s2 = inlined_call_operand.vmem [shape: f32[1,32], index: 2, kind: input, shape index: {}]   ;;  %s1475_s3 = inlined_call_operand.vmem [shape: f32[1536,32], index: 3, kind: output, shape index: {}]  }
   0x1 LB: > { %s831_s13 = sadd.s32 4294967295, %s1113_s12   ;;  %p835_p0 = scmp.ge.s32.totalorder %s1113_s12, 1  ;;  %s1113_s12 = sphi %s1135_s12, %s13_s12  }
   0x2   : > { %p138_p1 = scmp.lt.s32.totalorder %s1113_s12, 4 }
   0x4   : > { %p139_p2 = pnand %p835_p0, %p138_p1 }
   0x5   : > { %v238_v0 = vld [vmem:[%s1473_s1] sm:$0xff] (!%p139_p2)  ;;  %v239_v1 = vld [vmem:[%s1473_s1 + $0x8] sm:$0xff] (!%p139_p2)  ;;  %v240_v2 = vld [vmem:[%s1473_s1 + $0x10] sm:$0xff] (!%p139_p2)  ;;  %s836_s20 = sshll.u32 (!%p139_p2), %s831_s13, 6  ;;  %vm710_vm0 = vcmask (!%p139_p2), 261120  }
   0x6   : > { %142 = sbr.rel (%p139_p2) target bundleno = 319 (0x13f), region = 32  ;;  %v1051_v3 = vpack.c.bf16 (!%p139_p2), %v239_v1, %v238_v0  ;;  %v241_v4 = vld [vmem:[%s1473_s1 + $0x18] sm:$0xff] (!%p139_p2)  ;;  %p163_p3 = scmp.lt.s32.totalorder (!%p139_p2), %s836_s20, 191  ;;  %v242_v6 = vld [vmem:[%s1473_s1 + $0x20] sm:$0xff] (!%p139_p2)  ;;  %v243_v7 = vld [vmem:[%s1473_s1 + $0x28] sm:$0xff] (!%p139_p2) }
   0x7   : > { %v1055_v5 = vpack.c.bf16 (!%p139_p2), %v241_v4, %v240_v2  ;;  %v1059_v8 = vpack.c.bf16 (!%p139_p2), %v243_v7, %v242_v6  ;;  %v244_v9 = vld [vmem:[%s1473_s1 + $0x30] sm:$0xff] (!%p139_p2)  ;;  %v245_v10 = vld [vmem:[%s1473_s1 + $0x38] sm:$0xff] (!%p139_p2)  ;;  %v246_v14 = vld [vmem:[%s1473_s1 + $0x40] sm:$0xff] (!%p139_p2) }
   0x8   : > { %1052 = vmatprep.subr.bf16.mxu0 (!%p139_p2), %v1051_v3  ;;  %1083 = vmatprep.subr.bf16.mxu1 (!%p139_p2), %v1051_v3  ;;  %v1063_v13 = vpack.c.bf16 (!%p139_p2), %v245_v10, %v244_v9  ;;  %v247_v15 = vld [vmem:[%s1473_s1 + $0x48] sm:$0xff] (!%p139_p2)  ;;  %v248_v17 = vld [vmem:[%s1473_s1 + $0x50] sm:$0xff] (!%p139_p2)  ;;  %v249_v18 = vld [vmem:[%s1473_s1 + $0x58] sm:$0xff] (!%p139_p2) }
   0x9   : > { %1054 = vmatpush3.bf16.msra.mxu0 (!%p139_p2), %v1051_v3  ;;  %1091 = vmatpush3.bf16.msra.mxu1 (!%p139_p2), %v1051_v3  ;;  %v1067_v16 = vpack.c.bf16 (!%p139_p2), %v247_v15, %v246_v14  ;;  %v1071_v19 = vpack.c.bf16 (!%p139_p2), %v249_v18, %v248_v17  ;;  %v250_v20 = vld [vmem:[%s1473_s1 + $0x60] sm:$0xff] (!%p139_p2)  ;;  %v251_v21 = vld [vmem:[%s1473_s1 + $0x68] sm:$0xff] (!%p139_p2)  ;;  %v252_v23 = vld [vmem:[%s1473_s1 + $0x70] sm:$0xff] (!%p139_p2) }
   0xa   : > { %1056 = vmatprep.subr.bf16.mxu0 (!%p139_p2), %v1055_v5  ;;  %1084 = vmatprep.subr.bf16.mxu1 (!%p139_p2), %v1055_v5  ;;  %v1075_v22 = vpack.c.bf16 (!%p139_p2), %v251_v21, %v250_v20  ;;  %v253_v24 = vld [vmem:[%s1473_s1 + $0x78] sm:$0xff] (!%p139_p2) }
   0xb   : > { %v1079_v25 = vpack.c.bf16 (!%p139_p2), %v253_v24, %v252_v23  ;;  %v1268_v24 = vld [vmem:[%s1474_s2] ss:$0 sm:$0xff] (!%p139_p2) }
   0xd   : > { %s1477_s20 = smov (!%p163_p3, %s836_s20), 191  ;;  %1058 = vmatpush3.bf16.msra.mxu0 %v1055_v5  ;;  %1092 = vmatpush3.bf16.msra.mxu1 %v1055_v5 }
   0xe   : > { %s837_s27 = sshll.u32 %s1477_s20, 3  ;;  %1060 = vmatprep.subr.bf16.mxu0 %v1059_v8  ;;  %1085 = vmatprep.subr.bf16.mxu1 %v1059_v8 }
   0xf   : > { %s1175_s7 = scalar_lea.vmem %s1472_s0, %s837_s27  ;;  %s1277_s4 = scalar_lea.vmem %s1475_s3, %s837_s27 }
  0x10   : > { %v174_v11 = vld [vmem:[%s1175_s7] sm:$0xff]  ;;  %v175_v26 = vld [vmem:[%s1175_s7 + $0x8] sm:$0xff]  ;;  %v176_v28 = vld [vmem:[%s1175_s7 + $0x10] sm:$0xff] }
  0x11   : > { %v206_v12 = vld [vmem:[%s1175_s7 + $0x100] sm:$0xff]  ;;  %955 = vmatprep.mubr.f32.mxu0 %v174_v11  ;;  %1062 = vmatpush3.bf16.msra.mxu0 %v1059_v8  ;;  %v207_v27 = vld [vmem:[%s1175_s7 + $0x108] sm:$0xff]  ;;  %v208_v29 = vld [vmem:[%s1175_s7 + $0x110] sm:$0xff] }
  0x12   : > { %1003 = vmatprep.mubr.f32.mxu1 %v206_v12  ;;  %1093 = vmatpush3.bf16.msra.mxu1 %v1059_v8  ;;  %v177_v30 = vld [vmem:[%s1175_s7 + $0x18] sm:$0xff]  ;;  %v178_v32 = vld [vmem:[%s1175_s7 + $0x20] sm:$0xff]  ;;  %v179_v34 = vld [vmem:[%s1175_s7 + $0x28] sm:$0xff] }
  0x13   : > { %1064 = vmatprep.subr.bf16.mxu0 %v1063_v13  ;;  %1086 = vmatprep.subr.bf16.mxu1 %v1063_v13  ;;  %v209_v31 = vld [vmem:[%s1175_s7 + $0x118] sm:$0xff]  ;;  %v210_v33 = vld [vmem:[%s1175_s7 + $0x120] sm:$0xff]  ;;  %v211_v35 = vld [vmem:[%s1175_s7 + $0x128] sm:$0xff] }
  0x14   : > { %v180_v36 = vld [vmem:[%s1175_s7 + $0x30] sm:$0xff]  ;;  %v181_v38 = vld [vmem:[%s1175_s7 + $0x38] sm:$0xff]  ;;  %v182_v40 = vld [vmem:[%s1175_s7 + $0x40] sm:$0xff] }
  0x15   : > { %1066 = vmatpush3.bf16.msra.mxu0 %v1063_v13  ;;  %v212_v37 = vld [vmem:[%s1175_s7 + $0x130] sm:$0xff]  ;;  %v213_v39 = vld [vmem:[%s1175_s7 + $0x138] sm:$0xff]  ;;  %v214_v41 = vld [vmem:[%s1175_s7 + $0x140] sm:$0xff] }
  0x16   : > { %1094 = vmatpush3.bf16.msra.mxu1 %v1063_v13  ;;  %1068 = vmatprep.subr.bf16.mxu0 %v1067_v16  ;;  %v183_v42 = vld [vmem:[%s1175_s7 + $0x48] sm:$0xff]  ;;  %v184_v44 = vld [vmem:[%s1175_s7 + $0x50] sm:$0xff]  ;;  %v185_v46 = vld [vmem:[%s1175_s7 + $0x58] sm:$0xff] }
  0x17   : > { %1087 = vmatprep.subr.bf16.mxu1 %v1067_v16  ;;  %v215_v43 = vld [vmem:[%s1175_s7 + $0x148] sm:$0xff]  ;;  %v216_v45 = vld [vmem:[%s1175_s7 + $0x150] sm:$0xff]  ;;  %v217_v47 = vld [vmem:[%s1175_s7 + $0x158] sm:$0xff] }
  0x18   : > { %v186_v48 = vld [vmem:[%s1175_s7 + $0x60] sm:$0xff]  ;;  %v187_v50 = vld [vmem:[%s1175_s7 + $0x68] sm:$0xff]  ;;  %v188_v52 = vld [vmem:[%s1175_s7 + $0x70] sm:$0xff] }
  0x19   : > { %1070 = vmatpush3.bf16.msra.mxu0 %v1067_v16  ;;  %v218_v49 = vld [vmem:[%s1175_s7 + $0x160] sm:$0xff]  ;;  %v219_v51 = vld [vmem:[%s1175_s7 + $0x168] sm:$0xff]  ;;  %v220_v53 = vld [vmem:[%s1175_s7 + $0x170] sm:$0xff] }
  0x1a   : > { %1095 = vmatpush3.bf16.msra.mxu1 %v1067_v16  ;;  %1072 = vmatprep.subr.bf16.mxu0 %v1071_v19  ;;  %v189_v54 = vld [vmem:[%s1175_s7 + $0x78] sm:$0xff]  ;;  %v190_v56 = vld [vmem:[%s1175_s7 + $0x80] sm:$0xff]  ;;  %v191_v58 = vld [vmem:[%s1175_s7 + $0x88] sm:$0xff] }
  0x1b   : > { %1088 = vmatprep.subr.bf16.mxu1 %v1071_v19  ;;  %v221_v55 = vld [vmem:[%s1175_s7 + $0x178] sm:$0xff]  ;;  %v222_v57 = vld [vmem:[%s1175_s7 + $0x180] sm:$0xff]  ;;  %v223_v59 = vld [vmem:[%s1175_s7 + $0x188] sm:$0xff] }
  0x1c   : > { %v192_v60 = vld [vmem:[%s1175_s7 + $0x90] sm:$0xff]  ;;  %v193_v62 = vld [vmem:[%s1175_s7 + $0x98] sm:$0xff]  ;;  %v194_v0 = vld [vmem:[%s1175_s7 + $0xa0] sm:$0xff] }
  0x1d   : > { %1074 = vmatpush3.bf16.msra.mxu0 %v1071_v19  ;;  %v224_v61 = vld [vmem:[%s1175_s7 + $0x190] sm:$0xff]  ;;  %v225_v63 = vld [vmem:[%s1175_s7 + $0x198] sm:$0xff]  ;;  %v226_v1 = vld [vmem:[%s1175_s7 + $0x1a0] sm:$0xff] }
  0x1e   : > { %1096 = vmatpush3.bf16.msra.mxu1 %v1071_v19  ;;  %1076 = vmatprep.subr.bf16.mxu0 %v1075_v22  ;;  %v195_v2 = vld [vmem:[%s1175_s7 + $0xa8] sm:$0xff]  ;;  %v196_v4 = vld [vmem:[%s1175_s7 + $0xb0] sm:$0xff]  ;;  %v197_v6 = vld [vmem:[%s1175_s7 + $0xb8] sm:$0xff] }
  0x1f   : > { %1089 = vmatprep.subr.bf16.mxu1 %v1075_v22  ;;  %v227_v3 = vld [vmem:[%s1175_s7 + $0x1a8] sm:$0xff]  ;;  %v228_v5 = vld [vmem:[%s1175_s7 + $0x1b0] sm:$0xff]  ;;  %v229_v7 = vld [vmem:[%s1175_s7 + $0x1b8] sm:$0xff] }
  0x20   : > { %v198_v8 = vld [vmem:[%s1175_s7 + $0xc0] sm:$0xff]  ;;  %v199_v10 = vld [vmem:[%s1175_s7 + $0xc8] sm:$0xff]  ;;  %v200_v12 = vld [vmem:[%s1175_s7 + $0xd0] sm:$0xff] }
  0x21   : > { %1078 = vmatpush3.bf16.msra.mxu0 %v1075_v22  ;;  %v230_v9 = vld [vmem:[%s1175_s7 + $0x1c0] sm:$0xff]  ;;  %v231_v11 = vld [vmem:[%s1175_s7 + $0x1c8] sm:$0xff]  ;;  %v232_v13 = vld [vmem:[%s1175_s7 + $0x1d0] sm:$0xff] }
  0x22   : > { %1097 = vmatpush3.bf16.msra.mxu1 %v1075_v22  ;;  %1080 = vmatprep.subr.bf16.mxu0 %v1079_v25  ;;  %v201_v14 = vld [vmem:[%s1175_s7 + $0xd8] sm:$0xff]  ;;  %v202_v16 = vld [vmem:[%s1175_s7 + $0xe0] sm:$0xff]  ;;  %v203_v18 = vld [vmem:[%s1175_s7 + $0xe8] sm:$0xff] }
  0x23   : > { %1090 = vmatprep.subr.bf16.mxu1 %v1079_v25  ;;  %v233_v15 = vld [vmem:[%s1175_s7 + $0x1d8] sm:$0xff]  ;;  %v234_v17 = vld [vmem:[%s1175_s7 + $0x1e0] sm:$0xff]  ;;  %v235_v19 = vld [vmem:[%s1175_s7 + $0x1e8] sm:$0xff] }
  0x24   : > { %v204_v20 = vld [vmem:[%s1175_s7 + $0xf0] sm:$0xff]  ;;  %v205_v22 = vld [vmem:[%s1175_s7 + $0xf8] sm:$0xff] }
  0x25   : > { %1082 = vmatpush3.bf16.msra.mxu0 %v1079_v25  ;;  %v236_v21 = vld [vmem:[%s1175_s7 + $0x1f0] sm:$0xff]  ;;  %v237_v23 = vld [vmem:[%s1175_s7 + $0x1f8] sm:$0xff] }
  0x26   : > { %1098 = vmatpush3.bf16.msra.mxu1 %v1079_v25 }
  0x28   : > { %956 = vmatmul.mubr.f32.vlgmr.msra.gmra.mrb[0].mxu0 %v175_v26 }
  0x29   : > { %1004 = vmatmul.mubr.f32.vlgmr.msra.gmra.mrb[0].mxu1 %v207_v27  ;;  %958 = vmatprep.mubr.f32.mxu0 %v176_v28 }
  0x2a   : > { %1006 = vmatprep.mubr.f32.mxu1 %v208_v29 }
  0x2c   : > { %959 = vmatmul.mubr.f32.gmra.mrb[2].mxu0 %v177_v30 }
  0x2d   : > { %1007 = vmatmul.mubr.f32.gmra.mrb[2].mxu1 %v209_v31  ;;  %961 = vmatprep.mubr.f32.mxu0 %v178_v32 }
  0x2e   : > { %1009 = vmatprep.mubr.f32.mxu1 %v210_v33 }
  0x30   : > { %962 = vmatmul.mubr.f32.gmra.mrb[4].mxu0 %v179_v34 }
  0x31   : > { %1010 = vmatmul.mubr.f32.gmra.mrb[4].mxu1 %v211_v35  ;;  %964 = vmatprep.mubr.f32.mxu0 %v180_v36 }
  0x32   : > { %1012 = vmatprep.mubr.f32.mxu1 %v212_v37 }
  0x34   : > { %965 = vmatmul.mubr.f32.gmra.mrb[6].mxu0 %v181_v38 }
  0x35   : > { %1013 = vmatmul.mubr.f32.gmra.mrb[6].mxu1 %v213_v39  ;;  %967 = vmatprep.mubr.f32.mxu0 %v182_v40 }
  0x36   : > { %1015 = vmatprep.mubr.f32.mxu1 %v214_v41 }
  0x38   : > { %968 = vmatmul.mubr.f32.gmra.mrb[8].mxu0 %v183_v42 }
  0x39   : > { %1016 = vmatmul.mubr.f32.gmra.mrb[8].mxu1 %v215_v43  ;;  %970 = vmatprep.mubr.f32.mxu0 %v184_v44 }
  0x3a   : > { %1018 = vmatprep.mubr.f32.mxu1 %v216_v45 }
  0x3c   : > { %971 = vmatmul.mubr.f32.gmra.mrb[10].mxu0 %v185_v46 }
  0x3d   : > { %1019 = vmatmul.mubr.f32.gmra.mrb[10].mxu1 %v217_v47  ;;  %973 = vmatprep.mubr.f32.mxu0 %v186_v48 }
  0x3e   : > { %1021 = vmatprep.mubr.f32.mxu1 %v218_v49 }
  0x40   : > { %974 = vmatmul.mubr.f32.gmra.mrb[12].mxu0 %v187_v50 }
  0x41   : > { %1022 = vmatmul.mubr.f32.gmra.mrb[12].mxu1 %v219_v51  ;;  %976 = vmatprep.mubr.f32.mxu0 %v188_v52 }
  0x42   : > { %1024 = vmatprep.mubr.f32.mxu1 %v220_v53 }
  0x44   : > { %977 = vmatmul.mubr.f32.gmra.mrb[14].mxu0 %v189_v54 }
  0x45   : > { %1025 = vmatmul.mubr.f32.gmra.mrb[14].mxu1 %v221_v55  ;;  %979 = vmatprep.mubr.f32.mxu0 %v190_v56 }
  0x46   : > { %1027 = vmatprep.mubr.f32.mxu1 %v222_v57 }
  0x48   : > { %980 = vmatmul.mubr.f32.gmra.mrb[16].mxu0 %v191_v58 }
  0x49   : > { %1028 = vmatmul.mubr.f32.gmra.mrb[16].mxu1 %v223_v59  ;;  %982 = vmatprep.mubr.f32.mxu0 %v192_v60 }
  0x4a   : > { %1030 = vmatprep.mubr.f32.mxu1 %v224_v61 }
  0x4c   : > { %983 = vmatmul.mubr.f32.gmra.mrb[18].mxu0 %v193_v62 }
  0x4d   : > { %1031 = vmatmul.mubr.f32.gmra.mrb[18].mxu1 %v225_v63  ;;  %985 = vmatprep.mubr.f32.mxu0 %v194_v0 }
  0x4e   : > { %1033 = vmatprep.mubr.f32.mxu1 %v226_v1 }
  0x50   : > { %986 = vmatmul.mubr.f32.gmra.mrb[20].mxu0 %v195_v2 }
  0x51   : > { %1034 = vmatmul.mubr.f32.gmra.mrb[20].mxu1 %v227_v3  ;;  %988 = vmatprep.mubr.f32.mxu0 %v196_v4 }
  0x52   : > { %1036 = vmatprep.mubr.f32.mxu1 %v228_v5 }
  0x54   : > { %989 = vmatmul.mubr.f32.gmra.mrb[22].mxu0 %v197_v6 }
  0x55   : > { %1037 = vmatmul.mubr.f32.gmra.mrb[22].mxu1 %v229_v7  ;;  %991 = vmatprep.mubr.f32.mxu0 %v198_v8 }
  0x56   : > { %1039 = vmatprep.mubr.f32.mxu1 %v230_v9 }
  0x58   : > { %992 = vmatmul.mubr.f32.gmra.mrb[24].mxu0 %v199_v10 }
  0x59   : > { %1040 = vmatmul.mubr.f32.gmra.mrb[24].mxu1 %v231_v11  ;;  %994 = vmatprep.mubr.f32.mxu0 %v200_v12 }
  0x5a   : > { %1042 = vmatprep.mubr.f32.mxu1 %v232_v13 }
  0x5c   : > { %995 = vmatmul.mubr.f32.gmra.mrb[26].mxu0 %v201_v14 }
  0x5d   : > { %1043 = vmatmul.mubr.f32.gmra.mrb[26].mxu1 %v233_v15  ;;  %997 = vmatprep.mubr.f32.mxu0 %v202_v16 }
  0x5e   : > { %1045 = vmatprep.mubr.f32.mxu1 %v234_v17 }
  0x60   : > { %998 = vmatmul.mubr.f32.gmra.mrb[28].mxu0 %v203_v18 }
  0x61   : > { %1046 = vmatmul.mubr.f32.gmra.mrb[28].mxu1 %v235_v19  ;;  %1000 = vmatprep.mubr.f32.mxu0 %v204_v20 }
  0x62   : > { %1048 = vmatprep.mubr.f32.mxu1 %v236_v21 }
  0x64   : > { %1001 = vmatmul.mubr.f32.gmra.mrb[30].mxu0 %v205_v22 }
  0x65   : > { %1049 = vmatmul.mubr.f32.gmra.mrb[30].mxu1 %v237_v23 }
  0xfb   : > { %v957_v25 = vpop.f32.mrb[0].mxu0 }
  0xfc   : > { %v1005_v26 = vpop.f32.mrb[0].mxu1  ;;  %v333_v27 = vadd.f32 %v957_v25, %v1268_v24  ;;  %v327_v29 = vpop.f32.mrb[1].mxu0 }
  0xfd   : > { %v493_v28 = vadd.f32 %v1005_v26, %v1268_v24  ;;  %v487_v30 = vpop.f32.mrb[1].mxu1  ;;  %v328_v31 = vadd.f32 %v1268_v24, %v327_v29 }
  0xfe   : > { %v488_v32 = vadd.f32 %v1268_v24, %v487_v30  ;;  %v647_v33 = vmax.f32 %v333_v27, 0.0 }
  0xff   : > { %v679_v34 = vmax.f32 %v493_v28, 0.0  ;;  %v646_v35 = vmax.f32 %v328_v31, 0.0  ;;  %v960_v37 = vpop.f32.mrb[2].mxu0 }
 0x100   : > { %v678_v36 = vmax.f32 %v488_v32, 0.0  ;;  %v1008_v38 = vpop.f32.mrb[2].mxu1  ;;  %712 = vst.msk [vmem:[%s1277_s4 + $0x8] sm:$0xff] %vm710_vm0, %v647_v33  ;;  %v343_v39 = vadd.f32 %v960_v37, %v1268_v24  ;;  %v337_v41 = vpop.f32.mrb[3].mxu0 }
 0x101   : > { %744 = vst.msk [vmem:[%s1277_s4 + $0x108] sm:$0xff] %vm710_vm0, %v679_v34  ;;  %v503_v40 = vadd.f32 %v1008_v38, %v1268_v24  ;;  %v497_v42 = vpop.f32.mrb[3].mxu1  ;;  %711 = vst.msk [vmem:[%s1277_s4] sm:$0xff] %vm710_vm0, %v646_v35  ;;  %v338_v43 = vadd.f32 %v1268_v24, %v337_v41 }
 0x102   : > { %743 = vst.msk [vmem:[%s1277_s4 + $0x100] sm:$0xff] %vm710_vm0, %v678_v36  ;;  %v498_v44 = vadd.f32 %v1268_v24, %v497_v42  ;;  %v649_v45 = vmax.f32 %v343_v39, 0.0 }
 0x103   : > { %v681_v46 = vmax.f32 %v503_v40, 0.0  ;;  %v648_v47 = vmax.f32 %v338_v43, 0.0  ;;  %v963_v49 = vpop.f32.mrb[4].mxu0 }
 0x104   : > { %v680_v48 = vmax.f32 %v498_v44, 0.0  ;;  %v1011_v50 = vpop.f32.mrb[4].mxu1  ;;  %714 = vst.msk [vmem:[%s1277_s4 + $0x18] sm:$0xff] %vm710_vm0, %v649_v45  ;;  %v353_v51 = vadd.f32 %v963_v49, %v1268_v24  ;;  %v347_v53 = vpop.f32.mrb[5].mxu0 }
 0x105   : > { %746 = vst.msk [vmem:[%s1277_s4 + $0x118] sm:$0xff] %vm710_vm0, %v681_v46  ;;  %v513_v52 = vadd.f32 %v1011_v50, %v1268_v24  ;;  %v507_v54 = vpop.f32.mrb[5].mxu1  ;;  %713 = vst.msk [vmem:[%s1277_s4 + $0x10] sm:$0xff] %vm710_vm0, %v648_v47  ;;  %v348_v55 = vadd.f32 %v1268_v24, %v347_v53 }
 0x106   : > { %745 = vst.msk [vmem:[%s1277_s4 + $0x110] sm:$0xff] %vm710_vm0, %v680_v48  ;;  %v508_v56 = vadd.f32 %v1268_v24, %v507_v54  ;;  %v651_v57 = vmax.f32 %v353_v51, 0.0 }
 0x107   : > { %v683_v58 = vmax.f32 %v513_v52, 0.0  ;;  %v650_v59 = vmax.f32 %v348_v55, 0.0  ;;  %v966_v61 = vpop.f32.mrb[6].mxu0 }
 0x108   : > { %v682_v60 = vmax.f32 %v508_v56, 0.0  ;;  %v1014_v62 = vpop.f32.mrb[6].mxu1  ;;  %716 = vst.msk [vmem:[%s1277_s4 + $0x28] sm:$0xff] %vm710_vm0, %v651_v57  ;;  %v363_v63 = vadd.f32 %v966_v61, %v1268_v24  ;;  %v357_v1 = vpop.f32.mrb[7].mxu0 }
 0x109   : > { %748 = vst.msk [vmem:[%s1277_s4 + $0x128] sm:$0xff] %vm710_vm0, %v683_v58  ;;  %v523_v0 = vadd.f32 %v1014_v62, %v1268_v24  ;;  %v517_v2 = vpop.f32.mrb[7].mxu1  ;;  %715 = vst.msk [vmem:[%s1277_s4 + $0x20] sm:$0xff] %vm710_vm0, %v650_v59  ;;  %v358_v3 = vadd.f32 %v1268_v24, %v357_v1 }
 0x10a   : > { %747 = vst.msk [vmem:[%s1277_s4 + $0x120] sm:$0xff] %vm710_vm0, %v682_v60  ;;  %v518_v4 = vadd.f32 %v1268_v24, %v517_v2  ;;  %v653_v5 = vmax.f32 %v363_v63, 0.0 }
 0x10b   : > { %v685_v6 = vmax.f32 %v523_v0, 0.0  ;;  %v652_v7 = vmax.f32 %v358_v3, 0.0  ;;  %v969_v9 = vpop.f32.mrb[8].mxu0 }
 0x10c   : > { %v684_v8 = vmax.f32 %v518_v4, 0.0  ;;  %v1017_v10 = vpop.f32.mrb[8].mxu1  ;;  %718 = vst.msk [vmem:[%s1277_s4 + $0x38] sm:$0xff] %vm710_vm0, %v653_v5  ;;  %v373_v11 = vadd.f32 %v969_v9, %v1268_v24  ;;  %v367_v13 = vpop.f32.mrb[9].mxu0 }
 0x10d   : > { %750 = vst.msk [vmem:[%s1277_s4 + $0x138] sm:$0xff] %vm710_vm0, %v685_v6  ;;  %v533_v12 = vadd.f32 %v1017_v10, %v1268_v24  ;;  %v527_v14 = vpop.f32.mrb[9].mxu1  ;;  %717 = vst.msk [vmem:[%s1277_s4 + $0x30] sm:$0xff] %vm710_vm0, %v652_v7  ;;  %v368_v15 = vadd.f32 %v1268_v24, %v367_v13 }
 0x10e   : > { %749 = vst.msk [vmem:[%s1277_s4 + $0x130] sm:$0xff] %vm710_vm0, %v684_v8  ;;  %v528_v16 = vadd.f32 %v1268_v24, %v527_v14  ;;  %v655_v17 = vmax.f32 %v373_v11, 0.0 }
 0x10f   : > { %v687_v18 = vmax.f32 %v533_v12, 0.0  ;;  %v654_v19 = vmax.f32 %v368_v15, 0.0  ;;  %v972_v21 = vpop.f32.mrb[10].mxu0 }
 0x110   : > { %v686_v20 = vmax.f32 %v528_v16, 0.0  ;;  %v1020_v22 = vpop.f32.mrb[10].mxu1  ;;  %720 = vst.msk [vmem:[%s1277_s4 + $0x48] sm:$0xff] %vm710_vm0, %v655_v17  ;;  %v383_v23 = vadd.f32 %v972_v21, %v1268_v24  ;;  %v377_v26 = vpop.f32.mrb[11].mxu0 }
 0x111   : > { %752 = vst.msk [vmem:[%s1277_s4 + $0x148] sm:$0xff] %vm710_vm0, %v687_v18  ;;  %v543_v25 = vadd.f32 %v1020_v22, %v1268_v24  ;;  %v537_v27 = vpop.f32.mrb[11].mxu1  ;;  %719 = vst.msk [vmem:[%s1277_s4 + $0x40] sm:$0xff] %vm710_vm0, %v654_v19  ;;  %v378_v28 = vadd.f32 %v1268_v24, %v377_v26 }
 0x112   : > { %751 = vst.msk [vmem:[%s1277_s4 + $0x140] sm:$0xff] %vm710_vm0, %v686_v20  ;;  %v538_v29 = vadd.f32 %v1268_v24, %v537_v27  ;;  %v657_v30 = vmax.f32 %v383_v23, 0.0 }
 0x113   : > { %v689_v31 = vmax.f32 %v543_v25, 0.0  ;;  %v656_v32 = vmax.f32 %v378_v28, 0.0  ;;  %v975_v34 = vpop.f32.mrb[12].mxu0 }
 0x114   : > { %v688_v33 = vmax.f32 %v538_v29, 0.0  ;;  %v1023_v35 = vpop.f32.mrb[12].mxu1  ;;  %722 = vst.msk [vmem:[%s1277_s4 + $0x58] sm:$0xff] %vm710_vm0, %v657_v30  ;;  %v393_v36 = vadd.f32 %v975_v34, %v1268_v24  ;;  %v387_v38 = vpop.f32.mrb[13].mxu0 }
 0x115   : > { %754 = vst.msk [vmem:[%s1277_s4 + $0x158] sm:$0xff] %vm710_vm0, %v689_v31  ;;  %v553_v37 = vadd.f32 %v1023_v35, %v1268_v24  ;;  %v547_v39 = vpop.f32.mrb[13].mxu1  ;;  %721 = vst.msk [vmem:[%s1277_s4 + $0x50] sm:$0xff] %vm710_vm0, %v656_v32  ;;  %v388_v40 = vadd.f32 %v1268_v24, %v387_v38 }
 0x116   : > { %753 = vst.msk [vmem:[%s1277_s4 + $0x150] sm:$0xff] %vm710_vm0, %v688_v33  ;;  %v548_v41 = vadd.f32 %v1268_v24, %v547_v39  ;;  %v659_v42 = vmax.f32 %v393_v36, 0.0 }
 0x117   : > { %v691_v43 = vmax.f32 %v553_v37, 0.0  ;;  %v658_v44 = vmax.f32 %v388_v40, 0.0  ;;  %v978_v46 = vpop.f32.mrb[14].mxu0 }
 0x118   : > { %v690_v45 = vmax.f32 %v548_v41, 0.0  ;;  %v1026_v47 = vpop.f32.mrb[14].mxu1  ;;  %724 = vst.msk [vmem:[%s1277_s4 + $0x68] sm:$0xff] %vm710_vm0, %v659_v42  ;;  %v403_v48 = vadd.f32 %v978_v46, %v1268_v24  ;;  %v397_v50 = vpop.f32.mrb[15].mxu0 }
 0x119   : > { %756 = vst.msk [vmem:[%s1277_s4 + $0x168] sm:$0xff] %vm710_vm0, %v691_v43  ;;  %v563_v49 = vadd.f32 %v1026_v47, %v1268_v24  ;;  %v557_v51 = vpop.f32.mrb[15].mxu1  ;;  %723 = vst.msk [vmem:[%s1277_s4 + $0x60] sm:$0xff] %vm710_vm0, %v658_v44  ;;  %v398_v52 = vadd.f32 %v1268_v24, %v397_v50 }
 0x11a   : > { %755 = vst.msk [vmem:[%s1277_s4 + $0x160] sm:$0xff] %vm710_vm0, %v690_v45  ;;  %v558_v53 = vadd.f32 %v1268_v24, %v557_v51  ;;  %v661_v54 = vmax.f32 %v403_v48, 0.0 }
 0x11b   : > { %v693_v55 = vmax.f32 %v563_v49, 0.0  ;;  %v660_v56 = vmax.f32 %v398_v52, 0.0  ;;  %v981_v58 = vpop.f32.mrb[16].mxu0 }
 0x11c   : > { %v692_v57 = vmax.f32 %v558_v53, 0.0  ;;  %v1029_v59 = vpop.f32.mrb[16].mxu1  ;;  %726 = vst.msk [vmem:[%s1277_s4 + $0x78] sm:$0xff] %vm710_vm0, %v661_v54  ;;  %v413_v60 = vadd.f32 %v981_v58, %v1268_v24  ;;  %v407_v62 = vpop.f32.mrb[17].mxu0 }
 0x11d   : > { %758 = vst.msk [vmem:[%s1277_s4 + $0x178] sm:$0xff] %vm710_vm0, %v693_v55  ;;  %v573_v61 = vadd.f32 %v1029_v59, %v1268_v24  ;;  %v567_v63 = vpop.f32.mrb[17].mxu1  ;;  %725 = vst.msk [vmem:[%s1277_s4 + $0x70] sm:$0xff] %vm710_vm0, %v660_v56  ;;  %v408_v0 = vadd.f32 %v1268_v24, %v407_v62 }
 0x11e   : > { %757 = vst.msk [vmem:[%s1277_s4 + $0x170] sm:$0xff] %vm710_vm0, %v692_v57  ;;  %v568_v1 = vadd.f32 %v1268_v24, %v567_v63  ;;  %v663_v2 = vmax.f32 %v413_v60, 0.0 }
 0x11f   : > { %v695_v3 = vmax.f32 %v573_v61, 0.0  ;;  %v662_v4 = vmax.f32 %v408_v0, 0.0  ;;  %v984_v6 = vpop.f32.mrb[18].mxu0 }
 0x120   : > { %v694_v5 = vmax.f32 %v568_v1, 0.0  ;;  %v1032_v7 = vpop.f32.mrb[18].mxu1  ;;  %728 = vst.msk [vmem:[%s1277_s4 + $0x88] sm:$0xff] %vm710_vm0, %v663_v2  ;;  %v423_v8 = vadd.f32 %v984_v6, %v1268_v24  ;;  %v417_v10 = vpop.f32.mrb[19].mxu0 }
 0x121   : > { %760 = vst.msk [vmem:[%s1277_s4 + $0x188] sm:$0xff] %vm710_vm0, %v695_v3  ;;  %v583_v9 = vadd.f32 %v1032_v7, %v1268_v24  ;;  %v577_v11 = vpop.f32.mrb[19].mxu1  ;;  %727 = vst.msk [vmem:[%s1277_s4 + $0x80] sm:$0xff] %vm710_vm0, %v662_v4  ;;  %v418_v12 = vadd.f32 %v1268_v24, %v417_v10 }
 0x122   : > { %759 = vst.msk [vmem:[%s1277_s4 + $0x180] sm:$0xff] %vm710_vm0, %v694_v5  ;;  %v578_v13 = vadd.f32 %v1268_v24, %v577_v11  ;;  %v665_v14 = vmax.f32 %v423_v8, 0.0 }
 0x123   : > { %v697_v15 = vmax.f32 %v583_v9, 0.0  ;;  %v664_v16 = vmax.f32 %v418_v12, 0.0  ;;  %v987_v18 = vpop.f32.mrb[20].mxu0 }
 0x124   : > { %v696_v17 = vmax.f32 %v578_v13, 0.0  ;;  %v1035_v19 = vpop.f32.mrb[20].mxu1  ;;  %730 = vst.msk [vmem:[%s1277_s4 + $0x98] sm:$0xff] %vm710_vm0, %v665_v14  ;;  %v433_v20 = vadd.f32 %v987_v18, %v1268_v24  ;;  %v427_v22 = vpop.f32.mrb[21].mxu0 }
 0x125   : > { %762 = vst.msk [vmem:[%s1277_s4 + $0x198] sm:$0xff] %vm710_vm0, %v697_v15  ;;  %v593_v21 = vadd.f32 %v1035_v19, %v1268_v24  ;;  %v587_v23 = vpop.f32.mrb[21].mxu1  ;;  %729 = vst.msk [vmem:[%s1277_s4 + $0x90] sm:$0xff] %vm710_vm0, %v664_v16  ;;  %v428_v25 = vadd.f32 %v1268_v24, %v427_v22 }
 0x126   : > { %761 = vst.msk [vmem:[%s1277_s4 + $0x190] sm:$0xff] %vm710_vm0, %v696_v17  ;;  %v588_v26 = vadd.f32 %v1268_v24, %v587_v23  ;;  %v667_v27 = vmax.f32 %v433_v20, 0.0 }
 0x127   : > { %v699_v28 = vmax.f32 %v593_v21, 0.0  ;;  %v666_v29 = vmax.f32 %v428_v25, 0.0  ;;  %v990_v31 = vpop.f32.mrb[22].mxu0 }
 0x128   : > { %v698_v30 = vmax.f32 %v588_v26, 0.0  ;;  %v1038_v32 = vpop.f32.mrb[22].mxu1  ;;  %732 = vst.msk [vmem:[%s1277_s4 + $0xa8] sm:$0xff] %vm710_vm0, %v667_v27  ;;  %v443_v33 = vadd.f32 %v990_v31, %v1268_v24  ;;  %v437_v35 = vpop.f32.mrb[23].mxu0 }
 0x129   : > { %764 = vst.msk [vmem:[%s1277_s4 + $0x1a8] sm:$0xff] %vm710_vm0, %v699_v28  ;;  %v603_v34 = vadd.f32 %v1038_v32, %v1268_v24  ;;  %v597_v36 = vpop.f32.mrb[23].mxu1  ;;  %731 = vst.msk [vmem:[%s1277_s4 + $0xa0] sm:$0xff] %vm710_vm0, %v666_v29  ;;  %v438_v37 = vadd.f32 %v1268_v24, %v437_v35 }
 0x12a   : > { %763 = vst.msk [vmem:[%s1277_s4 + $0x1a0] sm:$0xff] %vm710_vm0, %v698_v30  ;;  %v598_v38 = vadd.f32 %v1268_v24, %v597_v36  ;;  %v669_v39 = vmax.f32 %v443_v33, 0.0 }
 0x12b   : > { %v701_v40 = vmax.f32 %v603_v34, 0.0  ;;  %v668_v41 = vmax.f32 %v438_v37, 0.0  ;;  %v993_v43 = vpop.f32.mrb[24].mxu0 }
 0x12c   : > { %v700_v42 = vmax.f32 %v598_v38, 0.0  ;;  %v1041_v44 = vpop.f32.mrb[24].mxu1  ;;  %734 = vst.msk [vmem:[%s1277_s4 + $0xb8] sm:$0xff] %vm710_vm0, %v669_v39  ;;  %v453_v45 = vadd.f32 %v993_v43, %v1268_v24  ;;  %v447_v47 = vpop.f32.mrb[25].mxu0 }
 0x12d   : > { %766 = vst.msk [vmem:[%s1277_s4 + $0x1b8] sm:$0xff] %vm710_vm0, %v701_v40  ;;  %v613_v46 = vadd.f32 %v1041_v44, %v1268_v24  ;;  %v607_v48 = vpop.f32.mrb[25].mxu1  ;;  %733 = vst.msk [vmem:[%s1277_s4 + $0xb0] sm:$0xff] %vm710_vm0, %v668_v41  ;;  %v448_v49 = vadd.f32 %v1268_v24, %v447_v47 }
 0x12e   : > { %765 = vst.msk [vmem:[%s1277_s4 + $0x1b0] sm:$0xff] %vm710_vm0, %v700_v42  ;;  %v608_v50 = vadd.f32 %v1268_v24, %v607_v48  ;;  %v671_v51 = vmax.f32 %v453_v45, 0.0 }
 0x12f   : > { %v703_v52 = vmax.f32 %v613_v46, 0.0  ;;  %v670_v53 = vmax.f32 %v448_v49, 0.0  ;;  %v996_v55 = vpop.f32.mrb[26].mxu0 }
 0x130   : > { %v702_v54 = vmax.f32 %v608_v50, 0.0  ;;  %v1044_v56 = vpop.f32.mrb[26].mxu1  ;;  %736 = vst.msk [vmem:[%s1277_s4 + $0xc8] sm:$0xff] %vm710_vm0, %v671_v51  ;;  %v463_v57 = vadd.f32 %v996_v55, %v1268_v24  ;;  %v457_v59 = vpop.f32.mrb[27].mxu0 }
 0x131   : > { %768 = vst.msk [vmem:[%s1277_s4 + $0x1c8] sm:$0xff] %vm710_vm0, %v703_v52  ;;  %v623_v58 = vadd.f32 %v1044_v56, %v1268_v24  ;;  %v617_v60 = vpop.f32.mrb[27].mxu1  ;;  %735 = vst.msk [vmem:[%s1277_s4 + $0xc0] sm:$0xff] %vm710_vm0, %v670_v53  ;;  %v458_v61 = vadd.f32 %v1268_v24, %v457_v59 }
 0x132   : > { %767 = vst.msk [vmem:[%s1277_s4 + $0x1c0] sm:$0xff] %vm710_vm0, %v702_v54  ;;  %v618_v62 = vadd.f32 %v1268_v24, %v617_v60  ;;  %v673_v63 = vmax.f32 %v463_v57, 0.0 }
 0x133   : > { %v705_v0 = vmax.f32 %v623_v58, 0.0  ;;  %v672_v1 = vmax.f32 %v458_v61, 0.0  ;;  %v999_v3 = vpop.f32.mrb[28].mxu0 }
 0x134   : > { %v704_v2 = vmax.f32 %v618_v62, 0.0  ;;  %v1047_v4 = vpop.f32.mrb[28].mxu1  ;;  %738 = vst.msk [vmem:[%s1277_s4 + $0xd8] sm:$0xff] %vm710_vm0, %v673_v63  ;;  %v473_v5 = vadd.f32 %v999_v3, %v1268_v24  ;;  %v467_v7 = vpop.f32.mrb[29].mxu0 }
 0x135   : > { %770 = vst.msk [vmem:[%s1277_s4 + $0x1d8] sm:$0xff] %vm710_vm0, %v705_v0  ;;  %v633_v6 = vadd.f32 %v1047_v4, %v1268_v24  ;;  %v627_v8 = vpop.f32.mrb[29].mxu1  ;;  %737 = vst.msk [vmem:[%s1277_s4 + $0xd0] sm:$0xff] %vm710_vm0, %v672_v1  ;;  %v468_v9 = vadd.f32 %v1268_v24, %v467_v7 }
 0x136   : > { %769 = vst.msk [vmem:[%s1277_s4 + $0x1d0] sm:$0xff] %vm710_vm0, %v704_v2  ;;  %v628_v10 = vadd.f32 %v1268_v24, %v627_v8  ;;  %v675_v11 = vmax.f32 %v473_v5, 0.0 }
 0x137   : > { %v707_v12 = vmax.f32 %v633_v6, 0.0  ;;  %v674_v13 = vmax.f32 %v468_v9, 0.0  ;;  %v1002_v15 = vpop.f32.mrb[30].mxu0 }
 0x138   : > { %v706_v14 = vmax.f32 %v628_v10, 0.0  ;;  %v1050_v16 = vpop.f32.mrb[30].mxu1  ;;  %740 = vst.msk [vmem:[%s1277_s4 + $0xe8] sm:$0xff] %vm710_vm0, %v675_v11  ;;  %v483_v17 = vadd.f32 %v1002_v15, %v1268_v24  ;;  %v477_v19 = vpop.f32.mrb[31].mxu0 }
 0x139   : > { %772 = vst.msk [vmem:[%s1277_s4 + $0x1e8] sm:$0xff] %vm710_vm0, %v707_v12  ;;  %v643_v18 = vadd.f32 %v1050_v16, %v1268_v24  ;;  %v637_v20 = vpop.f32.mrb[31].mxu1  ;;  %739 = vst.msk [vmem:[%s1277_s4 + $0xe0] sm:$0xff] %vm710_vm0, %v674_v13  ;;  %v478_v21 = vadd.f32 %v1268_v24, %v477_v19 }
 0x13a   : > { %771 = vst.msk [vmem:[%s1277_s4 + $0x1e0] sm:$0xff] %vm710_vm0, %v706_v14  ;;  %v638_v22 = vadd.f32 %v1268_v24, %v637_v20  ;;  %v677_v23 = vmax.f32 %v483_v17, 0.0 }
 0x13b   : > { %v709_v25 = vmax.f32 %v643_v18, 0.0  ;;  %v676_v26 = vmax.f32 %v478_v21, 0.0 }
 0x13c   : > { %v708_v27 = vmax.f32 %v638_v22, 0.0  ;;  %742 = vst.msk [vmem:[%s1277_s4 + $0xf8] sm:$0xff] %vm710_vm0, %v677_v23 }
 0x13d   : > { %774 = vst.msk [vmem:[%s1277_s4 + $0x1f8] sm:$0xff] %vm710_vm0, %v709_v25  ;;  %741 = vst.msk [vmem:[%s1277_s4 + $0xf0] sm:$0xff] %vm710_vm0, %v676_v26 }
 0x13e   : > { %773 = vst.msk [vmem:[%s1277_s4 + $0x1f0] sm:$0xff] %vm710_vm0, %v708_v27 }
 0x13f PF: > { %s13_s12 = sadd.s32 1, %s1113_s12  }
 0x140   : > { %p10_p4 = scmp.ge.s32.totalorder %s13_s12, 5  }
 0x142   :  { %12 = sbr.rel (!%p10_p4) target bundleno = 1 (0x1), region = 62 }

// kernel: myresnet_forward.10
= control target key start
LH: loop header
LB: loop body
LE: loop exit
PB: predicated region body
PF: predicated region fallthrough
CT: control target
= control target key end

     0   :  { %s1750_s12 = smov 0   ;;  %s2466_s0 = inlined_call_operand.vmem [shape: f32[1536,384], index: 0, kind: input, shape index: {}]   ;;  %s2467_s1 = inlined_call_operand.vmem [shape: f32[384,32], index: 1, kind: input, shape index: {}]   ;;  %s2468_s2 = inlined_call_operand.vmem [shape: f32[1,32], index: 2, kind: input, shape index: {}]   ;;  %s2469_s3 = inlined_call_operand.vmem [shape: f32[1536,32], index: 3, kind: output, shape index: {}]  }
   0x1 LB: > { %s1379_s13 = sadd.s32 4294967295, %s1727_s12   ;;  %p1383_p0 = scmp.ge.s32.totalorder %s1727_s12, 1  ;;  %s1727_s12 = sphi %s1750_s12, %s13_s12  }
   0x2   : > { %p139_p1 = scmp.lt.s32.totalorder %s1727_s12, 4 }
   0x4   : > { %p140_p2 = pnand %p1383_p0, %p139_p1 }
   0x5   : > { %v369_v0 = vld [vmem:[%s2467_s1] sm:$0xff] (!%p140_p2)  ;;  %v370_v1 = vld [vmem:[%s2467_s1 + $0x8] sm:$0xff] (!%p140_p2)  ;;  %v371_v2 = vld [vmem:[%s2467_s1 + $0x10] sm:$0xff] (!%p140_p2)  ;;  %s1384_s20 = sshll.u32 (!%p140_p2), %s1379_s13, 6  ;;  %v1729_v3 = vmov (!%p140_p2), 0.0|0.0   ;;  %vm1258_vm0 = vcmask (!%p140_p2), 261120  }
   0x6   : > { %143 = sbr.rel (%p140_p2) target bundleno = 478 (0x1de), region = 32  ;;  %1599 = vmatprep.subr.bf16.mxu0 (!%p140_p2), %v1729_v3  ;;  %1679 = vmatprep.subr.bf16.mxu1 (!%p140_p2), %v1729_v3  ;;  %v1600_v4 = vpack.c.bf16 (!%p140_p2), %v370_v1, %v369_v0  ;;  %v372_v5 = vld [vmem:[%s2467_s1 + $0x18] sm:$0xff] (!%p140_p2)  ;;  %p165_p3 = scmp.lt.s32.totalorder (!%p140_p2), %s1384_s20, 191  ;;  %v373_v7 = vld [vmem:[%s2467_s1 + $0x20] sm:$0xff] (!%p140_p2)  ;;  %v374_v8 = vld [vmem:[%s2467_s1 + $0x28] sm:$0xff] (!%p140_p2) }
   0x7   : > { %v1603_v6 = vpack.c.bf16 (!%p140_p2), %v372_v5, %v371_v2  ;;  %v1606_v9 = vpack.c.bf16 (!%p140_p2), %v374_v8, %v373_v7  ;;  %v375_v10 = vld [vmem:[%s2467_s1 + $0x30] sm:$0xff] (!%p140_p2)  ;;  %v376_v11 = vld [vmem:[%s2467_s1 + $0x38] sm:$0xff] (!%p140_p2)  ;;  %v377_v15 = vld [vmem:[%s2467_s1 + $0x40] sm:$0xff] (!%p140_p2) }
   0x8   : > { %1601 = vmatpush1.bf16.msra.mxu0 (!%p140_p2), %v1600_v4  ;;  %1695 = vmatpush1.bf16.msra.mxu1 (!%p140_p2), %v1600_v4  ;;  %v1609_v13 = vpack.c.bf16 (!%p140_p2), %v376_v11, %v375_v10  ;;  %v378_v16 = vld [vmem:[%s2467_s1 + $0x48] sm:$0xff] (!%p140_p2)  ;;  %v379_v18 = vld [vmem:[%s2467_s1 + $0x50] sm:$0xff] (!%p140_p2)  ;;  %v380_v19 = vld [vmem:[%s2467_s1 + $0x58] sm:$0xff] (!%p140_p2) }
   0x9   : > { %1602 = vmatprep.subr.bf16.mxu0 (!%p140_p2), %v1729_v3  ;;  %1680 = vmatprep.subr.bf16.mxu1 (!%p140_p2), %v1729_v3  ;;  %v1612_v17 = vpack.c.bf16 (!%p140_p2), %v378_v16, %v377_v15  ;;  %v1615_v20 = vpack.c.bf16 (!%p140_p2), %v380_v19, %v379_v18  ;;  %v381_v21 = vld [vmem:[%s2467_s1 + $0x60] sm:$0xff] (!%p140_p2)  ;;  %v382_v22 = vld [vmem:[%s2467_s1 + $0x68] sm:$0xff] (!%p140_p2)  ;;  %v383_v24 = vld [vmem:[%s2467_s1 + $0x70] sm:$0xff] (!%p140_p2) }
   0xa   : > { %v1618_v23 = vpack.c.bf16 (!%p140_p2), %v382_v22, %v381_v21  ;;  %v384_v25 = vld [vmem:[%s2467_s1 + $0x78] sm:$0xff] (!%p140_p2)  ;;  %v385_v27 = vld [vmem:[%s2467_s1 + $0x80] sm:$0xff] (!%p140_p2)  ;;  %v386_v28 = vld [vmem:[%s2467_s1 + $0x88] sm:$0xff] (!%p140_p2) }
   0xb   : > { %v1621_v26 = vpack.c.bf16 (!%p140_p2), %v384_v25, %v383_v24  ;;  %v1624_v29 = vpack.c.bf16 (!%p140_p2), %v386_v28, %v385_v27  ;;  %v387_v30 = vld [vmem:[%s2467_s1 + $0x90] sm:$0xff] (!%p140_p2)  ;;  %v388_v31 = vld [vmem:[%s2467_s1 + $0x98] sm:$0xff] (!%p140_p2)  ;;  %v389_v33 = vld [vmem:[%s2467_s1 + $0xa0] sm:$0xff] (!%p140_p2) }
   0xc   : > { %1604 = vmatpush1.bf16.msra.mxu0 (!%p140_p2), %v1603_v6  ;;  %1696 = vmatpush1.bf16.msra.mxu1 (!%p140_p2), %v1603_v6  ;;  %v1627_v32 = vpack.c.bf16 (!%p140_p2), %v388_v31, %v387_v30  ;;  %v390_v34 = vld [vmem:[%s2467_s1 + $0xa8] sm:$0xff] (!%p140_p2)  ;;  %v391_v36 = vld [vmem:[%s2467_s1 + $0xb0] sm:$0xff] (!%p140_p2)  ;;  %v392_v37 = vld [vmem:[%s2467_s1 + $0xb8] sm:$0xff] (!%p140_p2) }
   0xd   : > { %s2471_s20 = smov (!%p165_p3, %s1384_s20), 191  ;;  %1605 = vmatprep.subr.bf16.mxu0 %v1729_v3  ;;  %1681 = vmatprep.subr.bf16.mxu1 %v1729_v3  ;;  %v1630_v35 = vpack.c.bf16 %v390_v34, %v389_v33  ;;  %v1633_v38 = vpack.c.bf16 %v392_v37, %v391_v36  ;;  %v393_v39 = vld [vmem:[%s2467_s1 + $0xc0] sm:$0xff]  ;;  %v394_v40 = vld [vmem:[%s2467_s1 + $0xc8] sm:$0xff]  ;;  %v395_v42 = vld [vmem:[%s2467_s1 + $0xd0] sm:$0xff] }
   0xe   : > { %s1711_s27 = smul.u32 24, %s2471_s20  ;;  %v1636_v41 = vpack.c.bf16 %v394_v40, %v393_v39  ;;  %v396_v43 = vld [vmem:[%s2467_s1 + $0xd8] sm:$0xff]  ;;  %v397_v45 = vld [vmem:[%s2467_s1 + $0xe0] sm:$0xff]  ;;  %v398_v46 = vld [vmem:[%s2467_s1 + $0xe8] sm:$0xff]  ;;  %s1387_s18 = sshll.u32 %s2471_s20, 3 }
   0xf   : > { %v1639_v44 = vpack.c.bf16 %v396_v43, %v395_v42  ;;  %v1642_v47 = vpack.c.bf16 %v398_v46, %v397_v45  ;;  %v399_v48 = vld [vmem:[%s2467_s1 + $0xf0] sm:$0xff]  ;;  %v400_v49 = vld [vmem:[%s2467_s1 + $0xf8] sm:$0xff]  ;;  %v401_v50 = vld [vmem:[%s2467_s1 + $0x100] sm:$0xff]  ;;  %s2210_s22 = scalar_lea.vmem %s2469_s3, %s1387_s18 }
  0x10   : > { %s1786_s30 = scalar_lea.vmem %s2466_s0, %s1711_s27  ;;  %1607 = vmatpush1.bf16.msra.mxu0 %v1606_v9  ;;  %1697 = vmatpush1.bf16.msra.mxu1 %v1606_v9  ;;  %v402_v51 = vld [vmem:[%s2467_s1 + $0x108] sm:$0xff]  ;;  %v1645_v52 = vpack.c.bf16 %v400_v49, %v399_v48  ;;  %v403_v54 = vld [vmem:[%s2467_s1 + $0x110] sm:$0xff]  ;;  %v404_v55 = vld [vmem:[%s2467_s1 + $0x118] sm:$0xff] }
  0x11   : > { %v178_v12 = vld [vmem:[%s1786_s30 + $0x8] sm:$0xff]  ;;  %1608 = vmatprep.subr.bf16.mxu0 %v1729_v3  ;;  %1682 = vmatprep.subr.bf16.mxu1 %v1729_v3  ;;  %v1647_v53 = vpack.c.bf16 %v402_v51, %v401_v50  ;;  %v177_v56 = vld [vmem:[%s1786_s30] sm:$0xff]  ;;  %v1651_v59 = vpack.c.bf16 %v404_v55, %v403_v54  ;;  %v180_v63 = vld [vmem:[%s1786_s30 + $0x18] sm:$0xff] }
  0x12   : > { %v322_v14 = vld [vmem:[%s1786_s30 + $0x488] sm:$0xff]  ;;  %488 = vmatprep.mubr.f32.mxu0 %v178_v12  ;;  %v321_v57 = vld [vmem:[%s1786_s30 + $0x480] sm:$0xff]  ;;  %v324_v0 = vld [vmem:[%s1786_s30 + $0x498] sm:$0xff] }
  0x13   : > { %728 = vmatprep.mubr.f32.mxu1 %v322_v14  ;;  %v181_v58 = vld [vmem:[%s1786_s30 + $0x20] sm:$0xff]  ;;  %v406_v62 = vld [vmem:[%s2467_s1 + $0x128] sm:$0xff]  ;;  %v184_v1 = vld [vmem:[%s1786_s30 + $0x38] sm:$0xff] }
  0x14   : > { %1610 = vmatpush1.bf16.msra.mxu0 %v1609_v13  ;;  %1698 = vmatpush1.bf16.msra.mxu1 %v1609_v13  ;;  %v325_v60 = vld [vmem:[%s1786_s30 + $0x4a0] sm:$0xff]  ;;  %v328_v2 = vld [vmem:[%s1786_s30 + $0x4b8] sm:$0xff]  ;;  %v407_v4 = vld [vmem:[%s2467_s1 + $0x130] sm:$0xff] }
  0x15   : > { %1611 = vmatprep.subr.bf16.mxu0 %v1729_v3  ;;  %1683 = vmatprep.subr.bf16.mxu1 %v1729_v3  ;;  %v405_v61 = vld [vmem:[%s2467_s1 + $0x120] sm:$0xff]  ;;  %v408_v5 = vld [vmem:[%s2467_s1 + $0x138] sm:$0xff]  ;;  %v183_v6 = vld [vmem:[%s1786_s30 + $0x30] sm:$0xff] }
  0x16   : > { %v327_v7 = vld [vmem:[%s1786_s30 + $0x4b0] sm:$0xff]  ;;  %v1659_v10 = vpack.c.bf16 %v408_v5, %v407_v4  ;;  %v409_v11 = vld [vmem:[%s2467_s1 + $0x140] sm:$0xff]  ;;  %v410_v12 = vld [vmem:[%s2467_s1 + $0x148] sm:$0xff] }
  0x17   : > { %v187_v8 = vld [vmem:[%s1786_s30 + $0x50] sm:$0xff]  ;;  %v186_v13 = vld [vmem:[%s1786_s30 + $0x48] sm:$0xff]  ;;  %v412_v19 = vld [vmem:[%s2467_s1 + $0x158] sm:$0xff] }
  0x18   : > { %1613 = vmatpush1.bf16.msra.mxu0 %v1612_v17  ;;  %1699 = vmatpush1.bf16.msra.mxu1 %v1612_v17  ;;  %v331_v9 = vld [vmem:[%s1786_s30 + $0x4d0] sm:$0xff]  ;;  %v330_v14 = vld [vmem:[%s1786_s30 + $0x4c8] sm:$0xff]  ;;  %v1663_v17 = vpack.c.bf16 %v410_v12, %v409_v11  ;;  %v333_v21 = vld [vmem:[%s1786_s30 + $0x4e0] sm:$0xff] }
  0x19   : > { %1614 = vmatprep.subr.bf16.mxu0 %v1729_v3  ;;  %1684 = vmatprep.subr.bf16.mxu1 %v1729_v3  ;;  %v190_v15 = vld [vmem:[%s1786_s30 + $0x68] sm:$0xff]  ;;  %v411_v18 = vld [vmem:[%s2467_s1 + $0x150] sm:$0xff]  ;;  %v193_v22 = vld [vmem:[%s1786_s30 + $0x80] sm:$0xff] }
  0x1a   : > { %v334_v16 = vld [vmem:[%s1786_s30 + $0x4e8] sm:$0xff]  ;;  %v1667_v24 = vpack.c.bf16 %v412_v19, %v411_v18  ;;  %v413_v25 = vld [vmem:[%s2467_s1 + $0x160] sm:$0xff]  ;;  %v192_v27 = vld [vmem:[%s1786_s30 + $0x78] sm:$0xff] }
  0x1b   : > { %v336_v28 = vld [vmem:[%s1786_s30 + $0x4f8] sm:$0xff]  ;;  %v195_v34 = vld [vmem:[%s1786_s30 + $0x90] sm:$0xff]  ;;  %v198_v39 = vld [vmem:[%s1786_s30 + $0xa8] sm:$0xff] }
  0x1c   : > { %1616 = vmatpush1.bf16.msra.mxu0 %v1615_v20  ;;  %1700 = vmatpush1.bf16.msra.mxu1 %v1615_v20  ;;  %v189_v20 = vld [vmem:[%s1786_s30 + $0x60] sm:$0xff]  ;;  %v340_v30 = vld [vmem:[%s1786_s30 + $0x518] sm:$0xff]  ;;  %v199_v36 = vld [vmem:[%s1786_s30 + $0xb0] sm:$0xff] }
  0x1d   : > { %1617 = vmatprep.subr.bf16.mxu0 %v1729_v3  ;;  %1685 = vmatprep.subr.bf16.mxu1 %v1729_v3  ;;  %v416_v33 = vld [vmem:[%s2467_s1 + $0x178] sm:$0xff]  ;;  %v343_v37 = vld [vmem:[%s1786_s30 + $0x530] sm:$0xff]  ;;  %v342_v40 = vld [vmem:[%s1786_s30 + $0x528] sm:$0xff] }
  0x1e   : > { %v346_v42 = vld [vmem:[%s1786_s30 + $0x548] sm:$0xff]  ;;  %v201_v43 = vld [vmem:[%s1786_s30 + $0xc0] sm:$0xff]  ;;  %v348_v48 = vld [vmem:[%s1786_s30 + $0x558] sm:$0xff] }
  0x1f   : > { %v205_v45 = vld [vmem:[%s1786_s30 + $0xe0] sm:$0xff]  ;;  %v208_v49 = vld [vmem:[%s1786_s30 + $0xf8] sm:$0xff]  ;;  %v207_v51 = vld [vmem:[%s1786_s30 + $0xf0] sm:$0xff] }
  0x20   : > { %1619 = vmatpush1.bf16.msra.mxu0 %v1618_v23  ;;  %1701 = vmatpush1.bf16.msra.mxu1 %v1618_v23  ;;  %v337_v23 = vld [vmem:[%s1786_s30 + $0x500] sm:$0xff]  ;;  %v352_v50 = vld [vmem:[%s1786_s30 + $0x578] sm:$0xff]  ;;  %v355_v54 = vld [vmem:[%s1786_s30 + $0x590] sm:$0xff] }
  0x21   : > { %1620 = vmatprep.subr.bf16.mxu0 %v1729_v3  ;;  %1686 = vmatprep.subr.bf16.mxu1 %v1729_v3  ;;  %v349_v46 = vld [vmem:[%s1786_s30 + $0x560] sm:$0xff]  ;;  %v210_v55 = vld [vmem:[%s1786_s30 + $0x108] sm:$0xff]  ;;  %v363_v4 = vld [vmem:[%s1786_s30 + $0x5d0] sm:$0xff] }
  0x22   : > { %v223_v5 = vld [vmem:[%s1786_s30 + $0x170] sm:$0xff]  ;;  %v225_v11 = vld [vmem:[%s1786_s30 + $0x180] sm:$0xff]  ;;  %v182_v12 = vld [vmem:[%s1786_s30 + $0x28] sm:$0xff] }
  0x23   : > { %v191_v18 = vld [vmem:[%s1786_s30 + $0x70] sm:$0xff] }
  0x24   : > { %1622 = vmatpush1.bf16.msra.mxu0 %v1621_v26  ;;  %1702 = vmatpush1.bf16.msra.mxu1 %v1621_v26  ;;  %v414_v26 = vld [vmem:[%s2467_s1 + $0x168] sm:$0xff]  ;;  %v231_v19 = vld [vmem:[%s1786_s30 + $0x1b0] sm:$0xff] }
  0x25   : > { %1623 = vmatprep.subr.bf16.mxu0 %v1729_v3  ;;  %1687 = vmatprep.subr.bf16.mxu1 %v1729_v3  ;;  %v1671_v31 = vpack.c.bf16 %v414_v26, %v413_v25  ;;  %v238_v25 = vld [vmem:[%s1786_s30 + $0x1e8] sm:$0xff]  ;;  %v203_v26 = vld [vmem:[%s1786_s30 + $0xd0] sm:$0xff] }
  0x28   : > { %1625 = vmatpush1.bf16.msra.mxu0 %v1624_v29  ;;  %1703 = vmatpush1.bf16.msra.mxu1 %v1624_v29  ;;  %v196_v29 = vld [vmem:[%s1786_s30 + $0x98] sm:$0xff] }
  0x29   : > { %1626 = vmatprep.subr.bf16.mxu0 %v1729_v3  ;;  %1688 = vmatprep.subr.bf16.mxu1 %v1729_v3 }
  0x2c   : > { %1628 = vmatpush1.bf16.msra.mxu0 %v1627_v32  ;;  %1704 = vmatpush1.bf16.msra.mxu1 %v1627_v32  ;;  %v415_v32 = vld [vmem:[%s2467_s1 + $0x170] sm:$0xff] }
  0x2d   : > { %1629 = vmatprep.subr.bf16.mxu0 %v1729_v3  ;;  %1689 = vmatprep.subr.bf16.mxu1 %v1729_v3 }
  0x30   : > { %1631 = vmatpush1.bf16.msra.mxu0 %v1630_v35  ;;  %1705 = vmatpush1.bf16.msra.mxu1 %v1630_v35  ;;  %v339_v35 = vld [vmem:[%s1786_s30 + $0x510] sm:$0xff] }
  0x31   : > { %1632 = vmatprep.subr.bf16.mxu0 %v1729_v3  ;;  %1690 = vmatprep.subr.bf16.mxu1 %v1729_v3 }
  0x34   : > { %1634 = vmatpush1.bf16.msra.mxu0 %v1633_v38  ;;  %1706 = vmatpush1.bf16.msra.mxu1 %v1633_v38  ;;  %v1675_v38 = vpack.c.bf16 %v416_v33, %v415_v32  ;;  %v212_v32 = vld [vmem:[%s1786_s30 + $0x118] sm:$0xff] }
  0x35   : > { %1635 = vmatprep.subr.bf16.mxu0 %v1729_v3  ;;  %1691 = vmatprep.subr.bf16.mxu1 %v1729_v3  ;;  %v244_v33 = vld [vmem:[%s1786_s30 + $0x218] sm:$0xff] }
  0x38   : > { %1637 = vmatpush1.bf16.msra.mxu0 %v1636_v41  ;;  %1707 = vmatpush1.bf16.msra.mxu1 %v1636_v41  ;;  %v202_v41 = vld [vmem:[%s1786_s30 + $0xc8] sm:$0xff] }
  0x39   : > { %1638 = vmatprep.subr.bf16.mxu0 %v1729_v3  ;;  %1692 = vmatprep.subr.bf16.mxu1 %v1729_v3 }
  0x3c   : > { %1640 = vmatpush1.bf16.msra.mxu0 %v1639_v44  ;;  %1708 = vmatpush1.bf16.msra.mxu1 %v1639_v44  ;;  %v345_v44 = vld [vmem:[%s1786_s30 + $0x540] sm:$0xff] }
  0x3d   : > { %1641 = vmatprep.subr.bf16.mxu0 %v1729_v3  ;;  %1693 = vmatprep.subr.bf16.mxu1 %v1729_v3 }
  0x40   : > { %1643 = vmatpush1.bf16.msra.mxu0 %v1642_v47  ;;  %1709 = vmatpush1.bf16.msra.mxu1 %v1642_v47  ;;  %v204_v47 = vld [vmem:[%s1786_s30 + $0xd8] sm:$0xff] }
  0x41   : > { %1644 = vmatprep.subr.bf16.mxu0 %v1729_v3  ;;  %1694 = vmatprep.subr.bf16.mxu1 %v1729_v3  ;;  %v1655_v3 = vpack.c.bf16 %v406_v62, %v405_v61  ;;  %v217_v61 = vld [vmem:[%s1786_s30 + $0x140] sm:$0xff] }
  0x42   : > { %v361_v62 = vld [vmem:[%s1786_s30 + $0x5c0] sm:$0xff] }
  0x44   : > { %1646 = vmatpush1.bf16.msra.mxu0 %v1645_v52  ;;  %1710 = vmatpush1.bf16.msra.mxu1 %v1645_v52  ;;  %v351_v52 = vld [vmem:[%s1786_s30 + $0x570] sm:$0xff] }
  0x45   : > { %1648 = vmatprep.subr.bf16.mxu1 %v1647_v53 }
  0x47   : > { %489 = vmatmul.mubr.f32.vlgmr.msra.gmra.mrb[0].mxu0 %v177_v56  ;;  %729 = vmatmul.mubr.f32.vlgmr.msra.gmra.mrb[0].mxu1 %v321_v57  ;;  %v354_v56 = vld [vmem:[%s1786_s30 + $0x588] sm:$0xff] }
  0x48   : > { %1650 = vmatpush3.bf16.msra.mxu1 %v1647_v53  ;;  %493 = vmatprep.mubr.f32.mxu0 %v181_v58  ;;  %v211_v53 = vld [vmem:[%s1786_s30 + $0x110] sm:$0xff]  ;;  %v214_v57 = vld [vmem:[%s1786_s30 + $0x128] sm:$0xff] }
  0x49   : > { %733 = vmatprep.mubr.f32.mxu1 %v325_v60  ;;  %1652 = vmatprep.subr.bf16.mxu1 %v1651_v59  ;;  %v358_v58 = vld [vmem:[%s1786_s30 + $0x5a8] sm:$0xff]  ;;  %v357_v60 = vld [vmem:[%s1786_s30 + $0x5a0] sm:$0xff] }
  0x4b   : > { %494 = vmatmul.mubr.f32.gmra.mrb[2].mxu0 %v180_v63  ;;  %734 = vmatmul.mubr.f32.gmra.mrb[2].mxu1 %v324_v0  ;;  %v216_v63 = vld [vmem:[%s1786_s30 + $0x138] sm:$0xff] }
  0x4c   : > { %498 = vmatprep.mubr.f32.mxu0 %v184_v1  ;;  %738 = vmatprep.mubr.f32.mxu1 %v328_v2  ;;  %v360_v0 = vld [vmem:[%s1786_s30 + $0x5b8] sm:$0xff] }
  0x4d   : > { %1654 = vmatpush3.bf16.msra.mxu1 %v1651_v59  ;;  %v213_v59 = vld [vmem:[%s1786_s30 + $0x120] sm:$0xff]  ;;  %v220_v1 = vld [vmem:[%s1786_s30 + $0x158] sm:$0xff] }
  0x4e   : > { %1656 = vmatprep.subr.bf16.mxu1 %v1655_v3  ;;  %v364_v2 = vld [vmem:[%s1786_s30 + $0x5d8] sm:$0xff] }
  0x4f   : > { %499 = vmatmul.mubr.f32.gmra.mrb[4].mxu0 %v183_v6  ;;  %739 = vmatmul.mubr.f32.gmra.mrb[4].mxu1 %v327_v7  ;;  %v367_v6 = vld [vmem:[%s1786_s30 + $0x5f0] sm:$0xff]  ;;  %v222_v7 = vld [vmem:[%s1786_s30 + $0x168] sm:$0xff] }
  0x50   : > { %503 = vmatprep.mubr.f32.mxu0 %v187_v8  ;;  %743 = vmatprep.mubr.f32.mxu1 %v331_v9  ;;  %v366_v8 = vld [vmem:[%s1786_s30 + $0x5e8] sm:$0xff] }
  0x51   : > { %1658 = vmatpush3.bf16.msra.mxu1 %v1655_v3  ;;  %v219_v3 = vld [vmem:[%s1786_s30 + $0x150] sm:$0xff]  ;;  %v226_v9 = vld [vmem:[%s1786_s30 + $0x188] sm:$0xff] }
  0x52   : > { %1660 = vmatprep.subr.bf16.mxu1 %v1659_v10 }
  0x53   : > { %504 = vmatmul.mubr.f32.gmra.mrb[6].mxu0 %v186_v13  ;;  %744 = vmatmul.mubr.f32.gmra.mrb[6].mxu1 %v330_v14  ;;  %v229_v13 = vld [vmem:[%s1786_s30 + $0x1a0] sm:$0xff] }
  0x54   : > { %508 = vmatprep.mubr.f32.mxu0 %v190_v15  ;;  %748 = vmatprep.mubr.f32.mxu1 %v334_v16  ;;  %v185_v14 = vld [vmem:[%s1786_s30 + $0x40] sm:$0xff]  ;;  %v228_v15 = vld [vmem:[%s1786_s30 + $0x198] sm:$0xff] }
  0x55   : > { %1662 = vmatpush3.bf16.msra.mxu1 %v1659_v10  ;;  %v179_v10 = vld [vmem:[%s1786_s30 + $0x10] sm:$0xff]  ;;  %v188_v16 = vld [vmem:[%s1786_s30 + $0x58] sm:$0xff] }
  0x56   : > { %1664 = vmatprep.subr.bf16.mxu1 %v1663_v17 }
  0x57   : > { %509 = vmatmul.mubr.f32.gmra.mrb[8].mxu0 %v189_v20  ;;  %749 = vmatmul.mubr.f32.gmra.mrb[8].mxu1 %v333_v21  ;;  %v194_v20 = vld [vmem:[%s1786_s30 + $0x88] sm:$0xff]  ;;  %v235_v21 = vld [vmem:[%s1786_s30 + $0x1d0] sm:$0xff] }
  0x58   : > { %513 = vmatprep.mubr.f32.mxu0 %v193_v22  ;;  %753 = vmatprep.mubr.f32.mxu1 %v337_v23  ;;  %v197_v22 = vld [vmem:[%s1786_s30 + $0xa0] sm:$0xff]  ;;  %v234_v23 = vld [vmem:[%s1786_s30 + $0x1c8] sm:$0xff] }
  0x59   : > { %1666 = vmatpush3.bf16.msra.mxu1 %v1663_v17  ;;  %v232_v17 = vld [vmem:[%s1786_s30 + $0x1b8] sm:$0xff] }
  0x5a   : > { %1668 = vmatprep.subr.bf16.mxu1 %v1667_v24 }
  0x5b   : > { %514 = vmatmul.mubr.f32.gmra.mrb[10].mxu0 %v192_v27  ;;  %754 = vmatmul.mubr.f32.gmra.mrb[10].mxu1 %v336_v28  ;;  %v237_v27 = vld [vmem:[%s1786_s30 + $0x1e0] sm:$0xff]  ;;  %v206_v28 = vld [vmem:[%s1786_s30 + $0xe8] sm:$0xff] }
  0x5c   : > { %518 = vmatprep.mubr.f32.mxu0 %v196_v29  ;;  %758 = vmatprep.mubr.f32.mxu1 %v340_v30  ;;  %v241_v29 = vld [vmem:[%s1786_s30 + $0x200] sm:$0xff] }
  0x5d   : > { %1670 = vmatpush3.bf16.msra.mxu1 %v1667_v24  ;;  %v200_v24 = vld [vmem:[%s1786_s30 + $0xb8] sm:$0xff]  ;;  %v209_v30 = vld [vmem:[%s1786_s30 + $0x100] sm:$0xff] }
  0x5e   : > { %1672 = vmatprep.subr.bf16.mxu1 %v1671_v31 }
  0x5f   : > { %519 = vmatmul.mubr.f32.gmra.mrb[12].mxu0 %v195_v34  ;;  %759 = vmatmul.mubr.f32.gmra.mrb[12].mxu1 %v339_v35  ;;  %v215_v34 = vld [vmem:[%s1786_s30 + $0x130] sm:$0xff] }
  0x60   : > { %523 = vmatprep.mubr.f32.mxu0 %v199_v36  ;;  %763 = vmatprep.mubr.f32.mxu1 %v343_v37  ;;  %v243_v35 = vld [vmem:[%s1786_s30 + $0x210] sm:$0xff]  ;;  %v218_v36 = vld [vmem:[%s1786_s30 + $0x148] sm:$0xff] }
  0x61   : > { %1674 = vmatpush3.bf16.msra.mxu1 %v1671_v31  ;;  %v240_v31 = vld [vmem:[%s1786_s30 + $0x1f8] sm:$0xff]  ;;  %v247_v37 = vld [vmem:[%s1786_s30 + $0x230] sm:$0xff] }
  0x62   : > { %1676 = vmatprep.subr.bf16.mxu1 %v1675_v38 }
  0x63   : > { %524 = vmatmul.mubr.f32.gmra.mrb[14].mxu0 %v198_v39  ;;  %764 = vmatmul.mubr.f32.gmra.mrb[14].mxu1 %v342_v40  ;;  %v246_v39 = vld [vmem:[%s1786_s30 + $0x228] sm:$0xff]  ;;  %v224_v40 = vld [vmem:[%s1786_s30 + $0x178] sm:$0xff] }
  0x64   : > { %528 = vmatprep.mubr.f32.mxu0 %v202_v41  ;;  %768 = vmatprep.mubr.f32.mxu1 %v346_v42  ;;  %v250_v41 = vld [vmem:[%s1786_s30 + $0x248] sm:$0xff]  ;;  %v227_v42 = vld [vmem:[%s1786_s30 + $0x190] sm:$0xff] }
  0x65   : > { %1678 = vmatpush3.bf16.msra.mxu1 %v1675_v38  ;;  %v221_v38 = vld [vmem:[%s1786_s30 + $0x160] sm:$0xff] }
  0x67   : > { %529 = vmatmul.mubr.f32.gmra.mrb[16].mxu0 %v201_v43  ;;  %769 = vmatmul.mubr.f32.gmra.mrb[16].mxu1 %v345_v44  ;;  %v249_v43 = vld [vmem:[%s1786_s30 + $0x240] sm:$0xff]  ;;  %v230_v44 = vld [vmem:[%s1786_s30 + $0x1a8] sm:$0xff] }
  0x68   : > { %533 = vmatprep.mubr.f32.mxu0 %v205_v45  ;;  %773 = vmatprep.mubr.f32.mxu1 %v349_v46  ;;  %v253_v45 = vld [vmem:[%s1786_s30 + $0x260] sm:$0xff] }
  0x69   : > { %v233_v46 = vld [vmem:[%s1786_s30 + $0x1c0] sm:$0xff] }
  0x6b   : > { %534 = vmatmul.mubr.f32.gmra.mrb[18].mxu0 %v204_v47  ;;  %774 = vmatmul.mubr.f32.gmra.mrb[18].mxu1 %v348_v48  ;;  %v252_v47 = vld [vmem:[%s1786_s30 + $0x258] sm:$0xff] }
  0x6c   : > { %538 = vmatprep.mubr.f32.mxu0 %v208_v49  ;;  %778 = vmatprep.mubr.f32.mxu1 %v352_v50  ;;  %v236_v48 = vld [vmem:[%s1786_s30 + $0x1d8] sm:$0xff]  ;;  %v239_v50 = vld [vmem:[%s1786_s30 + $0x1f0] sm:$0xff] }
  0x6d   : > { %v256_v49 = vld [vmem:[%s1786_s30 + $0x278] sm:$0xff] }
  0x6f   : > { %539 = vmatmul.mubr.f32.gmra.mrb[20].mxu0 %v207_v51  ;;  %779 = vmatmul.mubr.f32.gmra.mrb[20].mxu1 %v351_v52  ;;  %v255_v51 = vld [vmem:[%s1786_s30 + $0x270] sm:$0xff]  ;;  %v242_v52 = vld [vmem:[%s1786_s30 + $0x208] sm:$0xff] }
  0x70   : > { %543 = vmatprep.mubr.f32.mxu0 %v211_v53  ;;  %783 = vmatprep.mubr.f32.mxu1 %v355_v54  ;;  %v259_v53 = vld [vmem:[%s1786_s30 + $0x290] sm:$0xff]  ;;  %v245_v54 = vld [vmem:[%s1786_s30 + $0x220] sm:$0xff] }
  0x73   : > { %544 = vmatmul.mubr.f32.gmra.mrb[22].mxu0 %v210_v55  ;;  %784 = vmatmul.mubr.f32.gmra.mrb[22].mxu1 %v354_v56  ;;  %v258_v55 = vld [vmem:[%s1786_s30 + $0x288] sm:$0xff]  ;;  %v248_v56 = vld [vmem:[%s1786_s30 + $0x238] sm:$0xff] }
  0x74   : > { %548 = vmatprep.mubr.f32.mxu0 %v214_v57  ;;  %788 = vmatprep.mubr.f32.mxu1 %v358_v58  ;;  %v262_v57 = vld [vmem:[%s1786_s30 + $0x2a8] sm:$0xff]  ;;  %v251_v58 = vld [vmem:[%s1786_s30 + $0x250] sm:$0xff] }
  0x77   : > { %549 = vmatmul.mubr.f32.gmra.mrb[24].mxu0 %v213_v59  ;;  %789 = vmatmul.mubr.f32.gmra.mrb[24].mxu1 %v357_v60  ;;  %v261_v59 = vld [vmem:[%s1786_s30 + $0x2a0] sm:$0xff]  ;;  %v254_v60 = vld [vmem:[%s1786_s30 + $0x268] sm:$0xff] }
  0x78   : > { %553 = vmatprep.mubr.f32.mxu0 %v217_v61  ;;  %793 = vmatprep.mubr.f32.mxu1 %v361_v62  ;;  %v265_v61 = vld [vmem:[%s1786_s30 + $0x2c0] sm:$0xff] }
  0x79   : > { %v257_v62 = vld [vmem:[%s1786_s30 + $0x280] sm:$0xff] }
  0x7b   : > { %554 = vmatmul.mubr.f32.gmra.mrb[26].mxu0 %v216_v63  ;;  %794 = vmatmul.mubr.f32.gmra.mrb[26].mxu1 %v360_v0  ;;  %v264_v63 = vld [vmem:[%s1786_s30 + $0x2b8] sm:$0xff] }
  0x7c   : > { %558 = vmatprep.mubr.f32.mxu0 %v220_v1  ;;  %798 = vmatprep.mubr.f32.mxu1 %v364_v2  ;;  %v260_v0 = vld [vmem:[%s1786_s30 + $0x298] sm:$0xff]  ;;  %v263_v2 = vld [vmem:[%s1786_s30 + $0x2b0] sm:$0xff] }
  0x7d   : > { %v268_v1 = vld [vmem:[%s1786_s30 + $0x2d8] sm:$0xff] }
  0x7f   : > { %559 = vmatmul.mubr.f32.gmra.mrb[28].mxu0 %v219_v3  ;;  %799 = vmatmul.mubr.f32.gmra.mrb[28].mxu1 %v363_v4  ;;  %v267_v3 = vld [vmem:[%s1786_s30 + $0x2d0] sm:$0xff]  ;;  %v266_v4 = vld [vmem:[%s1786_s30 + $0x2c8] sm:$0xff] }
  0x80   : > { %563 = vmatprep.mubr.f32.mxu0 %v223_v5  ;;  %803 = vmatprep.mubr.f32.mxu1 %v367_v6  ;;  %v271_v5 = vld [vmem:[%s1786_s30 + $0x2f0] sm:$0xff]  ;;  %v269_v6 = vld [vmem:[%s1786_s30 + $0x2e0] sm:$0xff] }
  0x83   : > { %564 = vmatmul.mubr.f32.gmra.mrb[30].mxu0 %v222_v7  ;;  %804 = vmatmul.mubr.f32.gmra.mrb[30].mxu1 %v366_v8  ;;  %v270_v7 = vld [vmem:[%s1786_s30 + $0x2e8] sm:$0xff]  ;;  %v272_v8 = vld [vmem:[%s1786_s30 + $0x2f8] sm:$0xff] }
  0x84   : > { %568 = vmatprep.mubr.f32.mxu0 %v226_v9  ;;  %1503 = vmatprep.mubr.f32.mxu1 %v179_v10  ;;  %v274_v9 = vld [vmem:[%s1786_s30 + $0x308] sm:$0xff]  ;;  %v275_v10 = vld [vmem:[%s1786_s30 + $0x310] sm:$0xff] }
  0x87   : > { %569 = vmatmul.mubr.f32.gmra.mrb[32].mxu0 %v225_v11  ;;  %1504 = vmatmul.mubr.f32.vlgmr.msra.gmra.mrb[32].mxu1 %v182_v12  ;;  %v273_v11 = vld [vmem:[%s1786_s30 + $0x300] sm:$0xff]  ;;  %v278_v12 = vld [vmem:[%s1786_s30 + $0x328] sm:$0xff] }
  0x88   : > { %573 = vmatprep.mubr.f32.mxu0 %v229_v13  ;;  %1506 = vmatprep.mubr.f32.mxu1 %v185_v14  ;;  %v277_v13 = vld [vmem:[%s1786_s30 + $0x320] sm:$0xff] }
  0x89   : > { %v281_v14 = vld [vmem:[%s1786_s30 + $0x340] sm:$0xff] }
  0x8b   : > { %574 = vmatmul.mubr.f32.gmra.mrb[34].mxu0 %v228_v15  ;;  %1507 = vmatmul.mubr.f32.gmra.mrb[34].mxu1 %v188_v16  ;;  %v276_v15 = vld [vmem:[%s1786_s30 + $0x318] sm:$0xff] }
  0x8c   : > { %578 = vmatprep.mubr.f32.mxu0 %v232_v17  ;;  %1509 = vmatprep.mubr.f32.mxu1 %v191_v18  ;;  %v284_v16 = vld [vmem:[%s1786_s30 + $0x358] sm:$0xff]  ;;  %v287_v18 = vld [vmem:[%s1786_s30 + $0x370] sm:$0xff] }
  0x8d   : > { %v280_v17 = vld [vmem:[%s1786_s30 + $0x338] sm:$0xff] }
  0x8f   : > { %579 = vmatmul.mubr.f32.gmra.mrb[36].mxu0 %v231_v19  ;;  %1510 = vmatmul.mubr.f32.gmra.mrb[36].mxu1 %v194_v20  ;;  %v279_v19 = vld [vmem:[%s1786_s30 + $0x330] sm:$0xff]  ;;  %v290_v20 = vld [vmem:[%s1786_s30 + $0x388] sm:$0xff] }
  0x90   : > { %583 = vmatprep.mubr.f32.mxu0 %v235_v21  ;;  %1512 = vmatprep.mubr.f32.mxu1 %v197_v22  ;;  %v283_v21 = vld [vmem:[%s1786_s30 + $0x350] sm:$0xff]  ;;  %v293_v22 = vld [vmem:[%s1786_s30 + $0x3a0] sm:$0xff] }
  0x93   : > { %584 = vmatmul.mubr.f32.gmra.mrb[38].mxu0 %v234_v23  ;;  %1513 = vmatmul.mubr.f32.gmra.mrb[38].mxu1 %v200_v24  ;;  %v282_v23 = vld [vmem:[%s1786_s30 + $0x348] sm:$0xff]  ;;  %v296_v24 = vld [vmem:[%s1786_s30 + $0x3b8] sm:$0xff] }
  0x94   : > { %588 = vmatprep.mubr.f32.mxu0 %v238_v25  ;;  %1515 = vmatprep.mubr.f32.mxu1 %v203_v26  ;;  %v286_v25 = vld [vmem:[%s1786_s30 + $0x368] sm:$0xff]  ;;  %v299_v26 = vld [vmem:[%s1786_s30 + $0x3d0] sm:$0xff] }
  0x97   : > { %589 = vmatmul.mubr.f32.gmra.mrb[40].mxu0 %v237_v27  ;;  %1516 = vmatmul.mubr.f32.gmra.mrb[40].mxu1 %v206_v28  ;;  %v285_v27 = vld [vmem:[%s1786_s30 + $0x360] sm:$0xff]  ;;  %v302_v28 = vld [vmem:[%s1786_s30 + $0x3e8] sm:$0xff] }
  0x98   : > { %593 = vmatprep.mubr.f32.mxu0 %v241_v29  ;;  %1518 = vmatprep.mubr.f32.mxu1 %v209_v30  ;;  %v289_v29 = vld [vmem:[%s1786_s30 + $0x380] sm:$0xff] }
  0x99   : > { %v305_v30 = vld [vmem:[%s1786_s30 + $0x400] sm:$0xff] }
  0x9b   : > { %594 = vmatmul.mubr.f32.gmra.mrb[42].mxu0 %v240_v31  ;;  %1519 = vmatmul.mubr.f32.gmra.mrb[42].mxu1 %v212_v32  ;;  %v288_v31 = vld [vmem:[%s1786_s30 + $0x378] sm:$0xff] }
  0x9c   : > { %598 = vmatprep.mubr.f32.mxu0 %v244_v33  ;;  %1521 = vmatprep.mubr.f32.mxu1 %v215_v34  ;;  %v308_v32 = vld [vmem:[%s1786_s30 + $0x418] sm:$0xff]  ;;  %v311_v34 = vld [vmem:[%s1786_s30 + $0x430] sm:$0xff] }
  0x9d   : > { %v292_v33 = vld [vmem:[%s1786_s30 + $0x398] sm:$0xff] }
  0x9f   : > { %599 = vmatmul.mubr.f32.gmra.mrb[44].mxu0 %v243_v35  ;;  %1522 = vmatmul.mubr.f32.gmra.mrb[44].mxu1 %v218_v36  ;;  %v291_v35 = vld [vmem:[%s1786_s30 + $0x390] sm:$0xff]  ;;  %v314_v36 = vld [vmem:[%s1786_s30 + $0x448] sm:$0xff] }
  0xa0   : > { %603 = vmatprep.mubr.f32.mxu0 %v247_v37  ;;  %1524 = vmatprep.mubr.f32.mxu1 %v221_v38  ;;  %v295_v37 = vld [vmem:[%s1786_s30 + $0x3b0] sm:$0xff]  ;;  %v317_v38 = vld [vmem:[%s1786_s30 + $0x460] sm:$0xff] }
  0xa3   : > { %604 = vmatmul.mubr.f32.gmra.mrb[46].mxu0 %v246_v39  ;;  %1525 = vmatmul.mubr.f32.gmra.mrb[46].mxu1 %v224_v40  ;;  %v294_v39 = vld [vmem:[%s1786_s30 + $0x3a8] sm:$0xff]  ;;  %v320_v40 = vld [vmem:[%s1786_s30 + $0x478] sm:$0xff] }
  0xa4   : > { %608 = vmatprep.mubr.f32.mxu0 %v250_v41  ;;  %1527 = vmatprep.mubr.f32.mxu1 %v227_v42  ;;  %v298_v41 = vld [vmem:[%s1786_s30 + $0x3c8] sm:$0xff]  ;;  %v323_v42 = vld [vmem:[%s1786_s30 + $0x490] sm:$0xff] }
  0xa7   : > { %609 = vmatmul.mubr.f32.gmra.mrb[48].mxu0 %v249_v43  ;;  %1528 = vmatmul.mubr.f32.gmra.mrb[48].mxu1 %v230_v44  ;;  %v297_v43 = vld [vmem:[%s1786_s30 + $0x3c0] sm:$0xff]  ;;  %v326_v44 = vld [vmem:[%s1786_s30 + $0x4a8] sm:$0xff] }
  0xa8   : > { %613 = vmatprep.mubr.f32.mxu0 %v253_v45  ;;  %1530 = vmatprep.mubr.f32.mxu1 %v233_v46  ;;  %v301_v45 = vld [vmem:[%s1786_s30 + $0x3e0] sm:$0xff] }
  0xa9   : > { %v329_v46 = vld [vmem:[%s1786_s30 + $0x4c0] sm:$0xff] }
  0xab   : > { %614 = vmatmul.mubr.f32.gmra.mrb[50].mxu0 %v252_v47  ;;  %1531 = vmatmul.mubr.f32.gmra.mrb[50].mxu1 %v236_v48  ;;  %v300_v47 = vld [vmem:[%s1786_s30 + $0x3d8] sm:$0xff] }
  0xac   : > { %618 = vmatprep.mubr.f32.mxu0 %v256_v49  ;;  %1533 = vmatprep.mubr.f32.mxu1 %v239_v50  ;;  %v332_v48 = vld [vmem:[%s1786_s30 + $0x4d8] sm:$0xff]  ;;  %v335_v50 = vld [vmem:[%s1786_s30 + $0x4f0] sm:$0xff] }
  0xad   : > { %v304_v49 = vld [vmem:[%s1786_s30 + $0x3f8] sm:$0xff] }
  0xaf   : > { %619 = vmatmul.mubr.f32.gmra.mrb[52].mxu0 %v255_v51  ;;  %1534 = vmatmul.mubr.f32.gmra.mrb[52].mxu1 %v242_v52  ;;  %v303_v51 = vld [vmem:[%s1786_s30 + $0x3f0] sm:$0xff]  ;;  %v338_v52 = vld [vmem:[%s1786_s30 + $0x508] sm:$0xff] }
  0xb0   : > { %623 = vmatprep.mubr.f32.mxu0 %v259_v53  ;;  %1536 = vmatprep.mubr.f32.mxu1 %v245_v54  ;;  %v307_v53 = vld [vmem:[%s1786_s30 + $0x410] sm:$0xff]  ;;  %v341_v54 = vld [vmem:[%s1786_s30 + $0x520] sm:$0xff] }
  0xb3   : > { %624 = vmatmul.mubr.f32.gmra.mrb[54].mxu0 %v258_v55  ;;  %1537 = vmatmul.mubr.f32.gmra.mrb[54].mxu1 %v248_v56  ;;  %v306_v55 = vld [vmem:[%s1786_s30 + $0x408] sm:$0xff]  ;;  %v344_v56 = vld [vmem:[%s1786_s30 + $0x538] sm:$0xff] }
  0xb4   : > { %628 = vmatprep.mubr.f32.mxu0 %v262_v57  ;;  %1539 = vmatprep.mubr.f32.mxu1 %v251_v58  ;;  %v310_v57 = vld [vmem:[%s1786_s30 + $0x428] sm:$0xff]  ;;  %v347_v58 = vld [vmem:[%s1786_s30 + $0x550] sm:$0xff] }
  0xb7   : > { %629 = vmatmul.mubr.f32.gmra.mrb[56].mxu0 %v261_v59  ;;  %1540 = vmatmul.mubr.f32.gmra.mrb[56].mxu1 %v254_v60  ;;  %v309_v59 = vld [vmem:[%s1786_s30 + $0x420] sm:$0xff]  ;;  %v350_v60 = vld [vmem:[%s1786_s30 + $0x568] sm:$0xff] }
  0xb8   : > { %633 = vmatprep.mubr.f32.mxu0 %v265_v61  ;;  %1542 = vmatprep.mubr.f32.mxu1 %v257_v62  ;;  %v313_v61 = vld [vmem:[%s1786_s30 + $0x440] sm:$0xff] }
  0xb9   : > { %v353_v62 = vld [vmem:[%s1786_s30 + $0x580] sm:$0xff] }
  0xbb   : > { %634 = vmatmul.mubr.f32.gmra.mrb[58].mxu0 %v264_v63  ;;  %1543 = vmatmul.mubr.f32.gmra.mrb[58].mxu1 %v260_v0  ;;  %v312_v63 = vld [vmem:[%s1786_s30 + $0x438] sm:$0xff] }
  0xbc   : > { %638 = vmatprep.mubr.f32.mxu0 %v268_v1  ;;  %1545 = vmatprep.mubr.f32.mxu1 %v263_v2  ;;  %v356_v0 = vld [vmem:[%s1786_s30 + $0x598] sm:$0xff]  ;;  %v359_v2 = vld [vmem:[%s1786_s30 + $0x5b0] sm:$0xff] }
  0xbd   : > { %v316_v1 = vld [vmem:[%s1786_s30 + $0x458] sm:$0xff] }
  0xbf   : > { %639 = vmatmul.mubr.f32.gmra.mrb[60].mxu0 %v267_v3  ;;  %1546 = vmatmul.mubr.f32.gmra.mrb[60].mxu1 %v266_v4  ;;  %v315_v3 = vld [vmem:[%s1786_s30 + $0x450] sm:$0xff]  ;;  %v362_v4 = vld [vmem:[%s1786_s30 + $0x5c8] sm:$0xff] }
  0xc0   : > { %643 = vmatprep.mubr.f32.mxu0 %v271_v5  ;;  %1548 = vmatprep.mubr.f32.mxu1 %v269_v6  ;;  %v319_v5 = vld [vmem:[%s1786_s30 + $0x470] sm:$0xff]  ;;  %v365_v6 = vld [vmem:[%s1786_s30 + $0x5e0] sm:$0xff] }
  0xc3   : > { %644 = vmatmul.mubr.f32.gmra.mrb[62].mxu0 %v270_v7  ;;  %1549 = vmatmul.mubr.f32.gmra.mrb[62].mxu1 %v272_v8  ;;  %v318_v7 = vld [vmem:[%s1786_s30 + $0x468] sm:$0xff]  ;;  %v368_v8 = vld [vmem:[%s1786_s30 + $0x5f8] sm:$0xff] }
  0xc4   : > { %648 = vmatprep.mubr.f32.mxu0 %v274_v9  ;;  %1551 = vmatprep.mubr.f32.mxu1 %v275_v10 }
  0xc7   : > { %649 = vmatmul.mubr.f32.gmra.mrb[64].mxu0 %v273_v11  ;;  %1552 = vmatmul.mubr.f32.gmra.mrb[64].mxu1 %v278_v12 }
  0xc8   : > { %653 = vmatprep.mubr.f32.mxu0 %v277_v13  ;;  %1554 = vmatprep.mubr.f32.mxu1 %v281_v14 }
  0xcb   : > { %654 = vmatmul.mubr.f32.gmra.mrb[66].mxu0 %v276_v15  ;;  %1555 = vmatmul.mubr.f32.gmra.mrb[66].mxu1 %v284_v16 }
  0xcc   : > { %658 = vmatprep.mubr.f32.mxu0 %v280_v17  ;;  %1557 = vmatprep.mubr.f32.mxu1 %v287_v18 }
  0xcf   : > { %659 = vmatmul.mubr.f32.gmra.mrb[68].mxu0 %v279_v19  ;;  %1558 = vmatmul.mubr.f32.gmra.mrb[68].mxu1 %v290_v20 }
  0xd0   : > { %663 = vmatprep.mubr.f32.mxu0 %v283_v21  ;;  %1560 = vmatprep.mubr.f32.mxu1 %v293_v22 }
  0xd3   : > { %664 = vmatmul.mubr.f32.gmra.mrb[70].mxu0 %v282_v23  ;;  %1561 = vmatmul.mubr.f32.gmra.mrb[70].mxu1 %v296_v24 }
  0xd4   : > { %668 = vmatprep.mubr.f32.mxu0 %v286_v25  ;;  %1563 = vmatprep.mubr.f32.mxu1 %v299_v26 }
  0xd7   : > { %669 = vmatmul.mubr.f32.gmra.mrb[72].mxu0 %v285_v27  ;;  %1564 = vmatmul.mubr.f32.gmra.mrb[72].mxu1 %v302_v28 }
  0xd8   : > { %673 = vmatprep.mubr.f32.mxu0 %v289_v29  ;;  %1566 = vmatprep.mubr.f32.mxu1 %v305_v30 }
  0xdb   : > { %674 = vmatmul.mubr.f32.gmra.mrb[74].mxu0 %v288_v31  ;;  %1567 = vmatmul.mubr.f32.gmra.mrb[74].mxu1 %v308_v32 }
  0xdc   : > { %678 = vmatprep.mubr.f32.mxu0 %v292_v33  ;;  %1569 = vmatprep.mubr.f32.mxu1 %v311_v34 }
  0xdf   : > { %679 = vmatmul.mubr.f32.gmra.mrb[76].mxu0 %v291_v35  ;;  %1570 = vmatmul.mubr.f32.gmra.mrb[76].mxu1 %v314_v36 }
  0xe0   : > { %683 = vmatprep.mubr.f32.mxu0 %v295_v37  ;;  %1572 = vmatprep.mubr.f32.mxu1 %v317_v38 }
  0xe3   : > { %684 = vmatmul.mubr.f32.gmra.mrb[78].mxu0 %v294_v39  ;;  %1573 = vmatmul.mubr.f32.gmra.mrb[78].mxu1 %v320_v40 }
  0xe4   : > { %688 = vmatprep.mubr.f32.mxu0 %v298_v41  ;;  %1575 = vmatprep.mubr.f32.mxu1 %v323_v42 }
  0xe7   : > { %689 = vmatmul.mubr.f32.gmra.mrb[80].mxu0 %v297_v43  ;;  %1576 = vmatmul.mubr.f32.gmra.mrb[80].mxu1 %v326_v44 }
  0xe8   : > { %693 = vmatprep.mubr.f32.mxu0 %v301_v45  ;;  %1578 = vmatprep.mubr.f32.mxu1 %v329_v46 }
  0xeb   : > { %694 = vmatmul.mubr.f32.gmra.mrb[82].mxu0 %v300_v47  ;;  %1579 = vmatmul.mubr.f32.gmra.mrb[82].mxu1 %v332_v48 }
  0xec   : > { %698 = vmatprep.mubr.f32.mxu0 %v304_v49  ;;  %1581 = vmatprep.mubr.f32.mxu1 %v335_v50 }
  0xef   : > { %699 = vmatmul.mubr.f32.gmra.mrb[84].mxu0 %v303_v51  ;;  %1582 = vmatmul.mubr.f32.gmra.mrb[84].mxu1 %v338_v52 }
  0xf0   : > { %703 = vmatprep.mubr.f32.mxu0 %v307_v53  ;;  %1584 = vmatprep.mubr.f32.mxu1 %v341_v54 }
  0xf3   : > { %704 = vmatmul.mubr.f32.gmra.mrb[86].mxu0 %v306_v55  ;;  %1585 = vmatmul.mubr.f32.gmra.mrb[86].mxu1 %v344_v56 }
  0xf4   : > { %708 = vmatprep.mubr.f32.mxu0 %v310_v57  ;;  %1587 = vmatprep.mubr.f32.mxu1 %v347_v58 }
  0xf7   : > { %709 = vmatmul.mubr.f32.gmra.mrb[88].mxu0 %v309_v59  ;;  %1588 = vmatmul.mubr.f32.gmra.mrb[88].mxu1 %v350_v60 }
  0xf8   : > { %713 = vmatprep.mubr.f32.mxu0 %v313_v61  ;;  %1590 = vmatprep.mubr.f32.mxu1 %v353_v62 }
  0xfb   : > { %714 = vmatmul.mubr.f32.gmra.mrb[90].mxu0 %v312_v63  ;;  %1591 = vmatmul.mubr.f32.gmra.mrb[90].mxu1 %v356_v0 }
  0xfc   : > { %718 = vmatprep.mubr.f32.mxu0 %v316_v1  ;;  %1593 = vmatprep.mubr.f32.mxu1 %v359_v2 }
  0xff   : > { %719 = vmatmul.mubr.f32.gmra.mrb[92].mxu0 %v315_v3  ;;  %1594 = vmatmul.mubr.f32.gmra.mrb[92].mxu1 %v362_v4 }
 0x100   : > { %723 = vmatprep.mubr.f32.mxu0 %v319_v5  ;;  %1596 = vmatprep.mubr.f32.mxu1 %v365_v6 }
 0x103   : > { %724 = vmatmul.mubr.f32.gmra.mrb[94].mxu0 %v318_v7  ;;  %1597 = vmatmul.mubr.f32.gmra.mrb[94].mxu1 %v368_v8  ;;  %v2199_v7 = vld [vmem:[%s2468_s2] ss:$0 sm:$0xff] }
 0x11a   : > { %v2134_v9 = vpop.f32.mrb[0].mxu0  ;;  %v2136_v10 = vpop.f32.mrb[0].mxu1 }
 0x11b   : > { %v492_v11 = vpop.f32.mrb[1].mxu0  ;;  %v732_v12 = vpop.f32.mrb[1].mxu1 }
 0x11e   : > { %v495_v13 = vpop.f32.mrb[2].mxu0  ;;  %v2138_v14 = vpop.f32.mrb[2].mxu1 }
 0x11f   : > { %v497_v15 = vpop.f32.mrb[3].mxu0  ;;  %v737_v16 = vpop.f32.mrb[3].mxu1  ;;  %v496_v12 = vadd.f32 %v2199_v7, %v495_v13 }
 0x120   : > { %v491_v15 = vadd.f32 %v2199_v7, %v2134_v9 }
 0x122   : > { %v2140_v17 = vpop.f32.mrb[4].mxu0  ;;  %v2142_v18 = vpop.f32.mrb[4].mxu1 }
 0x123   : > { %v502_v19 = vpop.f32.mrb[5].mxu0  ;;  %v742_v20 = vpop.f32.mrb[5].mxu1  ;;  %v501_v9 = vadd.f32 %v2199_v7, %v2140_v17 }
 0x126   : > { %v2144_v21 = vpop.f32.mrb[6].mxu0  ;;  %v2146_v22 = vpop.f32.mrb[6].mxu1 }
 0x127   : > { %v507_v23 = vpop.f32.mrb[7].mxu0  ;;  %v747_v24 = vpop.f32.mrb[7].mxu1  ;;  %v506_v13 = vadd.f32 %v2199_v7, %v2144_v21 }
 0x12a   : > { %v2148_v25 = vpop.f32.mrb[8].mxu0  ;;  %v2150_v26 = vpop.f32.mrb[8].mxu1 }
 0x12b   : > { %v512_v27 = vpop.f32.mrb[9].mxu0  ;;  %v752_v28 = vpop.f32.mrb[9].mxu1  ;;  %v511_v17 = vadd.f32 %v2199_v7, %v2148_v25 }
 0x12e   : > { %v2152_v29 = vpop.f32.mrb[10].mxu0  ;;  %v2154_v30 = vpop.f32.mrb[10].mxu1 }
 0x12f   : > { %v517_v31 = vpop.f32.mrb[11].mxu0  ;;  %v757_v32 = vpop.f32.mrb[11].mxu1  ;;  %v516_v21 = vadd.f32 %v2199_v7, %v2152_v29 }
 0x132   : > { %v2156_v33 = vpop.f32.mrb[12].mxu0  ;;  %v2158_v34 = vpop.f32.mrb[12].mxu1 }
 0x133   : > { %v522_v35 = vpop.f32.mrb[13].mxu0  ;;  %v762_v36 = vpop.f32.mrb[13].mxu1  ;;  %v521_v25 = vadd.f32 %v2199_v7, %v2156_v33 }
 0x136   : > { %v2160_v37 = vpop.f32.mrb[14].mxu0  ;;  %v2162_v38 = vpop.f32.mrb[14].mxu1 }
 0x137   : > { %v527_v39 = vpop.f32.mrb[15].mxu0  ;;  %v767_v40 = vpop.f32.mrb[15].mxu1  ;;  %v526_v29 = vadd.f32 %v2199_v7, %v2160_v37 }
 0x13a   : > { %v2164_v41 = vpop.f32.mrb[16].mxu0  ;;  %v2166_v42 = vpop.f32.mrb[16].mxu1 }
 0x13b   : > { %v532_v43 = vpop.f32.mrb[17].mxu0  ;;  %v772_v44 = vpop.f32.mrb[17].mxu1  ;;  %v531_v33 = vadd.f32 %v2199_v7, %v2164_v41 }
 0x13e   : > { %v2168_v45 = vpop.f32.mrb[18].mxu0  ;;  %v2170_v46 = vpop.f32.mrb[18].mxu1 }
 0x13f   : > { %v537_v47 = vpop.f32.mrb[19].mxu0  ;;  %v777_v48 = vpop.f32.mrb[19].mxu1  ;;  %v536_v37 = vadd.f32 %v2199_v7, %v2168_v45 }
 0x142   : > { %v2172_v49 = vpop.f32.mrb[20].mxu0  ;;  %v2174_v50 = vpop.f32.mrb[20].mxu1 }
 0x143   : > { %v542_v51 = vpop.f32.mrb[21].mxu0  ;;  %v782_v52 = vpop.f32.mrb[21].mxu1  ;;  %v541_v41 = vadd.f32 %v2199_v7, %v2172_v49 }
 0x146   : > { %v2176_v53 = vpop.f32.mrb[22].mxu0  ;;  %v2178_v54 = vpop.f32.mrb[22].mxu1 }
 0x147   : > { %v547_v55 = vpop.f32.mrb[23].mxu0  ;;  %v787_v56 = vpop.f32.mrb[23].mxu1  ;;  %v546_v45 = vadd.f32 %v2199_v7, %v2176_v53 }
 0x14a   : > { %v2180_v57 = vpop.f32.mrb[24].mxu0  ;;  %v2182_v58 = vpop.f32.mrb[24].mxu1 }
 0x14b   : > { %v552_v59 = vpop.f32.mrb[25].mxu0  ;;  %v792_v60 = vpop.f32.mrb[25].mxu1  ;;  %v551_v49 = vadd.f32 %v2199_v7, %v2180_v57 }
 0x14e   : > { %v2184_v61 = vpop.f32.mrb[26].mxu0  ;;  %v2186_v62 = vpop.f32.mrb[26].mxu1 }
 0x14f   : > { %v557_v63 = vpop.f32.mrb[27].mxu0  ;;  %v797_v0 = vpop.f32.mrb[27].mxu1  ;;  %v556_v53 = vadd.f32 %v2199_v7, %v2184_v61 }
 0x152   : > { %v2188_v1 = vpop.f32.mrb[28].mxu0  ;;  %v2190_v2 = vpop.f32.mrb[28].mxu1 }
 0x153   : > { %v562_v3 = vpop.f32.mrb[29].mxu0  ;;  %v802_v4 = vpop.f32.mrb[29].mxu1  ;;  %v561_v57 = vadd.f32 %v2199_v7, %v2188_v1 }
 0x156   : > { %v2192_v5 = vpop.f32.mrb[30].mxu0  ;;  %v2194_v6 = vpop.f32.mrb[30].mxu1 }
 0x157   : > { %v567_v8 = vpop.f32.mrb[31].mxu0  ;;  %v807_v11 = vpop.f32.mrb[31].mxu1  ;;  %v566_v61 = vadd.f32 %v2199_v7, %v2192_v5 }
 0x15a   : > { %v2205_v16 = vpop.f32.mrb[32].mxu0  ;;  %v1505_v19 = vpop.f32.mrb[32].mxu1 }
 0x15b   : > { %v881_v20 = vadd.f32 %v1505_v19, %v496_v12  ;;  %v572_v23 = vpop.f32.mrb[33].mxu0  ;;  %v875_v24 = vpop.f32.mrb[33].mxu1  ;;  %v571_v1 = vadd.f32 %v2199_v7, %v2205_v16 }
 0x15c   : > { %v876_v27 = vadd.f32 %v875_v24, %v491_v15 }
 0x15d   : > { %v1195_v28 = vmax.f32 %v881_v20, 0.0 }
 0x15e   : > { %v1194_v31 = vmax.f32 %v876_v27, 0.0  ;;  %v2216_v32 = vpop.f32.mrb[34].mxu0  ;;  %v1508_v35 = vpop.f32.mrb[34].mxu1 }
 0x15f   : > { %1260 = vst.msk [vmem:[%s2210_s22 + $0x8] sm:$0xff] %vm1258_vm0, %v1195_v28  ;;  %v891_v36 = vadd.f32 %v1508_v35, %v506_v13  ;;  %v577_v39 = vpop.f32.mrb[35].mxu0  ;;  %v885_v40 = vpop.f32.mrb[35].mxu1  ;;  %v576_v5 = vadd.f32 %v2199_v7, %v2216_v32 }
 0x160   : > { %1259 = vst.msk [vmem:[%s2210_s22] sm:$0xff] %vm1258_vm0, %v1194_v31  ;;  %v886_v43 = vadd.f32 %v885_v40, %v501_v9 }
 0x161   : > { %v1197_v44 = vmax.f32 %v891_v36, 0.0 }
 0x162   : > { %v1196_v47 = vmax.f32 %v886_v43, 0.0  ;;  %v2226_v48 = vpop.f32.mrb[36].mxu0  ;;  %v1511_v51 = vpop.f32.mrb[36].mxu1 }
 0x163   : > { %1262 = vst.msk [vmem:[%s2210_s22 + $0x18] sm:$0xff] %vm1258_vm0, %v1197_v44  ;;  %v901_v52 = vadd.f32 %v1511_v51, %v516_v21  ;;  %v582_v55 = vpop.f32.mrb[37].mxu0  ;;  %v895_v56 = vpop.f32.mrb[37].mxu1  ;;  %v581_v16 = vadd.f32 %v2199_v7, %v2226_v48 }
 0x164   : > { %1261 = vst.msk [vmem:[%s2210_s22 + $0x10] sm:$0xff] %vm1258_vm0, %v1196_v47  ;;  %v896_v59 = vadd.f32 %v895_v56, %v511_v17 }
 0x165   : > { %v1199_v60 = vmax.f32 %v901_v52, 0.0 }
 0x166   : > { %v1198_v63 = vmax.f32 %v896_v59, 0.0  ;;  %v2236_v0 = vpop.f32.mrb[38].mxu0  ;;  %v1514_v3 = vpop.f32.mrb[38].mxu1 }
 0x167   : > { %1264 = vst.msk [vmem:[%s2210_s22 + $0x28] sm:$0xff] %vm1258_vm0, %v1199_v60  ;;  %v911_v4 = vadd.f32 %v1514_v3, %v526_v29  ;;  %v587_v8 = vpop.f32.mrb[39].mxu0  ;;  %v905_v11 = vpop.f32.mrb[39].mxu1  ;;  %v586_v32 = vadd.f32 %v2199_v7, %v2236_v0 }
 0x168   : > { %1263 = vst.msk [vmem:[%s2210_s22 + $0x20] sm:$0xff] %vm1258_vm0, %v1198_v63  ;;  %v906_v12 = vadd.f32 %v905_v11, %v521_v25 }
 0x169   : > { %v1201_v15 = vmax.f32 %v911_v4, 0.0 }
 0x16a   : > { %v1200_v19 = vmax.f32 %v906_v12, 0.0  ;;  %v2246_v20 = vpop.f32.mrb[40].mxu0  ;;  %v1517_v23 = vpop.f32.mrb[40].mxu1 }
 0x16b   : > { %1266 = vst.msk [vmem:[%s2210_s22 + $0x38] sm:$0xff] %vm1258_vm0, %v1201_v15  ;;  %v921_v24 = vadd.f32 %v1517_v23, %v536_v37  ;;  %v592_v27 = vpop.f32.mrb[41].mxu0  ;;  %v915_v13 = vpop.f32.mrb[41].mxu1 }
 0x16c   : > { %1265 = vst.msk [vmem:[%s2210_s22 + $0x30] sm:$0xff] %vm1258_vm0, %v1200_v19  ;;  %v916_v28 = vadd.f32 %v915_v13, %v531_v33 }
 0x16d   : > { %v1203_v9 = vmax.f32 %v921_v24, 0.0 }
 0x16e   : > { %v1202_v31 = vmax.f32 %v916_v28, 0.0  ;;  %v595_v35 = vpop.f32.mrb[42].mxu0  ;;  %v1520_v36 = vpop.f32.mrb[42].mxu1 }
 0x16f   : > { %1268 = vst.msk [vmem:[%s2210_s22 + $0x48] sm:$0xff] %vm1258_vm0, %v1203_v9  ;;  %v931_v39 = vadd.f32 %v1520_v36, %v546_v45  ;;  %v597_v40 = vpop.f32.mrb[43].mxu0  ;;  %v925_v43 = vpop.f32.mrb[43].mxu1 }
 0x170   : > { %1267 = vst.msk [vmem:[%s2210_s22 + $0x40] sm:$0xff] %vm1258_vm0, %v1202_v31  ;;  %v926_v21 = vadd.f32 %v925_v43, %v541_v41  ;;  %v596_v40 = vadd.f32 %v2199_v7, %v595_v35  ;;  %v591_v43 = vadd.f32 %v2199_v7, %v2246_v20 }
 0x171   : > { %v1205_v44 = vmax.f32 %v931_v39, 0.0 }
 0x172   : > { %v1204_v17 = vmax.f32 %v926_v21, 0.0  ;;  %v600_v47 = vpop.f32.mrb[44].mxu0  ;;  %v1523_v51 = vpop.f32.mrb[44].mxu1 }
 0x173   : > { %1270 = vst.msk [vmem:[%s2210_s22 + $0x58] sm:$0xff] %vm1258_vm0, %v1205_v44  ;;  %v941_v52 = vadd.f32 %v1523_v51, %v556_v53  ;;  %v602_v55 = vpop.f32.mrb[45].mxu0  ;;  %v935_v56 = vpop.f32.mrb[45].mxu1 }
 0x174   : > { %1269 = vst.msk [vmem:[%s2210_s22 + $0x50] sm:$0xff] %vm1258_vm0, %v1204_v17  ;;  %v936_v59 = vadd.f32 %v935_v56, %v551_v49  ;;  %v601_v55 = vadd.f32 %v2199_v7, %v600_v47 }
 0x175   : > { %v1207_v29 = vmax.f32 %v941_v52, 0.0 }
 0x176   : > { %v1206_v60 = vmax.f32 %v936_v59, 0.0  ;;  %v605_v25 = vpop.f32.mrb[46].mxu0  ;;  %v1526_v63 = vpop.f32.mrb[46].mxu1 }
 0x177   : > { %1272 = vst.msk [vmem:[%s2210_s22 + $0x68] sm:$0xff] %vm1258_vm0, %v1207_v29  ;;  %v951_v3 = vadd.f32 %v1526_v63, %v566_v61  ;;  %v607_v4 = vpop.f32.mrb[47].mxu0  ;;  %v945_v8 = vpop.f32.mrb[47].mxu1  ;;  %v606_v52 = vadd.f32 %v2199_v7, %v605_v25 }
 0x178   : > { %1271 = vst.msk [vmem:[%s2210_s22 + $0x60] sm:$0xff] %vm1258_vm0, %v1206_v60  ;;  %v946_v11 = vadd.f32 %v945_v8, %v561_v57 }
 0x179   : > { %v1209_v12 = vmax.f32 %v951_v3, 0.0 }
 0x17a   : > { %v1208_v37 = vmax.f32 %v946_v11, 0.0  ;;  %v610_v15 = vpop.f32.mrb[48].mxu0  ;;  %v1529_v33 = vpop.f32.mrb[48].mxu1 }
 0x17b   : > { %1274 = vst.msk [vmem:[%s2210_s22 + $0x78] sm:$0xff] %vm1258_vm0, %v1209_v12  ;;  %v961_v19 = vadd.f32 %v1529_v33, %v576_v5  ;;  %v612_v23 = vpop.f32.mrb[49].mxu0  ;;  %v955_v24 = vpop.f32.mrb[49].mxu1  ;;  %v611_v25 = vadd.f32 %v2199_v7, %v610_v15 }
 0x17c   : > { %1273 = vst.msk [vmem:[%s2210_s22 + $0x70] sm:$0xff] %vm1258_vm0, %v1208_v37  ;;  %v956_v27 = vadd.f32 %v955_v24, %v571_v1 }
 0x17d   : > { %v1211_v13 = vmax.f32 %v961_v19, 0.0 }
 0x17e   : > { %v1210_v28 = vmax.f32 %v956_v27, 0.0  ;;  %v615_v45 = vpop.f32.mrb[50].mxu0  ;;  %v1532_v9 = vpop.f32.mrb[50].mxu1 }
 0x17f   : > { %1276 = vst.msk [vmem:[%s2210_s22 + $0x88] sm:$0xff] %vm1258_vm0, %v1211_v13  ;;  %v971_v41 = vadd.f32 %v1532_v9, %v586_v32  ;;  %v617_v31 = vpop.f32.mrb[51].mxu0  ;;  %v965_v36 = vpop.f32.mrb[51].mxu1  ;;  %v616_v63 = vadd.f32 %v2199_v7, %v615_v45 }
 0x180   : > { %1275 = vst.msk [vmem:[%s2210_s22 + $0x80] sm:$0xff] %vm1258_vm0, %v1210_v28  ;;  %v966_v39 = vadd.f32 %v965_v36, %v581_v16 }
 0x181   : > { %v1213_v0 = vmax.f32 %v971_v41, 0.0 }
 0x182   : > { %v1212_v48 = vmax.f32 %v966_v39, 0.0  ;;  %v620_v21 = vpop.f32.mrb[52].mxu0  ;;  %v1535_v53 = vpop.f32.mrb[52].mxu1 }
 0x183   : > { %1278 = vst.msk [vmem:[%s2210_s22 + $0x98] sm:$0xff] %vm1258_vm0, %v1213_v0  ;;  %v981_v44 = vadd.f32 %v1535_v53, %v596_v40  ;;  %v622_v49 = vpop.f32.mrb[53].mxu0  ;;  %v975_v17 = vpop.f32.mrb[53].mxu1  ;;  %v621_v19 = vadd.f32 %v2199_v7, %v620_v21 }
 0x184   : > { %1277 = vst.msk [vmem:[%s2210_s22 + $0x90] sm:$0xff] %vm1258_vm0, %v1212_v48  ;;  %v976_v51 = vadd.f32 %v975_v17, %v591_v43 }
 0x185   : > { %v1215_v35 = vmax.f32 %v981_v44, 0.0 }
 0x186   : > { %v1214_v20 = vmax.f32 %v976_v51, 0.0  ;;  %v625_v56 = vpop.f32.mrb[54].mxu0  ;;  %v1538_v59 = vpop.f32.mrb[54].mxu1 }
 0x187   : > { %1280 = vst.msk [vmem:[%s2210_s22 + $0xa8] sm:$0xff] %vm1258_vm0, %v1215_v35  ;;  %v991_v61 = vadd.f32 %v1538_v59, %v606_v52  ;;  %v627_v29 = vpop.f32.mrb[55].mxu0  ;;  %v985_v57 = vpop.f32.mrb[55].mxu1  ;;  %v626_v37 = vadd.f32 %v2199_v7, %v625_v56 }
 0x188   : > { %1279 = vst.msk [vmem:[%s2210_s22 + $0xa0] sm:$0xff] %vm1258_vm0, %v1214_v20  ;;  %v986_v60 = vadd.f32 %v985_v57, %v601_v55 }
 0x189   : > { %v1217_v3 = vmax.f32 %v991_v61, 0.0 }
 0x18a   : > { %v1216_v47 = vmax.f32 %v986_v60, 0.0  ;;  %v630_v4 = vpop.f32.mrb[56].mxu0  ;;  %v1541_v8 = vpop.f32.mrb[56].mxu1 }
 0x18b   : > { %1282 = vst.msk [vmem:[%s2210_s22 + $0xb8] sm:$0xff] %vm1258_vm0, %v1217_v3  ;;  %v1001_v11 = vadd.f32 %v1541_v8, %v616_v63  ;;  %v632_v5 = vpop.f32.mrb[57].mxu0  ;;  %v995_v12 = vpop.f32.mrb[57].mxu1  ;;  %v631_v9 = vadd.f32 %v2199_v7, %v630_v4 }
 0x18c   : > { %1281 = vst.msk [vmem:[%s2210_s22 + $0xb0] sm:$0xff] %vm1258_vm0, %v1216_v47  ;;  %v996_v1 = vadd.f32 %v995_v12, %v611_v25 }
 0x18d   : > { %v1219_v33 = vmax.f32 %v1001_v11, 0.0 }
 0x18e   : > { %v1218_v15 = vmax.f32 %v996_v1, 0.0  ;;  %v635_v23 = vpop.f32.mrb[58].mxu0  ;;  %v1544_v24 = vpop.f32.mrb[58].mxu1 }
 0x18f   : > { %1284 = vst.msk [vmem:[%s2210_s22 + $0xc8] sm:$0xff] %vm1258_vm0, %v1219_v33  ;;  %v1011_v27 = vadd.f32 %v1544_v24, %v626_v37  ;;  %v637_v32 = vpop.f32.mrb[59].mxu0  ;;  %v1005_v13 = vpop.f32.mrb[59].mxu1  ;;  %v636_v28 = vadd.f32 %v2199_v7, %v635_v23 }
 0x190   : > { %1283 = vst.msk [vmem:[%s2210_s22 + $0xc0] sm:$0xff] %vm1258_vm0, %v1218_v15  ;;  %v1006_v16 = vadd.f32 %v1005_v13, %v621_v19 }
 0x191   : > { %v1221_v45 = vmax.f32 %v1011_v27, 0.0 }
 0x192   : > { %v1220_v41 = vmax.f32 %v1006_v16, 0.0  ;;  %v640_v31 = vpop.f32.mrb[60].mxu0  ;;  %v1547_v36 = vpop.f32.mrb[60].mxu1 }
 0x193   : > { %1286 = vst.msk [vmem:[%s2210_s22 + $0xd8] sm:$0xff] %vm1258_vm0, %v1221_v45  ;;  %v1021_v39 = vadd.f32 %v1547_v36, %v636_v28  ;;  %v642_v40 = vpop.f32.mrb[61].mxu0  ;;  %v1015_v0 = vpop.f32.mrb[61].mxu1  ;;  %v641_v21 = vadd.f32 %v2199_v7, %v640_v31 }
 0x194   : > { %1285 = vst.msk [vmem:[%s2210_s22 + $0xd0] sm:$0xff] %vm1258_vm0, %v1220_v41  ;;  %v1016_v43 = vadd.f32 %v1015_v0, %v631_v9 }
 0x195   : > { %v1223_v48 = vmax.f32 %v1021_v39, 0.0 }
 0x196   : > { %v1222_v53 = vmax.f32 %v1016_v43, 0.0  ;;  %v645_v44 = vpop.f32.mrb[62].mxu0  ;;  %v1550_v49 = vpop.f32.mrb[62].mxu1 }
 0x197   : > { %1288 = vst.msk [vmem:[%s2210_s22 + $0xe8] sm:$0xff] %vm1258_vm0, %v1223_v48  ;;  %v646_v17 = vadd.f32 %v2199_v7, %v645_v44  ;;  %v647_v51 = vpop.f32.mrb[63].mxu0  ;;  %v1025_v52 = vpop.f32.mrb[63].mxu1 }
 0x198   : > { %1287 = vst.msk [vmem:[%s2210_s22 + $0xe0] sm:$0xff] %vm1258_vm0, %v1222_v53  ;;  %v1026_v35 = vadd.f32 %v1025_v52, %v641_v21 }
 0x199   : > { %v1031_v55 = vadd.f32 %v1550_v49, %v646_v17 }
 0x19a   : > { %v1224_v20 = vmax.f32 %v1026_v35, 0.0  ;;  %v650_v56 = vpop.f32.mrb[64].mxu0  ;;  %v1553_v59 = vpop.f32.mrb[64].mxu1 }
 0x19b   : > { %v1225_v61 = vmax.f32 %v1031_v55, 0.0  ;;  %v651_v29 = vadd.f32 %v2199_v7, %v650_v56  ;;  %v652_v57 = vpop.f32.mrb[65].mxu0  ;;  %v1035_v60 = vpop.f32.mrb[65].mxu1 }
 0x19c   : > { %1289 = vst.msk [vmem:[%s2210_s22 + $0xf0] sm:$0xff] %vm1258_vm0, %v1224_v20 }
 0x19d   : > { %1290 = vst.msk [vmem:[%s2210_s22 + $0xf8] sm:$0xff] %vm1258_vm0, %v1225_v61  ;;  %v1036_v63 = vadd.f32 %v1035_v60, %v651_v29 }
 0x19e   : > { %v655_v3 = vpop.f32.mrb[66].mxu0  ;;  %v1556_v25 = vpop.f32.mrb[66].mxu1 }
 0x19f   : > { %v1226_v47 = vmax.f32 %v1036_v63, 0.0  ;;  %v656_v4 = vadd.f32 %v2199_v7, %v655_v3  ;;  %v657_v8 = vpop.f32.mrb[67].mxu0  ;;  %v1045_v11 = vpop.f32.mrb[67].mxu1 }
 0x1a1   : > { %1291 = vst.msk [vmem:[%s2210_s22 + $0x100] sm:$0xff] %vm1258_vm0, %v1226_v47  ;;  %v1041_v5 = vadd.f32 %v1553_v59, %v656_v4  ;;  %v731_v4 = vadd.f32 %v2199_v7, %v2136_v10  ;;  %v741_v10 = vadd.f32 %v2199_v7, %v2142_v18 }
 0x1a2   : > { %v660_v12 = vpop.f32.mrb[68].mxu0  ;;  %v1559_v1 = vpop.f32.mrb[68].mxu1 }
 0x1a3   : > { %v1227_v37 = vmax.f32 %v1041_v5, 0.0  ;;  %v661_v33 = vadd.f32 %v2199_v7, %v660_v12  ;;  %v662_v19 = vpop.f32.mrb[69].mxu0  ;;  %v1055_v15 = vpop.f32.mrb[69].mxu1 }
 0x1a5   : > { %1292 = vst.msk [vmem:[%s2210_s22 + $0x108] sm:$0xff] %vm1258_vm0, %v1227_v37  ;;  %v1046_v23 = vadd.f32 %v1045_v11, %v661_v33 }
 0x1a6   : > { %v665_v24 = vpop.f32.mrb[70].mxu0  ;;  %v1562_v27 = vpop.f32.mrb[70].mxu1 }
 0x1a7   : > { %v1228_v32 = vmax.f32 %v1046_v23, 0.0  ;;  %v666_v13 = vadd.f32 %v2199_v7, %v665_v24  ;;  %v667_v16 = vpop.f32.mrb[71].mxu0  ;;  %v1065_v28 = vpop.f32.mrb[71].mxu1 }
 0x1a9   : > { %1293 = vst.msk [vmem:[%s2210_s22 + $0x110] sm:$0xff] %vm1258_vm0, %v1228_v32  ;;  %v1051_v45 = vadd.f32 %v1556_v25, %v666_v13  ;;  %v736_v25 = vadd.f32 %v2199_v7, %v2138_v14  ;;  %v746_v14 = vadd.f32 %v2199_v7, %v2146_v22 }
 0x1aa   : > { %v670_v9 = vpop.f32.mrb[72].mxu0  ;;  %v1565_v41 = vpop.f32.mrb[72].mxu1 }
 0x1ab   : > { %v1229_v31 = vmax.f32 %v1051_v45, 0.0  ;;  %v671_v36 = vadd.f32 %v2199_v7, %v670_v9  ;;  %v672_v39 = vpop.f32.mrb[73].mxu0  ;;  %v1075_v40 = vpop.f32.mrb[73].mxu1 }
 0x1ac   : > { %v751_v39 = vadd.f32 %v2199_v7, %v2150_v26 }
 0x1ad   : > { %1294 = vst.msk [vmem:[%s2210_s22 + $0x118] sm:$0xff] %vm1258_vm0, %v1229_v31  ;;  %v1056_v0 = vadd.f32 %v1055_v15, %v671_v36  ;;  %v756_v31 = vadd.f32 %v2199_v7, %v2154_v30 }
 0x1ae   : > { %v675_v43 = vpop.f32.mrb[74].mxu0  ;;  %v2346_v48 = vpop.f32.mrb[74].mxu1 }
 0x1af   : > { %v1230_v21 = vmax.f32 %v1056_v0, 0.0  ;;  %v676_v53 = vadd.f32 %v2199_v7, %v675_v43  ;;  %v677_v44 = vpop.f32.mrb[75].mxu0  ;;  %v2349_v49 = vpop.f32.mrb[75].mxu1 }
 0x1b1   : > { %1295 = vst.msk [vmem:[%s2210_s22 + $0x120] sm:$0xff] %vm1258_vm0, %v1230_v21  ;;  %v1061_v17 = vadd.f32 %v1559_v1, %v676_v53 }
 0x1b2   : > { %v680_v51 = vpop.f32.mrb[76].mxu0  ;;  %v2353_v52 = vpop.f32.mrb[76].mxu1 }
 0x1b3   : > { %v1231_v35 = vmax.f32 %v1061_v17, 0.0  ;;  %v681_v55 = vadd.f32 %v2199_v7, %v680_v51  ;;  %v682_v20 = vpop.f32.mrb[77].mxu0  ;;  %v2356_v56 = vpop.f32.mrb[77].mxu1  ;;  %v766_v51 = vadd.f32 %v2199_v7, %v2162_v38 }
 0x1b5   : > { %1296 = vst.msk [vmem:[%s2210_s22 + $0x128] sm:$0xff] %vm1258_vm0, %v1231_v35  ;;  %v1066_v59 = vadd.f32 %v1065_v28, %v681_v55  ;;  %v761_v55 = vadd.f32 %v2199_v7, %v2158_v34 }
 0x1b6   : > { %v685_v61 = vpop.f32.mrb[78].mxu0  ;;  %v2360_v29 = vpop.f32.mrb[78].mxu1 }
 0x1b7   : > { %v1232_v57 = vmax.f32 %v1066_v59, 0.0  ;;  %v686_v60 = vadd.f32 %v2199_v7, %v685_v61  ;;  %v687_v63 = vpop.f32.mrb[79].mxu0  ;;  %v2363_v3 = vpop.f32.mrb[79].mxu1 }
 0x1b9   : > { %1297 = vst.msk [vmem:[%s2210_s22 + $0x130] sm:$0xff] %vm1258_vm0, %v1232_v57  ;;  %v1071_v47 = vadd.f32 %v1562_v27, %v686_v60 }
 0x1ba   : > { %v690_v8 = vpop.f32.mrb[80].mxu0  ;;  %v1577_v11 = vpop.f32.mrb[80].mxu1 }
 0x1bb   : > { %v1233_v5 = vmax.f32 %v1071_v47, 0.0  ;;  %v691_v12 = vadd.f32 %v2199_v7, %v690_v8  ;;  %v1121_v1 = vadd.f32 %v1577_v11, %v736_v25  ;;  %v692_v37 = vpop.f32.mrb[81].mxu0  ;;  %v1115_v33 = vpop.f32.mrb[81].mxu1  ;;  %v776_v47 = vadd.f32 %v2199_v7, %v2170_v46 }
 0x1bc   : > { %v1116_v19 = vadd.f32 %v1115_v33, %v731_v4  ;;  %v771_v8 = vadd.f32 %v2199_v7, %v2166_v42 }
 0x1bd   : > { %1298 = vst.msk [vmem:[%s2210_s22 + $0x138] sm:$0xff] %vm1258_vm0, %v1233_v5  ;;  %v1076_v15 = vadd.f32 %v1075_v40, %v691_v12  ;;  %v1243_v23 = vmax.f32 %v1121_v1, 0.0 }
 0x1be   : > { %v1242_v24 = vmax.f32 %v1116_v19, 0.0  ;;  %v695_v27 = vpop.f32.mrb[82].mxu0  ;;  %v1580_v32 = vpop.f32.mrb[82].mxu1 }
 0x1bf   : > { %v1234_v13 = vmax.f32 %v1076_v15, 0.0  ;;  %1308 = vst.msk [vmem:[%s2210_s22 + $0x188] sm:$0xff] %vm1258_vm0, %v1243_v23  ;;  %v696_v16 = vadd.f32 %v2199_v7, %v695_v27  ;;  %v1131_v28 = vadd.f32 %v1580_v32, %v746_v14  ;;  %v697_v45 = vpop.f32.mrb[83].mxu0  ;;  %v1125_v22 = vpop.f32.mrb[83].mxu1  ;;  %v786_v14 = vadd.f32 %v2199_v7, %v2178_v54 }
 0x1c0   : > { %1307 = vst.msk [vmem:[%s2210_s22 + $0x180] sm:$0xff] %vm1258_vm0, %v1242_v24  ;;  %v1126_v9 = vadd.f32 %v1125_v22, %v741_v10  ;;  %v781_v23 = vadd.f32 %v2199_v7, %v2174_v50  ;;  %v796_v45 = vadd.f32 %v2199_v7, %v2186_v62 }
 0x1c1   : > { %1299 = vst.msk [vmem:[%s2210_s22 + $0x140] sm:$0xff] %vm1258_vm0, %v1234_v13  ;;  %v1081_v18 = vadd.f32 %v1565_v41, %v696_v16  ;;  %v1245_v36 = vmax.f32 %v1131_v28, 0.0 }
 0x1c2   : > { %v1244_v40 = vmax.f32 %v1126_v9, 0.0  ;;  %v700_v0 = vpop.f32.mrb[84].mxu0  ;;  %v1583_v43 = vpop.f32.mrb[84].mxu1  ;;  %v791_v9 = vadd.f32 %v2199_v7, %v2182_v58 }
 0x1c3   : > { %v1235_v21 = vmax.f32 %v1081_v18, 0.0  ;;  %1310 = vst.msk [vmem:[%s2210_s22 + $0x198] sm:$0xff] %vm1258_vm0, %v1245_v36  ;;  %v701_v53 = vadd.f32 %v2199_v7, %v700_v0  ;;  %v1141_v44 = vadd.f32 %v1583_v43, %v756_v31  ;;  %v702_v17 = vpop.f32.mrb[85].mxu0  ;;  %v1135_v30 = vpop.f32.mrb[85].mxu1 }
 0x1c4   : > { %1309 = vst.msk [vmem:[%s2210_s22 + $0x190] sm:$0xff] %vm1258_vm0, %v1244_v40  ;;  %v1136_v41 = vadd.f32 %v1135_v30, %v751_v39 }
 0x1c5   : > { %1300 = vst.msk [vmem:[%s2210_s22 + $0x148] sm:$0xff] %vm1258_vm0, %v1235_v21  ;;  %v1086_v26 = vadd.f32 %v2349_v49, %v701_v53  ;;  %v1247_v35 = vmax.f32 %v1141_v44, 0.0  ;;  %v806_v21 = vadd.f32 %v2199_v7, %v2194_v6  ;;  %v801_v44 = vadd.f32 %v2199_v7, %v2190_v2 }
 0x1c6   : > { %v1246_v20 = vmax.f32 %v1136_v41, 0.0  ;;  %v705_v59 = vpop.f32.mrb[86].mxu0  ;;  %v1586_v61 = vpop.f32.mrb[86].mxu1 }
 0x1c7   : > { %v1236_v57 = vmax.f32 %v1086_v26, 0.0  ;;  %1312 = vst.msk [vmem:[%s2210_s22 + $0x1a8] sm:$0xff] %vm1258_vm0, %v1247_v35  ;;  %v706_v60 = vadd.f32 %v2199_v7, %v705_v59  ;;  %v1151_v63 = vadd.f32 %v1586_v61, %v766_v51  ;;  %v707_v38 = vpop.f32.mrb[87].mxu0  ;;  %v1145_v25 = vpop.f32.mrb[87].mxu1 }
 0x1c8   : > { %1311 = vst.msk [vmem:[%s2210_s22 + $0x1a0] sm:$0xff] %vm1258_vm0, %v1246_v20  ;;  %v1146_v49 = vadd.f32 %v1145_v25, %v761_v55 }
 0x1c9   : > { %1301 = vst.msk [vmem:[%s2210_s22 + $0x150] sm:$0xff] %vm1258_vm0, %v1236_v57  ;;  %v1091_v34 = vadd.f32 %v2346_v48, %v706_v60  ;;  %v1249_v4 = vmax.f32 %v1151_v63, 0.0 }
 0x1ca   : > { %v1248_v11 = vmax.f32 %v1146_v49, 0.0  ;;  %v710_v5 = vpop.f32.mrb[88].mxu0  ;;  %v1589_v12 = vpop.f32.mrb[88].mxu1 }
 0x1cb   : > { %v1237_v1 = vmax.f32 %v1091_v34, 0.0  ;;  %1314 = vst.msk [vmem:[%s2210_s22 + $0x1b8] sm:$0xff] %vm1258_vm0, %v1249_v4  ;;  %v711_v37 = vadd.f32 %v2199_v7, %v710_v5  ;;  %v1161_v33 = vadd.f32 %v1589_v12, %v776_v47  ;;  %v712_v46 = vpop.f32.mrb[89].mxu0  ;;  %v1155_v19 = vpop.f32.mrb[89].mxu1 }
 0x1cc   : > { %1313 = vst.msk [vmem:[%s2210_s22 + $0x1b0] sm:$0xff] %vm1258_vm0, %v1248_v11  ;;  %v1156_v48 = vadd.f32 %v1155_v19, %v771_v8 }
 0x1cd   : > { %1302 = vst.msk [vmem:[%s2210_s22 + $0x158] sm:$0xff] %vm1258_vm0, %v1237_v1  ;;  %v1096_v42 = vadd.f32 %v2356_v56, %v711_v37  ;;  %v1251_v15 = vmax.f32 %v1161_v33, 0.0 }
 0x1ce   : > { %v1250_v10 = vmax.f32 %v1156_v48, 0.0  ;;  %v715_v24 = vpop.f32.mrb[90].mxu0  ;;  %v1592_v27 = vpop.f32.mrb[90].mxu1 }
 0x1cf   : > { %v1238_v32 = vmax.f32 %v1096_v42, 0.0  ;;  %1316 = vst.msk [vmem:[%s2210_s22 + $0x1c8] sm:$0xff] %vm1258_vm0, %v1251_v15  ;;  %v716_v13 = vadd.f32 %v2199_v7, %v715_v24  ;;  %v1171_v16 = vadd.f32 %v1592_v27, %v786_v14  ;;  %v717_v54 = vpop.f32.mrb[91].mxu0  ;;  %v1165_v28 = vpop.f32.mrb[91].mxu1 }
 0x1d0   : > { %1315 = vst.msk [vmem:[%s2210_s22 + $0x1c0] sm:$0xff] %vm1258_vm0, %v1250_v10  ;;  %v1166_v56 = vadd.f32 %v1165_v28, %v781_v23 }
 0x1d1   : > { %1303 = vst.msk [vmem:[%s2210_s22 + $0x160] sm:$0xff] %vm1258_vm0, %v1238_v32  ;;  %v1101_v50 = vadd.f32 %v2353_v52, %v716_v13  ;;  %v1253_v22 = vmax.f32 %v1171_v16, 0.0 }
 0x1d2   : > { %v1252_v31 = vmax.f32 %v1166_v56, 0.0  ;;  %v720_v18 = vpop.f32.mrb[92].mxu0  ;;  %v1595_v36 = vpop.f32.mrb[92].mxu1 }
 0x1d3   : > { %v1239_v39 = vmax.f32 %v1101_v50, 0.0  ;;  %1318 = vst.msk [vmem:[%s2210_s22 + $0x1d8] sm:$0xff] %vm1258_vm0, %v1253_v22  ;;  %v721_v40 = vadd.f32 %v2199_v7, %v720_v18  ;;  %v1181_v0 = vadd.f32 %v1595_v36, %v796_v45  ;;  %v722_v62 = vpop.f32.mrb[93].mxu0  ;;  %v1175_v43 = vpop.f32.mrb[93].mxu1 }
 0x1d4   : > { %1317 = vst.msk [vmem:[%s2210_s22 + $0x1d0] sm:$0xff] %vm1258_vm0, %v1252_v31  ;;  %v1176_v52 = vadd.f32 %v1175_v43, %v791_v9 }
 0x1d5   : > { %1304 = vst.msk [vmem:[%s2210_s22 + $0x168] sm:$0xff] %vm1258_vm0, %v1239_v39  ;;  %v1106_v58 = vadd.f32 %v2363_v3, %v721_v40  ;;  %v1255_v53 = vmax.f32 %v1181_v0, 0.0 }
 0x1d6   : > { %v1254_v17 = vmax.f32 %v1176_v52, 0.0  ;;  %v725_v30 = vpop.f32.mrb[94].mxu0  ;;  %v1598_v41 = vpop.f32.mrb[94].mxu1 }
 0x1d7   : > { %v1240_v51 = vmax.f32 %v1106_v58, 0.0  ;;  %1320 = vst.msk [vmem:[%s2210_s22 + $0x1e8] sm:$0xff] %vm1258_vm0, %v1255_v53  ;;  %v726_v6 = vadd.f32 %v2199_v7, %v725_v30  ;;  %v1191_v26 = vadd.f32 %v1598_v41, %v806_v21  ;;  %v727_v35 = vpop.f32.mrb[95].mxu0  ;;  %v1185_v55 = vpop.f32.mrb[95].mxu1 }
 0x1d8   : > { %1319 = vst.msk [vmem:[%s2210_s22 + $0x1e0] sm:$0xff] %vm1258_vm0, %v1254_v17  ;;  %v1186_v3 = vadd.f32 %v1185_v55, %v801_v44 }
 0x1d9   : > { %1305 = vst.msk [vmem:[%s2210_s22 + $0x170] sm:$0xff] %vm1258_vm0, %v1240_v51  ;;  %v1111_v2 = vadd.f32 %v2360_v29, %v726_v6  ;;  %v1257_v20 = vmax.f32 %v1191_v26, 0.0 }
 0x1da   : > { %v1256_v59 = vmax.f32 %v1186_v3, 0.0 }
 0x1db   : > { %v1241_v61 = vmax.f32 %v1111_v2, 0.0  ;;  %1322 = vst.msk [vmem:[%s2210_s22 + $0x1f8] sm:$0xff] %vm1258_vm0, %v1257_v20 }
 0x1dc   : > { %1321 = vst.msk [vmem:[%s2210_s22 + $0x1f0] sm:$0xff] %vm1258_vm0, %v1256_v59 }
 0x1dd   : > { %1306 = vst.msk [vmem:[%s2210_s22 + $0x178] sm:$0xff] %vm1258_vm0, %v1241_v61 }
 0x1de PF: > { %s13_s12 = sadd.s32 1, %s1727_s12  }
 0x1df   : > { %p10_p4 = scmp.ge.s32.totalorder %s13_s12, 5  }
 0x1e1   :  { %12 = sbr.rel (!%p10_p4) target bundleno = 1 (0x1), region = 62 }

// kernel: myresnet_forward.11
= control target key start
LH: loop header
LB: loop body
LE: loop exit
PB: predicated region body
PF: predicated region fallthrough
CT: control target
= control target key end

     0   :  { %s1946_s15 = smov 0   ;;  %s2743_s0 = inlined_call_operand.vmem [shape: f32[1536,384], index: 0, kind: input, shape index: {}]   ;;  %s2744_s1 = inlined_call_operand.vmem [shape: f32[384,32], index: 1, kind: input, shape index: {}]   ;;  %s2745_s2 = inlined_call_operand.vmem [shape: f32[1,32], index: 2, kind: input, shape index: {}]   ;;  %s2746_s3 = inlined_call_operand.vmem [shape: f32[1536,32], index: 3, kind: input, shape index: {}]   ;;  %s2747_s4 = inlined_call_operand.vmem [shape: f32[1536,32], index: 4, kind: output, shape index: {}]  }
   0x1 LB: > { %s1568_s16 = sadd.s32 4294967295, %s1918_s15   ;;  %p1572_p0 = scmp.ge.s32.totalorder %s1918_s15, 1  ;;  %s1918_s15 = sphi %s1946_s15, %s14_s15  }
   0x2   : > { %p175_p1 = scmp.lt.s32.totalorder %s1918_s15, 4 }
   0x4   : > { %p176_p2 = pnand %p1572_p0, %p175_p1 }
   0x5   : > { %v418_v0 = vld [vmem:[%s2744_s1] sm:$0xff] (!%p176_p2)  ;;  %v419_v1 = vld [vmem:[%s2744_s1 + $0x8] sm:$0xff] (!%p176_p2)  ;;  %v420_v2 = vld [vmem:[%s2744_s1 + $0x10] sm:$0xff] (!%p176_p2)  ;;  %s1573_s23 = sshll.u32 (!%p176_p2), %s1568_s16, 6  ;;  %v1920_v3 = vmov (!%p176_p2), 0.0|0.0   ;;  %vm1435_vm0 = vcmask (!%p176_p2), 261120  }
   0x6   : > { %179 = sbr.rel (%p176_p2) target bundleno = 480 (0x1e0), region = 36  ;;  %1790 = vmatprep.subr.bf16.mxu0 (!%p176_p2), %v1920_v3  ;;  %1870 = vmatprep.subr.bf16.mxu1 (!%p176_p2), %v1920_v3  ;;  %v1791_v4 = vpack.c.bf16 (!%p176_p2), %v419_v1, %v418_v0  ;;  %v421_v5 = vld [vmem:[%s2744_s1 + $0x18] sm:$0xff] (!%p176_p2)  ;;  %p208_p3 = scmp.lt.s32.totalorder (!%p176_p2), %s1573_s23, 191  ;;  %v422_v7 = vld [vmem:[%s2744_s1 + $0x20] sm:$0xff] (!%p176_p2)  ;;  %v423_v8 = vld [vmem:[%s2744_s1 + $0x28] sm:$0xff] (!%p176_p2) }
   0x7   : > { %v1794_v6 = vpack.c.bf16 (!%p176_p2), %v421_v5, %v420_v2  ;;  %v1797_v9 = vpack.c.bf16 (!%p176_p2), %v423_v8, %v422_v7  ;;  %v424_v10 = vld [vmem:[%s2744_s1 + $0x30] sm:$0xff] (!%p176_p2)  ;;  %v425_v11 = vld [vmem:[%s2744_s1 + $0x38] sm:$0xff] (!%p176_p2)  ;;  %v426_v15 = vld [vmem:[%s2744_s1 + $0x40] sm:$0xff] (!%p176_p2) }
   0x8   : > { %1792 = vmatpush1.bf16.msra.mxu0 (!%p176_p2), %v1791_v4  ;;  %1886 = vmatpush1.bf16.msra.mxu1 (!%p176_p2), %v1791_v4  ;;  %v1800_v13 = vpack.c.bf16 (!%p176_p2), %v425_v11, %v424_v10  ;;  %v427_v16 = vld [vmem:[%s2744_s1 + $0x48] sm:$0xff] (!%p176_p2)  ;;  %v428_v18 = vld [vmem:[%s2744_s1 + $0x50] sm:$0xff] (!%p176_p2)  ;;  %v429_v19 = vld [vmem:[%s2744_s1 + $0x58] sm:$0xff] (!%p176_p2) }
   0x9   : > { %1793 = vmatprep.subr.bf16.mxu0 (!%p176_p2), %v1920_v3  ;;  %1871 = vmatprep.subr.bf16.mxu1 (!%p176_p2), %v1920_v3  ;;  %v1803_v17 = vpack.c.bf16 (!%p176_p2), %v427_v16, %v426_v15  ;;  %v1806_v20 = vpack.c.bf16 (!%p176_p2), %v429_v19, %v428_v18  ;;  %v430_v21 = vld [vmem:[%s2744_s1 + $0x60] sm:$0xff] (!%p176_p2)  ;;  %v431_v22 = vld [vmem:[%s2744_s1 + $0x68] sm:$0xff] (!%p176_p2)  ;;  %v432_v24 = vld [vmem:[%s2744_s1 + $0x70] sm:$0xff] (!%p176_p2) }
   0xa   : > { %v1809_v23 = vpack.c.bf16 (!%p176_p2), %v431_v22, %v430_v21  ;;  %v433_v25 = vld [vmem:[%s2744_s1 + $0x78] sm:$0xff] (!%p176_p2)  ;;  %v434_v27 = vld [vmem:[%s2744_s1 + $0x80] sm:$0xff] (!%p176_p2)  ;;  %v435_v28 = vld [vmem:[%s2744_s1 + $0x88] sm:$0xff] (!%p176_p2) }
   0xb   : > { %v1812_v26 = vpack.c.bf16 (!%p176_p2), %v433_v25, %v432_v24  ;;  %v1815_v29 = vpack.c.bf16 (!%p176_p2), %v435_v28, %v434_v27  ;;  %v436_v30 = vld [vmem:[%s2744_s1 + $0x90] sm:$0xff] (!%p176_p2)  ;;  %v437_v31 = vld [vmem:[%s2744_s1 + $0x98] sm:$0xff] (!%p176_p2)  ;;  %v438_v33 = vld [vmem:[%s2744_s1 + $0xa0] sm:$0xff] (!%p176_p2) }
   0xc   : > { %1795 = vmatpush1.bf16.msra.mxu0 (!%p176_p2), %v1794_v6  ;;  %1887 = vmatpush1.bf16.msra.mxu1 (!%p176_p2), %v1794_v6  ;;  %v1818_v32 = vpack.c.bf16 (!%p176_p2), %v437_v31, %v436_v30  ;;  %v439_v34 = vld [vmem:[%s2744_s1 + $0xa8] sm:$0xff] (!%p176_p2)  ;;  %v440_v36 = vld [vmem:[%s2744_s1 + $0xb0] sm:$0xff] (!%p176_p2)  ;;  %v441_v37 = vld [vmem:[%s2744_s1 + $0xb8] sm:$0xff] (!%p176_p2) }
   0xd   : > { %s2749_s23 = smov (!%p208_p3, %s1573_s23), 191  ;;  %1796 = vmatprep.subr.bf16.mxu0 %v1920_v3  ;;  %1872 = vmatprep.subr.bf16.mxu1 %v1920_v3  ;;  %v1821_v35 = vpack.c.bf16 %v439_v34, %v438_v33  ;;  %v1824_v38 = vpack.c.bf16 %v441_v37, %v440_v36  ;;  %v442_v39 = vld [vmem:[%s2744_s1 + $0xc0] sm:$0xff]  ;;  %v443_v40 = vld [vmem:[%s2744_s1 + $0xc8] sm:$0xff]  ;;  %v444_v42 = vld [vmem:[%s2744_s1 + $0xd0] sm:$0xff] }
   0xe   : > { %s1902_s30 = smul.u32 24, %s2749_s23  ;;  %v1827_v41 = vpack.c.bf16 %v443_v40, %v442_v39  ;;  %v445_v43 = vld [vmem:[%s2744_s1 + $0xd8] sm:$0xff]  ;;  %v446_v45 = vld [vmem:[%s2744_s1 + $0xe0] sm:$0xff]  ;;  %v447_v46 = vld [vmem:[%s2744_s1 + $0xe8] sm:$0xff] }
   0xf   : > { %v1830_v44 = vpack.c.bf16 %v445_v43, %v444_v42  ;;  %v1833_v47 = vpack.c.bf16 %v447_v46, %v446_v45  ;;  %v448_v48 = vld [vmem:[%s2744_s1 + $0xf0] sm:$0xff]  ;;  %v449_v49 = vld [vmem:[%s2744_s1 + $0xf8] sm:$0xff]  ;;  %v450_v50 = vld [vmem:[%s2744_s1 + $0x100] sm:$0xff] }
  0x10   : > { %s1982_s7 = scalar_lea.vmem %s2743_s0, %s1902_s30  ;;  %1798 = vmatpush1.bf16.msra.mxu0 %v1797_v9  ;;  %1888 = vmatpush1.bf16.msra.mxu1 %v1797_v9  ;;  %v451_v51 = vld [vmem:[%s2744_s1 + $0x108] sm:$0xff]  ;;  %v1836_v52 = vpack.c.bf16 %v449_v49, %v448_v48  ;;  %v452_v54 = vld [vmem:[%s2744_s1 + $0x110] sm:$0xff]  ;;  %v453_v55 = vld [vmem:[%s2744_s1 + $0x118] sm:$0xff] }
  0x11   : > { %v227_v12 = vld [vmem:[%s1982_s7 + $0x8] sm:$0xff]  ;;  %1799 = vmatprep.subr.bf16.mxu0 %v1920_v3  ;;  %1873 = vmatprep.subr.bf16.mxu1 %v1920_v3  ;;  %v1838_v53 = vpack.c.bf16 %v451_v51, %v450_v50  ;;  %v226_v56 = vld [vmem:[%s1982_s7] sm:$0xff]  ;;  %v1842_v59 = vpack.c.bf16 %v453_v55, %v452_v54  ;;  %v229_v63 = vld [vmem:[%s1982_s7 + $0x18] sm:$0xff] }
  0x12   : > { %v371_v14 = vld [vmem:[%s1982_s7 + $0x488] sm:$0xff]  ;;  %537 = vmatprep.mubr.f32.mxu0 %v227_v12  ;;  %v370_v57 = vld [vmem:[%s1982_s7 + $0x480] sm:$0xff]  ;;  %v373_v0 = vld [vmem:[%s1982_s7 + $0x498] sm:$0xff] }
  0x13   : > { %777 = vmatprep.mubr.f32.mxu1 %v371_v14  ;;  %v230_v58 = vld [vmem:[%s1982_s7 + $0x20] sm:$0xff]  ;;  %v455_v62 = vld [vmem:[%s2744_s1 + $0x128] sm:$0xff]  ;;  %v233_v1 = vld [vmem:[%s1982_s7 + $0x38] sm:$0xff] }
  0x14   : > { %1801 = vmatpush1.bf16.msra.mxu0 %v1800_v13  ;;  %1889 = vmatpush1.bf16.msra.mxu1 %v1800_v13  ;;  %v374_v60 = vld [vmem:[%s1982_s7 + $0x4a0] sm:$0xff]  ;;  %v377_v2 = vld [vmem:[%s1982_s7 + $0x4b8] sm:$0xff]  ;;  %v456_v4 = vld [vmem:[%s2744_s1 + $0x130] sm:$0xff] }
  0x15   : > { %1802 = vmatprep.subr.bf16.mxu0 %v1920_v3  ;;  %1874 = vmatprep.subr.bf16.mxu1 %v1920_v3  ;;  %v454_v61 = vld [vmem:[%s2744_s1 + $0x120] sm:$0xff]  ;;  %v457_v5 = vld [vmem:[%s2744_s1 + $0x138] sm:$0xff]  ;;  %v232_v6 = vld [vmem:[%s1982_s7 + $0x30] sm:$0xff] }
  0x16   : > { %v376_v7 = vld [vmem:[%s1982_s7 + $0x4b0] sm:$0xff]  ;;  %v1850_v10 = vpack.c.bf16 %v457_v5, %v456_v4  ;;  %v458_v11 = vld [vmem:[%s2744_s1 + $0x140] sm:$0xff]  ;;  %v459_v12 = vld [vmem:[%s2744_s1 + $0x148] sm:$0xff] }
  0x17   : > { %v236_v8 = vld [vmem:[%s1982_s7 + $0x50] sm:$0xff]  ;;  %v235_v13 = vld [vmem:[%s1982_s7 + $0x48] sm:$0xff]  ;;  %v461_v19 = vld [vmem:[%s2744_s1 + $0x158] sm:$0xff] }
  0x18   : > { %1804 = vmatpush1.bf16.msra.mxu0 %v1803_v17  ;;  %1890 = vmatpush1.bf16.msra.mxu1 %v1803_v17  ;;  %v380_v9 = vld [vmem:[%s1982_s7 + $0x4d0] sm:$0xff]  ;;  %v379_v14 = vld [vmem:[%s1982_s7 + $0x4c8] sm:$0xff]  ;;  %v1854_v17 = vpack.c.bf16 %v459_v12, %v458_v11  ;;  %v382_v21 = vld [vmem:[%s1982_s7 + $0x4e0] sm:$0xff] }
  0x19   : > { %1805 = vmatprep.subr.bf16.mxu0 %v1920_v3  ;;  %1875 = vmatprep.subr.bf16.mxu1 %v1920_v3  ;;  %v239_v15 = vld [vmem:[%s1982_s7 + $0x68] sm:$0xff]  ;;  %v460_v18 = vld [vmem:[%s2744_s1 + $0x150] sm:$0xff]  ;;  %v242_v22 = vld [vmem:[%s1982_s7 + $0x80] sm:$0xff] }
  0x1a   : > { %v383_v16 = vld [vmem:[%s1982_s7 + $0x4e8] sm:$0xff]  ;;  %v1858_v24 = vpack.c.bf16 %v461_v19, %v460_v18  ;;  %v462_v25 = vld [vmem:[%s2744_s1 + $0x160] sm:$0xff]  ;;  %v241_v27 = vld [vmem:[%s1982_s7 + $0x78] sm:$0xff] }
  0x1b   : > { %v385_v28 = vld [vmem:[%s1982_s7 + $0x4f8] sm:$0xff]  ;;  %v244_v34 = vld [vmem:[%s1982_s7 + $0x90] sm:$0xff]  ;;  %v247_v39 = vld [vmem:[%s1982_s7 + $0xa8] sm:$0xff] }
  0x1c   : > { %1807 = vmatpush1.bf16.msra.mxu0 %v1806_v20  ;;  %1891 = vmatpush1.bf16.msra.mxu1 %v1806_v20  ;;  %v238_v20 = vld [vmem:[%s1982_s7 + $0x60] sm:$0xff]  ;;  %v389_v30 = vld [vmem:[%s1982_s7 + $0x518] sm:$0xff]  ;;  %v248_v36 = vld [vmem:[%s1982_s7 + $0xb0] sm:$0xff] }
  0x1d   : > { %1808 = vmatprep.subr.bf16.mxu0 %v1920_v3  ;;  %1876 = vmatprep.subr.bf16.mxu1 %v1920_v3  ;;  %v465_v33 = vld [vmem:[%s2744_s1 + $0x178] sm:$0xff]  ;;  %v392_v37 = vld [vmem:[%s1982_s7 + $0x530] sm:$0xff]  ;;  %v391_v40 = vld [vmem:[%s1982_s7 + $0x528] sm:$0xff] }
  0x1e   : > { %v395_v42 = vld [vmem:[%s1982_s7 + $0x548] sm:$0xff]  ;;  %v250_v43 = vld [vmem:[%s1982_s7 + $0xc0] sm:$0xff]  ;;  %v397_v48 = vld [vmem:[%s1982_s7 + $0x558] sm:$0xff] }
  0x1f   : > { %v254_v45 = vld [vmem:[%s1982_s7 + $0xe0] sm:$0xff]  ;;  %v257_v49 = vld [vmem:[%s1982_s7 + $0xf8] sm:$0xff]  ;;  %v256_v51 = vld [vmem:[%s1982_s7 + $0xf0] sm:$0xff] }
  0x20   : > { %1810 = vmatpush1.bf16.msra.mxu0 %v1809_v23  ;;  %1892 = vmatpush1.bf16.msra.mxu1 %v1809_v23  ;;  %v386_v23 = vld [vmem:[%s1982_s7 + $0x500] sm:$0xff]  ;;  %v401_v50 = vld [vmem:[%s1982_s7 + $0x578] sm:$0xff]  ;;  %v404_v54 = vld [vmem:[%s1982_s7 + $0x590] sm:$0xff] }
  0x21   : > { %1811 = vmatprep.subr.bf16.mxu0 %v1920_v3  ;;  %1877 = vmatprep.subr.bf16.mxu1 %v1920_v3  ;;  %v398_v46 = vld [vmem:[%s1982_s7 + $0x560] sm:$0xff]  ;;  %v259_v55 = vld [vmem:[%s1982_s7 + $0x108] sm:$0xff]  ;;  %v412_v4 = vld [vmem:[%s1982_s7 + $0x5d0] sm:$0xff] }
  0x22   : > { %v272_v5 = vld [vmem:[%s1982_s7 + $0x170] sm:$0xff]  ;;  %v274_v11 = vld [vmem:[%s1982_s7 + $0x180] sm:$0xff]  ;;  %v231_v12 = vld [vmem:[%s1982_s7 + $0x28] sm:$0xff] }
  0x23   : > { %v240_v18 = vld [vmem:[%s1982_s7 + $0x70] sm:$0xff] }
  0x24   : > { %1813 = vmatpush1.bf16.msra.mxu0 %v1812_v26  ;;  %1893 = vmatpush1.bf16.msra.mxu1 %v1812_v26  ;;  %v463_v26 = vld [vmem:[%s2744_s1 + $0x168] sm:$0xff]  ;;  %v280_v19 = vld [vmem:[%s1982_s7 + $0x1b0] sm:$0xff] }
  0x25   : > { %1814 = vmatprep.subr.bf16.mxu0 %v1920_v3  ;;  %1878 = vmatprep.subr.bf16.mxu1 %v1920_v3  ;;  %v1862_v31 = vpack.c.bf16 %v463_v26, %v462_v25  ;;  %v287_v25 = vld [vmem:[%s1982_s7 + $0x1e8] sm:$0xff]  ;;  %v252_v26 = vld [vmem:[%s1982_s7 + $0xd0] sm:$0xff] }
  0x28   : > { %1816 = vmatpush1.bf16.msra.mxu0 %v1815_v29  ;;  %1894 = vmatpush1.bf16.msra.mxu1 %v1815_v29  ;;  %v245_v29 = vld [vmem:[%s1982_s7 + $0x98] sm:$0xff] }
  0x29   : > { %1817 = vmatprep.subr.bf16.mxu0 %v1920_v3  ;;  %1879 = vmatprep.subr.bf16.mxu1 %v1920_v3 }
  0x2c   : > { %1819 = vmatpush1.bf16.msra.mxu0 %v1818_v32  ;;  %1895 = vmatpush1.bf16.msra.mxu1 %v1818_v32  ;;  %v464_v32 = vld [vmem:[%s2744_s1 + $0x170] sm:$0xff] }
  0x2d   : > { %1820 = vmatprep.subr.bf16.mxu0 %v1920_v3  ;;  %1880 = vmatprep.subr.bf16.mxu1 %v1920_v3 }
  0x30   : > { %1822 = vmatpush1.bf16.msra.mxu0 %v1821_v35  ;;  %1896 = vmatpush1.bf16.msra.mxu1 %v1821_v35  ;;  %v388_v35 = vld [vmem:[%s1982_s7 + $0x510] sm:$0xff] }
  0x31   : > { %1823 = vmatprep.subr.bf16.mxu0 %v1920_v3  ;;  %1881 = vmatprep.subr.bf16.mxu1 %v1920_v3 }
  0x34   : > { %1825 = vmatpush1.bf16.msra.mxu0 %v1824_v38  ;;  %1897 = vmatpush1.bf16.msra.mxu1 %v1824_v38  ;;  %v1866_v38 = vpack.c.bf16 %v465_v33, %v464_v32  ;;  %v261_v32 = vld [vmem:[%s1982_s7 + $0x118] sm:$0xff] }
  0x35   : > { %1826 = vmatprep.subr.bf16.mxu0 %v1920_v3  ;;  %1882 = vmatprep.subr.bf16.mxu1 %v1920_v3  ;;  %v293_v33 = vld [vmem:[%s1982_s7 + $0x218] sm:$0xff] }
  0x38   : > { %1828 = vmatpush1.bf16.msra.mxu0 %v1827_v41  ;;  %1898 = vmatpush1.bf16.msra.mxu1 %v1827_v41  ;;  %v251_v41 = vld [vmem:[%s1982_s7 + $0xc8] sm:$0xff] }
  0x39   : > { %1829 = vmatprep.subr.bf16.mxu0 %v1920_v3  ;;  %1883 = vmatprep.subr.bf16.mxu1 %v1920_v3 }
  0x3c   : > { %1831 = vmatpush1.bf16.msra.mxu0 %v1830_v44  ;;  %1899 = vmatpush1.bf16.msra.mxu1 %v1830_v44  ;;  %v394_v44 = vld [vmem:[%s1982_s7 + $0x540] sm:$0xff] }
  0x3d   : > { %1832 = vmatprep.subr.bf16.mxu0 %v1920_v3  ;;  %1884 = vmatprep.subr.bf16.mxu1 %v1920_v3 }
  0x40   : > { %1834 = vmatpush1.bf16.msra.mxu0 %v1833_v47  ;;  %1900 = vmatpush1.bf16.msra.mxu1 %v1833_v47  ;;  %v253_v47 = vld [vmem:[%s1982_s7 + $0xd8] sm:$0xff] }
  0x41   : > { %1835 = vmatprep.subr.bf16.mxu0 %v1920_v3  ;;  %1885 = vmatprep.subr.bf16.mxu1 %v1920_v3  ;;  %v1846_v3 = vpack.c.bf16 %v455_v62, %v454_v61  ;;  %v266_v61 = vld [vmem:[%s1982_s7 + $0x140] sm:$0xff] }
  0x42   : > { %v410_v62 = vld [vmem:[%s1982_s7 + $0x5c0] sm:$0xff] }
  0x44   : > { %1837 = vmatpush1.bf16.msra.mxu0 %v1836_v52  ;;  %1901 = vmatpush1.bf16.msra.mxu1 %v1836_v52  ;;  %v400_v52 = vld [vmem:[%s1982_s7 + $0x570] sm:$0xff] }
  0x45   : > { %1839 = vmatprep.subr.bf16.mxu1 %v1838_v53 }
  0x47   : > { %538 = vmatmul.mubr.f32.vlgmr.msra.gmra.mrb[0].mxu0 %v226_v56  ;;  %778 = vmatmul.mubr.f32.vlgmr.msra.gmra.mrb[0].mxu1 %v370_v57  ;;  %v403_v56 = vld [vmem:[%s1982_s7 + $0x588] sm:$0xff] }
  0x48   : > { %1841 = vmatpush3.bf16.msra.mxu1 %v1838_v53  ;;  %542 = vmatprep.mubr.f32.mxu0 %v230_v58  ;;  %v260_v53 = vld [vmem:[%s1982_s7 + $0x110] sm:$0xff]  ;;  %v263_v57 = vld [vmem:[%s1982_s7 + $0x128] sm:$0xff] }
  0x49   : > { %782 = vmatprep.mubr.f32.mxu1 %v374_v60  ;;  %1843 = vmatprep.subr.bf16.mxu1 %v1842_v59  ;;  %v407_v58 = vld [vmem:[%s1982_s7 + $0x5a8] sm:$0xff]  ;;  %v406_v60 = vld [vmem:[%s1982_s7 + $0x5a0] sm:$0xff] }
  0x4b   : > { %543 = vmatmul.mubr.f32.gmra.mrb[2].mxu0 %v229_v63  ;;  %783 = vmatmul.mubr.f32.gmra.mrb[2].mxu1 %v373_v0  ;;  %v265_v63 = vld [vmem:[%s1982_s7 + $0x138] sm:$0xff] }
  0x4c   : > { %547 = vmatprep.mubr.f32.mxu0 %v233_v1  ;;  %787 = vmatprep.mubr.f32.mxu1 %v377_v2  ;;  %v409_v0 = vld [vmem:[%s1982_s7 + $0x5b8] sm:$0xff] }
  0x4d   : > { %1845 = vmatpush3.bf16.msra.mxu1 %v1842_v59  ;;  %v262_v59 = vld [vmem:[%s1982_s7 + $0x120] sm:$0xff]  ;;  %v269_v1 = vld [vmem:[%s1982_s7 + $0x158] sm:$0xff] }
  0x4e   : > { %1847 = vmatprep.subr.bf16.mxu1 %v1846_v3  ;;  %v413_v2 = vld [vmem:[%s1982_s7 + $0x5d8] sm:$0xff] }
  0x4f   : > { %548 = vmatmul.mubr.f32.gmra.mrb[4].mxu0 %v232_v6  ;;  %788 = vmatmul.mubr.f32.gmra.mrb[4].mxu1 %v376_v7  ;;  %v416_v6 = vld [vmem:[%s1982_s7 + $0x5f0] sm:$0xff]  ;;  %v271_v7 = vld [vmem:[%s1982_s7 + $0x168] sm:$0xff] }
  0x50   : > { %552 = vmatprep.mubr.f32.mxu0 %v236_v8  ;;  %792 = vmatprep.mubr.f32.mxu1 %v380_v9  ;;  %v415_v8 = vld [vmem:[%s1982_s7 + $0x5e8] sm:$0xff] }
  0x51   : > { %1849 = vmatpush3.bf16.msra.mxu1 %v1846_v3  ;;  %v268_v3 = vld [vmem:[%s1982_s7 + $0x150] sm:$0xff]  ;;  %v275_v9 = vld [vmem:[%s1982_s7 + $0x188] sm:$0xff] }
  0x52   : > { %1851 = vmatprep.subr.bf16.mxu1 %v1850_v10 }
  0x53   : > { %553 = vmatmul.mubr.f32.gmra.mrb[6].mxu0 %v235_v13  ;;  %793 = vmatmul.mubr.f32.gmra.mrb[6].mxu1 %v379_v14  ;;  %v278_v13 = vld [vmem:[%s1982_s7 + $0x1a0] sm:$0xff] }
  0x54   : > { %557 = vmatprep.mubr.f32.mxu0 %v239_v15  ;;  %797 = vmatprep.mubr.f32.mxu1 %v383_v16  ;;  %v234_v14 = vld [vmem:[%s1982_s7 + $0x40] sm:$0xff]  ;;  %v277_v15 = vld [vmem:[%s1982_s7 + $0x198] sm:$0xff] }
  0x55   : > { %1853 = vmatpush3.bf16.msra.mxu1 %v1850_v10  ;;  %v228_v10 = vld [vmem:[%s1982_s7 + $0x10] sm:$0xff]  ;;  %v237_v16 = vld [vmem:[%s1982_s7 + $0x58] sm:$0xff] }
  0x56   : > { %1855 = vmatprep.subr.bf16.mxu1 %v1854_v17 }
  0x57   : > { %558 = vmatmul.mubr.f32.gmra.mrb[8].mxu0 %v238_v20  ;;  %798 = vmatmul.mubr.f32.gmra.mrb[8].mxu1 %v382_v21  ;;  %v243_v20 = vld [vmem:[%s1982_s7 + $0x88] sm:$0xff]  ;;  %v284_v21 = vld [vmem:[%s1982_s7 + $0x1d0] sm:$0xff] }
  0x58   : > { %562 = vmatprep.mubr.f32.mxu0 %v242_v22  ;;  %802 = vmatprep.mubr.f32.mxu1 %v386_v23  ;;  %v246_v22 = vld [vmem:[%s1982_s7 + $0xa0] sm:$0xff]  ;;  %v283_v23 = vld [vmem:[%s1982_s7 + $0x1c8] sm:$0xff] }
  0x59   : > { %1857 = vmatpush3.bf16.msra.mxu1 %v1854_v17  ;;  %v281_v17 = vld [vmem:[%s1982_s7 + $0x1b8] sm:$0xff] }
  0x5a   : > { %1859 = vmatprep.subr.bf16.mxu1 %v1858_v24 }
  0x5b   : > { %563 = vmatmul.mubr.f32.gmra.mrb[10].mxu0 %v241_v27  ;;  %803 = vmatmul.mubr.f32.gmra.mrb[10].mxu1 %v385_v28  ;;  %v286_v27 = vld [vmem:[%s1982_s7 + $0x1e0] sm:$0xff]  ;;  %v255_v28 = vld [vmem:[%s1982_s7 + $0xe8] sm:$0xff] }
  0x5c   : > { %567 = vmatprep.mubr.f32.mxu0 %v245_v29  ;;  %807 = vmatprep.mubr.f32.mxu1 %v389_v30  ;;  %v290_v29 = vld [vmem:[%s1982_s7 + $0x200] sm:$0xff] }
  0x5d   : > { %1861 = vmatpush3.bf16.msra.mxu1 %v1858_v24  ;;  %v249_v24 = vld [vmem:[%s1982_s7 + $0xb8] sm:$0xff]  ;;  %v258_v30 = vld [vmem:[%s1982_s7 + $0x100] sm:$0xff] }
  0x5e   : > { %1863 = vmatprep.subr.bf16.mxu1 %v1862_v31 }
  0x5f   : > { %568 = vmatmul.mubr.f32.gmra.mrb[12].mxu0 %v244_v34  ;;  %808 = vmatmul.mubr.f32.gmra.mrb[12].mxu1 %v388_v35  ;;  %v264_v34 = vld [vmem:[%s1982_s7 + $0x130] sm:$0xff] }
  0x60   : > { %572 = vmatprep.mubr.f32.mxu0 %v248_v36  ;;  %812 = vmatprep.mubr.f32.mxu1 %v392_v37  ;;  %v292_v35 = vld [vmem:[%s1982_s7 + $0x210] sm:$0xff]  ;;  %v267_v36 = vld [vmem:[%s1982_s7 + $0x148] sm:$0xff] }
  0x61   : > { %1865 = vmatpush3.bf16.msra.mxu1 %v1862_v31  ;;  %v289_v31 = vld [vmem:[%s1982_s7 + $0x1f8] sm:$0xff]  ;;  %v296_v37 = vld [vmem:[%s1982_s7 + $0x230] sm:$0xff] }
  0x62   : > { %1867 = vmatprep.subr.bf16.mxu1 %v1866_v38 }
  0x63   : > { %573 = vmatmul.mubr.f32.gmra.mrb[14].mxu0 %v247_v39  ;;  %813 = vmatmul.mubr.f32.gmra.mrb[14].mxu1 %v391_v40  ;;  %v295_v39 = vld [vmem:[%s1982_s7 + $0x228] sm:$0xff]  ;;  %v273_v40 = vld [vmem:[%s1982_s7 + $0x178] sm:$0xff] }
  0x64   : > { %577 = vmatprep.mubr.f32.mxu0 %v251_v41  ;;  %817 = vmatprep.mubr.f32.mxu1 %v395_v42  ;;  %v299_v41 = vld [vmem:[%s1982_s7 + $0x248] sm:$0xff]  ;;  %v276_v42 = vld [vmem:[%s1982_s7 + $0x190] sm:$0xff] }
  0x65   : > { %1869 = vmatpush3.bf16.msra.mxu1 %v1866_v38  ;;  %v270_v38 = vld [vmem:[%s1982_s7 + $0x160] sm:$0xff] }
  0x67   : > { %578 = vmatmul.mubr.f32.gmra.mrb[16].mxu0 %v250_v43  ;;  %818 = vmatmul.mubr.f32.gmra.mrb[16].mxu1 %v394_v44  ;;  %v298_v43 = vld [vmem:[%s1982_s7 + $0x240] sm:$0xff]  ;;  %v279_v44 = vld [vmem:[%s1982_s7 + $0x1a8] sm:$0xff] }
  0x68   : > { %582 = vmatprep.mubr.f32.mxu0 %v254_v45  ;;  %822 = vmatprep.mubr.f32.mxu1 %v398_v46  ;;  %v302_v45 = vld [vmem:[%s1982_s7 + $0x260] sm:$0xff] }
  0x69   : > { %v282_v46 = vld [vmem:[%s1982_s7 + $0x1c0] sm:$0xff] }
  0x6b   : > { %583 = vmatmul.mubr.f32.gmra.mrb[18].mxu0 %v253_v47  ;;  %823 = vmatmul.mubr.f32.gmra.mrb[18].mxu1 %v397_v48  ;;  %v301_v47 = vld [vmem:[%s1982_s7 + $0x258] sm:$0xff] }
  0x6c   : > { %587 = vmatprep.mubr.f32.mxu0 %v257_v49  ;;  %827 = vmatprep.mubr.f32.mxu1 %v401_v50  ;;  %v285_v48 = vld [vmem:[%s1982_s7 + $0x1d8] sm:$0xff]  ;;  %v288_v50 = vld [vmem:[%s1982_s7 + $0x1f0] sm:$0xff] }
  0x6d   : > { %v305_v49 = vld [vmem:[%s1982_s7 + $0x278] sm:$0xff] }
  0x6f   : > { %588 = vmatmul.mubr.f32.gmra.mrb[20].mxu0 %v256_v51  ;;  %828 = vmatmul.mubr.f32.gmra.mrb[20].mxu1 %v400_v52  ;;  %v304_v51 = vld [vmem:[%s1982_s7 + $0x270] sm:$0xff]  ;;  %v291_v52 = vld [vmem:[%s1982_s7 + $0x208] sm:$0xff] }
  0x70   : > { %592 = vmatprep.mubr.f32.mxu0 %v260_v53  ;;  %832 = vmatprep.mubr.f32.mxu1 %v404_v54  ;;  %v308_v53 = vld [vmem:[%s1982_s7 + $0x290] sm:$0xff]  ;;  %v294_v54 = vld [vmem:[%s1982_s7 + $0x220] sm:$0xff] }
  0x73   : > { %593 = vmatmul.mubr.f32.gmra.mrb[22].mxu0 %v259_v55  ;;  %833 = vmatmul.mubr.f32.gmra.mrb[22].mxu1 %v403_v56  ;;  %v307_v55 = vld [vmem:[%s1982_s7 + $0x288] sm:$0xff]  ;;  %v297_v56 = vld [vmem:[%s1982_s7 + $0x238] sm:$0xff] }
  0x74   : > { %597 = vmatprep.mubr.f32.mxu0 %v263_v57  ;;  %837 = vmatprep.mubr.f32.mxu1 %v407_v58  ;;  %v311_v57 = vld [vmem:[%s1982_s7 + $0x2a8] sm:$0xff]  ;;  %v300_v58 = vld [vmem:[%s1982_s7 + $0x250] sm:$0xff] }
  0x77   : > { %598 = vmatmul.mubr.f32.gmra.mrb[24].mxu0 %v262_v59  ;;  %838 = vmatmul.mubr.f32.gmra.mrb[24].mxu1 %v406_v60  ;;  %v310_v59 = vld [vmem:[%s1982_s7 + $0x2a0] sm:$0xff]  ;;  %v303_v60 = vld [vmem:[%s1982_s7 + $0x268] sm:$0xff] }
  0x78   : > { %602 = vmatprep.mubr.f32.mxu0 %v266_v61  ;;  %842 = vmatprep.mubr.f32.mxu1 %v410_v62  ;;  %v314_v61 = vld [vmem:[%s1982_s7 + $0x2c0] sm:$0xff] }
  0x79   : > { %v306_v62 = vld [vmem:[%s1982_s7 + $0x280] sm:$0xff] }
  0x7b   : > { %603 = vmatmul.mubr.f32.gmra.mrb[26].mxu0 %v265_v63  ;;  %843 = vmatmul.mubr.f32.gmra.mrb[26].mxu1 %v409_v0  ;;  %v313_v63 = vld [vmem:[%s1982_s7 + $0x2b8] sm:$0xff] }
  0x7c   : > { %607 = vmatprep.mubr.f32.mxu0 %v269_v1  ;;  %847 = vmatprep.mubr.f32.mxu1 %v413_v2  ;;  %v309_v0 = vld [vmem:[%s1982_s7 + $0x298] sm:$0xff]  ;;  %v312_v2 = vld [vmem:[%s1982_s7 + $0x2b0] sm:$0xff] }
  0x7d   : > { %v317_v1 = vld [vmem:[%s1982_s7 + $0x2d8] sm:$0xff] }
  0x7f   : > { %608 = vmatmul.mubr.f32.gmra.mrb[28].mxu0 %v268_v3  ;;  %848 = vmatmul.mubr.f32.gmra.mrb[28].mxu1 %v412_v4  ;;  %v316_v3 = vld [vmem:[%s1982_s7 + $0x2d0] sm:$0xff]  ;;  %v315_v4 = vld [vmem:[%s1982_s7 + $0x2c8] sm:$0xff] }
  0x80   : > { %612 = vmatprep.mubr.f32.mxu0 %v272_v5  ;;  %852 = vmatprep.mubr.f32.mxu1 %v416_v6  ;;  %v320_v5 = vld [vmem:[%s1982_s7 + $0x2f0] sm:$0xff]  ;;  %v318_v6 = vld [vmem:[%s1982_s7 + $0x2e0] sm:$0xff] }
  0x83   : > { %613 = vmatmul.mubr.f32.gmra.mrb[30].mxu0 %v271_v7  ;;  %853 = vmatmul.mubr.f32.gmra.mrb[30].mxu1 %v415_v8  ;;  %v319_v7 = vld [vmem:[%s1982_s7 + $0x2e8] sm:$0xff]  ;;  %v321_v8 = vld [vmem:[%s1982_s7 + $0x2f8] sm:$0xff] }
  0x84   : > { %617 = vmatprep.mubr.f32.mxu0 %v275_v9  ;;  %1694 = vmatprep.mubr.f32.mxu1 %v228_v10  ;;  %v323_v9 = vld [vmem:[%s1982_s7 + $0x308] sm:$0xff]  ;;  %v324_v10 = vld [vmem:[%s1982_s7 + $0x310] sm:$0xff] }
  0x87   : > { %618 = vmatmul.mubr.f32.gmra.mrb[32].mxu0 %v274_v11  ;;  %1695 = vmatmul.mubr.f32.vlgmr.msra.gmra.mrb[32].mxu1 %v231_v12  ;;  %v322_v11 = vld [vmem:[%s1982_s7 + $0x300] sm:$0xff]  ;;  %v327_v12 = vld [vmem:[%s1982_s7 + $0x328] sm:$0xff] }
  0x88   : > { %622 = vmatprep.mubr.f32.mxu0 %v278_v13  ;;  %1697 = vmatprep.mubr.f32.mxu1 %v234_v14  ;;  %v326_v13 = vld [vmem:[%s1982_s7 + $0x320] sm:$0xff] }
  0x89   : > { %v330_v14 = vld [vmem:[%s1982_s7 + $0x340] sm:$0xff] }
  0x8b   : > { %623 = vmatmul.mubr.f32.gmra.mrb[34].mxu0 %v277_v15  ;;  %1698 = vmatmul.mubr.f32.gmra.mrb[34].mxu1 %v237_v16  ;;  %v325_v15 = vld [vmem:[%s1982_s7 + $0x318] sm:$0xff] }
  0x8c   : > { %627 = vmatprep.mubr.f32.mxu0 %v281_v17  ;;  %1700 = vmatprep.mubr.f32.mxu1 %v240_v18  ;;  %v333_v16 = vld [vmem:[%s1982_s7 + $0x358] sm:$0xff]  ;;  %v336_v18 = vld [vmem:[%s1982_s7 + $0x370] sm:$0xff] }
  0x8d   : > { %v329_v17 = vld [vmem:[%s1982_s7 + $0x338] sm:$0xff] }
  0x8f   : > { %628 = vmatmul.mubr.f32.gmra.mrb[36].mxu0 %v280_v19  ;;  %1701 = vmatmul.mubr.f32.gmra.mrb[36].mxu1 %v243_v20  ;;  %v328_v19 = vld [vmem:[%s1982_s7 + $0x330] sm:$0xff]  ;;  %v339_v20 = vld [vmem:[%s1982_s7 + $0x388] sm:$0xff] }
  0x90   : > { %632 = vmatprep.mubr.f32.mxu0 %v284_v21  ;;  %1703 = vmatprep.mubr.f32.mxu1 %v246_v22  ;;  %v332_v21 = vld [vmem:[%s1982_s7 + $0x350] sm:$0xff]  ;;  %v342_v22 = vld [vmem:[%s1982_s7 + $0x3a0] sm:$0xff] }
  0x93   : > { %633 = vmatmul.mubr.f32.gmra.mrb[38].mxu0 %v283_v23  ;;  %1704 = vmatmul.mubr.f32.gmra.mrb[38].mxu1 %v249_v24  ;;  %v331_v23 = vld [vmem:[%s1982_s7 + $0x348] sm:$0xff]  ;;  %v345_v24 = vld [vmem:[%s1982_s7 + $0x3b8] sm:$0xff] }
  0x94   : > { %637 = vmatprep.mubr.f32.mxu0 %v287_v25  ;;  %1706 = vmatprep.mubr.f32.mxu1 %v252_v26  ;;  %v335_v25 = vld [vmem:[%s1982_s7 + $0x368] sm:$0xff]  ;;  %v348_v26 = vld [vmem:[%s1982_s7 + $0x3d0] sm:$0xff] }
  0x97   : > { %638 = vmatmul.mubr.f32.gmra.mrb[40].mxu0 %v286_v27  ;;  %1707 = vmatmul.mubr.f32.gmra.mrb[40].mxu1 %v255_v28  ;;  %v334_v27 = vld [vmem:[%s1982_s7 + $0x360] sm:$0xff]  ;;  %v351_v28 = vld [vmem:[%s1982_s7 + $0x3e8] sm:$0xff] }
  0x98   : > { %642 = vmatprep.mubr.f32.mxu0 %v290_v29  ;;  %1709 = vmatprep.mubr.f32.mxu1 %v258_v30  ;;  %v338_v29 = vld [vmem:[%s1982_s7 + $0x380] sm:$0xff] }
  0x99   : > { %v354_v30 = vld [vmem:[%s1982_s7 + $0x400] sm:$0xff] }
  0x9b   : > { %643 = vmatmul.mubr.f32.gmra.mrb[42].mxu0 %v289_v31  ;;  %1710 = vmatmul.mubr.f32.gmra.mrb[42].mxu1 %v261_v32  ;;  %v337_v31 = vld [vmem:[%s1982_s7 + $0x378] sm:$0xff] }
  0x9c   : > { %647 = vmatprep.mubr.f32.mxu0 %v293_v33  ;;  %1712 = vmatprep.mubr.f32.mxu1 %v264_v34  ;;  %v357_v32 = vld [vmem:[%s1982_s7 + $0x418] sm:$0xff]  ;;  %v360_v34 = vld [vmem:[%s1982_s7 + $0x430] sm:$0xff] }
  0x9d   : > { %v341_v33 = vld [vmem:[%s1982_s7 + $0x398] sm:$0xff] }
  0x9f   : > { %648 = vmatmul.mubr.f32.gmra.mrb[44].mxu0 %v292_v35  ;;  %1713 = vmatmul.mubr.f32.gmra.mrb[44].mxu1 %v267_v36  ;;  %v340_v35 = vld [vmem:[%s1982_s7 + $0x390] sm:$0xff]  ;;  %v363_v36 = vld [vmem:[%s1982_s7 + $0x448] sm:$0xff] }
  0xa0   : > { %652 = vmatprep.mubr.f32.mxu0 %v296_v37  ;;  %1715 = vmatprep.mubr.f32.mxu1 %v270_v38  ;;  %v344_v37 = vld [vmem:[%s1982_s7 + $0x3b0] sm:$0xff]  ;;  %v366_v38 = vld [vmem:[%s1982_s7 + $0x460] sm:$0xff] }
  0xa3   : > { %653 = vmatmul.mubr.f32.gmra.mrb[46].mxu0 %v295_v39  ;;  %1716 = vmatmul.mubr.f32.gmra.mrb[46].mxu1 %v273_v40  ;;  %v343_v39 = vld [vmem:[%s1982_s7 + $0x3a8] sm:$0xff]  ;;  %v369_v40 = vld [vmem:[%s1982_s7 + $0x478] sm:$0xff] }
  0xa4   : > { %657 = vmatprep.mubr.f32.mxu0 %v299_v41  ;;  %1718 = vmatprep.mubr.f32.mxu1 %v276_v42  ;;  %v347_v41 = vld [vmem:[%s1982_s7 + $0x3c8] sm:$0xff]  ;;  %v372_v42 = vld [vmem:[%s1982_s7 + $0x490] sm:$0xff] }
  0xa7   : > { %658 = vmatmul.mubr.f32.gmra.mrb[48].mxu0 %v298_v43  ;;  %1719 = vmatmul.mubr.f32.gmra.mrb[48].mxu1 %v279_v44  ;;  %v346_v43 = vld [vmem:[%s1982_s7 + $0x3c0] sm:$0xff]  ;;  %v375_v44 = vld [vmem:[%s1982_s7 + $0x4a8] sm:$0xff] }
  0xa8   : > { %662 = vmatprep.mubr.f32.mxu0 %v302_v45  ;;  %1721 = vmatprep.mubr.f32.mxu1 %v282_v46  ;;  %v350_v45 = vld [vmem:[%s1982_s7 + $0x3e0] sm:$0xff] }
  0xa9   : > { %v378_v46 = vld [vmem:[%s1982_s7 + $0x4c0] sm:$0xff] }
  0xab   : > { %663 = vmatmul.mubr.f32.gmra.mrb[50].mxu0 %v301_v47  ;;  %1722 = vmatmul.mubr.f32.gmra.mrb[50].mxu1 %v285_v48  ;;  %v349_v47 = vld [vmem:[%s1982_s7 + $0x3d8] sm:$0xff] }
  0xac   : > { %667 = vmatprep.mubr.f32.mxu0 %v305_v49  ;;  %1724 = vmatprep.mubr.f32.mxu1 %v288_v50  ;;  %v381_v48 = vld [vmem:[%s1982_s7 + $0x4d8] sm:$0xff]  ;;  %v384_v50 = vld [vmem:[%s1982_s7 + $0x4f0] sm:$0xff] }
  0xad   : > { %v353_v49 = vld [vmem:[%s1982_s7 + $0x3f8] sm:$0xff] }
  0xaf   : > { %668 = vmatmul.mubr.f32.gmra.mrb[52].mxu0 %v304_v51  ;;  %1725 = vmatmul.mubr.f32.gmra.mrb[52].mxu1 %v291_v52  ;;  %v352_v51 = vld [vmem:[%s1982_s7 + $0x3f0] sm:$0xff]  ;;  %v387_v52 = vld [vmem:[%s1982_s7 + $0x508] sm:$0xff] }
  0xb0   : > { %672 = vmatprep.mubr.f32.mxu0 %v308_v53  ;;  %1727 = vmatprep.mubr.f32.mxu1 %v294_v54  ;;  %v356_v53 = vld [vmem:[%s1982_s7 + $0x410] sm:$0xff]  ;;  %v390_v54 = vld [vmem:[%s1982_s7 + $0x520] sm:$0xff] }
  0xb3   : > { %673 = vmatmul.mubr.f32.gmra.mrb[54].mxu0 %v307_v55  ;;  %1728 = vmatmul.mubr.f32.gmra.mrb[54].mxu1 %v297_v56  ;;  %v355_v55 = vld [vmem:[%s1982_s7 + $0x408] sm:$0xff]  ;;  %v393_v56 = vld [vmem:[%s1982_s7 + $0x538] sm:$0xff] }
  0xb4   : > { %677 = vmatprep.mubr.f32.mxu0 %v311_v57  ;;  %1730 = vmatprep.mubr.f32.mxu1 %v300_v58  ;;  %v359_v57 = vld [vmem:[%s1982_s7 + $0x428] sm:$0xff]  ;;  %v396_v58 = vld [vmem:[%s1982_s7 + $0x550] sm:$0xff] }
  0xb7   : > { %678 = vmatmul.mubr.f32.gmra.mrb[56].mxu0 %v310_v59  ;;  %1731 = vmatmul.mubr.f32.gmra.mrb[56].mxu1 %v303_v60  ;;  %v358_v59 = vld [vmem:[%s1982_s7 + $0x420] sm:$0xff]  ;;  %v399_v60 = vld [vmem:[%s1982_s7 + $0x568] sm:$0xff] }
  0xb8   : > { %682 = vmatprep.mubr.f32.mxu0 %v314_v61  ;;  %1733 = vmatprep.mubr.f32.mxu1 %v306_v62  ;;  %v362_v61 = vld [vmem:[%s1982_s7 + $0x440] sm:$0xff] }
  0xb9   : > { %v402_v62 = vld [vmem:[%s1982_s7 + $0x580] sm:$0xff] }
  0xbb   : > { %683 = vmatmul.mubr.f32.gmra.mrb[58].mxu0 %v313_v63  ;;  %1734 = vmatmul.mubr.f32.gmra.mrb[58].mxu1 %v309_v0  ;;  %v361_v63 = vld [vmem:[%s1982_s7 + $0x438] sm:$0xff] }
  0xbc   : > { %687 = vmatprep.mubr.f32.mxu0 %v317_v1  ;;  %1736 = vmatprep.mubr.f32.mxu1 %v312_v2  ;;  %v405_v0 = vld [vmem:[%s1982_s7 + $0x598] sm:$0xff]  ;;  %v408_v2 = vld [vmem:[%s1982_s7 + $0x5b0] sm:$0xff] }
  0xbd   : > { %v365_v1 = vld [vmem:[%s1982_s7 + $0x458] sm:$0xff] }
  0xbf   : > { %688 = vmatmul.mubr.f32.gmra.mrb[60].mxu0 %v316_v3  ;;  %1737 = vmatmul.mubr.f32.gmra.mrb[60].mxu1 %v315_v4  ;;  %v364_v3 = vld [vmem:[%s1982_s7 + $0x450] sm:$0xff]  ;;  %v411_v4 = vld [vmem:[%s1982_s7 + $0x5c8] sm:$0xff] }
  0xc0   : > { %692 = vmatprep.mubr.f32.mxu0 %v320_v5  ;;  %1739 = vmatprep.mubr.f32.mxu1 %v318_v6  ;;  %v368_v5 = vld [vmem:[%s1982_s7 + $0x470] sm:$0xff]  ;;  %v414_v6 = vld [vmem:[%s1982_s7 + $0x5e0] sm:$0xff] }
  0xc3   : > { %693 = vmatmul.mubr.f32.gmra.mrb[62].mxu0 %v319_v7  ;;  %1740 = vmatmul.mubr.f32.gmra.mrb[62].mxu1 %v321_v8  ;;  %v367_v7 = vld [vmem:[%s1982_s7 + $0x468] sm:$0xff]  ;;  %v417_v8 = vld [vmem:[%s1982_s7 + $0x5f8] sm:$0xff]  ;;  %s1576_s7 = sshll.u32 %s2749_s23, 3 }
  0xc4   : > { %697 = vmatprep.mubr.f32.mxu0 %v323_v9  ;;  %1742 = vmatprep.mubr.f32.mxu1 %v324_v10  ;;  %s2403_s29 = scalar_lea.vmem %s2746_s3, %s1576_s7  ;;  %s2420_s5 = scalar_lea.vmem %s2747_s4, %s1576_s7 }
  0xc7   : > { %698 = vmatmul.mubr.f32.gmra.mrb[64].mxu0 %v322_v11  ;;  %1743 = vmatmul.mubr.f32.gmra.mrb[64].mxu1 %v327_v12 }
  0xc8   : > { %702 = vmatprep.mubr.f32.mxu0 %v326_v13  ;;  %1745 = vmatprep.mubr.f32.mxu1 %v330_v14 }
  0xcb   : > { %703 = vmatmul.mubr.f32.gmra.mrb[66].mxu0 %v325_v15  ;;  %1746 = vmatmul.mubr.f32.gmra.mrb[66].mxu1 %v333_v16 }
  0xcc   : > { %707 = vmatprep.mubr.f32.mxu0 %v329_v17  ;;  %1748 = vmatprep.mubr.f32.mxu1 %v336_v18 }
  0xcf   : > { %708 = vmatmul.mubr.f32.gmra.mrb[68].mxu0 %v328_v19  ;;  %1749 = vmatmul.mubr.f32.gmra.mrb[68].mxu1 %v339_v20 }
  0xd0   : > { %712 = vmatprep.mubr.f32.mxu0 %v332_v21  ;;  %1751 = vmatprep.mubr.f32.mxu1 %v342_v22 }
  0xd3   : > { %713 = vmatmul.mubr.f32.gmra.mrb[70].mxu0 %v331_v23  ;;  %1752 = vmatmul.mubr.f32.gmra.mrb[70].mxu1 %v345_v24 }
  0xd4   : > { %717 = vmatprep.mubr.f32.mxu0 %v335_v25  ;;  %1754 = vmatprep.mubr.f32.mxu1 %v348_v26 }
  0xd7   : > { %718 = vmatmul.mubr.f32.gmra.mrb[72].mxu0 %v334_v27  ;;  %1755 = vmatmul.mubr.f32.gmra.mrb[72].mxu1 %v351_v28 }
  0xd8   : > { %722 = vmatprep.mubr.f32.mxu0 %v338_v29  ;;  %1757 = vmatprep.mubr.f32.mxu1 %v354_v30 }
  0xdb   : > { %723 = vmatmul.mubr.f32.gmra.mrb[74].mxu0 %v337_v31  ;;  %1758 = vmatmul.mubr.f32.gmra.mrb[74].mxu1 %v357_v32 }
  0xdc   : > { %727 = vmatprep.mubr.f32.mxu0 %v341_v33  ;;  %1760 = vmatprep.mubr.f32.mxu1 %v360_v34 }
  0xdf   : > { %728 = vmatmul.mubr.f32.gmra.mrb[76].mxu0 %v340_v35  ;;  %1761 = vmatmul.mubr.f32.gmra.mrb[76].mxu1 %v363_v36 }
  0xe0   : > { %732 = vmatprep.mubr.f32.mxu0 %v344_v37  ;;  %1763 = vmatprep.mubr.f32.mxu1 %v366_v38 }
  0xe3   : > { %733 = vmatmul.mubr.f32.gmra.mrb[78].mxu0 %v343_v39  ;;  %1764 = vmatmul.mubr.f32.gmra.mrb[78].mxu1 %v369_v40 }
  0xe4   : > { %737 = vmatprep.mubr.f32.mxu0 %v347_v41  ;;  %1766 = vmatprep.mubr.f32.mxu1 %v372_v42 }
  0xe7   : > { %738 = vmatmul.mubr.f32.gmra.mrb[80].mxu0 %v346_v43  ;;  %1767 = vmatmul.mubr.f32.gmra.mrb[80].mxu1 %v375_v44 }
  0xe8   : > { %742 = vmatprep.mubr.f32.mxu0 %v350_v45  ;;  %1769 = vmatprep.mubr.f32.mxu1 %v378_v46 }
  0xeb   : > { %743 = vmatmul.mubr.f32.gmra.mrb[82].mxu0 %v349_v47  ;;  %1770 = vmatmul.mubr.f32.gmra.mrb[82].mxu1 %v381_v48 }
  0xec   : > { %747 = vmatprep.mubr.f32.mxu0 %v353_v49  ;;  %1772 = vmatprep.mubr.f32.mxu1 %v384_v50 }
  0xef   : > { %748 = vmatmul.mubr.f32.gmra.mrb[84].mxu0 %v352_v51  ;;  %1773 = vmatmul.mubr.f32.gmra.mrb[84].mxu1 %v387_v52 }
  0xf0   : > { %752 = vmatprep.mubr.f32.mxu0 %v356_v53  ;;  %1775 = vmatprep.mubr.f32.mxu1 %v390_v54 }
  0xf3   : > { %753 = vmatmul.mubr.f32.gmra.mrb[86].mxu0 %v355_v55  ;;  %1776 = vmatmul.mubr.f32.gmra.mrb[86].mxu1 %v393_v56 }
  0xf4   : > { %757 = vmatprep.mubr.f32.mxu0 %v359_v57  ;;  %1778 = vmatprep.mubr.f32.mxu1 %v396_v58 }
  0xf7   : > { %758 = vmatmul.mubr.f32.gmra.mrb[88].mxu0 %v358_v59  ;;  %1779 = vmatmul.mubr.f32.gmra.mrb[88].mxu1 %v399_v60 }
  0xf8   : > { %762 = vmatprep.mubr.f32.mxu0 %v362_v61  ;;  %1781 = vmatprep.mubr.f32.mxu1 %v402_v62 }
  0xfb   : > { %763 = vmatmul.mubr.f32.gmra.mrb[90].mxu0 %v361_v63  ;;  %1782 = vmatmul.mubr.f32.gmra.mrb[90].mxu1 %v405_v0 }
  0xfc   : > { %767 = vmatprep.mubr.f32.mxu0 %v365_v1  ;;  %1784 = vmatprep.mubr.f32.mxu1 %v408_v2 }
  0xff   : > { %768 = vmatmul.mubr.f32.gmra.mrb[92].mxu0 %v364_v3  ;;  %1785 = vmatmul.mubr.f32.gmra.mrb[92].mxu1 %v411_v4 }
 0x100   : > { %772 = vmatprep.mubr.f32.mxu0 %v368_v5  ;;  %1787 = vmatprep.mubr.f32.mxu1 %v414_v6 }
 0x103   : > { %773 = vmatmul.mubr.f32.gmra.mrb[94].mxu0 %v367_v7  ;;  %1788 = vmatmul.mubr.f32.gmra.mrb[94].mxu1 %v417_v8  ;;  %v2398_v7 = vld [vmem:[%s2745_s2] ss:$0 sm:$0xff] }
 0x11a   : > { %v2330_v9 = vpop.f32.mrb[0].mxu0  ;;  %v2332_v10 = vpop.f32.mrb[0].mxu1 }
 0x11b   : > { %v541_v11 = vpop.f32.mrb[1].mxu0  ;;  %v781_v12 = vpop.f32.mrb[1].mxu1 }
 0x11e   : > { %v2334_v13 = vpop.f32.mrb[2].mxu0  ;;  %v2336_v14 = vpop.f32.mrb[2].mxu1 }
 0x11f   : > { %v546_v15 = vpop.f32.mrb[3].mxu0  ;;  %v786_v16 = vpop.f32.mrb[3].mxu1  ;;  %v545_v12 = vadd.f32 %v2398_v7, %v2334_v13 }
 0x120   : > { %v540_v15 = vadd.f32 %v2398_v7, %v2330_v9 }
 0x122   : > { %v2338_v17 = vpop.f32.mrb[4].mxu0  ;;  %v2340_v18 = vpop.f32.mrb[4].mxu1 }
 0x123   : > { %v551_v19 = vpop.f32.mrb[5].mxu0  ;;  %v791_v20 = vpop.f32.mrb[5].mxu1  ;;  %v550_v13 = vadd.f32 %v2398_v7, %v2338_v17 }
 0x124   : > { %v1244_v20 = vld [vmem:[%s2403_s29 + $0x8] sm:$0xff] }
 0x126   : > { %v2342_v21 = vpop.f32.mrb[6].mxu0  ;;  %v2344_v22 = vpop.f32.mrb[6].mxu1 }
 0x127   : > { %v556_v23 = vpop.f32.mrb[7].mxu0  ;;  %v796_v24 = vpop.f32.mrb[7].mxu1 }
 0x12a   : > { %v2346_v25 = vpop.f32.mrb[8].mxu0  ;;  %v2348_v26 = vpop.f32.mrb[8].mxu1 }
 0x12b   : > { %v561_v27 = vpop.f32.mrb[9].mxu0  ;;  %v801_v28 = vpop.f32.mrb[9].mxu1 }
 0x12c   : > { %v1243_v28 = vld [vmem:[%s2403_s29] sm:$0xff] }
 0x12e   : > { %v2350_v29 = vpop.f32.mrb[10].mxu0  ;;  %v2352_v30 = vpop.f32.mrb[10].mxu1 }
 0x12f   : > { %v566_v31 = vpop.f32.mrb[11].mxu0  ;;  %v806_v32 = vpop.f32.mrb[11].mxu1 }
 0x130   : > { %v555_v32 = vadd.f32 %v2398_v7, %v2342_v21 }
 0x132   : > { %v2354_v33 = vpop.f32.mrb[12].mxu0  ;;  %v2356_v34 = vpop.f32.mrb[12].mxu1 }
 0x133   : > { %v571_v35 = vpop.f32.mrb[13].mxu0  ;;  %v811_v36 = vpop.f32.mrb[13].mxu1 }
 0x136   : > { %v2358_v37 = vpop.f32.mrb[14].mxu0  ;;  %v2360_v38 = vpop.f32.mrb[14].mxu1 }
 0x137   : > { %v576_v39 = vpop.f32.mrb[15].mxu0  ;;  %v816_v40 = vpop.f32.mrb[15].mxu1 }
 0x138   : > { %v1246_v40 = vld [vmem:[%s2403_s29 + $0x18] sm:$0xff] }
 0x13a   : > { %v2362_v41 = vpop.f32.mrb[16].mxu0  ;;  %v2364_v42 = vpop.f32.mrb[16].mxu1 }
 0x13b   : > { %v581_v43 = vpop.f32.mrb[17].mxu0  ;;  %v821_v44 = vpop.f32.mrb[17].mxu1 }
 0x13e   : > { %v2366_v45 = vpop.f32.mrb[18].mxu0  ;;  %v2368_v46 = vpop.f32.mrb[18].mxu1 }
 0x13f   : > { %v586_v47 = vpop.f32.mrb[19].mxu0  ;;  %v826_v48 = vpop.f32.mrb[19].mxu1 }
 0x140   : > { %v1245_v48 = vld [vmem:[%s2403_s29 + $0x10] sm:$0xff] }
 0x142   : > { %v2370_v49 = vpop.f32.mrb[20].mxu0  ;;  %v2372_v50 = vpop.f32.mrb[20].mxu1 }
 0x143   : > { %v591_v51 = vpop.f32.mrb[21].mxu0  ;;  %v831_v52 = vpop.f32.mrb[21].mxu1 }
 0x144   : > { %v565_v52 = vadd.f32 %v2398_v7, %v2350_v29 }
 0x146   : > { %v2374_v53 = vpop.f32.mrb[22].mxu0  ;;  %v2376_v54 = vpop.f32.mrb[22].mxu1 }
 0x147   : > { %v596_v55 = vpop.f32.mrb[23].mxu0  ;;  %v836_v56 = vpop.f32.mrb[23].mxu1 }
 0x148   : > { %v560_v56 = vadd.f32 %v2398_v7, %v2346_v25  ;;  %v575_v25 = vadd.f32 %v2398_v7, %v2358_v37 }
 0x14a   : > { %v2378_v57 = vpop.f32.mrb[24].mxu0  ;;  %v2380_v58 = vpop.f32.mrb[24].mxu1 }
 0x14b   : > { %v601_v59 = vpop.f32.mrb[25].mxu0  ;;  %v841_v60 = vpop.f32.mrb[25].mxu1 }
 0x14e   : > { %v2382_v61 = vpop.f32.mrb[26].mxu0  ;;  %v2384_v62 = vpop.f32.mrb[26].mxu1 }
 0x14f   : > { %v606_v63 = vpop.f32.mrb[27].mxu0  ;;  %v846_v0 = vpop.f32.mrb[27].mxu1 }
 0x150   : > { %v1248_v0 = vld [vmem:[%s2403_s29 + $0x28] sm:$0xff] }
 0x152   : > { %v2386_v1 = vpop.f32.mrb[28].mxu0  ;;  %v2388_v2 = vpop.f32.mrb[28].mxu1 }
 0x153   : > { %v611_v3 = vpop.f32.mrb[29].mxu0  ;;  %v851_v4 = vpop.f32.mrb[29].mxu1 }
 0x156   : > { %v2391_v5 = vpop.f32.mrb[30].mxu0  ;;  %v2393_v6 = vpop.f32.mrb[30].mxu1 }
 0x157   : > { %v616_v8 = vpop.f32.mrb[31].mxu0  ;;  %v856_v11 = vpop.f32.mrb[31].mxu1 }
 0x158   : > { %v1247_v11 = vld [vmem:[%s2403_s29 + $0x20] sm:$0xff] }
 0x15a   : > { %v2409_v16 = vpop.f32.mrb[32].mxu0  ;;  %v1696_v19 = vpop.f32.mrb[32].mxu1 }
 0x15b   : > { %v930_v23 = vadd.f32 %v1696_v19, %v545_v12  ;;  %v621_v24 = vpop.f32.mrb[33].mxu0  ;;  %v924_v27 = vpop.f32.mrb[33].mxu1 }
 0x15c   : > { %v925_v31 = vadd.f32 %v924_v27, %v540_v15 }
 0x15d   : > { %v1308_v35 = vadd.f32 %v1244_v20, %v930_v23  ;;  %v570_v20 = vadd.f32 %v2398_v7, %v2354_v33  ;;  %v585_v33 = vadd.f32 %v2398_v7, %v2366_v45 }
 0x15e   : > { %v1307_v9 = vadd.f32 %v1243_v28, %v925_v31  ;;  %v2422_v36 = vpop.f32.mrb[34].mxu0  ;;  %v1699_v39 = vpop.f32.mrb[34].mxu1  ;;  %v1250_v28 = vld [vmem:[%s2403_s29 + $0x38] sm:$0xff] }
 0x15f   : > { %v1372_v43 = vmax.f32 %v1308_v35, 0.0  ;;  %v940_v21 = vadd.f32 %v1699_v39, %v555_v32  ;;  %v626_v44 = vpop.f32.mrb[35].mxu0  ;;  %v934_v47 = vpop.f32.mrb[35].mxu1 }
 0x160   : > { %v1371_v17 = vmax.f32 %v1307_v9, 0.0  ;;  %v935_v51 = vadd.f32 %v934_v47, %v550_v13  ;;  %v1249_v13 = vld [vmem:[%s2403_s29 + $0x30] sm:$0xff] }
 0x161   : > { %1437 = vst.msk [vmem:[%s2420_s5 + $0x8] sm:$0xff] %vm1435_vm0, %v1372_v43  ;;  %v1310_v55 = vadd.f32 %v1246_v40, %v940_v21  ;;  %v580_v43 = vadd.f32 %v2398_v7, %v2362_v41  ;;  %v595_v41 = vadd.f32 %v2398_v7, %v2374_v53 }
 0x162   : > { %1436 = vst.msk [vmem:[%s2420_s5] sm:$0xff] %vm1435_vm0, %v1371_v17  ;;  %v1309_v59 = vadd.f32 %v1245_v48, %v935_v51  ;;  %v2434_v60 = vpop.f32.mrb[36].mxu0  ;;  %v1702_v63 = vpop.f32.mrb[36].mxu1  ;;  %v1252_v48 = vld [vmem:[%s2403_s29 + $0x48] sm:$0xff] }
 0x163   : > { %v1374_v3 = vmax.f32 %v1310_v55, 0.0  ;;  %v950_v4 = vadd.f32 %v1702_v63, %v565_v52  ;;  %v631_v8 = vpop.f32.mrb[37].mxu0  ;;  %v944_v29 = vpop.f32.mrb[37].mxu1  ;;  %v1251_v55 = vld [vmem:[%s2403_s29 + $0x40] sm:$0xff] }
 0x164   : > { %v1373_v12 = vmax.f32 %v1309_v59, 0.0  ;;  %v945_v15 = vadd.f32 %v944_v29, %v560_v56  ;;  %v1254_v29 = vld [vmem:[%s2403_s29 + $0x58] sm:$0xff] }
 0x165   : > { %1439 = vst.msk [vmem:[%s2420_s5 + $0x18] sm:$0xff] %vm1435_vm0, %v1374_v3  ;;  %v1312_v19 = vadd.f32 %v1248_v0, %v950_v4  ;;  %v590_v0 = vadd.f32 %v2398_v7, %v2370_v49  ;;  %v605_v49 = vadd.f32 %v2398_v7, %v2382_v61 }
 0x166   : > { %1438 = vst.msk [vmem:[%s2420_s5 + $0x10] sm:$0xff] %vm1435_vm0, %v1373_v12  ;;  %v1311_v23 = vadd.f32 %v1247_v11, %v945_v15  ;;  %v2446_v24 = vpop.f32.mrb[38].mxu0  ;;  %v1705_v27 = vpop.f32.mrb[38].mxu1 }
 0x167   : > { %v1376_v31 = vmax.f32 %v1312_v19, 0.0  ;;  %v960_v32 = vadd.f32 %v1705_v27, %v575_v25  ;;  %v636_v35 = vpop.f32.mrb[39].mxu0  ;;  %v954_v37 = vpop.f32.mrb[39].mxu1  ;;  %v1253_v25 = vld [vmem:[%s2403_s29 + $0x50] sm:$0xff]  ;;  %v600_v27 = vadd.f32 %v2398_v7, %v2378_v57  ;;  %v615_v57 = vadd.f32 %v2398_v7, %v2391_v5 }
 0x168   : > { %v1375_v9 = vmax.f32 %v1311_v23, 0.0  ;;  %v955_v39 = vadd.f32 %v954_v37, %v570_v20  ;;  %v1256_v35 = vld [vmem:[%s2403_s29 + $0x68] sm:$0xff]  ;;  %v1257_v5 = vld [vmem:[%s2403_s29 + $0x70] sm:$0xff] }
 0x169   : > { %1441 = vst.msk [vmem:[%s2420_s5 + $0x28] sm:$0xff] %vm1435_vm0, %v1376_v31  ;;  %v1314_v40 = vadd.f32 %v1250_v28, %v960_v32 }
 0x16a   : > { %1440 = vst.msk [vmem:[%s2420_s5 + $0x20] sm:$0xff] %vm1435_vm0, %v1375_v9  ;;  %v1313_v21 = vadd.f32 %v1249_v13, %v955_v39  ;;  %v2458_v44 = vpop.f32.mrb[40].mxu0  ;;  %v1708_v47 = vpop.f32.mrb[40].mxu1  ;;  %v1255_v39 = vld [vmem:[%s2403_s29 + $0x60] sm:$0xff] }
 0x16b   : > { %v1378_v17 = vmax.f32 %v1314_v40, 0.0  ;;  %v970_v51 = vadd.f32 %v1708_v47, %v585_v33  ;;  %v641_v52 = vpop.f32.mrb[41].mxu0  ;;  %v964_v45 = vpop.f32.mrb[41].mxu1 }
 0x16c   : > { %v1377_v56 = vmax.f32 %v1313_v21, 0.0  ;;  %v965_v59 = vadd.f32 %v964_v45, %v580_v43  ;;  %v610_v21 = vadd.f32 %v2398_v7, %v2386_v1 }
 0x16d   : > { %1443 = vst.msk [vmem:[%s2420_s5 + $0x38] sm:$0xff] %vm1435_vm0, %v1378_v17  ;;  %v1316_v63 = vadd.f32 %v1252_v48, %v970_v51  ;;  %v1258_v51 = vld [vmem:[%s2403_s29 + $0x78] sm:$0xff] }
 0x16e   : > { %1442 = vst.msk [vmem:[%s2420_s5 + $0x30] sm:$0xff] %vm1435_vm0, %v1377_v56  ;;  %v1315_v3 = vadd.f32 %v1251_v55, %v965_v59  ;;  %v2470_v4 = vpop.f32.mrb[42].mxu0  ;;  %v1711_v8 = vpop.f32.mrb[42].mxu1 }
 0x16f   : > { %v1380_v11 = vmax.f32 %v1316_v63, 0.0  ;;  %v980_v12 = vadd.f32 %v1711_v8, %v595_v41  ;;  %v646_v15 = vpop.f32.mrb[43].mxu0  ;;  %v974_v53 = vpop.f32.mrb[43].mxu1  ;;  %v625_v63 = vadd.f32 %v2398_v7, %v2422_v36  ;;  %v1259_v36 = vld [vmem:[%s2403_s29 + $0x80] sm:$0xff] }
 0x170   : > { %v1379_v19 = vmax.f32 %v1315_v3, 0.0  ;;  %v975_v20 = vadd.f32 %v974_v53, %v590_v0  ;;  %v620_v0 = vadd.f32 %v2398_v7, %v2409_v16 }
 0x171   : > { %1445 = vst.msk [vmem:[%s2420_s5 + $0x48] sm:$0xff] %vm1435_vm0, %v1380_v11  ;;  %v1318_v23 = vadd.f32 %v1254_v29, %v980_v12  ;;  %v1260_v11 = vld [vmem:[%s2403_s29 + $0x88] sm:$0xff] }
 0x172   : > { %1444 = vst.msk [vmem:[%s2420_s5 + $0x40] sm:$0xff] %vm1435_vm0, %v1379_v19  ;;  %v1317_v28 = vadd.f32 %v1253_v25, %v975_v20  ;;  %v2482_v31 = vpop.f32.mrb[44].mxu0  ;;  %v1714_v32 = vpop.f32.mrb[44].mxu1 }
 0x173   : > { %v1382_v37 = vmax.f32 %v1318_v23, 0.0  ;;  %v990_v13 = vadd.f32 %v1714_v32, %v605_v49  ;;  %v651_v9 = vpop.f32.mrb[45].mxu0  ;;  %v984_v61 = vpop.f32.mrb[45].mxu1  ;;  %v635_v49 = vadd.f32 %v2398_v7, %v2446_v24  ;;  %v630_v23 = vadd.f32 %v2398_v7, %v2434_v60  ;;  %v1261_v24 = vld [vmem:[%s2403_s29 + $0x90] sm:$0xff] }
 0x174   : > { %v1381_v33 = vmax.f32 %v1317_v28, 0.0  ;;  %v985_v40 = vadd.f32 %v984_v61, %v600_v27 }
 0x175   : > { %1447 = vst.msk [vmem:[%s2420_s5 + $0x58] sm:$0xff] %vm1435_vm0, %v1382_v37  ;;  %v1320_v43 = vadd.f32 %v1256_v35, %v990_v13  ;;  %v1262_v35 = vld [vmem:[%s2403_s29 + $0x98] sm:$0xff] }
 0x176   : > { %1446 = vst.msk [vmem:[%s2420_s5 + $0x50] sm:$0xff] %vm1435_vm0, %v1381_v33  ;;  %v1319_v47 = vadd.f32 %v1255_v39, %v985_v40  ;;  %v654_v48 = vpop.f32.mrb[46].mxu0  ;;  %v1717_v17 = vpop.f32.mrb[46].mxu1  ;;  %v645_v40 = vadd.f32 %v2398_v7, %v2470_v4  ;;  %v1263_v4 = vld [vmem:[%s2403_s29 + $0xa0] sm:$0xff] }
 0x177   : > { %v1384_v52 = vmax.f32 %v1320_v43, 0.0  ;;  %v1000_v45 = vadd.f32 %v1717_v17, %v615_v57  ;;  %v656_v55 = vpop.f32.mrb[47].mxu0  ;;  %v994_v56 = vpop.f32.mrb[47].mxu1  ;;  %v640_v57 = vadd.f32 %v2398_v7, %v2458_v44  ;;  %v1264_v17 = vld [vmem:[%s2403_s29 + $0xa8] sm:$0xff] }
 0x178   : > { %v1383_v59 = vmax.f32 %v1319_v47, 0.0  ;;  %v995_v41 = vadd.f32 %v994_v56, %v610_v21 }
 0x179   : > { %1449 = vst.msk [vmem:[%s2420_s5 + $0x68] sm:$0xff] %vm1435_vm0, %v1384_v52  ;;  %v1322_v1 = vadd.f32 %v1258_v51, %v1000_v45 }
 0x17a   : > { %1448 = vst.msk [vmem:[%s2420_s5 + $0x60] sm:$0xff] %vm1435_vm0, %v1383_v59  ;;  %v1321_v3 = vadd.f32 %v1257_v5, %v995_v41  ;;  %v659_v8 = vpop.f32.mrb[48].mxu0  ;;  %v1720_v29 = vpop.f32.mrb[48].mxu1  ;;  %v655_v59 = vadd.f32 %v2398_v7, %v654_v48  ;;  %v650_v41 = vadd.f32 %v2398_v7, %v2482_v31  ;;  %v1265_v48 = vld [vmem:[%s2403_s29 + $0xb0] sm:$0xff] }
 0x17b   : > { %v1386_v12 = vmax.f32 %v1322_v1, 0.0  ;;  %v1010_v15 = vadd.f32 %v1720_v29, %v625_v63  ;;  %v661_v53 = vpop.f32.mrb[49].mxu0  ;;  %v1004_v25 = vpop.f32.mrb[49].mxu1 }
 0x17c   : > { %v1385_v19 = vmax.f32 %v1321_v3, 0.0  ;;  %v1005_v20 = vadd.f32 %v1004_v25, %v620_v0  ;;  %v1266_v3 = vld [vmem:[%s2403_s29 + $0xb8] sm:$0xff] }
 0x17d   : > { %1451 = vst.msk [vmem:[%s2420_s5 + $0x78] sm:$0xff] %vm1435_vm0, %v1386_v12  ;;  %v1324_v16 = vadd.f32 %v1260_v11, %v1010_v15 }
 0x17e   : > { %1450 = vst.msk [vmem:[%s2420_s5 + $0x70] sm:$0xff] %vm1435_vm0, %v1385_v19  ;;  %v1323_v27 = vadd.f32 %v1259_v36, %v1005_v20  ;;  %v664_v28 = vpop.f32.mrb[50].mxu0  ;;  %v1723_v32 = vpop.f32.mrb[50].mxu1  ;;  %v660_v19 = vadd.f32 %v2398_v7, %v659_v8 }
 0x17f   : > { %v1388_v37 = vmax.f32 %v1324_v16, 0.0  ;;  %v1020_v13 = vadd.f32 %v1723_v32, %v635_v49  ;;  %v666_v9 = vpop.f32.mrb[51].mxu0  ;;  %v1014_v61 = vpop.f32.mrb[51].mxu1  ;;  %v665_v36 = vadd.f32 %v2398_v7, %v664_v28 }
 0x180   : > { %v1387_v39 = vmax.f32 %v1323_v27, 0.0  ;;  %v1015_v33 = vadd.f32 %v1014_v61, %v630_v23  ;;  %v1268_v23 = vld [vmem:[%s2403_s29 + $0xc8] sm:$0xff] }
 0x181   : > { %1453 = vst.msk [vmem:[%s2420_s5 + $0x88] sm:$0xff] %vm1435_vm0, %v1388_v37  ;;  %v1326_v60 = vadd.f32 %v1262_v35, %v1020_v13  ;;  %v1267_v13 = vld [vmem:[%s2403_s29 + $0xc0] sm:$0xff] }
 0x182   : > { %1452 = vst.msk [vmem:[%s2420_s5 + $0x80] sm:$0xff] %vm1435_vm0, %v1387_v39  ;;  %v1325_v43 = vadd.f32 %v1261_v24, %v1015_v33  ;;  %v669_v21 = vpop.f32.mrb[52].mxu0  ;;  %v1726_v47 = vpop.f32.mrb[52].mxu1 }
 0x183   : > { %v1390_v51 = vmax.f32 %v1326_v60, 0.0  ;;  %v1030_v52 = vadd.f32 %v1726_v47, %v645_v40  ;;  %v671_v45 = vpop.f32.mrb[53].mxu0  ;;  %v1024_v55 = vpop.f32.mrb[53].mxu1  ;;  %v670_v24 = vadd.f32 %v2398_v7, %v669_v21  ;;  %v1270_v60 = vld [vmem:[%s2403_s29 + $0xd8] sm:$0xff] }
 0x184   : > { %v1389_v56 = vmax.f32 %v1325_v43, 0.0  ;;  %v1025_v5 = vadd.f32 %v1024_v55, %v640_v57 }
 0x185   : > { %1455 = vst.msk [vmem:[%s2420_s5 + $0x98] sm:$0xff] %vm1435_vm0, %v1390_v51  ;;  %v1328_v44 = vadd.f32 %v1264_v17, %v1030_v52  ;;  %v1269_v51 = vld [vmem:[%s2403_s29 + $0xd0] sm:$0xff] }
 0x186   : > { %1454 = vst.msk [vmem:[%s2420_s5 + $0x90] sm:$0xff] %vm1435_vm0, %v1389_v56  ;;  %v1327_v63 = vadd.f32 %v1263_v4, %v1025_v5  ;;  %v674_v1 = vpop.f32.mrb[54].mxu0  ;;  %v1729_v0 = vpop.f32.mrb[54].mxu1 }
 0x187   : > { %v1392_v29 = vmax.f32 %v1328_v44, 0.0  ;;  %v1040_v11 = vadd.f32 %v1729_v0, %v655_v59  ;;  %v676_v12 = vpop.f32.mrb[55].mxu0  ;;  %v1034_v15 = vpop.f32.mrb[55].mxu1  ;;  %v675_v61 = vadd.f32 %v2398_v7, %v674_v1  ;;  %v1272_v44 = vld [vmem:[%s2403_s29 + $0xe8] sm:$0xff] }
 0x188   : > { %v1391_v53 = vmax.f32 %v1327_v63, 0.0  ;;  %v1035_v25 = vadd.f32 %v1034_v15, %v650_v41 }
 0x189   : > { %1457 = vst.msk [vmem:[%s2420_s5 + $0xa8] sm:$0xff] %vm1435_vm0, %v1392_v29  ;;  %v1330_v31 = vadd.f32 %v1266_v3, %v1040_v11  ;;  %v1271_v3 = vld [vmem:[%s2403_s29 + $0xe0] sm:$0xff] }
 0x18a   : > { %1456 = vst.msk [vmem:[%s2420_s5 + $0xa0] sm:$0xff] %vm1435_vm0, %v1391_v53  ;;  %v1329_v20 = vadd.f32 %v1265_v48, %v1035_v25  ;;  %v679_v49 = vpop.f32.mrb[56].mxu0  ;;  %v1732_v16 = vpop.f32.mrb[56].mxu1 }
 0x18b   : > { %v1394_v27 = vmax.f32 %v1330_v31, 0.0  ;;  %v1050_v32 = vadd.f32 %v1732_v16, %v665_v36  ;;  %v681_v35 = vpop.f32.mrb[57].mxu0  ;;  %v1044_v37 = vpop.f32.mrb[57].mxu1  ;;  %v680_v4 = vadd.f32 %v2398_v7, %v679_v49  ;;  %v1273_v49 = vld [vmem:[%s2403_s29 + $0xf0] sm:$0xff] }
 0x18c   : > { %v1393_v28 = vmax.f32 %v1329_v20, 0.0  ;;  %v1045_v9 = vadd.f32 %v1044_v37, %v660_v19 }
 0x18d   : > { %1459 = vst.msk [vmem:[%s2420_s5 + $0xb8] sm:$0xff] %vm1435_vm0, %v1394_v27  ;;  %v1332_v8 = vadd.f32 %v1268_v23, %v1050_v32  ;;  %v1274_v23 = vld [vmem:[%s2403_s29 + $0xf8] sm:$0xff] }
 0x18e   : > { %1458 = vst.msk [vmem:[%s2420_s5 + $0xb0] sm:$0xff] %vm1435_vm0, %v1393_v28  ;;  %v1331_v39 = vadd.f32 %v1267_v13, %v1045_v9  ;;  %v684_v33 = vpop.f32.mrb[58].mxu0  ;;  %v1735_v40 = vpop.f32.mrb[58].mxu1 }
 0x18f   : > { %v1396_v57 = vmax.f32 %v1332_v8, 0.0  ;;  %v1060_v43 = vadd.f32 %v1735_v40, %v675_v61  ;;  %v686_v47 = vpop.f32.mrb[59].mxu0  ;;  %v1054_v17 = vpop.f32.mrb[59].mxu1  ;;  %v685_v21 = vadd.f32 %v2398_v7, %v684_v33 }
 0x190   : > { %v1395_v52 = vmax.f32 %v1331_v39, 0.0  ;;  %v1055_v45 = vadd.f32 %v1054_v17, %v670_v24  ;;  %v1275_v39 = vld [vmem:[%s2403_s29 + $0x100] sm:$0xff] }
 0x191   : > { %1461 = vst.msk [vmem:[%s2420_s5 + $0xc8] sm:$0xff] %vm1435_vm0, %v1396_v57  ;;  %v1334_v55 = vadd.f32 %v1270_v60, %v1060_v43 }
 0x192   : > { %1460 = vst.msk [vmem:[%s2420_s5 + $0xc0] sm:$0xff] %vm1435_vm0, %v1395_v52  ;;  %v1333_v56 = vadd.f32 %v1269_v51, %v1055_v45  ;;  %v689_v5 = vpop.f32.mrb[60].mxu0  ;;  %v1738_v59 = vpop.f32.mrb[60].mxu1  ;;  %v1276_v52 = vld [vmem:[%s2403_s29 + $0x108] sm:$0xff] }
 0x193   : > { %v1398_v41 = vmax.f32 %v1334_v55, 0.0  ;;  %v1070_v63 = vadd.f32 %v1738_v59, %v685_v21  ;;  %v691_v1 = vpop.f32.mrb[61].mxu0  ;;  %v1064_v0 = vpop.f32.mrb[61].mxu1  ;;  %v690_v15 = vadd.f32 %v2398_v7, %v689_v5 }
 0x194   : > { %v1397_v29 = vmax.f32 %v1333_v56, 0.0  ;;  %v1065_v11 = vadd.f32 %v1064_v0, %v680_v4 }
 0x195   : > { %1463 = vst.msk [vmem:[%s2420_s5 + $0xd8] sm:$0xff] %vm1435_vm0, %v1398_v41  ;;  %v1336_v12 = vadd.f32 %v1272_v44, %v1070_v63  ;;  %v1277_v41 = vld [vmem:[%s2403_s29 + $0x110] sm:$0xff] }
 0x196   : > { %1462 = vst.msk [vmem:[%s2420_s5 + $0xd0] sm:$0xff] %vm1435_vm0, %v1397_v29  ;;  %v1335_v48 = vadd.f32 %v1271_v3, %v1065_v11  ;;  %v694_v53 = vpop.f32.mrb[62].mxu0  ;;  %v1741_v25 = vpop.f32.mrb[62].mxu1 }
 0x197   : > { %v1400_v36 = vmax.f32 %v1336_v12, 0.0  ;;  %v695_v31 = vadd.f32 %v2398_v7, %v694_v53  ;;  %v696_v19 = vpop.f32.mrb[63].mxu0  ;;  %v1074_v20 = vpop.f32.mrb[63].mxu1 }
 0x198   : > { %v1399_v16 = vmax.f32 %v1335_v48, 0.0  ;;  %v1075_v27 = vadd.f32 %v1074_v20, %v690_v15  ;;  %v1278_v48 = vld [vmem:[%s2403_s29 + $0x118] sm:$0xff] }
 0x199   : > { %1465 = vst.msk [vmem:[%s2420_s5 + $0xe8] sm:$0xff] %vm1435_vm0, %v1400_v36  ;;  %v1080_v32 = vadd.f32 %v1741_v25, %v695_v31 }
 0x19a   : > { %1464 = vst.msk [vmem:[%s2420_s5 + $0xe0] sm:$0xff] %vm1435_vm0, %v1399_v16  ;;  %v1337_v35 = vadd.f32 %v1273_v49, %v1075_v27  ;;  %v699_v37 = vpop.f32.mrb[64].mxu0  ;;  %v1744_v13 = vpop.f32.mrb[64].mxu1 }
 0x19b   : > { %v1338_v28 = vadd.f32 %v1274_v23, %v1080_v32  ;;  %v700_v9 = vadd.f32 %v2398_v7, %v699_v37  ;;  %v701_v61 = vpop.f32.mrb[65].mxu0  ;;  %v1084_v8 = vpop.f32.mrb[65].mxu1  ;;  %v1279_v23 = vld [vmem:[%s2403_s29 + $0x120] sm:$0xff] }
 0x19c   : > { %v1401_v24 = vmax.f32 %v1337_v35, 0.0 }
 0x19d   : > { %v1402_v33 = vmax.f32 %v1338_v28, 0.0  ;;  %v1085_v40 = vadd.f32 %v1084_v8, %v700_v9  ;;  %v1280_v8 = vld [vmem:[%s2403_s29 + $0x128] sm:$0xff] }
 0x19e   : > { %1466 = vst.msk [vmem:[%s2420_s5 + $0xf0] sm:$0xff] %vm1435_vm0, %v1401_v24  ;;  %v704_v60 = vpop.f32.mrb[66].mxu0  ;;  %v1747_v57 = vpop.f32.mrb[66].mxu1 }
 0x19f   : > { %1467 = vst.msk [vmem:[%s2420_s5 + $0xf8] sm:$0xff] %vm1435_vm0, %v1402_v33  ;;  %v1339_v43 = vadd.f32 %v1275_v39, %v1085_v40  ;;  %v705_v47 = vadd.f32 %v2398_v7, %v704_v60  ;;  %v706_v17 = vpop.f32.mrb[67].mxu0  ;;  %v1094_v51 = vpop.f32.mrb[67].mxu1 }
 0x1a0   : > { %v1281_v17 = vld [vmem:[%s2403_s29 + $0x130] sm:$0xff] }
 0x1a1   : > { %v1403_v45 = vmax.f32 %v1339_v43, 0.0  ;;  %v1090_v21 = vadd.f32 %v1744_v13, %v705_v47 }
 0x1a2   : > { %v709_v55 = vpop.f32.mrb[68].mxu0  ;;  %v1750_v4 = vpop.f32.mrb[68].mxu1 }
 0x1a3   : > { %1468 = vst.msk [vmem:[%s2420_s5 + $0x100] sm:$0xff] %vm1435_vm0, %v1403_v45  ;;  %v1340_v56 = vadd.f32 %v1276_v52, %v1090_v21  ;;  %v710_v5 = vadd.f32 %v2398_v7, %v709_v55  ;;  %v711_v59 = vpop.f32.mrb[69].mxu0  ;;  %v1104_v44 = vpop.f32.mrb[69].mxu1 }
 0x1a4   : > { %v1282_v59 = vld [vmem:[%s2403_s29 + $0x138] sm:$0xff] }
 0x1a5   : > { %v1404_v63 = vmax.f32 %v1340_v56, 0.0  ;;  %v1095_v1 = vadd.f32 %v1094_v51, %v710_v5 }
 0x1a6   : > { %v714_v0 = vpop.f32.mrb[70].mxu0  ;;  %v1753_v3 = vpop.f32.mrb[70].mxu1 }
 0x1a7   : > { %1469 = vst.msk [vmem:[%s2420_s5 + $0x108] sm:$0xff] %vm1435_vm0, %v1404_v63  ;;  %v1341_v29 = vadd.f32 %v1277_v41, %v1095_v1  ;;  %v715_v11 = vadd.f32 %v2398_v7, %v714_v0  ;;  %v716_v12 = vpop.f32.mrb[71].mxu0  ;;  %v1114_v15 = vpop.f32.mrb[71].mxu1  ;;  %v780_v1 = vadd.f32 %v2398_v7, %v2332_v10 }
 0x1a9   : > { %v1405_v53 = vmax.f32 %v1341_v29, 0.0  ;;  %v1100_v25 = vadd.f32 %v1747_v57, %v715_v11  ;;  %v1292_v11 = vld [vmem:[%s2403_s29 + $0x188] sm:$0xff] }
 0x1aa   : > { %v719_v36 = vpop.f32.mrb[72].mxu0  ;;  %v2587_v31 = vpop.f32.mrb[72].mxu1 }
 0x1ab   : > { %1470 = vst.msk [vmem:[%s2420_s5 + $0x110] sm:$0xff] %vm1435_vm0, %v1405_v53  ;;  %v1342_v19 = vadd.f32 %v1278_v48, %v1100_v25  ;;  %v720_v20 = vadd.f32 %v2398_v7, %v719_v36  ;;  %v721_v49 = vpop.f32.mrb[73].mxu0  ;;  %v1124_v16 = vpop.f32.mrb[73].mxu1  ;;  %v1291_v36 = vld [vmem:[%s2403_s29 + $0x180] sm:$0xff] }
 0x1ad   : > { %v1406_v27 = vmax.f32 %v1342_v19, 0.0  ;;  %v1105_v32 = vadd.f32 %v1104_v44, %v720_v20  ;;  %v785_v44 = vadd.f32 %v2398_v7, %v2336_v14  ;;  %v1283_v14 = vld [vmem:[%s2403_s29 + $0x140] sm:$0xff] }
 0x1ae   : > { %v724_v35 = vpop.f32.mrb[74].mxu0  ;;  %v2593_v37 = vpop.f32.mrb[74].mxu1 }
 0x1af   : > { %1471 = vst.msk [vmem:[%s2420_s5 + $0x118] sm:$0xff] %vm1435_vm0, %v1406_v27  ;;  %v1343_v13 = vadd.f32 %v1279_v23, %v1105_v32  ;;  %v725_v28 = vadd.f32 %v2398_v7, %v724_v35  ;;  %v726_v9 = vpop.f32.mrb[75].mxu0  ;;  %v2598_v61 = vpop.f32.mrb[75].mxu1  ;;  %v790_v23 = vadd.f32 %v2398_v7, %v2340_v18  ;;  %v1284_v18 = vld [vmem:[%s2403_s29 + $0x148] sm:$0xff] }
 0x1b1   : > { %v1407_v24 = vmax.f32 %v1343_v13, 0.0  ;;  %v1110_v39 = vadd.f32 %v1750_v4, %v725_v28  ;;  %v1294_v13 = vld [vmem:[%s2403_s29 + $0x198] sm:$0xff] }
 0x1b2   : > { %v729_v33 = vpop.f32.mrb[76].mxu0  ;;  %v2601_v40 = vpop.f32.mrb[76].mxu1 }
 0x1b3   : > { %1472 = vst.msk [vmem:[%s2420_s5 + $0x120] sm:$0xff] %vm1435_vm0, %v1407_v24  ;;  %v1344_v60 = vadd.f32 %v1280_v8, %v1110_v39  ;;  %v730_v57 = vadd.f32 %v2398_v7, %v729_v33  ;;  %v731_v43 = vpop.f32.mrb[77].mxu0  ;;  %v2606_v47 = vpop.f32.mrb[77].mxu1  ;;  %v1293_v39 = vld [vmem:[%s2403_s29 + $0x190] sm:$0xff] }
 0x1b5   : > { %v1408_v51 = vmax.f32 %v1344_v60, 0.0  ;;  %v1115_v52 = vadd.f32 %v1114_v15, %v730_v57  ;;  %v805_v57 = vadd.f32 %v2398_v7, %v2352_v30 }
 0x1b6   : > { %v734_v45 = vpop.f32.mrb[78].mxu0  ;;  %v2609_v21 = vpop.f32.mrb[78].mxu1 }
 0x1b7   : > { %1473 = vst.msk [vmem:[%s2420_s5 + $0x128] sm:$0xff] %vm1435_vm0, %v1408_v51  ;;  %v1345_v55 = vadd.f32 %v1281_v17, %v1115_v52  ;;  %v735_v4 = vadd.f32 %v2398_v7, %v734_v45  ;;  %v736_v56 = vpop.f32.mrb[79].mxu0  ;;  %v2614_v5 = vpop.f32.mrb[79].mxu1  ;;  %v800_v52 = vadd.f32 %v2398_v7, %v2348_v26  ;;  %v1295_v26 = vld [vmem:[%s2403_s29 + $0x1a0] sm:$0xff] }
 0x1b8   : > { %v1296_v56 = vld [vmem:[%s2403_s29 + $0x1a8] sm:$0xff] }
 0x1b9   : > { %v1409_v41 = vmax.f32 %v1345_v55, 0.0  ;;  %v1120_v63 = vadd.f32 %v1753_v3, %v735_v4  ;;  %v795_v3 = vadd.f32 %v2398_v7, %v2344_v22 }
 0x1ba   : > { %v739_v0 = vpop.f32.mrb[80].mxu0  ;;  %v1768_v29 = vpop.f32.mrb[80].mxu1 }
 0x1bb   : > { %1474 = vst.msk [vmem:[%s2420_s5 + $0x130] sm:$0xff] %vm1435_vm0, %v1409_v41  ;;  %v1346_v12 = vadd.f32 %v1282_v59, %v1120_v63  ;;  %v740_v15 = vadd.f32 %v2398_v7, %v739_v0  ;;  %v1170_v48 = vadd.f32 %v1768_v29, %v785_v44  ;;  %v741_v53 = vpop.f32.mrb[81].mxu0  ;;  %v1164_v25 = vpop.f32.mrb[81].mxu1  ;;  %v1285_v0 = vld [vmem:[%s2403_s29 + $0x150] sm:$0xff] }
 0x1bc   : > { %v1165_v19 = vadd.f32 %v1164_v25, %v780_v1  ;;  %v810_v53 = vadd.f32 %v2398_v7, %v2356_v34  ;;  %v1297_v34 = vld [vmem:[%s2403_s29 + $0x1b0] sm:$0xff] }
 0x1bd   : > { %v1410_v10 = vmax.f32 %v1346_v12, 0.0  ;;  %v1125_v20 = vadd.f32 %v1124_v16, %v740_v15  ;;  %v1356_v49 = vadd.f32 %v1292_v11, %v1170_v48  ;;  %v815_v11 = vadd.f32 %v2398_v7, %v2360_v38 }
 0x1be   : > { %v1355_v27 = vadd.f32 %v1291_v36, %v1165_v19  ;;  %v744_v32 = vpop.f32.mrb[82].mxu0  ;;  %v1771_v35 = vpop.f32.mrb[82].mxu1  ;;  %v1298_v19 = vld [vmem:[%s2403_s29 + $0x1b8] sm:$0xff] }
 0x1bf   : > { %1475 = vst.msk [vmem:[%s2420_s5 + $0x138] sm:$0xff] %vm1435_vm0, %v1410_v10  ;;  %v1347_v28 = vadd.f32 %v1283_v14, %v1125_v20  ;;  %v1420_v9 = vmax.f32 %v1356_v49, 0.0  ;;  %v745_v22 = vadd.f32 %v2398_v7, %v744_v32  ;;  %v1180_v8 = vadd.f32 %v1771_v35, %v795_v3  ;;  %v746_v24 = vpop.f32.mrb[83].mxu0  ;;  %v1174_v16 = vpop.f32.mrb[83].mxu1 }
 0x1c0   : > { %v1419_v33 = vmax.f32 %v1355_v27, 0.0  ;;  %v1175_v60 = vadd.f32 %v1174_v16, %v790_v23  ;;  %v1286_v27 = vld [vmem:[%s2403_s29 + $0x158] sm:$0xff]  ;;  %v825_v35 = vadd.f32 %v2398_v7, %v2368_v46 }
 0x1c1   : > { %v1411_v43 = vmax.f32 %v1347_v28, 0.0  ;;  %1485 = vst.msk [vmem:[%s2420_s5 + $0x188] sm:$0xff] %vm1435_vm0, %v1420_v9  ;;  %v1130_v17 = vadd.f32 %v2587_v31, %v745_v22  ;;  %v1358_v51 = vadd.f32 %v1294_v13, %v1180_v8  ;;  %v820_v22 = vadd.f32 %v2398_v7, %v2364_v42  ;;  %v1299_v42 = vld [vmem:[%s2403_s29 + $0x1c0] sm:$0xff] }
 0x1c2   : > { %1484 = vst.msk [vmem:[%s2420_s5 + $0x180] sm:$0xff] %vm1435_vm0, %v1419_v33  ;;  %v1357_v45 = vadd.f32 %v1293_v39, %v1175_v60  ;;  %v749_v55 = vpop.f32.mrb[84].mxu0  ;;  %v1774_v4 = vpop.f32.mrb[84].mxu1  ;;  %v1300_v39 = vld [vmem:[%s2403_s29 + $0x1c8] sm:$0xff] }
 0x1c3   : > { %1476 = vst.msk [vmem:[%s2420_s5 + $0x140] sm:$0xff] %vm1435_vm0, %v1411_v43  ;;  %v1348_v30 = vadd.f32 %v1284_v18, %v1130_v17  ;;  %v1422_v59 = vmax.f32 %v1358_v51, 0.0  ;;  %v750_v44 = vadd.f32 %v2398_v7, %v749_v55  ;;  %v1190_v31 = vadd.f32 %v1774_v4, %v805_v57  ;;  %v751_v41 = vpop.f32.mrb[85].mxu0  ;;  %v1184_v63 = vpop.f32.mrb[85].mxu1  ;;  %v1287_v17 = vld [vmem:[%s2403_s29 + $0x160] sm:$0xff] }
 0x1c4   : > { %v1421_v1 = vmax.f32 %v1357_v45, 0.0  ;;  %v1185_v29 = vadd.f32 %v1184_v63, %v800_v52  ;;  %v835_v52 = vadd.f32 %v2398_v7, %v2376_v54 }
 0x1c5   : > { %v1412_v12 = vmax.f32 %v1348_v30, 0.0  ;;  %1487 = vst.msk [vmem:[%s2420_s5 + $0x198] sm:$0xff] %vm1435_vm0, %v1422_v59  ;;  %v1135_v15 = vadd.f32 %v2598_v61, %v750_v44  ;;  %v1360_v48 = vadd.f32 %v1296_v56, %v1190_v31  ;;  %v830_v56 = vadd.f32 %v2398_v7, %v2372_v50  ;;  %v1302_v31 = vld [vmem:[%s2403_s29 + $0x1d8] sm:$0xff]  ;;  %v1301_v50 = vld [vmem:[%s2403_s29 + $0x1d0] sm:$0xff] }
 0x1c6   : > { %1486 = vst.msk [vmem:[%s2420_s5 + $0x190] sm:$0xff] %vm1435_vm0, %v1421_v1  ;;  %v1359_v25 = vadd.f32 %v1295_v26, %v1185_v29  ;;  %v754_v36 = vpop.f32.mrb[86].mxu0  ;;  %v1777_v14 = vpop.f32.mrb[86].mxu1  ;;  %v1288_v29 = vld [vmem:[%s2403_s29 + $0x168] sm:$0xff] }
 0x1c7   : > { %1477 = vst.msk [vmem:[%s2420_s5 + $0x148] sm:$0xff] %vm1435_vm0, %v1412_v12  ;;  %v1349_v38 = vadd.f32 %v1285_v0, %v1135_v15  ;;  %v1424_v3 = vmax.f32 %v1360_v48, 0.0  ;;  %v755_v10 = vadd.f32 %v2398_v7, %v754_v36  ;;  %v1200_v61 = vadd.f32 %v1777_v14, %v815_v11  ;;  %v756_v20 = vpop.f32.mrb[87].mxu0  ;;  %v1194_v49 = vpop.f32.mrb[87].mxu1 }
 0x1c8   : > { %v1423_v23 = vmax.f32 %v1359_v25, 0.0  ;;  %v1195_v32 = vadd.f32 %v1194_v49, %v810_v53  ;;  %v845_v12 = vadd.f32 %v2398_v7, %v2384_v62  ;;  %v840_v25 = vadd.f32 %v2398_v7, %v2380_v58  ;;  %v1303_v58 = vld [vmem:[%s2403_s29 + $0x1e0] sm:$0xff] }
 0x1c9   : > { %v1413_v13 = vmax.f32 %v1349_v38, 0.0  ;;  %1489 = vst.msk [vmem:[%s2420_s5 + $0x1a8] sm:$0xff] %vm1435_vm0, %v1424_v3  ;;  %v1140_v28 = vadd.f32 %v2593_v37, %v755_v10  ;;  %v1362_v9 = vadd.f32 %v1298_v19, %v1200_v61  ;;  %v1304_v38 = vld [vmem:[%s2403_s29 + $0x1e8] sm:$0xff] }
 0x1ca   : > { %1488 = vst.msk [vmem:[%s2420_s5 + $0x1a0] sm:$0xff] %vm1435_vm0, %v1423_v23  ;;  %v1361_v8 = vadd.f32 %v1297_v34, %v1195_v32  ;;  %v759_v24 = vpop.f32.mrb[88].mxu0  ;;  %v1780_v16 = vpop.f32.mrb[88].mxu1  ;;  %v1289_v34 = vld [vmem:[%s2403_s29 + $0x170] sm:$0xff] }
 0x1cb   : > { %1478 = vst.msk [vmem:[%s2420_s5 + $0x150] sm:$0xff] %vm1435_vm0, %v1413_v13  ;;  %v1350_v46 = vadd.f32 %v1286_v27, %v1140_v28  ;;  %v1426_v33 = vmax.f32 %v1362_v9, 0.0  ;;  %v760_v18 = vadd.f32 %v2398_v7, %v759_v24  ;;  %v1210_v37 = vadd.f32 %v1780_v16, %v825_v35  ;;  %v761_v60 = vpop.f32.mrb[89].mxu0  ;;  %v1204_v57 = vpop.f32.mrb[89].mxu1  ;;  %v1306_v24 = vld [vmem:[%s2403_s29 + $0x1f8] sm:$0xff] }
 0x1cc   : > { %v1425_v43 = vmax.f32 %v1361_v8, 0.0  ;;  %v1205_v51 = vadd.f32 %v1204_v57, %v820_v22  ;;  %v855_v27 = vadd.f32 %v2398_v7, %v2393_v6  ;;  %v850_v28 = vadd.f32 %v2398_v7, %v2388_v2  ;;  %v1305_v2 = vld [vmem:[%s2403_s29 + $0x1f0] sm:$0xff] }
 0x1cd   : > { %v1414_v45 = vmax.f32 %v1350_v46, 0.0  ;;  %1491 = vst.msk [vmem:[%s2420_s5 + $0x1b8] sm:$0xff] %vm1435_vm0, %v1426_v33  ;;  %v1145_v55 = vadd.f32 %v2606_v47, %v760_v18  ;;  %v1364_v4 = vadd.f32 %v1300_v39, %v1210_v37  ;;  %v1290_v37 = vld [vmem:[%s2403_s29 + $0x178] sm:$0xff] }
 0x1ce   : > { %1490 = vst.msk [vmem:[%s2420_s5 + $0x1b0] sm:$0xff] %vm1435_vm0, %v1425_v43  ;;  %v1363_v30 = vadd.f32 %v1299_v42, %v1205_v51  ;;  %v764_v59 = vpop.f32.mrb[90].mxu0  ;;  %v1783_v44 = vpop.f32.mrb[90].mxu1 }
 0x1cf   : > { %1479 = vst.msk [vmem:[%s2420_s5 + $0x158] sm:$0xff] %vm1435_vm0, %v1414_v45  ;;  %v1351_v54 = vadd.f32 %v1287_v17, %v1145_v55  ;;  %v1428_v41 = vmax.f32 %v1364_v4, 0.0  ;;  %v765_v63 = vadd.f32 %v2398_v7, %v764_v59  ;;  %v1220_v47 = vadd.f32 %v1783_v44, %v835_v52  ;;  %v766_v26 = vpop.f32.mrb[91].mxu0  ;;  %v1214_v1 = vpop.f32.mrb[91].mxu1 }
 0x1d0   : > { %v1427_v0 = vmax.f32 %v1363_v30, 0.0  ;;  %v1215_v11 = vadd.f32 %v1214_v1, %v830_v56 }
 0x1d1   : > { %v1415_v15 = vmax.f32 %v1351_v54, 0.0  ;;  %1493 = vst.msk [vmem:[%s2420_s5 + $0x1c8] sm:$0xff] %vm1435_vm0, %v1428_v41  ;;  %v1150_v48 = vadd.f32 %v2601_v40, %v765_v63  ;;  %v1366_v53 = vadd.f32 %v1302_v31, %v1220_v47 }
 0x1d2   : > { %1492 = vst.msk [vmem:[%s2420_s5 + $0x1c0] sm:$0xff] %vm1435_vm0, %v1427_v0  ;;  %v1365_v36 = vadd.f32 %v1301_v50, %v1215_v11  ;;  %v769_v14 = vpop.f32.mrb[92].mxu0  ;;  %v1786_v19 = vpop.f32.mrb[92].mxu1 }
 0x1d3   : > { %1480 = vst.msk [vmem:[%s2420_s5 + $0x160] sm:$0xff] %vm1435_vm0, %v1415_v15  ;;  %v1352_v62 = vadd.f32 %v1288_v29, %v1150_v48  ;;  %v1430_v3 = vmax.f32 %v1366_v53, 0.0  ;;  %v770_v10 = vadd.f32 %v2398_v7, %v769_v14  ;;  %v1230_v40 = vadd.f32 %v1786_v19, %v845_v12  ;;  %v771_v61 = vpop.f32.mrb[93].mxu0  ;;  %v1224_v20 = vpop.f32.mrb[93].mxu1 }
 0x1d4   : > { %v1429_v49 = vmax.f32 %v1365_v36, 0.0  ;;  %v1225_v23 = vadd.f32 %v1224_v20, %v840_v25 }
 0x1d5   : > { %v1416_v32 = vmax.f32 %v1352_v62, 0.0  ;;  %1495 = vst.msk [vmem:[%s2420_s5 + $0x1d8] sm:$0xff] %vm1435_vm0, %v1430_v3  ;;  %v1155_v35 = vadd.f32 %v2614_v5, %v770_v10  ;;  %v1368_v13 = vadd.f32 %v1304_v38, %v1230_v40 }
 0x1d6   : > { %1494 = vst.msk [vmem:[%s2420_s5 + $0x1d0] sm:$0xff] %vm1435_vm0, %v1429_v49  ;;  %v1367_v9 = vadd.f32 %v1303_v58, %v1225_v23  ;;  %v774_v22 = vpop.f32.mrb[94].mxu0  ;;  %v1789_v8 = vpop.f32.mrb[94].mxu1 }
 0x1d7   : > { %1481 = vst.msk [vmem:[%s2420_s5 + $0x168] sm:$0xff] %vm1435_vm0, %v1416_v32  ;;  %v1353_v6 = vadd.f32 %v1289_v34, %v1155_v35  ;;  %v1432_v16 = vmax.f32 %v1368_v13, 0.0  ;;  %v775_v5 = vadd.f32 %v2398_v7, %v774_v22  ;;  %v1240_v39 = vadd.f32 %v1789_v8, %v855_v27  ;;  %v776_v46 = vpop.f32.mrb[95].mxu0  ;;  %v1234_v33 = vpop.f32.mrb[95].mxu1 }
 0x1d8   : > { %v1431_v18 = vmax.f32 %v1367_v9, 0.0  ;;  %v1235_v60 = vadd.f32 %v1234_v33, %v850_v28 }
 0x1d9   : > { %v1417_v57 = vmax.f32 %v1353_v6, 0.0  ;;  %1497 = vst.msk [vmem:[%s2420_s5 + $0x1e8] sm:$0xff] %vm1435_vm0, %v1432_v16  ;;  %v1160_v42 = vadd.f32 %v2609_v21, %v775_v5  ;;  %v1370_v43 = vadd.f32 %v1306_v24, %v1240_v39 }
 0x1da   : > { %1496 = vst.msk [vmem:[%s2420_s5 + $0x1e0] sm:$0xff] %vm1435_vm0, %v1431_v18  ;;  %v1369_v17 = vadd.f32 %v1305_v2, %v1235_v60 }
 0x1db   : > { %1482 = vst.msk [vmem:[%s2420_s5 + $0x170] sm:$0xff] %vm1435_vm0, %v1417_v57  ;;  %v1354_v7 = vadd.f32 %v1290_v37, %v1160_v42  ;;  %v1434_v51 = vmax.f32 %v1370_v43, 0.0 }
 0x1dc   : > { %v1433_v52 = vmax.f32 %v1369_v17, 0.0 }
 0x1dd   : > { %v1418_v45 = vmax.f32 %v1354_v7, 0.0  ;;  %1499 = vst.msk [vmem:[%s2420_s5 + $0x1f8] sm:$0xff] %vm1435_vm0, %v1434_v51 }
 0x1de   : > { %1498 = vst.msk [vmem:[%s2420_s5 + $0x1f0] sm:$0xff] %vm1435_vm0, %v1433_v52 }
 0x1df   : > { %1483 = vst.msk [vmem:[%s2420_s5 + $0x178] sm:$0xff] %vm1435_vm0, %v1418_v45 }
 0x1e0 PF: > { %s14_s15 = sadd.s32 1, %s1918_s15  }
 0x1e1   : > { %p11_p4 = scmp.ge.s32.totalorder %s14_s15, 5  }
 0x1e3   :  { %13 = sbr.rel (!%p11_p4) target bundleno = 1 (0x1), region = 69 }

// kernel: myresnet_forward.12
= control target key start
LH: loop header
LB: loop body
LE: loop exit
PB: predicated region body
PF: predicated region fallthrough
CT: control target
= control target key end

     0   :  { %vm318_vm0 = vcmask 261120   ;;  %s1079_s0 = inlined_call_operand.vmem [shape: f32[344,32], index: 0, kind: input, shape index: {}]   ;;  %s1080_s1 = inlined_call_operand.vmem [shape: f32[344,32], index: 1, kind: input, shape index: {}]   ;;  %s1081_s2 = inlined_call_operand.vmem [shape: f32[344,32], index: 2, kind: input, shape index: {}]   ;;  %s1082_s3 = inlined_call_operand.vmem [shape: f32[344,32], index: 3, kind: input, shape index: {}]   ;;  %s1083_s4 = inlined_call_operand.vmem [shape: f32[344,32], index: 4, kind: output, shape index: {}]  }
   0x1   :  { %v17_v0 = vld [vmem:[%s1079_s0] sm:$0xff]  ;;  %v18_v5 = vld [vmem:[%s1079_s0 + $0x8] sm:$0xff]  ;;  %v19_v11 = vld [vmem:[%s1079_s0 + $0x10] sm:$0xff] }
   0x2   :  { %v60_v1 = vld [vmem:[%s1080_s1] sm:$0xff]  ;;  %v61_v6 = vld [vmem:[%s1080_s1 + $0x8] sm:$0xff]  ;;  %v62_v13 = vld [vmem:[%s1080_s1 + $0x10] sm:$0xff] }
   0x3   :  { %v146_v2 = vld [vmem:[%s1081_s2] sm:$0xff]  ;;  %v103_v3 = vmax.f32 %v17_v0, %v60_v1  ;;  %v104_v8 = vmax.f32 %v18_v5, %v61_v6  ;;  %v147_v9 = vld [vmem:[%s1081_s2 + $0x8] sm:$0xff]  ;;  %v148_v14 = vld [vmem:[%s1081_s2 + $0x10] sm:$0xff]  ;;  %v105_v17 = vmax.f32 %v19_v11, %v62_v13 }
   0x4   :  { %v189_v4 = vld [vmem:[%s1082_s3] sm:$0xff]  ;;  %v190_v10 = vld [vmem:[%s1082_s3 + $0x8] sm:$0xff]  ;;  %v191_v15 = vld [vmem:[%s1082_s3 + $0x10] sm:$0xff] }
   0x5   :  { %v232_v7 = vmax.f32 %v146_v2, %v189_v4  ;;  %v233_v12 = vmax.f32 %v147_v9, %v190_v10  ;;  %v234_v18 = vmax.f32 %v148_v14, %v191_v15  ;;  %v20_v19 = vld [vmem:[%s1079_s0 + $0x18] sm:$0xff]  ;;  %v21_v25 = vld [vmem:[%s1079_s0 + $0x20] sm:$0xff]  ;;  %v22_v32 = vld [vmem:[%s1079_s0 + $0x28] sm:$0xff] }
   0x6   :  { %v63_v20 = vld [vmem:[%s1080_s1 + $0x18] sm:$0xff]  ;;  %v64_v26 = vld [vmem:[%s1080_s1 + $0x20] sm:$0xff]  ;;  %v65_v34 = vld [vmem:[%s1080_s1 + $0x28] sm:$0xff] }
   0x7   :  { %v275_v16 = vmax.f32 %v103_v3, %v232_v7  ;;  %v149_v21 = vld [vmem:[%s1081_s2 + $0x18] sm:$0xff]  ;;  %v276_v22 = vmax.f32 %v104_v8, %v233_v12  ;;  %v106_v23 = vmax.f32 %v20_v19, %v63_v20  ;;  %v277_v27 = vmax.f32 %v105_v17, %v234_v18  ;;  %v150_v30 = vld [vmem:[%s1081_s2 + $0x20] sm:$0xff]  ;;  %v151_v35 = vld [vmem:[%s1081_s2 + $0x28] sm:$0xff] }
   0x8   :  { %v192_v24 = vld [vmem:[%s1082_s3 + $0x18] sm:$0xff]  ;;  %v107_v29 = vmax.f32 %v21_v25, %v64_v26  ;;  %v193_v31 = vld [vmem:[%s1082_s3 + $0x20] sm:$0xff]  ;;  %v194_v36 = vld [vmem:[%s1082_s3 + $0x28] sm:$0xff]  ;;  %v108_v38 = vmax.f32 %v22_v32, %v65_v34 }
   0x9   :  { %319 = vst.msk [vmem:[%s1083_s4] sm:$0xff] %vm318_vm0, %v275_v16  ;;  %v235_v28 = vmax.f32 %v149_v21, %v192_v24  ;;  %320 = vst.msk [vmem:[%s1083_s4 + $0x8] sm:$0xff] %vm318_vm0, %v276_v22  ;;  %v236_v33 = vmax.f32 %v150_v30, %v193_v31  ;;  %v237_v39 = vmax.f32 %v151_v35, %v194_v36  ;;  %v23_v40 = vld [vmem:[%s1079_s0 + $0x30] sm:$0xff]  ;;  %v24_v46 = vld [vmem:[%s1079_s0 + $0x38] sm:$0xff] }
   0xa   :  { %321 = vst.msk [vmem:[%s1083_s4 + $0x10] sm:$0xff] %vm318_vm0, %v277_v27  ;;  %v66_v41 = vld [vmem:[%s1080_s1 + $0x30] sm:$0xff]  ;;  %v67_v47 = vld [vmem:[%s1080_s1 + $0x38] sm:$0xff]  ;;  %v25_v53 = vld [vmem:[%s1079_s0 + $0x40] sm:$0xff] }
   0xb   :  { %v278_v37 = vmax.f32 %v106_v23, %v235_v28  ;;  %v152_v42 = vld [vmem:[%s1081_s2 + $0x30] sm:$0xff]  ;;  %v279_v43 = vmax.f32 %v107_v29, %v236_v33  ;;  %v109_v44 = vmax.f32 %v23_v40, %v66_v41  ;;  %v280_v48 = vmax.f32 %v108_v38, %v237_v39  ;;  %v153_v51 = vld [vmem:[%s1081_s2 + $0x38] sm:$0xff]  ;;  %v68_v55 = vld [vmem:[%s1080_s1 + $0x40] sm:$0xff] }
   0xc   :  { %v195_v45 = vld [vmem:[%s1082_s3 + $0x30] sm:$0xff]  ;;  %v110_v50 = vmax.f32 %v24_v46, %v67_v47  ;;  %v196_v52 = vld [vmem:[%s1082_s3 + $0x38] sm:$0xff]  ;;  %v154_v56 = vld [vmem:[%s1081_s2 + $0x40] sm:$0xff]  ;;  %v111_v59 = vmax.f32 %v25_v53, %v68_v55 }
   0xd   :  { %322 = vst.msk [vmem:[%s1083_s4 + $0x18] sm:$0xff] %vm318_vm0, %v278_v37  ;;  %v238_v49 = vmax.f32 %v152_v42, %v195_v45  ;;  %323 = vst.msk [vmem:[%s1083_s4 + $0x20] sm:$0xff] %vm318_vm0, %v279_v43  ;;  %v239_v54 = vmax.f32 %v153_v51, %v196_v52  ;;  %v197_v57 = vld [vmem:[%s1082_s3 + $0x40] sm:$0xff]  ;;  %v26_v61 = vld [vmem:[%s1079_s0 + $0x48] sm:$0xff] }
   0xe   :  { %324 = vst.msk [vmem:[%s1083_s4 + $0x28] sm:$0xff] %vm318_vm0, %v280_v48  ;;  %v240_v60 = vmax.f32 %v154_v56, %v197_v57  ;;  %v69_v62 = vld [vmem:[%s1080_s1 + $0x48] sm:$0xff]  ;;  %v27_v3 = vld [vmem:[%s1079_s0 + $0x50] sm:$0xff]  ;;  %v28_v10 = vld [vmem:[%s1079_s0 + $0x58] sm:$0xff] }
   0xf   :  { %v281_v58 = vmax.f32 %v109_v44, %v238_v49  ;;  %v155_v63 = vld [vmem:[%s1081_s2 + $0x48] sm:$0xff]  ;;  %v282_v0 = vmax.f32 %v110_v50, %v239_v54  ;;  %v112_v1 = vmax.f32 %v26_v61, %v69_v62  ;;  %v70_v4 = vld [vmem:[%s1080_s1 + $0x50] sm:$0xff]  ;;  %v71_v12 = vld [vmem:[%s1080_s1 + $0x58] sm:$0xff] }
  0x10   :  { %v198_v2 = vld [vmem:[%s1082_s3 + $0x48] sm:$0xff]  ;;  %v283_v5 = vmax.f32 %v111_v59, %v240_v60  ;;  %v113_v7 = vmax.f32 %v27_v3, %v70_v4  ;;  %v156_v8 = vld [vmem:[%s1081_s2 + $0x50] sm:$0xff]  ;;  %v157_v13 = vld [vmem:[%s1081_s2 + $0x58] sm:$0xff]  ;;  %v114_v16 = vmax.f32 %v28_v10, %v71_v12 }
  0x11   :  { %325 = vst.msk [vmem:[%s1083_s4 + $0x30] sm:$0xff] %vm318_vm0, %v281_v58  ;;  %v241_v6 = vmax.f32 %v155_v63, %v198_v2  ;;  %v199_v9 = vld [vmem:[%s1082_s3 + $0x50] sm:$0xff]  ;;  %326 = vst.msk [vmem:[%s1083_s4 + $0x38] sm:$0xff] %vm318_vm0, %v282_v0  ;;  %v200_v14 = vld [vmem:[%s1082_s3 + $0x58] sm:$0xff] }
  0x12   :  { %v242_v11 = vmax.f32 %v156_v8, %v199_v9  ;;  %327 = vst.msk [vmem:[%s1083_s4 + $0x40] sm:$0xff] %vm318_vm0, %v283_v5  ;;  %v243_v17 = vmax.f32 %v157_v13, %v200_v14  ;;  %v29_v18 = vld [vmem:[%s1079_s0 + $0x60] sm:$0xff]  ;;  %v30_v24 = vld [vmem:[%s1079_s0 + $0x68] sm:$0xff]  ;;  %v31_v31 = vld [vmem:[%s1079_s0 + $0x70] sm:$0xff] }
  0x13   :  { %v284_v15 = vmax.f32 %v112_v1, %v241_v6  ;;  %v72_v19 = vld [vmem:[%s1080_s1 + $0x60] sm:$0xff]  ;;  %v73_v25 = vld [vmem:[%s1080_s1 + $0x68] sm:$0xff]  ;;  %v74_v33 = vld [vmem:[%s1080_s1 + $0x70] sm:$0xff] }
  0x14   :  { %v158_v20 = vld [vmem:[%s1081_s2 + $0x60] sm:$0xff]  ;;  %v285_v21 = vmax.f32 %v113_v7, %v242_v11  ;;  %v115_v22 = vmax.f32 %v29_v18, %v72_v19  ;;  %v286_v26 = vmax.f32 %v114_v16, %v243_v17  ;;  %v116_v28 = vmax.f32 %v30_v24, %v73_v25  ;;  %v159_v29 = vld [vmem:[%s1081_s2 + $0x68] sm:$0xff]  ;;  %v160_v34 = vld [vmem:[%s1081_s2 + $0x70] sm:$0xff] }
  0x15   :  { %v201_v23 = vld [vmem:[%s1082_s3 + $0x60] sm:$0xff]  ;;  %328 = vst.msk [vmem:[%s1083_s4 + $0x48] sm:$0xff] %vm318_vm0, %v284_v15  ;;  %v202_v30 = vld [vmem:[%s1082_s3 + $0x68] sm:$0xff]  ;;  %v203_v35 = vld [vmem:[%s1082_s3 + $0x70] sm:$0xff]  ;;  %v117_v37 = vmax.f32 %v31_v31, %v74_v33 }
  0x16   :  { %v244_v27 = vmax.f32 %v158_v20, %v201_v23  ;;  %329 = vst.msk [vmem:[%s1083_s4 + $0x50] sm:$0xff] %vm318_vm0, %v285_v21  ;;  %v245_v32 = vmax.f32 %v159_v29, %v202_v30  ;;  %330 = vst.msk [vmem:[%s1083_s4 + $0x58] sm:$0xff] %vm318_vm0, %v286_v26  ;;  %v246_v38 = vmax.f32 %v160_v34, %v203_v35  ;;  %v32_v39 = vld [vmem:[%s1079_s0 + $0x78] sm:$0xff]  ;;  %v33_v45 = vld [vmem:[%s1079_s0 + $0x80] sm:$0xff] }
  0x17   :  { %v75_v40 = vld [vmem:[%s1080_s1 + $0x78] sm:$0xff]  ;;  %v76_v46 = vld [vmem:[%s1080_s1 + $0x80] sm:$0xff]  ;;  %v34_v52 = vld [vmem:[%s1079_s0 + $0x88] sm:$0xff] }
  0x18   :  { %v287_v36 = vmax.f32 %v115_v22, %v244_v27  ;;  %v161_v41 = vld [vmem:[%s1081_s2 + $0x78] sm:$0xff]  ;;  %v288_v42 = vmax.f32 %v116_v28, %v245_v32  ;;  %v118_v43 = vmax.f32 %v32_v39, %v75_v40  ;;  %v289_v47 = vmax.f32 %v117_v37, %v246_v38  ;;  %v162_v50 = vld [vmem:[%s1081_s2 + $0x80] sm:$0xff]  ;;  %v77_v54 = vld [vmem:[%s1080_s1 + $0x88] sm:$0xff] }
  0x19   :  { %v204_v44 = vld [vmem:[%s1082_s3 + $0x78] sm:$0xff]  ;;  %v119_v49 = vmax.f32 %v33_v45, %v76_v46  ;;  %v205_v51 = vld [vmem:[%s1082_s3 + $0x80] sm:$0xff]  ;;  %v163_v55 = vld [vmem:[%s1081_s2 + $0x88] sm:$0xff]  ;;  %v120_v58 = vmax.f32 %v34_v52, %v77_v54 }
  0x1a   :  { %331 = vst.msk [vmem:[%s1083_s4 + $0x60] sm:$0xff] %vm318_vm0, %v287_v36  ;;  %v247_v48 = vmax.f32 %v161_v41, %v204_v44  ;;  %332 = vst.msk [vmem:[%s1083_s4 + $0x68] sm:$0xff] %vm318_vm0, %v288_v42  ;;  %v248_v53 = vmax.f32 %v162_v50, %v205_v51  ;;  %v206_v56 = vld [vmem:[%s1082_s3 + $0x88] sm:$0xff]  ;;  %v35_v60 = vld [vmem:[%s1079_s0 + $0x90] sm:$0xff] }
  0x1b   :  { %333 = vst.msk [vmem:[%s1083_s4 + $0x70] sm:$0xff] %vm318_vm0, %v289_v47  ;;  %v249_v59 = vmax.f32 %v163_v55, %v206_v56  ;;  %v78_v61 = vld [vmem:[%s1080_s1 + $0x90] sm:$0xff]  ;;  %v36_v2 = vld [vmem:[%s1079_s0 + $0x98] sm:$0xff]  ;;  %v37_v9 = vld [vmem:[%s1079_s0 + $0xa0] sm:$0xff] }
  0x1c   :  { %v290_v57 = vmax.f32 %v118_v43, %v247_v48  ;;  %v164_v62 = vld [vmem:[%s1081_s2 + $0x90] sm:$0xff]  ;;  %v291_v63 = vmax.f32 %v119_v49, %v248_v53  ;;  %v121_v0 = vmax.f32 %v35_v60, %v78_v61  ;;  %v79_v3 = vld [vmem:[%s1080_s1 + $0x98] sm:$0xff]  ;;  %v80_v11 = vld [vmem:[%s1080_s1 + $0xa0] sm:$0xff] }
  0x1d   :  { %v207_v1 = vld [vmem:[%s1082_s3 + $0x90] sm:$0xff]  ;;  %v292_v4 = vmax.f32 %v120_v58, %v249_v59  ;;  %v122_v6 = vmax.f32 %v36_v2, %v79_v3  ;;  %v165_v7 = vld [vmem:[%s1081_s2 + $0x98] sm:$0xff]  ;;  %v166_v12 = vld [vmem:[%s1081_s2 + $0xa0] sm:$0xff]  ;;  %v123_v15 = vmax.f32 %v37_v9, %v80_v11 }
  0x1e   :  { %334 = vst.msk [vmem:[%s1083_s4 + $0x78] sm:$0xff] %vm318_vm0, %v290_v57  ;;  %v250_v5 = vmax.f32 %v164_v62, %v207_v1  ;;  %v208_v8 = vld [vmem:[%s1082_s3 + $0x98] sm:$0xff]  ;;  %335 = vst.msk [vmem:[%s1083_s4 + $0x80] sm:$0xff] %vm318_vm0, %v291_v63  ;;  %v209_v13 = vld [vmem:[%s1082_s3 + $0xa0] sm:$0xff] }
  0x1f   :  { %v251_v10 = vmax.f32 %v165_v7, %v208_v8  ;;  %336 = vst.msk [vmem:[%s1083_s4 + $0x88] sm:$0xff] %vm318_vm0, %v292_v4  ;;  %v252_v16 = vmax.f32 %v166_v12, %v209_v13  ;;  %v38_v17 = vld [vmem:[%s1079_s0 + $0xa8] sm:$0xff]  ;;  %v39_v23 = vld [vmem:[%s1079_s0 + $0xb0] sm:$0xff]  ;;  %v40_v30 = vld [vmem:[%s1079_s0 + $0xb8] sm:$0xff] }
  0x20   :  { %v293_v14 = vmax.f32 %v121_v0, %v250_v5  ;;  %v81_v18 = vld [vmem:[%s1080_s1 + $0xa8] sm:$0xff]  ;;  %v82_v24 = vld [vmem:[%s1080_s1 + $0xb0] sm:$0xff]  ;;  %v83_v32 = vld [vmem:[%s1080_s1 + $0xb8] sm:$0xff] }
  0x21   :  { %v167_v19 = vld [vmem:[%s1081_s2 + $0xa8] sm:$0xff]  ;;  %v294_v20 = vmax.f32 %v122_v6, %v251_v10  ;;  %v124_v21 = vmax.f32 %v38_v17, %v81_v18  ;;  %v295_v25 = vmax.f32 %v123_v15, %v252_v16  ;;  %v125_v27 = vmax.f32 %v39_v23, %v82_v24  ;;  %v168_v28 = vld [vmem:[%s1081_s2 + $0xb0] sm:$0xff]  ;;  %v169_v33 = vld [vmem:[%s1081_s2 + $0xb8] sm:$0xff] }
  0x22   :  { %v210_v22 = vld [vmem:[%s1082_s3 + $0xa8] sm:$0xff]  ;;  %337 = vst.msk [vmem:[%s1083_s4 + $0x90] sm:$0xff] %vm318_vm0, %v293_v14  ;;  %v211_v29 = vld [vmem:[%s1082_s3 + $0xb0] sm:$0xff]  ;;  %v212_v34 = vld [vmem:[%s1082_s3 + $0xb8] sm:$0xff]  ;;  %v126_v36 = vmax.f32 %v40_v30, %v83_v32 }
  0x23   :  { %v253_v26 = vmax.f32 %v167_v19, %v210_v22  ;;  %338 = vst.msk [vmem:[%s1083_s4 + $0x98] sm:$0xff] %vm318_vm0, %v294_v20  ;;  %v254_v31 = vmax.f32 %v168_v28, %v211_v29  ;;  %339 = vst.msk [vmem:[%s1083_s4 + $0xa0] sm:$0xff] %vm318_vm0, %v295_v25  ;;  %v255_v37 = vmax.f32 %v169_v33, %v212_v34  ;;  %v41_v38 = vld [vmem:[%s1079_s0 + $0xc0] sm:$0xff]  ;;  %v42_v44 = vld [vmem:[%s1079_s0 + $0xc8] sm:$0xff] }
  0x24   :  { %v84_v39 = vld [vmem:[%s1080_s1 + $0xc0] sm:$0xff]  ;;  %v85_v45 = vld [vmem:[%s1080_s1 + $0xc8] sm:$0xff]  ;;  %v43_v51 = vld [vmem:[%s1079_s0 + $0xd0] sm:$0xff] }
  0x25   :  { %v296_v35 = vmax.f32 %v124_v21, %v253_v26  ;;  %v170_v40 = vld [vmem:[%s1081_s2 + $0xc0] sm:$0xff]  ;;  %v297_v41 = vmax.f32 %v125_v27, %v254_v31  ;;  %v127_v42 = vmax.f32 %v41_v38, %v84_v39  ;;  %v298_v46 = vmax.f32 %v126_v36, %v255_v37  ;;  %v171_v49 = vld [vmem:[%s1081_s2 + $0xc8] sm:$0xff]  ;;  %v86_v53 = vld [vmem:[%s1080_s1 + $0xd0] sm:$0xff] }
  0x26   :  { %v213_v43 = vld [vmem:[%s1082_s3 + $0xc0] sm:$0xff]  ;;  %v128_v48 = vmax.f32 %v42_v44, %v85_v45  ;;  %v214_v50 = vld [vmem:[%s1082_s3 + $0xc8] sm:$0xff]  ;;  %v172_v54 = vld [vmem:[%s1081_s2 + $0xd0] sm:$0xff]  ;;  %v129_v57 = vmax.f32 %v43_v51, %v86_v53 }
  0x27   :  { %340 = vst.msk [vmem:[%s1083_s4 + $0xa8] sm:$0xff] %vm318_vm0, %v296_v35  ;;  %v256_v47 = vmax.f32 %v170_v40, %v213_v43  ;;  %341 = vst.msk [vmem:[%s1083_s4 + $0xb0] sm:$0xff] %vm318_vm0, %v297_v41  ;;  %v257_v52 = vmax.f32 %v171_v49, %v214_v50  ;;  %v215_v55 = vld [vmem:[%s1082_s3 + $0xd0] sm:$0xff]  ;;  %v44_v59 = vld [vmem:[%s1079_s0 + $0xd8] sm:$0xff] }
  0x28   :  { %342 = vst.msk [vmem:[%s1083_s4 + $0xb8] sm:$0xff] %vm318_vm0, %v298_v46  ;;  %v258_v58 = vmax.f32 %v172_v54, %v215_v55  ;;  %v87_v60 = vld [vmem:[%s1080_s1 + $0xd8] sm:$0xff]  ;;  %v45_v1 = vld [vmem:[%s1079_s0 + $0xe0] sm:$0xff]  ;;  %v46_v8 = vld [vmem:[%s1079_s0 + $0xe8] sm:$0xff] }
  0x29   :  { %v299_v56 = vmax.f32 %v127_v42, %v256_v47  ;;  %v173_v61 = vld [vmem:[%s1081_s2 + $0xd8] sm:$0xff]  ;;  %v300_v62 = vmax.f32 %v128_v48, %v257_v52  ;;  %v130_v63 = vmax.f32 %v44_v59, %v87_v60  ;;  %v88_v2 = vld [vmem:[%s1080_s1 + $0xe0] sm:$0xff]  ;;  %v89_v10 = vld [vmem:[%s1080_s1 + $0xe8] sm:$0xff] }
  0x2a   :  { %v216_v0 = vld [vmem:[%s1082_s3 + $0xd8] sm:$0xff]  ;;  %v301_v3 = vmax.f32 %v129_v57, %v258_v58  ;;  %v131_v5 = vmax.f32 %v45_v1, %v88_v2  ;;  %v174_v6 = vld [vmem:[%s1081_s2 + $0xe0] sm:$0xff]  ;;  %v175_v11 = vld [vmem:[%s1081_s2 + $0xe8] sm:$0xff]  ;;  %v132_v14 = vmax.f32 %v46_v8, %v89_v10 }
  0x2b   :  { %343 = vst.msk [vmem:[%s1083_s4 + $0xc0] sm:$0xff] %vm318_vm0, %v299_v56  ;;  %v259_v4 = vmax.f32 %v173_v61, %v216_v0  ;;  %v217_v7 = vld [vmem:[%s1082_s3 + $0xe0] sm:$0xff]  ;;  %344 = vst.msk [vmem:[%s1083_s4 + $0xc8] sm:$0xff] %vm318_vm0, %v300_v62  ;;  %v218_v12 = vld [vmem:[%s1082_s3 + $0xe8] sm:$0xff] }
  0x2c   :  { %v260_v9 = vmax.f32 %v174_v6, %v217_v7  ;;  %345 = vst.msk [vmem:[%s1083_s4 + $0xd0] sm:$0xff] %vm318_vm0, %v301_v3  ;;  %v261_v15 = vmax.f32 %v175_v11, %v218_v12  ;;  %v47_v16 = vld [vmem:[%s1079_s0 + $0xf0] sm:$0xff]  ;;  %v48_v22 = vld [vmem:[%s1079_s0 + $0xf8] sm:$0xff]  ;;  %v49_v29 = vld [vmem:[%s1079_s0 + $0x100] sm:$0xff] }
  0x2d   :  { %v302_v13 = vmax.f32 %v130_v63, %v259_v4  ;;  %v90_v17 = vld [vmem:[%s1080_s1 + $0xf0] sm:$0xff]  ;;  %v91_v23 = vld [vmem:[%s1080_s1 + $0xf8] sm:$0xff]  ;;  %v92_v31 = vld [vmem:[%s1080_s1 + $0x100] sm:$0xff] }
  0x2e   :  { %v176_v18 = vld [vmem:[%s1081_s2 + $0xf0] sm:$0xff]  ;;  %v303_v19 = vmax.f32 %v131_v5, %v260_v9  ;;  %v133_v20 = vmax.f32 %v47_v16, %v90_v17  ;;  %v304_v24 = vmax.f32 %v132_v14, %v261_v15  ;;  %v134_v26 = vmax.f32 %v48_v22, %v91_v23  ;;  %v177_v27 = vld [vmem:[%s1081_s2 + $0xf8] sm:$0xff]  ;;  %v178_v32 = vld [vmem:[%s1081_s2 + $0x100] sm:$0xff] }
  0x2f   :  { %v219_v21 = vld [vmem:[%s1082_s3 + $0xf0] sm:$0xff]  ;;  %346 = vst.msk [vmem:[%s1083_s4 + $0xd8] sm:$0xff] %vm318_vm0, %v302_v13  ;;  %v220_v28 = vld [vmem:[%s1082_s3 + $0xf8] sm:$0xff]  ;;  %v221_v33 = vld [vmem:[%s1082_s3 + $0x100] sm:$0xff]  ;;  %v135_v35 = vmax.f32 %v49_v29, %v92_v31 }
  0x30   :  { %v262_v25 = vmax.f32 %v176_v18, %v219_v21  ;;  %347 = vst.msk [vmem:[%s1083_s4 + $0xe0] sm:$0xff] %vm318_vm0, %v303_v19  ;;  %v263_v30 = vmax.f32 %v177_v27, %v220_v28  ;;  %348 = vst.msk [vmem:[%s1083_s4 + $0xe8] sm:$0xff] %vm318_vm0, %v304_v24  ;;  %v264_v36 = vmax.f32 %v178_v32, %v221_v33  ;;  %v50_v37 = vld [vmem:[%s1079_s0 + $0x108] sm:$0xff]  ;;  %v51_v43 = vld [vmem:[%s1079_s0 + $0x110] sm:$0xff] }
  0x31   :  { %v93_v38 = vld [vmem:[%s1080_s1 + $0x108] sm:$0xff]  ;;  %v94_v44 = vld [vmem:[%s1080_s1 + $0x110] sm:$0xff]  ;;  %v52_v50 = vld [vmem:[%s1079_s0 + $0x118] sm:$0xff] }
  0x32   :  { %v305_v34 = vmax.f32 %v133_v20, %v262_v25  ;;  %v179_v39 = vld [vmem:[%s1081_s2 + $0x108] sm:$0xff]  ;;  %v306_v40 = vmax.f32 %v134_v26, %v263_v30  ;;  %v136_v41 = vmax.f32 %v50_v37, %v93_v38  ;;  %v307_v45 = vmax.f32 %v135_v35, %v264_v36  ;;  %v180_v48 = vld [vmem:[%s1081_s2 + $0x110] sm:$0xff]  ;;  %v95_v52 = vld [vmem:[%s1080_s1 + $0x118] sm:$0xff] }
  0x33   :  { %v222_v42 = vld [vmem:[%s1082_s3 + $0x108] sm:$0xff]  ;;  %v137_v47 = vmax.f32 %v51_v43, %v94_v44  ;;  %v223_v49 = vld [vmem:[%s1082_s3 + $0x110] sm:$0xff]  ;;  %v181_v53 = vld [vmem:[%s1081_s2 + $0x118] sm:$0xff]  ;;  %v138_v56 = vmax.f32 %v52_v50, %v95_v52 }
  0x34   :  { %349 = vst.msk [vmem:[%s1083_s4 + $0xf0] sm:$0xff] %vm318_vm0, %v305_v34  ;;  %v265_v46 = vmax.f32 %v179_v39, %v222_v42  ;;  %350 = vst.msk [vmem:[%s1083_s4 + $0xf8] sm:$0xff] %vm318_vm0, %v306_v40  ;;  %v266_v51 = vmax.f32 %v180_v48, %v223_v49  ;;  %v224_v54 = vld [vmem:[%s1082_s3 + $0x118] sm:$0xff]  ;;  %v53_v58 = vld [vmem:[%s1079_s0 + $0x120] sm:$0xff] }
  0x35   :  { %351 = vst.msk [vmem:[%s1083_s4 + $0x100] sm:$0xff] %vm318_vm0, %v307_v45  ;;  %v267_v57 = vmax.f32 %v181_v53, %v224_v54  ;;  %v96_v59 = vld [vmem:[%s1080_s1 + $0x120] sm:$0xff]  ;;  %v54_v0 = vld [vmem:[%s1079_s0 + $0x128] sm:$0xff]  ;;  %v55_v7 = vld [vmem:[%s1079_s0 + $0x130] sm:$0xff] }
  0x36   :  { %v308_v55 = vmax.f32 %v136_v41, %v265_v46  ;;  %v182_v60 = vld [vmem:[%s1081_s2 + $0x120] sm:$0xff]  ;;  %v309_v61 = vmax.f32 %v137_v47, %v266_v51  ;;  %v139_v62 = vmax.f32 %v53_v58, %v96_v59  ;;  %v97_v1 = vld [vmem:[%s1080_s1 + $0x128] sm:$0xff]  ;;  %v98_v9 = vld [vmem:[%s1080_s1 + $0x130] sm:$0xff] }
  0x37   :  { %v225_v63 = vld [vmem:[%s1082_s3 + $0x120] sm:$0xff]  ;;  %v310_v2 = vmax.f32 %v138_v56, %v267_v57  ;;  %v140_v4 = vmax.f32 %v54_v0, %v97_v1  ;;  %v183_v5 = vld [vmem:[%s1081_s2 + $0x128] sm:$0xff]  ;;  %v184_v10 = vld [vmem:[%s1081_s2 + $0x130] sm:$0xff]  ;;  %v141_v13 = vmax.f32 %v55_v7, %v98_v9 }
  0x38   :  { %352 = vst.msk [vmem:[%s1083_s4 + $0x108] sm:$0xff] %vm318_vm0, %v308_v55  ;;  %v268_v3 = vmax.f32 %v182_v60, %v225_v63  ;;  %v226_v6 = vld [vmem:[%s1082_s3 + $0x128] sm:$0xff]  ;;  %353 = vst.msk [vmem:[%s1083_s4 + $0x110] sm:$0xff] %vm318_vm0, %v309_v61  ;;  %v227_v11 = vld [vmem:[%s1082_s3 + $0x130] sm:$0xff] }
  0x39   :  { %v269_v8 = vmax.f32 %v183_v5, %v226_v6  ;;  %354 = vst.msk [vmem:[%s1083_s4 + $0x118] sm:$0xff] %vm318_vm0, %v310_v2  ;;  %v270_v14 = vmax.f32 %v184_v10, %v227_v11  ;;  %v56_v15 = vld [vmem:[%s1079_s0 + $0x138] sm:$0xff]  ;;  %v57_v21 = vld [vmem:[%s1079_s0 + $0x140] sm:$0xff]  ;;  %v58_v28 = vld [vmem:[%s1079_s0 + $0x148] sm:$0xff] }
  0x3a   :  { %v311_v12 = vmax.f32 %v139_v62, %v268_v3  ;;  %v99_v16 = vld [vmem:[%s1080_s1 + $0x138] sm:$0xff]  ;;  %v100_v22 = vld [vmem:[%s1080_s1 + $0x140] sm:$0xff]  ;;  %v101_v30 = vld [vmem:[%s1080_s1 + $0x148] sm:$0xff] }
  0x3b   :  { %v185_v17 = vld [vmem:[%s1081_s2 + $0x138] sm:$0xff]  ;;  %v312_v18 = vmax.f32 %v140_v4, %v269_v8  ;;  %v142_v19 = vmax.f32 %v56_v15, %v99_v16  ;;  %v313_v23 = vmax.f32 %v141_v13, %v270_v14  ;;  %v143_v25 = vmax.f32 %v57_v21, %v100_v22  ;;  %v186_v26 = vld [vmem:[%s1081_s2 + $0x140] sm:$0xff]  ;;  %v187_v31 = vld [vmem:[%s1081_s2 + $0x148] sm:$0xff] }
  0x3c   :  { %v228_v20 = vld [vmem:[%s1082_s3 + $0x138] sm:$0xff]  ;;  %355 = vst.msk [vmem:[%s1083_s4 + $0x120] sm:$0xff] %vm318_vm0, %v311_v12  ;;  %v229_v27 = vld [vmem:[%s1082_s3 + $0x140] sm:$0xff]  ;;  %v230_v32 = vld [vmem:[%s1082_s3 + $0x148] sm:$0xff]  ;;  %v144_v34 = vmax.f32 %v58_v28, %v101_v30 }
  0x3d   :  { %v271_v24 = vmax.f32 %v185_v17, %v228_v20  ;;  %356 = vst.msk [vmem:[%s1083_s4 + $0x128] sm:$0xff] %vm318_vm0, %v312_v18  ;;  %v272_v29 = vmax.f32 %v186_v26, %v229_v27  ;;  %357 = vst.msk [vmem:[%s1083_s4 + $0x130] sm:$0xff] %vm318_vm0, %v313_v23  ;;  %v273_v35 = vmax.f32 %v187_v31, %v230_v32  ;;  %v59_v36 = vld [vmem:[%s1079_s0 + $0x150] sm:$0xff] }
  0x3e   :  { %v102_v37 = vld [vmem:[%s1080_s1 + $0x150] sm:$0xff] }
  0x3f   :  { %v314_v33 = vmax.f32 %v142_v19, %v271_v24  ;;  %v188_v38 = vld [vmem:[%s1081_s2 + $0x150] sm:$0xff]  ;;  %v315_v39 = vmax.f32 %v143_v25, %v272_v29  ;;  %v145_v40 = vmax.f32 %v59_v36, %v102_v37  ;;  %v316_v42 = vmax.f32 %v144_v34, %v273_v35 }
  0x40   :  { %v231_v41 = vld [vmem:[%s1082_s3 + $0x150] sm:$0xff] }
  0x41   :  { %358 = vst.msk [vmem:[%s1083_s4 + $0x138] sm:$0xff] %vm318_vm0, %v314_v33  ;;  %v274_v43 = vmax.f32 %v188_v38, %v231_v41  ;;  %359 = vst.msk [vmem:[%s1083_s4 + $0x140] sm:$0xff] %vm318_vm0, %v315_v39 }
  0x42   :  { %360 = vst.msk [vmem:[%s1083_s4 + $0x148] sm:$0xff] %vm318_vm0, %v316_v42 }
  0x43   :  { %v317_v44 = vmax.f32 %v145_v40, %v274_v43 }
  0x45   :  { %361 = vst.msk [vmem:[%s1083_s4 + $0x150] sm:$0xff] %vm318_vm0, %v317_v44 }

// kernel: myresnet_forward.13
= control target key start
LH: loop header
LB: loop body
LE: loop exit
PB: predicated region body
PF: predicated region fallthrough
CT: control target
= control target key end

     0   :  { %v979_v0 = vmov 0.0|0.0   ;;  %vm980_vm0 = vmmov 0   ;;  %v981_v6 = vmov 0.0   ;;  %vm633_vm1 = vcmask 523264   ;;  %s1671_s1 = inlined_call_operand.vmem [shape: f32[384,64], index: 1, kind: input, shape index: {}]   ;;  %s1672_s0 = inlined_call_operand.vmem [shape: f32[248,384], index: 0, kind: input, shape index: {}]   ;;  %s1673_s2 = inlined_call_operand.vmem [shape: f32[1,64], index: 2, kind: input, shape index: {}]   ;;  %s1674_s3 = inlined_call_operand.vmem [shape: f32[248,64], index: 3, kind: output, shape index: {}]  }
   0x1   :  { %842 = vmatprep.subr.bf16.mxu1 %v979_v0  ;;  %v107_v1 = vld [vmem:[%s1671_s1] sm:$0xff]  ;;  %v108_v2 = vld [vmem:[%s1671_s1 + $0x8] sm:$0xff]  ;;  %v109_v3 = vld [vmem:[%s1671_s1 + $0x10] sm:$0xff]  ;;  %890 = vmatprep.subr.bf16.mxu0 %v979_v0 }
   0x2   :  { %v843_v4 = vpack.c.bf16 %v108_v2, %v107_v1  ;;  %v110_v5 = vld [vmem:[%s1671_s1 + $0x18] sm:$0xff]  ;;  %749 = vmatprep.mubr.msk.f32.mxu0 %vm980_vm0, %v981_v6  ;;  %v111_v8 = vld [vmem:[%s1671_s1 + $0x20] sm:$0xff]  ;;  %v112_v9 = vld [vmem:[%s1671_s1 + $0x28] sm:$0xff] }
   0x3   :  { %v846_v7 = vpack.c.bf16 %v110_v5, %v109_v3  ;;  %v139_v10 = vld [vmem:[%s1671_s1 + $0x100] sm:$0xff]  ;;  %v140_v11 = vld [vmem:[%s1671_s1 + $0x108] sm:$0xff]  ;;  %v849_v12 = vpack.c.bf16 %v112_v9, %v111_v8  ;;  %v141_v14 = vld [vmem:[%s1671_s1 + $0x110] sm:$0xff] }
   0x4   :  { %844 = vmatpush1.bf16.msra.mxu1 %v843_v4  ;;  %v891_v13 = vpack.c.bf16 %v140_v11, %v139_v10  ;;  %v142_v15 = vld [vmem:[%s1671_s1 + $0x118] sm:$0xff]  ;;  %v113_v16 = vld [vmem:[%s1671_s1 + $0x30] sm:$0xff]  ;;  %v143_v19 = vld [vmem:[%s1671_s1 + $0x120] sm:$0xff] }
   0x5   :  { %845 = vmatprep.subr.bf16.mxu1 %v979_v0  ;;  %v114_v17 = vld [vmem:[%s1671_s1 + $0x38] sm:$0xff]  ;;  %v894_v18 = vpack.c.bf16 %v142_v15, %v141_v14  ;;  %v144_v20 = vld [vmem:[%s1671_s1 + $0x128] sm:$0xff]  ;;  %v115_v22 = vld [vmem:[%s1671_s1 + $0x40] sm:$0xff] }
   0x6   :  { %892 = vmatpush3.bf16.msra.mxu0 %v891_v13  ;;  %v852_v21 = vpack.c.bf16 %v114_v17, %v113_v16  ;;  %v116_v23 = vld [vmem:[%s1671_s1 + $0x48] sm:$0xff]  ;;  %v897_v24 = vpack.c.bf16 %v144_v20, %v143_v19  ;;  %v145_v25 = vld [vmem:[%s1671_s1 + $0x130] sm:$0xff]  ;;  %v146_v26 = vld [vmem:[%s1671_s1 + $0x138] sm:$0xff] }
   0x7   :  { %893 = vmatprep.subr.bf16.mxu0 %v979_v0  ;;  %v855_v27 = vpack.c.bf16 %v116_v23, %v115_v22  ;;  %v117_v28 = vld [vmem:[%s1671_s1 + $0x50] sm:$0xff]  ;;  %v118_v29 = vld [vmem:[%s1671_s1 + $0x58] sm:$0xff]  ;;  %v15_v30 = vld [vmem:[%s1672_s0 + $0x8] sm:$0xff]  ;;  %v900_v31 = vpack.c.bf16 %v146_v26, %v145_v25 }
   0x8   :  { %847 = vmatpush1.bf16.msra.mxu1 %v846_v7  ;;  %226 = vmatprep.mubr.f32.mxu1 %v15_v30  ;;  %v147_v32 = vld [vmem:[%s1671_s1 + $0x140] sm:$0xff]  ;;  %v148_v33 = vld [vmem:[%s1671_s1 + $0x148] sm:$0xff]  ;;  %v858_v34 = vpack.c.bf16 %v118_v29, %v117_v28  ;;  %v149_v38 = vld [vmem:[%s1671_s1 + $0x150] sm:$0xff] }
   0x9   :  { %848 = vmatprep.subr.bf16.mxu1 %v979_v0  ;;  %v119_v35 = vld [vmem:[%s1671_s1 + $0x60] sm:$0xff]  ;;  %v120_v36 = vld [vmem:[%s1671_s1 + $0x68] sm:$0xff]  ;;  %v903_v37 = vpack.c.bf16 %v148_v33, %v147_v32  ;;  %v150_v39 = vld [vmem:[%s1671_s1 + $0x158] sm:$0xff] }
   0xa   :  { %895 = vmatpush3.bf16.msra.mxu0 %v894_v18  ;;  %v861_v40 = vpack.c.bf16 %v120_v36, %v119_v35  ;;  %v121_v41 = vld [vmem:[%s1671_s1 + $0x70] sm:$0xff]  ;;  %v122_v42 = vld [vmem:[%s1671_s1 + $0x78] sm:$0xff]  ;;  %v906_v43 = vpack.c.bf16 %v150_v39, %v149_v38  ;;  %v151_v44 = vld [vmem:[%s1671_s1 + $0x160] sm:$0xff] }
   0xb   :  { %896 = vmatprep.subr.bf16.mxu0 %v979_v0  ;;  %v152_v45 = vld [vmem:[%s1671_s1 + $0x168] sm:$0xff]  ;;  %v864_v46 = vpack.c.bf16 %v122_v42, %v121_v41  ;;  %v123_v47 = vld [vmem:[%s1671_s1 + $0x80] sm:$0xff]  ;;  %v153_v50 = vld [vmem:[%s1671_s1 + $0x170] sm:$0xff] }
   0xc   :  { %850 = vmatpush1.bf16.msra.mxu1 %v849_v12  ;;  %v124_v48 = vld [vmem:[%s1671_s1 + $0x88] sm:$0xff]  ;;  %v909_v49 = vpack.c.bf16 %v152_v45, %v151_v44  ;;  %v154_v51 = vld [vmem:[%s1671_s1 + $0x178] sm:$0xff]  ;;  %v125_v53 = vld [vmem:[%s1671_s1 + $0x90] sm:$0xff] }
   0xd   :  { %851 = vmatprep.subr.bf16.mxu1 %v979_v0  ;;  %v867_v52 = vpack.c.bf16 %v124_v48, %v123_v47  ;;  %v126_v54 = vld [vmem:[%s1671_s1 + $0x98] sm:$0xff]  ;;  %v912_v55 = vpack.c.bf16 %v154_v51, %v153_v50  ;;  %v127_v57 = vld [vmem:[%s1671_s1 + $0xa0] sm:$0xff]  ;;  %v128_v58 = vld [vmem:[%s1671_s1 + $0xa8] sm:$0xff] }
   0xe   :  { %898 = vmatpush3.bf16.msra.mxu0 %v897_v24  ;;  %v870_v56 = vpack.c.bf16 %v126_v54, %v125_v53  ;;  %v16_v59 = vld [vmem:[%s1672_s0 + $0x10] sm:$0xff]  ;;  %v873_v60 = vpack.c.bf16 %v128_v58, %v127_v57  ;;  %v130_v62 = vld [vmem:[%s1671_s1 + $0xb8] sm:$0xff]  ;;  %v19_v63 = vld [vmem:[%s1672_s0 + $0x28] sm:$0xff] }
   0xf   :  { %899 = vmatprep.subr.bf16.mxu0 %v979_v0  ;;  %v129_v61 = vld [vmem:[%s1671_s1 + $0xb0] sm:$0xff]  ;;  %v131_v2 = vld [vmem:[%s1671_s1 + $0xc0] sm:$0xff]  ;;  %v132_v3 = vld [vmem:[%s1671_s1 + $0xc8] sm:$0xff] }
  0x10   :  { %853 = vmatpush1.bf16.msra.mxu1 %v852_v21  ;;  %v876_v1 = vpack.c.bf16 %v130_v62, %v129_v61  ;;  %v22_v4 = vld [vmem:[%s1672_s0 + $0x40] sm:$0xff]  ;;  %v879_v5 = vpack.c.bf16 %v132_v3, %v131_v2  ;;  %v133_v7 = vld [vmem:[%s1671_s1 + $0xd0] sm:$0xff]  ;;  %v134_v8 = vld [vmem:[%s1671_s1 + $0xd8] sm:$0xff] }
  0x11   :  { %854 = vmatprep.subr.bf16.mxu1 %v979_v0  ;;  %v25_v9 = vld [vmem:[%s1672_s0 + $0x58] sm:$0xff]  ;;  %v882_v10 = vpack.c.bf16 %v134_v8, %v133_v7  ;;  %v135_v11 = vld [vmem:[%s1671_s1 + $0xe0] sm:$0xff]  ;;  %v136_v12 = vld [vmem:[%s1671_s1 + $0xe8] sm:$0xff] }
  0x12   :  { %901 = vmatpush3.bf16.msra.mxu0 %v900_v31  ;;  %v28_v13 = vld [vmem:[%s1672_s0 + $0x70] sm:$0xff]  ;;  %v885_v14 = vpack.c.bf16 %v136_v12, %v135_v11  ;;  %v138_v16 = vld [vmem:[%s1671_s1 + $0xf8] sm:$0xff]  ;;  %v31_v17 = vld [vmem:[%s1672_s0 + $0x88] sm:$0xff] }
  0x13   :  { %902 = vmatprep.subr.bf16.mxu0 %v979_v0  ;;  %v137_v15 = vld [vmem:[%s1671_s1 + $0xf0] sm:$0xff]  ;;  %v34_v19 = vld [vmem:[%s1672_s0 + $0xa0] sm:$0xff]  ;;  %v17_v22 = vld [vmem:[%s1672_s0 + $0x18] sm:$0xff] }
  0x14   :  { %856 = vmatpush1.bf16.msra.mxu1 %v855_v27  ;;  %v888_v18 = vpack.c.bf16 %v138_v16, %v137_v15  ;;  %v14_v20 = vld [vmem:[%s1672_s0] sm:$0xff]  ;;  %v21_v23 = vld [vmem:[%s1672_s0 + $0x38] sm:$0xff]  ;;  %v40_v24 = vld [vmem:[%s1672_s0 + $0xd0] sm:$0xff] }
  0x15   :  { %857 = vmatprep.subr.bf16.mxu1 %v979_v0  ;;  %v18_v21 = vld [vmem:[%s1672_s0 + $0x20] sm:$0xff]  ;;  %v20_v25 = vld [vmem:[%s1672_s0 + $0x30] sm:$0xff]  ;;  %v43_v27 = vld [vmem:[%s1672_s0 + $0xe8] sm:$0xff] }
  0x16   :  { %904 = vmatpush3.bf16.msra.mxu0 %v903_v37  ;;  %v24_v26 = vld [vmem:[%s1672_s0 + $0x50] sm:$0xff]  ;;  %v23_v28 = vld [vmem:[%s1672_s0 + $0x48] sm:$0xff]  ;;  %v46_v30 = vld [vmem:[%s1672_s0 + $0x100] sm:$0xff] }
  0x17   :  { %905 = vmatprep.subr.bf16.mxu0 %v979_v0  ;;  %v27_v29 = vld [vmem:[%s1672_s0 + $0x68] sm:$0xff]  ;;  %v26_v31 = vld [vmem:[%s1672_s0 + $0x60] sm:$0xff]  ;;  %v49_v33 = vld [vmem:[%s1672_s0 + $0x118] sm:$0xff] }
  0x18   :  { %859 = vmatpush1.bf16.msra.mxu1 %v858_v34  ;;  %v30_v32 = vld [vmem:[%s1672_s0 + $0x80] sm:$0xff]  ;;  %v29_v34 = vld [vmem:[%s1672_s0 + $0x78] sm:$0xff]  ;;  %v52_v36 = vld [vmem:[%s1672_s0 + $0x130] sm:$0xff] }
  0x19   :  { %860 = vmatprep.subr.bf16.mxu1 %v979_v0  ;;  %v33_v35 = vld [vmem:[%s1672_s0 + $0x98] sm:$0xff]  ;;  %v32_v37 = vld [vmem:[%s1672_s0 + $0x90] sm:$0xff]  ;;  %v55_v39 = vld [vmem:[%s1672_s0 + $0x148] sm:$0xff] }
  0x1a   :  { %907 = vmatpush3.bf16.msra.mxu0 %v906_v43  ;;  %v36_v38 = vld [vmem:[%s1672_s0 + $0xb0] sm:$0xff]  ;;  %v39_v41 = vld [vmem:[%s1672_s0 + $0xc8] sm:$0xff]  ;;  %v58_v42 = vld [vmem:[%s1672_s0 + $0x160] sm:$0xff] }
  0x1b   :  { %908 = vmatprep.subr.bf16.mxu0 %v979_v0  ;;  %v38_v43 = vld [vmem:[%s1672_s0 + $0xc0] sm:$0xff]  ;;  %v61_v45 = vld [vmem:[%s1672_s0 + $0x178] sm:$0xff]  ;;  %v64_v48 = vld [vmem:[%s1672_s0 + $0x190] sm:$0xff] }
  0x1c   :  { %862 = vmatpush1.bf16.msra.mxu1 %v861_v40  ;;  %v35_v40 = vld [vmem:[%s1672_s0 + $0xa8] sm:$0xff]  ;;  %v42_v44 = vld [vmem:[%s1672_s0 + $0xe0] sm:$0xff]  ;;  %v45_v47 = vld [vmem:[%s1672_s0 + $0xf8] sm:$0xff] }
  0x1d   :  { %863 = vmatprep.subr.bf16.mxu1 %v979_v0  ;;  %v48_v50 = vld [vmem:[%s1672_s0 + $0x110] sm:$0xff]  ;;  %v67_v51 = vld [vmem:[%s1672_s0 + $0x1a8] sm:$0xff]  ;;  %v70_v54 = vld [vmem:[%s1672_s0 + $0x1c0] sm:$0xff] }
  0x1e   :  { %910 = vmatpush3.bf16.msra.mxu0 %v909_v49  ;;  %v44_v49 = vld [vmem:[%s1672_s0 + $0xf0] sm:$0xff]  ;;  %v51_v53 = vld [vmem:[%s1672_s0 + $0x128] sm:$0xff]  ;;  %v73_v57 = vld [vmem:[%s1672_s0 + $0x1d8] sm:$0xff] }
  0x1f   :  { %911 = vmatprep.subr.bf16.mxu0 %v979_v0  ;;  %v53_v58 = vld [vmem:[%s1672_s0 + $0x138] sm:$0xff]  ;;  %v56_v61 = vld [vmem:[%s1672_s0 + $0x150] sm:$0xff]  ;;  %v63_v2 = vld [vmem:[%s1672_s0 + $0x188] sm:$0xff] }
  0x20   :  { %865 = vmatpush1.bf16.msra.mxu1 %v864_v46  ;;  %v41_v46 = vld [vmem:[%s1672_s0 + $0xd8] sm:$0xff]  ;;  %v60_v62 = vld [vmem:[%s1672_s0 + $0x170] sm:$0xff]  ;;  %v82_v3 = vld [vmem:[%s1672_s0 + $0x220] sm:$0xff] }
  0x21   :  { %866 = vmatprep.subr.bf16.mxu1 %v979_v0  ;;  %v85_v7 = vld [vmem:[%s1672_s0 + $0x238] sm:$0xff]  ;;  %v68_v11 = vld [vmem:[%s1672_s0 + $0x1b0] sm:$0xff]  ;;  %v75_v15 = vld [vmem:[%s1672_s0 + $0x1e8] sm:$0xff] }
  0x22   :  { %913 = vmatpush3.bf16.msra.mxu0 %v912_v55  ;;  %v50_v55 = vld [vmem:[%s1672_s0 + $0x120] sm:$0xff]  ;;  %v65_v8 = vld [vmem:[%s1672_s0 + $0x198] sm:$0xff]  ;;  %v72_v12 = vld [vmem:[%s1672_s0 + $0x1d0] sm:$0xff] }
  0x23   :  { %v94_v16 = vld [vmem:[%s1672_s0 + $0x280] sm:$0xff] }
  0x24   :  { %868 = vmatpush1.bf16.msra.mxu1 %v867_v52  ;;  %v47_v52 = vld [vmem:[%s1672_s0 + $0x108] sm:$0xff] }
  0x25   :  { %869 = vmatprep.subr.bf16.mxu1 %v979_v0  ;;  %750 = vmatmul.mubr.f32.vlgmr.msra.gmra.mrb[0].mxu0 %v16_v59  ;;  %v57_v59 = vld [vmem:[%s1672_s0 + $0x158] sm:$0xff] }
  0x26   :  { %752 = vmatprep.mubr.msk.f32.mxu0 %vm980_vm0, %v981_v6 }
  0x28   :  { %871 = vmatpush1.bf16.msra.mxu1 %v870_v56  ;;  %v54_v56 = vld [vmem:[%s1672_s0 + $0x140] sm:$0xff] }
  0x29   :  { %872 = vmatprep.subr.bf16.mxu1 %v979_v0  ;;  %753 = vmatmul.mubr.f32.gmra.mrb[2].mxu0 %v19_v63  ;;  %v79_v63 = vld [vmem:[%s1672_s0 + $0x208] sm:$0xff] }
  0x2a   :  { %755 = vmatprep.mubr.msk.f32.mxu0 %vm980_vm0, %v981_v6 }
  0x2c   :  { %874 = vmatpush1.bf16.msra.mxu1 %v873_v60  ;;  %v76_v60 = vld [vmem:[%s1672_s0 + $0x1f0] sm:$0xff] }
  0x2d   :  { %875 = vmatprep.subr.bf16.mxu1 %v979_v0  ;;  %756 = vmatmul.mubr.f32.gmra.mrb[4].mxu0 %v22_v4  ;;  %v62_v4 = vld [vmem:[%s1672_s0 + $0x180] sm:$0xff] }
  0x2e   :  { %758 = vmatprep.mubr.msk.f32.mxu0 %vm980_vm0, %v981_v6 }
  0x30   :  { %877 = vmatpush1.bf16.msra.mxu1 %v876_v1  ;;  %v59_v1 = vld [vmem:[%s1672_s0 + $0x168] sm:$0xff] }
  0x31   :  { %878 = vmatprep.subr.bf16.mxu1 %v979_v0  ;;  %759 = vmatmul.mubr.f32.gmra.mrb[6].mxu0 %v25_v9  ;;  %v69_v9 = vld [vmem:[%s1672_s0 + $0x1b8] sm:$0xff] }
  0x32   :  { %761 = vmatprep.mubr.msk.f32.mxu0 %vm980_vm0, %v981_v6 }
  0x34   :  { %880 = vmatpush1.bf16.msra.mxu1 %v879_v5  ;;  %v66_v5 = vld [vmem:[%s1672_s0 + $0x1a0] sm:$0xff] }
  0x35   :  { %881 = vmatprep.subr.bf16.mxu1 %v979_v0  ;;  %762 = vmatmul.mubr.f32.gmra.mrb[8].mxu0 %v28_v13  ;;  %v91_v13 = vld [vmem:[%s1672_s0 + $0x268] sm:$0xff] }
  0x36   :  { %764 = vmatprep.mubr.msk.f32.mxu0 %vm980_vm0, %v981_v6 }
  0x38   :  { %883 = vmatpush1.bf16.msra.mxu1 %v882_v10  ;;  %v88_v10 = vld [vmem:[%s1672_s0 + $0x250] sm:$0xff] }
  0x39   :  { %884 = vmatprep.subr.bf16.mxu1 %v979_v0  ;;  %765 = vmatmul.mubr.f32.gmra.mrb[10].mxu0 %v31_v17  ;;  %v74_v17 = vld [vmem:[%s1672_s0 + $0x1e0] sm:$0xff] }
  0x3a   :  { %767 = vmatprep.mubr.msk.f32.mxu0 %vm980_vm0, %v981_v6 }
  0x3c   :  { %886 = vmatpush1.bf16.msra.mxu1 %v885_v14  ;;  %v71_v14 = vld [vmem:[%s1672_s0 + $0x1c8] sm:$0xff] }
  0x3d   :  { %887 = vmatprep.subr.bf16.mxu1 %v979_v0  ;;  %768 = vmatmul.mubr.f32.gmra.mrb[12].mxu0 %v34_v19  ;;  %v37_v0 = vld [vmem:[%s1672_s0 + $0xb8] sm:$0xff] }
  0x3e   :  { %770 = vmatprep.mubr.msk.f32.mxu0 %vm980_vm0, %v981_v6  ;;  %v97_v19 = vld [vmem:[%s1672_s0 + $0x298] sm:$0xff] }
  0x40   :  { %889 = vmatpush1.bf16.msra.mxu1 %v888_v18  ;;  %v78_v18 = vld [vmem:[%s1672_s0 + $0x200] sm:$0xff] }
  0x41   :  { %771 = vmatmul.mubr.f32.gmra.mrb[14].mxu0 %v37_v0  ;;  %v100_v0 = vld [vmem:[%s1672_s0 + $0x2b0] sm:$0xff] }
  0x42   :  { %773 = vmatprep.mubr.msk.f32.mxu0 %vm980_vm0, %v981_v6 }
  0x43   :  { %227 = vmatmul.mubr.f32.vlgmr.msra.gmra.mrb[0].mxu1 %v14_v20  ;;  %v77_v20 = vld [vmem:[%s1672_s0 + $0x1f8] sm:$0xff] }
  0x44   :  { %231 = vmatprep.mubr.f32.mxu1 %v18_v21  ;;  %v81_v21 = vld [vmem:[%s1672_s0 + $0x218] sm:$0xff] }
  0x45   :  { %774 = vmatmul.mubr.f32.gmra.mrb[16].mxu0 %v40_v24  ;;  %v103_v24 = vld [vmem:[%s1672_s0 + $0x2c8] sm:$0xff] }
  0x46   :  { %776 = vmatprep.mubr.msk.f32.mxu0 %vm980_vm0, %v981_v6 }
  0x47   :  { %232 = vmatmul.mubr.f32.gmra.mrb[2].mxu1 %v17_v22  ;;  %v80_v22 = vld [vmem:[%s1672_s0 + $0x210] sm:$0xff] }
  0x48   :  { %236 = vmatprep.mubr.f32.mxu1 %v21_v23  ;;  %v84_v23 = vld [vmem:[%s1672_s0 + $0x230] sm:$0xff] }
  0x49   :  { %777 = vmatmul.mubr.f32.gmra.mrb[18].mxu0 %v43_v27  ;;  %v106_v27 = vld [vmem:[%s1672_s0 + $0x2e0] sm:$0xff] }
  0x4a   :  { %779 = vmatprep.mubr.msk.f32.mxu0 %vm980_vm0, %v981_v6 }
  0x4b   :  { %237 = vmatmul.mubr.f32.gmra.mrb[4].mxu1 %v20_v25  ;;  %v83_v25 = vld [vmem:[%s1672_s0 + $0x228] sm:$0xff] }
  0x4c   :  { %241 = vmatprep.mubr.f32.mxu1 %v24_v26  ;;  %v87_v26 = vld [vmem:[%s1672_s0 + $0x248] sm:$0xff] }
  0x4d   :  { %780 = vmatmul.mubr.f32.gmra.mrb[20].mxu0 %v46_v30  ;;  %v93_v30 = vld [vmem:[%s1672_s0 + $0x278] sm:$0xff] }
  0x4e   :  { %782 = vmatprep.mubr.msk.f32.mxu0 %vm980_vm0, %v981_v6 }
  0x4f   :  { %242 = vmatmul.mubr.f32.gmra.mrb[6].mxu1 %v23_v28  ;;  %v86_v28 = vld [vmem:[%s1672_s0 + $0x240] sm:$0xff] }
  0x50   :  { %246 = vmatprep.mubr.f32.mxu1 %v27_v29  ;;  %v90_v29 = vld [vmem:[%s1672_s0 + $0x260] sm:$0xff] }
  0x51   :  { %783 = vmatmul.mubr.f32.gmra.mrb[22].mxu0 %v49_v33  ;;  %v95_v33 = vld [vmem:[%s1672_s0 + $0x288] sm:$0xff] }
  0x52   :  { %785 = vmatprep.mubr.msk.f32.mxu0 %vm980_vm0, %v981_v6 }
  0x53   :  { %247 = vmatmul.mubr.f32.gmra.mrb[8].mxu1 %v26_v31  ;;  %v92_v31 = vld [vmem:[%s1672_s0 + $0x270] sm:$0xff] }
  0x54   :  { %251 = vmatprep.mubr.f32.mxu1 %v30_v32  ;;  %v96_v32 = vld [vmem:[%s1672_s0 + $0x290] sm:$0xff] }
  0x55   :  { %786 = vmatmul.mubr.f32.gmra.mrb[24].mxu0 %v52_v36  ;;  %v102_v36 = vld [vmem:[%s1672_s0 + $0x2c0] sm:$0xff] }
  0x56   :  { %788 = vmatprep.mubr.msk.f32.mxu0 %vm980_vm0, %v981_v6 }
  0x57   :  { %252 = vmatmul.mubr.f32.gmra.mrb[10].mxu1 %v29_v34  ;;  %v99_v34 = vld [vmem:[%s1672_s0 + $0x2a8] sm:$0xff] }
  0x58   :  { %256 = vmatprep.mubr.f32.mxu1 %v33_v35  ;;  %v98_v35 = vld [vmem:[%s1672_s0 + $0x2a0] sm:$0xff] }
  0x59   :  { %789 = vmatmul.mubr.f32.gmra.mrb[26].mxu0 %v55_v39  ;;  %v104_v39 = vld [vmem:[%s1672_s0 + $0x2d0] sm:$0xff] }
  0x5a   :  { %791 = vmatprep.mubr.msk.f32.mxu0 %vm980_vm0, %v981_v6 }
  0x5b   :  { %257 = vmatmul.mubr.f32.gmra.mrb[12].mxu1 %v32_v37  ;;  %v101_v37 = vld [vmem:[%s1672_s0 + $0x2b8] sm:$0xff] }
  0x5c   :  { %261 = vmatprep.mubr.f32.mxu1 %v36_v38  ;;  %v105_v38 = vld [vmem:[%s1672_s0 + $0x2d8] sm:$0xff] }
  0x5d   :  { %792 = vmatmul.mubr.f32.gmra.mrb[28].mxu0 %v58_v42 }
  0x5e   :  { %794 = vmatprep.mubr.msk.f32.mxu0 %vm980_vm0, %v981_v6 }
  0x5f   :  { %262 = vmatmul.mubr.f32.gmra.mrb[14].mxu1 %v35_v40 }
  0x60   :  { %266 = vmatprep.mubr.f32.mxu1 %v39_v41 }
  0x61   :  { %795 = vmatmul.mubr.f32.gmra.mrb[30].mxu0 %v61_v45 }
  0x62   :  { %797 = vmatprep.mubr.msk.f32.mxu0 %vm980_vm0, %v981_v6 }
  0x63   :  { %267 = vmatmul.mubr.f32.gmra.mrb[16].mxu1 %v38_v43 }
  0x64   :  { %271 = vmatprep.mubr.f32.mxu1 %v42_v44 }
  0x65   :  { %798 = vmatmul.mubr.f32.gmra.mrb[32].mxu0 %v64_v48 }
  0x66   :  { %800 = vmatprep.mubr.msk.f32.mxu0 %vm980_vm0, %v981_v6 }
  0x67   :  { %272 = vmatmul.mubr.f32.gmra.mrb[18].mxu1 %v41_v46 }
  0x68   :  { %276 = vmatprep.mubr.f32.mxu1 %v45_v47 }
  0x69   :  { %801 = vmatmul.mubr.f32.gmra.mrb[34].mxu0 %v67_v51 }
  0x6a   :  { %803 = vmatprep.mubr.msk.f32.mxu0 %vm980_vm0, %v981_v6 }
  0x6b   :  { %277 = vmatmul.mubr.f32.gmra.mrb[20].mxu1 %v44_v49 }
  0x6c   :  { %281 = vmatprep.mubr.f32.mxu1 %v48_v50 }
  0x6d   :  { %804 = vmatmul.mubr.f32.gmra.mrb[36].mxu0 %v70_v54 }
  0x6e   :  { %806 = vmatprep.mubr.msk.f32.mxu0 %vm980_vm0, %v981_v6 }
  0x6f   :  { %282 = vmatmul.mubr.f32.gmra.mrb[22].mxu1 %v47_v52  ;;  %v1514_v52 = vld [vmem:[%s1673_s2] ss:$0 sm:$0xff] }
  0x70   :  { %286 = vmatprep.mubr.f32.mxu1 %v51_v53 }
  0x71   :  { %807 = vmatmul.mubr.f32.gmra.mrb[38].mxu0 %v73_v57 }
  0x72   :  { %809 = vmatprep.mubr.msk.f32.mxu0 %vm980_vm0, %v981_v6 }
  0x73   :  { %287 = vmatmul.mubr.f32.gmra.mrb[24].mxu1 %v50_v55 }
  0x74   :  { %291 = vmatprep.mubr.f32.mxu1 %v54_v56 }
  0x75   :  { %810 = vmatmul.mubr.f32.gmra.mrb[40].mxu0 %v76_v60 }
  0x76   :  { %812 = vmatprep.mubr.msk.f32.mxu0 %vm980_vm0, %v981_v6 }
  0x77   :  { %292 = vmatmul.mubr.f32.gmra.mrb[26].mxu1 %v53_v58 }
  0x78   :  { %296 = vmatprep.mubr.f32.mxu1 %v57_v59 }
  0x79   :  { %813 = vmatmul.mubr.f32.gmra.mrb[42].mxu0 %v79_v63 }
  0x7a   :  { %815 = vmatprep.mubr.msk.f32.mxu0 %vm980_vm0, %v981_v6 }
  0x7b   :  { %297 = vmatmul.mubr.f32.gmra.mrb[28].mxu1 %v56_v61 }
  0x7c   :  { %301 = vmatprep.mubr.f32.mxu1 %v60_v62 }
  0x7d   :  { %816 = vmatmul.mubr.f32.gmra.mrb[44].mxu0 %v82_v3 }
  0x7e   :  { %818 = vmatprep.mubr.msk.f32.mxu0 %vm980_vm0, %v981_v6 }
  0x7f   :  { %302 = vmatmul.mubr.f32.gmra.mrb[30].mxu1 %v59_v1 }
  0x80   :  { %306 = vmatprep.mubr.f32.mxu1 %v63_v2 }
  0x81   :  { %819 = vmatmul.mubr.f32.gmra.mrb[46].mxu0 %v85_v7 }
  0x82   :  { %821 = vmatprep.mubr.msk.f32.mxu0 %vm980_vm0, %v981_v6 }
  0x83   :  { %307 = vmatmul.mubr.f32.gmra.mrb[32].mxu1 %v62_v4 }
  0x84   :  { %311 = vmatprep.mubr.f32.mxu1 %v66_v5 }
  0x85   :  { %822 = vmatmul.mubr.f32.gmra.mrb[48].mxu0 %v88_v10 }
  0x86   :  { %824 = vmatprep.mubr.msk.f32.mxu0 %vm980_vm0, %v981_v6 }
  0x87   :  { %312 = vmatmul.mubr.f32.gmra.mrb[34].mxu1 %v65_v8 }
  0x88   :  { %316 = vmatprep.mubr.f32.mxu1 %v69_v9 }
  0x89   :  { %825 = vmatmul.mubr.f32.gmra.mrb[50].mxu0 %v91_v13 }
  0x8a   :  { %827 = vmatprep.mubr.msk.f32.mxu0 %vm980_vm0, %v981_v6 }
  0x8b   :  { %317 = vmatmul.mubr.f32.gmra.mrb[36].mxu1 %v68_v11 }
  0x8c   :  { %321 = vmatprep.mubr.f32.mxu1 %v72_v12 }
  0x8d   :  { %828 = vmatmul.mubr.f32.gmra.mrb[52].mxu0 %v94_v16 }
  0x8e   :  { %830 = vmatprep.mubr.msk.f32.mxu0 %vm980_vm0, %v981_v6 }
  0x8f   :  { %322 = vmatmul.mubr.f32.gmra.mrb[38].mxu1 %v71_v14 }
  0x90   :  { %326 = vmatprep.mubr.f32.mxu1 %v75_v15 }
  0x91   :  { %831 = vmatmul.mubr.f32.gmra.mrb[54].mxu0 %v97_v19 }
  0x92   :  { %833 = vmatprep.mubr.msk.f32.mxu0 %vm980_vm0, %v981_v6 }
  0x93   :  { %327 = vmatmul.mubr.f32.gmra.mrb[40].mxu1 %v74_v17 }
  0x94   :  { %331 = vmatprep.mubr.f32.mxu1 %v78_v18 }
  0x95   :  { %834 = vmatmul.mubr.f32.gmra.mrb[56].mxu0 %v100_v0 }
  0x96   :  { %836 = vmatprep.mubr.msk.f32.mxu0 %vm980_vm0, %v981_v6 }
  0x97   :  { %332 = vmatmul.mubr.f32.gmra.mrb[42].mxu1 %v77_v20 }
  0x98   :  { %336 = vmatprep.mubr.f32.mxu1 %v81_v21 }
  0x99   :  { %837 = vmatmul.mubr.f32.gmra.mrb[58].mxu0 %v103_v24 }
  0x9a   :  { %839 = vmatprep.mubr.msk.f32.mxu0 %vm980_vm0, %v981_v6  ;;  %v89_v6 = vld [vmem:[%s1672_s0 + $0x258] sm:$0xff] }
  0x9b   :  { %337 = vmatmul.mubr.f32.gmra.mrb[44].mxu1 %v80_v22 }
  0x9c   :  { %341 = vmatprep.mubr.f32.mxu1 %v84_v23 }
  0x9d   :  { %840 = vmatmul.mubr.f32.gmra.mrb[60].mxu0 %v106_v27 }
  0x9f   :  { %342 = vmatmul.mubr.f32.gmra.mrb[46].mxu1 %v83_v25 }
  0xa0   :  { %346 = vmatprep.mubr.f32.mxu1 %v87_v26 }
  0xa3   :  { %347 = vmatmul.mubr.f32.gmra.mrb[48].mxu1 %v86_v28 }
  0xa4   :  { %351 = vmatprep.mubr.f32.mxu1 %v90_v29 }
  0xa7   :  { %352 = vmatmul.mubr.f32.gmra.mrb[50].mxu1 %v89_v6 }
  0xa8   :  { %356 = vmatprep.mubr.f32.mxu1 %v93_v30 }
  0xab   :  { %357 = vmatmul.mubr.f32.gmra.mrb[52].mxu1 %v92_v31 }
  0xac   :  { %361 = vmatprep.mubr.f32.mxu1 %v96_v32 }
  0xaf   :  { %362 = vmatmul.mubr.f32.gmra.mrb[54].mxu1 %v95_v33 }
  0xb0   :  { %366 = vmatprep.mubr.f32.mxu1 %v99_v34 }
  0xb3   :  { %367 = vmatmul.mubr.f32.gmra.mrb[56].mxu1 %v98_v35 }
  0xb4   :  { %371 = vmatprep.mubr.f32.mxu1 %v102_v36 }
  0xb7   :  { %372 = vmatmul.mubr.f32.gmra.mrb[58].mxu1 %v101_v37 }
  0xb8   :  { %376 = vmatprep.mubr.f32.mxu1 %v105_v38 }
  0xbb   :  { %377 = vmatmul.mubr.f32.gmra.mrb[60].mxu1 %v104_v39 }
  0xf8   :  { %v448_v40 = vpop.f32.mrb[0].mxu0 }
  0xf9   :  { %v751_v41 = vpop.f32.mrb[1].mxu0 }
  0xfc   :  { %v453_v42 = vpop.f32.mrb[2].mxu0 }
  0xfd   :  { %v754_v43 = vpop.f32.mrb[3].mxu0 }
 0x100   :  { %v458_v44 = vpop.f32.mrb[4].mxu0 }
 0x101   :  { %v757_v45 = vpop.f32.mrb[5].mxu0 }
 0x104   :  { %v463_v46 = vpop.f32.mrb[6].mxu0 }
 0x105   :  { %v760_v47 = vpop.f32.mrb[7].mxu0 }
 0x108   :  { %v468_v48 = vpop.f32.mrb[8].mxu0 }
 0x109   :  { %v763_v49 = vpop.f32.mrb[9].mxu0 }
 0x10c   :  { %v473_v50 = vpop.f32.mrb[10].mxu0 }
 0x10d   :  { %v766_v51 = vpop.f32.mrb[11].mxu0 }
 0x110   :  { %v478_v53 = vpop.f32.mrb[12].mxu0 }
 0x111   :  { %v769_v54 = vpop.f32.mrb[13].mxu0 }
 0x114   :  { %v483_v58 = vpop.f32.mrb[14].mxu0 }
 0x115   :  { %v772_v60 = vpop.f32.mrb[15].mxu0 }
 0x116   :  { %v228_v55 = vpop.f32.mrb[0].mxu1 }
 0x117   :  { %v229_v56 = vadd.f32 %v1514_v52, %v228_v55  ;;  %v230_v57 = vpop.f32.mrb[1].mxu1 }
 0x118   :  { %v488_v2 = vpop.f32.mrb[16].mxu0 }
 0x119   :  { %v449_v59 = vadd.f32 %v448_v40, %v229_v56  ;;  %v775_v4 = vpop.f32.mrb[17].mxu0 }
 0x11a   :  { %v233_v61 = vpop.f32.mrb[2].mxu1 }
 0x11b   :  { %v602_v62 = vmax.f32 %v449_v59, 0.0  ;;  %v234_v63 = vadd.f32 %v1514_v52, %v233_v61  ;;  %v235_v1 = vpop.f32.mrb[3].mxu1 }
 0x11c   :  { %v493_v10 = vpop.f32.mrb[18].mxu0 }
 0x11d   :  { %634 = vst.msk [vmem:[%s1674_s3] sm:$0xff] %vm633_vm1, %v602_v62  ;;  %v454_v3 = vadd.f32 %v453_v42, %v234_v63  ;;  %v778_v12 = vpop.f32.mrb[19].mxu0 }
 0x11e   :  { %v238_v5 = vpop.f32.mrb[4].mxu1 }
 0x11f   :  { %v603_v7 = vmax.f32 %v454_v3, 0.0  ;;  %v239_v8 = vadd.f32 %v1514_v52, %v238_v5  ;;  %v240_v9 = vpop.f32.mrb[5].mxu1 }
 0x120   :  { %v498_v17 = vpop.f32.mrb[20].mxu0 }
 0x121   :  { %635 = vst.msk [vmem:[%s1674_s3 + $0x8] sm:$0xff] %vm633_vm1, %v603_v7  ;;  %v459_v11 = vadd.f32 %v458_v44, %v239_v8  ;;  %v781_v19 = vpop.f32.mrb[21].mxu0 }
 0x122   :  { %v243_v13 = vpop.f32.mrb[6].mxu1 }
 0x123   :  { %v604_v14 = vmax.f32 %v459_v11, 0.0  ;;  %v244_v15 = vadd.f32 %v1514_v52, %v243_v13  ;;  %v245_v16 = vpop.f32.mrb[7].mxu1 }
 0x124   :  { %v503_v23 = vpop.f32.mrb[22].mxu0 }
 0x125   :  { %636 = vst.msk [vmem:[%s1674_s3 + $0x10] sm:$0xff] %vm633_vm1, %v604_v14  ;;  %v464_v18 = vadd.f32 %v463_v46, %v244_v15  ;;  %v784_v25 = vpop.f32.mrb[23].mxu0 }
 0x126   :  { %v248_v20 = vpop.f32.mrb[8].mxu1 }
 0x127   :  { %v605_v21 = vmax.f32 %v464_v18, 0.0  ;;  %v249_v0 = vadd.f32 %v1514_v52, %v248_v20  ;;  %v250_v22 = vpop.f32.mrb[9].mxu1 }
 0x128   :  { %v508_v6 = vpop.f32.mrb[24].mxu0 }
 0x129   :  { %637 = vst.msk [vmem:[%s1674_s3 + $0x18] sm:$0xff] %vm633_vm1, %v605_v21  ;;  %v469_v24 = vadd.f32 %v468_v48, %v249_v0  ;;  %v787_v31 = vpop.f32.mrb[25].mxu0 }
 0x12a   :  { %v253_v26 = vpop.f32.mrb[10].mxu1 }
 0x12b   :  { %v606_v27 = vmax.f32 %v469_v24, 0.0  ;;  %v254_v28 = vadd.f32 %v1514_v52, %v253_v26  ;;  %v255_v29 = vpop.f32.mrb[11].mxu1 }
 0x12c   :  { %v513_v36 = vpop.f32.mrb[26].mxu0 }
 0x12d   :  { %638 = vst.msk [vmem:[%s1674_s3 + $0x20] sm:$0xff] %vm633_vm1, %v606_v27  ;;  %v474_v30 = vadd.f32 %v473_v50, %v254_v28  ;;  %v790_v38 = vpop.f32.mrb[27].mxu0 }
 0x12e   :  { %v258_v32 = vpop.f32.mrb[12].mxu1 }
 0x12f   :  { %v607_v33 = vmax.f32 %v474_v30, 0.0  ;;  %v259_v34 = vadd.f32 %v1514_v52, %v258_v32  ;;  %v260_v35 = vpop.f32.mrb[13].mxu1 }
 0x130   :  { %v518_v43 = vpop.f32.mrb[28].mxu0 }
 0x131   :  { %639 = vst.msk [vmem:[%s1674_s3 + $0x28] sm:$0xff] %vm633_vm1, %v607_v33  ;;  %v479_v37 = vadd.f32 %v478_v53, %v259_v34  ;;  %v793_v45 = vpop.f32.mrb[29].mxu0 }
 0x132   :  { %v263_v39 = vpop.f32.mrb[14].mxu1 }
 0x133   :  { %v608_v40 = vmax.f32 %v479_v37, 0.0  ;;  %v264_v41 = vadd.f32 %v1514_v52, %v263_v39  ;;  %v265_v42 = vpop.f32.mrb[15].mxu1 }
 0x134   :  { %v523_v50 = vpop.f32.mrb[30].mxu0 }
 0x135   :  { %640 = vst.msk [vmem:[%s1674_s3 + $0x30] sm:$0xff] %vm633_vm1, %v608_v40  ;;  %v484_v44 = vadd.f32 %v483_v58, %v264_v41  ;;  %v796_v53 = vpop.f32.mrb[31].mxu0 }
 0x136   :  { %v268_v46 = vpop.f32.mrb[16].mxu1 }
 0x137   :  { %v609_v47 = vmax.f32 %v484_v44, 0.0  ;;  %v269_v48 = vadd.f32 %v1514_v52, %v268_v46  ;;  %v270_v49 = vpop.f32.mrb[17].mxu1 }
 0x138   :  { %v528_v58 = vpop.f32.mrb[32].mxu0 }
 0x139   :  { %641 = vst.msk [vmem:[%s1674_s3 + $0x38] sm:$0xff] %vm633_vm1, %v609_v47  ;;  %v489_v51 = vadd.f32 %v488_v2, %v269_v48  ;;  %v799_v60 = vpop.f32.mrb[33].mxu0 }
 0x13a   :  { %v273_v54 = vpop.f32.mrb[18].mxu1 }
 0x13b   :  { %v610_v55 = vmax.f32 %v489_v51, 0.0  ;;  %v274_v56 = vadd.f32 %v1514_v52, %v273_v54  ;;  %v275_v57 = vpop.f32.mrb[19].mxu1 }
 0x13c   :  { %v533_v2 = vpop.f32.mrb[34].mxu0 }
 0x13d   :  { %642 = vst.msk [vmem:[%s1674_s3 + $0x40] sm:$0xff] %vm633_vm1, %v610_v55  ;;  %v494_v59 = vadd.f32 %v493_v10, %v274_v56  ;;  %v802_v4 = vpop.f32.mrb[35].mxu0 }
 0x13e   :  { %v278_v61 = vpop.f32.mrb[20].mxu1 }
 0x13f   :  { %v611_v62 = vmax.f32 %v494_v59, 0.0  ;;  %v279_v63 = vadd.f32 %v1514_v52, %v278_v61  ;;  %v280_v1 = vpop.f32.mrb[21].mxu1 }
 0x140   :  { %v538_v10 = vpop.f32.mrb[36].mxu0 }
 0x141   :  { %643 = vst.msk [vmem:[%s1674_s3 + $0x48] sm:$0xff] %vm633_vm1, %v611_v62  ;;  %v499_v3 = vadd.f32 %v498_v17, %v279_v63  ;;  %v805_v12 = vpop.f32.mrb[37].mxu0 }
 0x142   :  { %v283_v5 = vpop.f32.mrb[22].mxu1 }
 0x143   :  { %v612_v7 = vmax.f32 %v499_v3, 0.0  ;;  %v284_v8 = vadd.f32 %v1514_v52, %v283_v5  ;;  %v285_v9 = vpop.f32.mrb[23].mxu1 }
 0x144   :  { %v543_v17 = vpop.f32.mrb[38].mxu0 }
 0x145   :  { %644 = vst.msk [vmem:[%s1674_s3 + $0x50] sm:$0xff] %vm633_vm1, %v612_v7  ;;  %v504_v11 = vadd.f32 %v503_v23, %v284_v8  ;;  %v808_v19 = vpop.f32.mrb[39].mxu0 }
 0x146   :  { %v288_v13 = vpop.f32.mrb[24].mxu1 }
 0x147   :  { %v613_v14 = vmax.f32 %v504_v11, 0.0  ;;  %v289_v15 = vadd.f32 %v1514_v52, %v288_v13  ;;  %v290_v16 = vpop.f32.mrb[25].mxu1 }
 0x148   :  { %v548_v23 = vpop.f32.mrb[40].mxu0 }
 0x149   :  { %645 = vst.msk [vmem:[%s1674_s3 + $0x58] sm:$0xff] %vm633_vm1, %v613_v14  ;;  %v509_v18 = vadd.f32 %v508_v6, %v289_v15  ;;  %v811_v25 = vpop.f32.mrb[41].mxu0 }
 0x14a   :  { %v293_v20 = vpop.f32.mrb[26].mxu1 }
 0x14b   :  { %v614_v21 = vmax.f32 %v509_v18, 0.0  ;;  %v294_v0 = vadd.f32 %v1514_v52, %v293_v20  ;;  %v295_v22 = vpop.f32.mrb[27].mxu1 }
 0x14c   :  { %v553_v6 = vpop.f32.mrb[42].mxu0 }
 0x14d   :  { %646 = vst.msk [vmem:[%s1674_s3 + $0x60] sm:$0xff] %vm633_vm1, %v614_v21  ;;  %v514_v24 = vadd.f32 %v513_v36, %v294_v0  ;;  %v814_v31 = vpop.f32.mrb[43].mxu0 }
 0x14e   :  { %v298_v26 = vpop.f32.mrb[28].mxu1 }
 0x14f   :  { %v615_v27 = vmax.f32 %v514_v24, 0.0  ;;  %v299_v28 = vadd.f32 %v1514_v52, %v298_v26  ;;  %v300_v29 = vpop.f32.mrb[29].mxu1 }
 0x150   :  { %v558_v36 = vpop.f32.mrb[44].mxu0 }
 0x151   :  { %647 = vst.msk [vmem:[%s1674_s3 + $0x68] sm:$0xff] %vm633_vm1, %v615_v27  ;;  %v519_v30 = vadd.f32 %v518_v43, %v299_v28  ;;  %v817_v38 = vpop.f32.mrb[45].mxu0 }
 0x152   :  { %v303_v32 = vpop.f32.mrb[30].mxu1 }
 0x153   :  { %v616_v33 = vmax.f32 %v519_v30, 0.0  ;;  %v304_v34 = vadd.f32 %v1514_v52, %v303_v32  ;;  %v305_v35 = vpop.f32.mrb[31].mxu1 }
 0x154   :  { %v563_v43 = vpop.f32.mrb[46].mxu0 }
 0x155   :  { %648 = vst.msk [vmem:[%s1674_s3 + $0x70] sm:$0xff] %vm633_vm1, %v616_v33  ;;  %v524_v37 = vadd.f32 %v523_v50, %v304_v34  ;;  %v820_v45 = vpop.f32.mrb[47].mxu0 }
 0x156   :  { %v308_v39 = vpop.f32.mrb[32].mxu1 }
 0x157   :  { %v617_v40 = vmax.f32 %v524_v37, 0.0  ;;  %v309_v41 = vadd.f32 %v1514_v52, %v308_v39  ;;  %v310_v42 = vpop.f32.mrb[33].mxu1 }
 0x158   :  { %v568_v50 = vpop.f32.mrb[48].mxu0 }
 0x159   :  { %649 = vst.msk [vmem:[%s1674_s3 + $0x78] sm:$0xff] %vm633_vm1, %v617_v40  ;;  %v529_v44 = vadd.f32 %v528_v58, %v309_v41  ;;  %v823_v53 = vpop.f32.mrb[49].mxu0 }
 0x15a   :  { %v313_v46 = vpop.f32.mrb[34].mxu1 }
 0x15b   :  { %v618_v47 = vmax.f32 %v529_v44, 0.0  ;;  %v314_v48 = vadd.f32 %v1514_v52, %v313_v46  ;;  %v315_v49 = vpop.f32.mrb[35].mxu1 }
 0x15c   :  { %v573_v58 = vpop.f32.mrb[50].mxu0 }
 0x15d   :  { %650 = vst.msk [vmem:[%s1674_s3 + $0x80] sm:$0xff] %vm633_vm1, %v618_v47  ;;  %v534_v51 = vadd.f32 %v533_v2, %v314_v48  ;;  %v826_v60 = vpop.f32.mrb[51].mxu0 }
 0x15e   :  { %v318_v54 = vpop.f32.mrb[36].mxu1 }
 0x15f   :  { %v619_v55 = vmax.f32 %v534_v51, 0.0  ;;  %v319_v56 = vadd.f32 %v1514_v52, %v318_v54  ;;  %v320_v57 = vpop.f32.mrb[37].mxu1 }
 0x160   :  { %v578_v2 = vpop.f32.mrb[52].mxu0 }
 0x161   :  { %651 = vst.msk [vmem:[%s1674_s3 + $0x88] sm:$0xff] %vm633_vm1, %v619_v55  ;;  %v539_v59 = vadd.f32 %v538_v10, %v319_v56  ;;  %v829_v4 = vpop.f32.mrb[53].mxu0 }
 0x162   :  { %v323_v61 = vpop.f32.mrb[38].mxu1 }
 0x163   :  { %v620_v62 = vmax.f32 %v539_v59, 0.0  ;;  %v324_v63 = vadd.f32 %v1514_v52, %v323_v61  ;;  %v325_v1 = vpop.f32.mrb[39].mxu1 }
 0x164   :  { %v583_v10 = vpop.f32.mrb[54].mxu0 }
 0x165   :  { %652 = vst.msk [vmem:[%s1674_s3 + $0x90] sm:$0xff] %vm633_vm1, %v620_v62  ;;  %v544_v3 = vadd.f32 %v543_v17, %v324_v63  ;;  %v832_v12 = vpop.f32.mrb[55].mxu0 }
 0x166   :  { %v328_v5 = vpop.f32.mrb[40].mxu1 }
 0x167   :  { %v621_v7 = vmax.f32 %v544_v3, 0.0  ;;  %v329_v8 = vadd.f32 %v1514_v52, %v328_v5  ;;  %v330_v9 = vpop.f32.mrb[41].mxu1 }
 0x168   :  { %v588_v17 = vpop.f32.mrb[56].mxu0 }
 0x169   :  { %653 = vst.msk [vmem:[%s1674_s3 + $0x98] sm:$0xff] %vm633_vm1, %v621_v7  ;;  %v549_v11 = vadd.f32 %v548_v23, %v329_v8  ;;  %v835_v19 = vpop.f32.mrb[57].mxu0 }
 0x16a   :  { %v333_v13 = vpop.f32.mrb[42].mxu1 }
 0x16b   :  { %v622_v14 = vmax.f32 %v549_v11, 0.0  ;;  %v334_v15 = vadd.f32 %v1514_v52, %v333_v13  ;;  %v335_v16 = vpop.f32.mrb[43].mxu1 }
 0x16c   :  { %v593_v23 = vpop.f32.mrb[58].mxu0 }
 0x16d   :  { %654 = vst.msk [vmem:[%s1674_s3 + $0xa0] sm:$0xff] %vm633_vm1, %v622_v14  ;;  %v554_v18 = vadd.f32 %v553_v6, %v334_v15  ;;  %v838_v25 = vpop.f32.mrb[59].mxu0 }
 0x16e   :  { %v338_v20 = vpop.f32.mrb[44].mxu1 }
 0x16f   :  { %v623_v21 = vmax.f32 %v554_v18, 0.0  ;;  %v339_v0 = vadd.f32 %v1514_v52, %v338_v20  ;;  %v340_v22 = vpop.f32.mrb[45].mxu1 }
 0x170   :  { %v598_v6 = vpop.f32.mrb[60].mxu0 }
 0x171   :  { %655 = vst.msk [vmem:[%s1674_s3 + $0xa8] sm:$0xff] %vm633_vm1, %v623_v21  ;;  %v559_v24 = vadd.f32 %v558_v36, %v339_v0  ;;  %v841_v31 = vpop.f32.mrb[61].mxu0 }
 0x172   :  { %v343_v26 = vpop.f32.mrb[46].mxu1 }
 0x173   :  { %v624_v27 = vmax.f32 %v559_v24, 0.0  ;;  %v344_v28 = vadd.f32 %v1514_v52, %v343_v26  ;;  %v345_v29 = vpop.f32.mrb[47].mxu1 }
 0x175   :  { %656 = vst.msk [vmem:[%s1674_s3 + $0xb0] sm:$0xff] %vm633_vm1, %v624_v27  ;;  %v564_v30 = vadd.f32 %v563_v43, %v344_v28 }
 0x176   :  { %v348_v32 = vpop.f32.mrb[48].mxu1 }
 0x177   :  { %v625_v33 = vmax.f32 %v564_v30, 0.0  ;;  %v349_v34 = vadd.f32 %v1514_v52, %v348_v32  ;;  %v350_v35 = vpop.f32.mrb[49].mxu1 }
 0x179   :  { %657 = vst.msk [vmem:[%s1674_s3 + $0xb8] sm:$0xff] %vm633_vm1, %v625_v33  ;;  %v569_v36 = vadd.f32 %v568_v50, %v349_v34 }
 0x17a   :  { %v353_v37 = vpop.f32.mrb[50].mxu1 }
 0x17b   :  { %v626_v38 = vmax.f32 %v569_v36, 0.0  ;;  %v354_v39 = vadd.f32 %v1514_v52, %v353_v37  ;;  %v355_v40 = vpop.f32.mrb[51].mxu1 }
 0x17d   :  { %658 = vst.msk [vmem:[%s1674_s3 + $0xc0] sm:$0xff] %vm633_vm1, %v626_v38  ;;  %v574_v41 = vadd.f32 %v573_v58, %v354_v39 }
 0x17e   :  { %v358_v42 = vpop.f32.mrb[52].mxu1 }
 0x17f   :  { %v627_v43 = vmax.f32 %v574_v41, 0.0  ;;  %v359_v44 = vadd.f32 %v1514_v52, %v358_v42  ;;  %v360_v45 = vpop.f32.mrb[53].mxu1 }
 0x181   :  { %659 = vst.msk [vmem:[%s1674_s3 + $0xc8] sm:$0xff] %vm633_vm1, %v627_v43  ;;  %v579_v46 = vadd.f32 %v578_v2, %v359_v44 }
 0x182   :  { %v363_v47 = vpop.f32.mrb[54].mxu1 }
 0x183   :  { %v628_v48 = vmax.f32 %v579_v46, 0.0  ;;  %v364_v49 = vadd.f32 %v1514_v52, %v363_v47  ;;  %v365_v50 = vpop.f32.mrb[55].mxu1 }
 0x185   :  { %660 = vst.msk [vmem:[%s1674_s3 + $0xd0] sm:$0xff] %vm633_vm1, %v628_v48  ;;  %v584_v51 = vadd.f32 %v583_v10, %v364_v49 }
 0x186   :  { %v368_v53 = vpop.f32.mrb[56].mxu1 }
 0x187   :  { %v629_v54 = vmax.f32 %v584_v51, 0.0  ;;  %v369_v55 = vadd.f32 %v1514_v52, %v368_v53  ;;  %v370_v56 = vpop.f32.mrb[57].mxu1 }
 0x189   :  { %661 = vst.msk [vmem:[%s1674_s3 + $0xd8] sm:$0xff] %vm633_vm1, %v629_v54  ;;  %v589_v57 = vadd.f32 %v588_v17, %v369_v55 }
 0x18a   :  { %v373_v58 = vpop.f32.mrb[58].mxu1 }
 0x18b   :  { %v630_v59 = vmax.f32 %v589_v57, 0.0  ;;  %v374_v60 = vadd.f32 %v1514_v52, %v373_v58  ;;  %v375_v61 = vpop.f32.mrb[59].mxu1 }
 0x18d   :  { %662 = vst.msk [vmem:[%s1674_s3 + $0xe0] sm:$0xff] %vm633_vm1, %v630_v59  ;;  %v594_v62 = vadd.f32 %v593_v23, %v374_v60 }
 0x18e   :  { %v378_v63 = vpop.f32.mrb[60].mxu1 }
 0x18f   :  { %v631_v1 = vmax.f32 %v594_v62, 0.0  ;;  %v379_v2 = vadd.f32 %v1514_v52, %v378_v63  ;;  %v380_v3 = vpop.f32.mrb[61].mxu1 }
 0x191   :  { %663 = vst.msk [vmem:[%s1674_s3 + $0xe8] sm:$0xff] %vm633_vm1, %v631_v1  ;;  %v599_v4 = vadd.f32 %v598_v6, %v379_v2 }
 0x193   :  { %v632_v5 = vmax.f32 %v599_v4, 0.0 }
 0x195   :  { %664 = vst.msk [vmem:[%s1674_s3 + $0xf0] sm:$0xff] %vm633_vm1, %v632_v5 }

// kernel: myresnet_forward.15
= control target key start
LH: loop header
LB: loop body
LE: loop exit
PB: predicated region body
PF: predicated region fallthrough
CT: control target
= control target key end

     0   :  { %vm45_vm0 = vcmask 523264   ;;  %s143_s0 = inlined_call_operand.vmem [shape: f32[32,64], index: 0, kind: input, shape index: {}]   ;;  %s144_s1 = inlined_call_operand.vmem [shape: f32[32,64], index: 1, kind: input, shape index: {}]   ;;  %s145_s2 = inlined_call_operand.vmem [shape: f32[32,64], index: 2, kind: input, shape index: {}]   ;;  %s146_s3 = inlined_call_operand.vmem [shape: f32[32,64], index: 3, kind: input, shape index: {}]   ;;  %s147_s4 = inlined_call_operand.vmem [shape: f32[32,64], index: 4, kind: output, shape index: {}]  }
   0x1   :  { %v17_v0 = vld [vmem:[%s143_s0] sm:$0xff]  ;;  %v18_v5 = vld [vmem:[%s143_s0 + $0x8] sm:$0xff]  ;;  %v19_v11 = vld [vmem:[%s143_s0 + $0x10] sm:$0xff] }
   0x2   :  { %v21_v1 = vld [vmem:[%s144_s1] sm:$0xff]  ;;  %v22_v6 = vld [vmem:[%s144_s1 + $0x8] sm:$0xff]  ;;  %v23_v13 = vld [vmem:[%s144_s1 + $0x10] sm:$0xff] }
   0x3   :  { %v29_v2 = vld [vmem:[%s145_s2] sm:$0xff]  ;;  %v25_v3 = vmax.f32 %v17_v0, %v21_v1  ;;  %v26_v8 = vmax.f32 %v18_v5, %v22_v6  ;;  %v30_v9 = vld [vmem:[%s145_s2 + $0x8] sm:$0xff]  ;;  %v31_v14 = vld [vmem:[%s145_s2 + $0x10] sm:$0xff]  ;;  %v27_v17 = vmax.f32 %v19_v11, %v23_v13 }
   0x4   :  { %v33_v4 = vld [vmem:[%s146_s3] sm:$0xff]  ;;  %v34_v10 = vld [vmem:[%s146_s3 + $0x8] sm:$0xff]  ;;  %v35_v15 = vld [vmem:[%s146_s3 + $0x10] sm:$0xff] }
   0x5   :  { %v37_v7 = vmax.f32 %v29_v2, %v33_v4  ;;  %v38_v12 = vmax.f32 %v30_v9, %v34_v10  ;;  %v39_v18 = vmax.f32 %v31_v14, %v35_v15  ;;  %v20_v19 = vld [vmem:[%s143_s0 + $0x18] sm:$0xff] }
   0x6   :  { %v24_v20 = vld [vmem:[%s144_s1 + $0x18] sm:$0xff] }
   0x7   :  { %v41_v16 = vmax.f32 %v25_v3, %v37_v7  ;;  %v32_v21 = vld [vmem:[%s145_s2 + $0x18] sm:$0xff]  ;;  %v42_v22 = vmax.f32 %v26_v8, %v38_v12  ;;  %v28_v23 = vmax.f32 %v20_v19, %v24_v20  ;;  %v43_v25 = vmax.f32 %v27_v17, %v39_v18 }
   0x8   :  { %v36_v24 = vld [vmem:[%s146_s3 + $0x18] sm:$0xff] }
   0x9   :  { %46 = vst.msk [vmem:[%s147_s4] sm:$0xff] %vm45_vm0, %v41_v16  ;;  %v40_v26 = vmax.f32 %v32_v21, %v36_v24  ;;  %47 = vst.msk [vmem:[%s147_s4 + $0x8] sm:$0xff] %vm45_vm0, %v42_v22 }
   0xa   :  { %48 = vst.msk [vmem:[%s147_s4 + $0x10] sm:$0xff] %vm45_vm0, %v43_v25 }
   0xb   :  { %v44_v27 = vmax.f32 %v28_v23, %v40_v26 }
   0xd   :  { %49 = vst.msk [vmem:[%s147_s4 + $0x18] sm:$0xff] %vm45_vm0, %v44_v27 }

// kernel: myresnet_forward.14
= control target key start
LH: loop header
LB: loop body
LE: loop exit
PB: predicated region body
PF: predicated region fallthrough
CT: control target
= control target key end

     0   :  { %v1135_v0 = vmov 0.0|0.0   ;;  %vm1136_vm0 = vmmov 0   ;;  %vm737_vm1 = vcmask 523264   ;;  %s1988_s1 = inlined_call_operand.vmem [shape: f32[640,64], index: 1, kind: input, shape index: {}]   ;;  %s1989_s0 = inlined_call_operand.vmem [shape: f32[168,640], index: 0, kind: input, shape index: {}]   ;;  %s1990_s2 = inlined_call_operand.vmem [shape: f32[1,64], index: 2, kind: input, shape index: {}]   ;;  %s1991_s3 = inlined_call_operand.vmem [shape: f32[168,64], index: 3, kind: output, shape index: {}]  }
   0x1   :  { %896 = vmatprep.subr.bf16.mxu1 %v1135_v0  ;;  %944 = vmatprep.subr.bf16.mxu0 %v1135_v0  ;;  %v119_v1 = vld [vmem:[%s1988_s1] sm:$0xff]  ;;  %v120_v2 = vld [vmem:[%s1988_s1 + $0x8] sm:$0xff]  ;;  %v121_v6 = vld [vmem:[%s1988_s1 + $0x10] sm:$0xff] }
   0x2   :  { %v151_v3 = vld [vmem:[%s1988_s1 + $0x100] sm:$0xff]  ;;  %v897_v4 = vpack.c.bf16 %v120_v2, %v119_v1  ;;  %v152_v5 = vld [vmem:[%s1988_s1 + $0x108] sm:$0xff]  ;;  %v122_v7 = vld [vmem:[%s1988_s1 + $0x18] sm:$0xff] }
   0x3   :  { %v1178_v8 = vpack.c.bf16 %v152_v5, %v151_v3  ;;  %v153_v9 = vld [vmem:[%s1988_s1 + $0x110] sm:$0xff]  ;;  %v154_v10 = vld [vmem:[%s1988_s1 + $0x118] sm:$0xff]  ;;  %v900_v11 = vpack.c.bf16 %v122_v7, %v121_v6  ;;  %v123_v13 = vld [vmem:[%s1988_s1 + $0x20] sm:$0xff] }
   0x4   :  { %898 = vmatpush1.bf16.msra.mxu1 %v897_v4  ;;  %v1188_v12 = vpack.c.bf16 %v154_v10, %v153_v9  ;;  %v124_v14 = vld [vmem:[%s1988_s1 + $0x28] sm:$0xff]  ;;  %v155_v15 = vld [vmem:[%s1988_s1 + $0x120] sm:$0xff]  ;;  %v125_v19 = vld [vmem:[%s1988_s1 + $0x30] sm:$0xff] }
   0x5   :  { %946 = vmatpush1.bf16.msra.mxu0 %v1178_v8  ;;  %899 = vmatprep.subr.bf16.mxu1 %v1135_v0  ;;  %v156_v16 = vld [vmem:[%s1988_s1 + $0x128] sm:$0xff]  ;;  %v903_v17 = vpack.c.bf16 %v124_v14, %v123_v13  ;;  %v126_v20 = vld [vmem:[%s1988_s1 + $0x38] sm:$0xff]  ;;  %v157_v21 = vld [vmem:[%s1988_s1 + $0x130] sm:$0xff] }
   0x6   :  { %947 = vmatprep.subr.bf16.mxu0 %v1135_v0  ;;  %v1205_v18 = vpack.c.bf16 %v156_v16, %v155_v15  ;;  %v158_v22 = vld [vmem:[%s1988_s1 + $0x138] sm:$0xff]  ;;  %v906_v23 = vpack.c.bf16 %v126_v20, %v125_v19  ;;  %v127_v25 = vld [vmem:[%s1988_s1 + $0x40] sm:$0xff]  ;;  %v128_v26 = vld [vmem:[%s1988_s1 + $0x48] sm:$0xff] }
   0x7   :  { %v1222_v24 = vpack.c.bf16 %v158_v22, %v157_v21  ;;  %v159_v27 = vld [vmem:[%s1988_s1 + $0x140] sm:$0xff]  ;;  %v160_v28 = vld [vmem:[%s1988_s1 + $0x148] sm:$0xff]  ;;  %v909_v29 = vpack.c.bf16 %v128_v26, %v127_v25  ;;  %v129_v31 = vld [vmem:[%s1988_s1 + $0x50] sm:$0xff] }
   0x8   :  { %901 = vmatpush1.bf16.msra.mxu1 %v900_v11  ;;  %v1239_v30 = vpack.c.bf16 %v160_v28, %v159_v27  ;;  %v130_v32 = vld [vmem:[%s1988_s1 + $0x58] sm:$0xff]  ;;  %v161_v33 = vld [vmem:[%s1988_s1 + $0x150] sm:$0xff]  ;;  %v131_v37 = vld [vmem:[%s1988_s1 + $0x60] sm:$0xff] }
   0x9   :  { %949 = vmatpush1.bf16.msra.mxu0 %v1188_v12  ;;  %902 = vmatprep.subr.bf16.mxu1 %v1135_v0  ;;  %v162_v34 = vld [vmem:[%s1988_s1 + $0x158] sm:$0xff]  ;;  %v912_v35 = vpack.c.bf16 %v130_v32, %v129_v31  ;;  %v132_v38 = vld [vmem:[%s1988_s1 + $0x68] sm:$0xff]  ;;  %v163_v39 = vld [vmem:[%s1988_s1 + $0x160] sm:$0xff] }
   0xa   :  { %950 = vmatprep.subr.bf16.mxu0 %v1135_v0  ;;  %v1256_v36 = vpack.c.bf16 %v162_v34, %v161_v33  ;;  %v164_v40 = vld [vmem:[%s1988_s1 + $0x168] sm:$0xff]  ;;  %v17_v42 = vld [vmem:[%s1989_s0 + $0x18] sm:$0xff]  ;;  %v915_v43 = vpack.c.bf16 %v132_v38, %v131_v37  ;;  %v133_v45 = vld [vmem:[%s1988_s1 + $0x70] sm:$0xff] }
   0xb   :  { %v15_v41 = vld [vmem:[%s1989_s0 + $0x8] sm:$0xff]  ;;  %440 = vmatprep.mubr.f32.mxu0 %v17_v42  ;;  %v1279_v44 = vpack.c.bf16 %v164_v40, %v163_v39  ;;  %v134_v46 = vld [vmem:[%s1988_s1 + $0x78] sm:$0xff]  ;;  %v165_v47 = vld [vmem:[%s1988_s1 + $0x170] sm:$0xff] }
   0xc   :  { %904 = vmatpush1.bf16.msra.mxu1 %v903_v17  ;;  %270 = vmatprep.mubr.f32.mxu1 %v15_v41  ;;  %v166_v48 = vld [vmem:[%s1988_s1 + $0x178] sm:$0xff]  ;;  %v918_v49 = vpack.c.bf16 %v134_v46, %v133_v45  ;;  %v135_v51 = vld [vmem:[%s1988_s1 + $0x80] sm:$0xff]  ;;  %v136_v52 = vld [vmem:[%s1988_s1 + $0x88] sm:$0xff] }
   0xd   :  { %952 = vmatpush1.bf16.msra.mxu0 %v1205_v18  ;;  %905 = vmatprep.subr.bf16.mxu1 %v1135_v0  ;;  %v1296_v50 = vpack.c.bf16 %v166_v48, %v165_v47  ;;  %v167_v53 = vld [vmem:[%s1988_s1 + $0x180] sm:$0xff]  ;;  %v168_v54 = vld [vmem:[%s1988_s1 + $0x188] sm:$0xff]  ;;  %v921_v55 = vpack.c.bf16 %v136_v52, %v135_v51  ;;  %v137_v57 = vld [vmem:[%s1988_s1 + $0x90] sm:$0xff] }
   0xe   :  { %953 = vmatprep.subr.bf16.mxu0 %v1135_v0  ;;  %v1313_v56 = vpack.c.bf16 %v168_v54, %v167_v53  ;;  %v138_v58 = vld [vmem:[%s1988_s1 + $0x98] sm:$0xff]  ;;  %v169_v59 = vld [vmem:[%s1988_s1 + $0x190] sm:$0xff]  ;;  %v139_v63 = vld [vmem:[%s1988_s1 + $0xa0] sm:$0xff] }
   0xf   :  { %v170_v60 = vld [vmem:[%s1988_s1 + $0x198] sm:$0xff]  ;;  %v924_v61 = vpack.c.bf16 %v138_v58, %v137_v57  ;;  %v140_v1 = vld [vmem:[%s1988_s1 + $0xa8] sm:$0xff]  ;;  %v171_v2 = vld [vmem:[%s1988_s1 + $0x1a0] sm:$0xff] }
  0x10   :  { %907 = vmatpush1.bf16.msra.mxu1 %v906_v23  ;;  %v1330_v62 = vpack.c.bf16 %v170_v60, %v169_v59  ;;  %v172_v3 = vld [vmem:[%s1988_s1 + $0x1a8] sm:$0xff]  ;;  %v927_v4 = vpack.c.bf16 %v140_v1, %v139_v63  ;;  %v141_v6 = vld [vmem:[%s1988_s1 + $0xb0] sm:$0xff]  ;;  %v142_v7 = vld [vmem:[%s1988_s1 + $0xb8] sm:$0xff] }
  0x11   :  { %955 = vmatpush1.bf16.msra.mxu0 %v1222_v24  ;;  %908 = vmatprep.subr.bf16.mxu1 %v1135_v0  ;;  %v1347_v5 = vpack.c.bf16 %v172_v3, %v171_v2  ;;  %v173_v9 = vld [vmem:[%s1988_s1 + $0x1b0] sm:$0xff]  ;;  %v174_v10 = vld [vmem:[%s1988_s1 + $0x1b8] sm:$0xff]  ;;  %v930_v11 = vpack.c.bf16 %v142_v7, %v141_v6  ;;  %v143_v14 = vld [vmem:[%s1988_s1 + $0xc0] sm:$0xff] }
  0x12   :  { %956 = vmatprep.subr.bf16.mxu0 %v1135_v0  ;;  %v1364_v13 = vpack.c.bf16 %v174_v10, %v173_v9  ;;  %v144_v15 = vld [vmem:[%s1988_s1 + $0xc8] sm:$0xff]  ;;  %v175_v16 = vld [vmem:[%s1988_s1 + $0x1c0] sm:$0xff]  ;;  %v145_v21 = vld [vmem:[%s1988_s1 + $0xd0] sm:$0xff] }
  0x13   :  { %v176_v17 = vld [vmem:[%s1988_s1 + $0x1c8] sm:$0xff]  ;;  %v933_v19 = vpack.c.bf16 %v144_v15, %v143_v14  ;;  %v146_v22 = vld [vmem:[%s1988_s1 + $0xd8] sm:$0xff]  ;;  %v177_v23 = vld [vmem:[%s1988_s1 + $0x1d0] sm:$0xff] }
  0x14   :  { %910 = vmatpush1.bf16.msra.mxu1 %v909_v29  ;;  %v1381_v20 = vpack.c.bf16 %v176_v17, %v175_v16  ;;  %v178_v25 = vld [vmem:[%s1988_s1 + $0x1d8] sm:$0xff]  ;;  %v936_v26 = vpack.c.bf16 %v146_v22, %v145_v21  ;;  %v147_v28 = vld [vmem:[%s1988_s1 + $0xe0] sm:$0xff]  ;;  %v148_v29 = vld [vmem:[%s1988_s1 + $0xe8] sm:$0xff] }
  0x15   :  { %958 = vmatpush1.bf16.msra.mxu0 %v1239_v30  ;;  %911 = vmatprep.subr.bf16.mxu1 %v1135_v0  ;;  %v1398_v27 = vpack.c.bf16 %v178_v25, %v177_v23  ;;  %v179_v31 = vld [vmem:[%s1988_s1 + $0x1e0] sm:$0xff]  ;;  %v180_v32 = vld [vmem:[%s1988_s1 + $0x1e8] sm:$0xff]  ;;  %v939_v33 = vpack.c.bf16 %v148_v29, %v147_v28  ;;  %v150_v37 = vld [vmem:[%s1988_s1 + $0xf8] sm:$0xff] }
  0x16   :  { %959 = vmatprep.subr.bf16.mxu0 %v1135_v0  ;;  %v1415_v34 = vpack.c.bf16 %v180_v32, %v179_v31  ;;  %v181_v38 = vld [vmem:[%s1988_s1 + $0x1f0] sm:$0xff]  ;;  %v182_v39 = vld [vmem:[%s1988_s1 + $0x1f8] sm:$0xff]  ;;  %v183_v42 = vld [vmem:[%s1988_s1 + $0x200] sm:$0xff] }
  0x17   :  { %v1432_v41 = vpack.c.bf16 %v182_v39, %v181_v38  ;;  %v14_v45 = vld [vmem:[%s1989_s0] sm:$0xff]  ;;  %v16_v46 = vld [vmem:[%s1989_s0 + $0x10] sm:$0xff]  ;;  %v186_v51 = vld [vmem:[%s1988_s1 + $0x218] sm:$0xff] }
  0x18   :  { %913 = vmatpush1.bf16.msra.mxu1 %v912_v35  ;;  %v149_v35 = vld [vmem:[%s1988_s1 + $0xf0] sm:$0xff]  ;;  %v22_v52 = vld [vmem:[%s1989_s0 + $0x40] sm:$0xff]  ;;  %v19_v53 = vld [vmem:[%s1989_s0 + $0x28] sm:$0xff] }
  0x19   :  { %961 = vmatpush1.bf16.msra.mxu0 %v1256_v36  ;;  %914 = vmatprep.subr.bf16.mxu1 %v1135_v0  ;;  %v942_v40 = vpack.c.bf16 %v150_v37, %v149_v35  ;;  %v20_v48 = vld [vmem:[%s1989_s0 + $0x30] sm:$0xff]  ;;  %v21_v54 = vld [vmem:[%s1989_s0 + $0x38] sm:$0xff]  ;;  %v27_v58 = vld [vmem:[%s1989_s0 + $0x68] sm:$0xff] }
  0x1a   :  { %962 = vmatprep.subr.bf16.mxu0 %v1135_v0  ;;  %v188_v59 = vld [vmem:[%s1988_s1 + $0x228] sm:$0xff]  ;;  %v24_v60 = vld [vmem:[%s1989_s0 + $0x50] sm:$0xff]  ;;  %v30_v63 = vld [vmem:[%s1989_s0 + $0x80] sm:$0xff] }
  0x1b   :  { %v32_v2 = vld [vmem:[%s1989_s0 + $0x90] sm:$0xff]  ;;  %v31_v6 = vld [vmem:[%s1989_s0 + $0x88] sm:$0xff]  ;;  %v37_v10 = vld [vmem:[%s1989_s0 + $0xb8] sm:$0xff] }
  0x1c   :  { %916 = vmatpush1.bf16.msra.mxu1 %v915_v43  ;;  %v184_v43 = vld [vmem:[%s1988_s1 + $0x208] sm:$0xff]  ;;  %v189_v3 = vld [vmem:[%s1988_s1 + $0x230] sm:$0xff]  ;;  %v194_v22 = vld [vmem:[%s1988_s1 + $0x258] sm:$0xff] }
  0x1d   :  { %964 = vmatpush1.bf16.msra.mxu0 %v1279_v44  ;;  %917 = vmatprep.subr.bf16.mxu1 %v1135_v0  ;;  %v993_v47 = vpack.c.bf16 %v184_v43, %v183_v42  ;;  %v35_v7 = vld [vmem:[%s1989_s0 + $0xa8] sm:$0xff]  ;;  %v36_v15 = vld [vmem:[%s1989_s0 + $0xb0] sm:$0xff]  ;;  %v41_v23 = vld [vmem:[%s1989_s0 + $0xd8] sm:$0xff] }
  0x1e   :  { %965 = vmatprep.subr.bf16.mxu0 %v1135_v0  ;;  %v192_v14 = vld [vmem:[%s1988_s1 + $0x248] sm:$0xff]  ;;  %v40_v16 = vld [vmem:[%s1989_s0 + $0xd0] sm:$0xff]  ;;  %v45_v25 = vld [vmem:[%s1989_s0 + $0xf8] sm:$0xff] }
  0x1f   :  { %v193_v21 = vld [vmem:[%s1988_s1 + $0x250] sm:$0xff]  ;;  %v47_v28 = vld [vmem:[%s1989_s0 + $0x108] sm:$0xff]  ;;  %v195_v29 = vld [vmem:[%s1988_s1 + $0x260] sm:$0xff] }
  0x20   :  { %919 = vmatpush1.bf16.msra.mxu1 %v918_v49  ;;  %v185_v49 = vld [vmem:[%s1988_s1 + $0x210] sm:$0xff]  ;;  %v196_v31 = vld [vmem:[%s1988_s1 + $0x268] sm:$0xff]  ;;  %v198_v39 = vld [vmem:[%s1988_s1 + $0x278] sm:$0xff] }
  0x21   :  { %967 = vmatpush1.bf16.msra.mxu0 %v1296_v50  ;;  %920 = vmatprep.subr.bf16.mxu1 %v1135_v0  ;;  %v996_v57 = vpack.c.bf16 %v186_v51, %v185_v49  ;;  %v44_v32 = vld [vmem:[%s1989_s0 + $0xf0] sm:$0xff]  ;;  %v1011_v35 = vpack.c.bf16 %v196_v31, %v195_v29  ;;  %v55_v42 = vld [vmem:[%s1989_s0 + $0x148] sm:$0xff]  ;;  %v61_v51 = vld [vmem:[%s1989_s0 + $0x178] sm:$0xff] }
  0x22   :  { %968 = vmatprep.subr.bf16.mxu0 %v1135_v0  ;;  %v52_v37 = vld [vmem:[%s1989_s0 + $0x130] sm:$0xff]  ;;  %v59_v49 = vld [vmem:[%s1989_s0 + $0x168] sm:$0xff]  ;;  %v86_v31 = vld [vmem:[%s1989_s0 + $0x240] sm:$0xff] }
  0x23   :  { %v197_v38 = vld [vmem:[%s1988_s1 + $0x270] sm:$0xff]  ;;  %v87_v29 = vld [vmem:[%s1989_s0 + $0x248] sm:$0xff] }
  0x24   :  { %922 = vmatpush1.bf16.msra.mxu1 %v921_v55  ;;  %v25_v55 = vld [vmem:[%s1989_s0 + $0x58] sm:$0xff]  ;;  %v1014_v43 = vpack.c.bf16 %v198_v39, %v197_v38  ;;  %v96_v38 = vld [vmem:[%s1989_s0 + $0x290] sm:$0xff] }
  0x25   :  { %970 = vmatpush1.bf16.msra.mxu0 %v1313_v56  ;;  %923 = vmatprep.subr.bf16.mxu1 %v1135_v0  ;;  %v93_v39 = vld [vmem:[%s1989_s0 + $0x278] sm:$0xff] }
  0x26   :  { %971 = vmatprep.subr.bf16.mxu0 %v1135_v0 }
  0x28   :  { %925 = vmatpush1.bf16.msra.mxu1 %v924_v61  ;;  %v26_v61 = vld [vmem:[%s1989_s0 + $0x60] sm:$0xff] }
  0x29   :  { %973 = vmatpush1.bf16.msra.mxu0 %v1330_v62  ;;  %926 = vmatprep.subr.bf16.mxu1 %v1135_v0 }
  0x2a   :  { %974 = vmatprep.subr.bf16.mxu0 %v1135_v0 }
  0x2c   :  { %928 = vmatpush1.bf16.msra.mxu1 %v927_v4  ;;  %v190_v4 = vld [vmem:[%s1988_s1 + $0x238] sm:$0xff] }
  0x2d   :  { %976 = vmatpush1.bf16.msra.mxu0 %v1347_v5  ;;  %929 = vmatprep.subr.bf16.mxu1 %v1135_v0  ;;  %v1002_v9 = vpack.c.bf16 %v190_v4, %v189_v3  ;;  %v38_v3 = vld [vmem:[%s1989_s0 + $0xc0] sm:$0xff] }
  0x2e   :  { %977 = vmatprep.subr.bf16.mxu0 %v1135_v0  ;;  %v94_v4 = vld [vmem:[%s1989_s0 + $0x280] sm:$0xff] }
  0x30   :  { %931 = vmatpush1.bf16.msra.mxu1 %v930_v11  ;;  %v191_v11 = vld [vmem:[%s1988_s1 + $0x240] sm:$0xff] }
  0x31   :  { %979 = vmatpush1.bf16.msra.mxu0 %v1364_v13  ;;  %932 = vmatprep.subr.bf16.mxu1 %v1135_v0  ;;  %v1005_v17 = vpack.c.bf16 %v192_v14, %v191_v11  ;;  %v109_v11 = vld [vmem:[%s1989_s0 + $0x2f8] sm:$0xff]  ;;  %v58_v14 = vld [vmem:[%s1989_s0 + $0x160] sm:$0xff] }
  0x32   :  { %980 = vmatprep.subr.bf16.mxu0 %v1135_v0 }
  0x34   :  { %934 = vmatpush1.bf16.msra.mxu1 %v933_v19  ;;  %v42_v19 = vld [vmem:[%s1989_s0 + $0xe0] sm:$0xff] }
  0x35   :  { %982 = vmatpush1.bf16.msra.mxu0 %v1381_v20  ;;  %935 = vmatprep.subr.bf16.mxu1 %v1135_v0 }
  0x36   :  { %983 = vmatprep.subr.bf16.mxu0 %v1135_v0 }
  0x38   :  { %937 = vmatpush1.bf16.msra.mxu1 %v936_v26  ;;  %v1008_v26 = vpack.c.bf16 %v194_v22, %v193_v21  ;;  %v68_v21 = vld [vmem:[%s1989_s0 + $0x1b0] sm:$0xff]  ;;  %v77_v22 = vld [vmem:[%s1989_s0 + $0x1f8] sm:$0xff] }
  0x39   :  { %985 = vmatpush1.bf16.msra.mxu0 %v1398_v27  ;;  %938 = vmatprep.subr.bf16.mxu1 %v1135_v0 }
  0x3a   :  { %986 = vmatprep.subr.bf16.mxu0 %v1135_v0 }
  0x3c   :  { %940 = vmatpush1.bf16.msra.mxu1 %v939_v33  ;;  %v50_v33 = vld [vmem:[%s1989_s0 + $0x120] sm:$0xff] }
  0x3d   :  { %988 = vmatpush1.bf16.msra.mxu0 %v1415_v34  ;;  %941 = vmatprep.subr.bf16.mxu1 %v1135_v0 }
  0x3e   :  { %989 = vmatprep.subr.bf16.mxu0 %v1135_v0 }
  0x40   :  { %943 = vmatpush1.bf16.msra.mxu1 %v942_v40  ;;  %v49_v40 = vld [vmem:[%s1989_s0 + $0x118] sm:$0xff] }
  0x41   :  { %991 = vmatpush1.bf16.msra.mxu0 %v1432_v41  ;;  %1016 = vmatprep.subr.bf16.mxu1 %v1135_v0 }
  0x42   :  { %992 = vmatprep.subr.bf16.mxu0 %v1135_v0 }
  0x43   :  { %271 = vmatmul.mubr.f32.vlgmr.msra.gmra.mrb[0].mxu1 %v14_v45  ;;  %v57_v45 = vld [vmem:[%s1989_s0 + $0x158] sm:$0xff] }
  0x44   :  { %441 = vmatmul.mubr.f32.vlgmr.msra.gmra.mrb[0].mxu0 %v16_v46  ;;  %275 = vmatprep.mubr.f32.mxu1 %v20_v48  ;;  %v54_v46 = vld [vmem:[%s1989_s0 + $0x140] sm:$0xff] }
  0x45   :  { %994 = vmatpush3.bf16.msra.mxu0 %v993_v47  ;;  %1032 = vmatpush1.bf16.msra.mxu1 %v1178_v8  ;;  %v187_v8 = vld [vmem:[%s1988_s1 + $0x220] sm:$0xff]  ;;  %v56_v47 = vld [vmem:[%s1989_s0 + $0x150] sm:$0xff] }
  0x46   :  { %445 = vmatprep.mubr.f32.mxu0 %v22_v52  ;;  %995 = vmatprep.subr.bf16.mxu0 %v1135_v0  ;;  %v999_v1 = vpack.c.bf16 %v188_v59, %v187_v8  ;;  %v62_v48 = vld [vmem:[%s1989_s0 + $0x180] sm:$0xff]  ;;  %v65_v52 = vld [vmem:[%s1989_s0 + $0x198] sm:$0xff]  ;;  %v23_v59 = vld [vmem:[%s1989_s0 + $0x48] sm:$0xff] }
  0x47   :  { %276 = vmatmul.mubr.f32.gmra.mrb[2].mxu1 %v19_v53  ;;  %1017 = vmatprep.subr.bf16.mxu1 %v1135_v0  ;;  %v64_v53 = vld [vmem:[%s1989_s0 + $0x190] sm:$0xff]  ;;  %v74_v8 = vld [vmem:[%s1989_s0 + $0x1e0] sm:$0xff] }
  0x48   :  { %446 = vmatmul.mubr.f32.gmra.mrb[2].mxu0 %v21_v54  ;;  %280 = vmatprep.mubr.f32.mxu1 %v25_v55  ;;  %v66_v54 = vld [vmem:[%s1989_s0 + $0x1a0] sm:$0xff] }
  0x49   :  { %450 = vmatprep.mubr.f32.mxu0 %v27_v58  ;;  %997 = vmatpush3.bf16.msra.mxu0 %v996_v57  ;;  %v70_v55 = vld [vmem:[%s1989_s0 + $0x1c0] sm:$0xff]  ;;  %v1137_v57 = vmov 0.0  }
  0x4a   :  { %1033 = vmatpush1.bf16.msra.mxu1 %v1188_v12  ;;  %998 = vmatprep.subr.bf16.mxu0 %v1135_v0  ;;  %v29_v12 = vld [vmem:[%s1989_s0 + $0x78] sm:$0xff]  ;;  %v18_v58 = vld [vmem:[%s1989_s0 + $0x20] sm:$0xff] }
  0x4b   :  { %281 = vmatmul.mubr.f32.gmra.mrb[4].mxu1 %v24_v60  ;;  %1018 = vmatprep.subr.bf16.mxu1 %v1135_v0  ;;  %v79_v60 = vld [vmem:[%s1989_s0 + $0x208] sm:$0xff] }
  0x4c   :  { %451 = vmatmul.mubr.f32.gmra.mrb[4].mxu0 %v26_v61  ;;  %285 = vmatprep.mubr.f32.mxu1 %v30_v63  ;;  %v28_v61 = vld [vmem:[%s1989_s0 + $0x70] sm:$0xff] }
  0x4d   :  { %455 = vmatprep.mubr.f32.mxu0 %v32_v2  ;;  %1000 = vmatpush3.bf16.msra.mxu0 %v999_v1  ;;  %v84_v63 = vld [vmem:[%s1989_s0 + $0x230] sm:$0xff]  ;;  %v33_v1 = vld [vmem:[%s1989_s0 + $0x98] sm:$0xff] }
  0x4e   :  { %1034 = vmatpush1.bf16.msra.mxu1 %v1205_v18  ;;  %1001 = vmatprep.subr.bf16.mxu0 %v1135_v0  ;;  %v34_v18 = vld [vmem:[%s1989_s0 + $0xa0] sm:$0xff]  ;;  %v89_v2 = vld [vmem:[%s1989_s0 + $0x258] sm:$0xff] }
  0x4f   :  { %286 = vmatmul.mubr.f32.gmra.mrb[6].mxu1 %v29_v12  ;;  %1019 = vmatprep.subr.bf16.mxu1 %v1135_v0  ;;  %v43_v12 = vld [vmem:[%s1989_s0 + $0xe8] sm:$0xff] }
  0x50   :  { %456 = vmatmul.mubr.f32.gmra.mrb[6].mxu0 %v31_v6  ;;  %290 = vmatprep.mubr.f32.mxu1 %v35_v7  ;;  %v48_v6 = vld [vmem:[%s1989_s0 + $0x110] sm:$0xff]  ;;  %v105_v7 = vld [vmem:[%s1989_s0 + $0x2d8] sm:$0xff] }
  0x51   :  { %460 = vmatprep.mubr.f32.mxu0 %v37_v10  ;;  %1003 = vmatpush3.bf16.msra.mxu0 %v1002_v9  ;;  %v53_v9 = vld [vmem:[%s1989_s0 + $0x138] sm:$0xff]  ;;  %v110_v10 = vld [vmem:[%s1989_s0 + $0x300] sm:$0xff] }
  0x52   :  { %1035 = vmatpush1.bf16.msra.mxu1 %v1222_v24  ;;  %1004 = vmatprep.subr.bf16.mxu0 %v1135_v0  ;;  %v39_v24 = vld [vmem:[%s1989_s0 + $0xc8] sm:$0xff] }
  0x53   :  { %291 = vmatmul.mubr.f32.gmra.mrb[8].mxu1 %v34_v18  ;;  %1020 = vmatprep.subr.bf16.mxu1 %v1135_v0  ;;  %v115_v18 = vld [vmem:[%s1989_s0 + $0x328] sm:$0xff] }
  0x54   :  { %461 = vmatmul.mubr.f32.gmra.mrb[8].mxu0 %v36_v15  ;;  %295 = vmatprep.mubr.f32.mxu1 %v40_v16  ;;  %v114_v15 = vld [vmem:[%s1989_s0 + $0x320] sm:$0xff]  ;;  %v63_v16 = vld [vmem:[%s1989_s0 + $0x188] sm:$0xff] }
  0x55   :  { %465 = vmatprep.mubr.f32.mxu0 %v42_v19  ;;  %1006 = vmatpush3.bf16.msra.mxu0 %v1005_v17  ;;  %v72_v17 = vld [vmem:[%s1989_s0 + $0x1d0] sm:$0xff]  ;;  %v71_v19 = vld [vmem:[%s1989_s0 + $0x1c8] sm:$0xff] }
  0x56   :  { %1036 = vmatpush1.bf16.msra.mxu1 %v1239_v30  ;;  %1007 = vmatprep.subr.bf16.mxu0 %v1135_v0  ;;  %v46_v30 = vld [vmem:[%s1989_s0 + $0x100] sm:$0xff] }
  0x57   :  { %296 = vmatmul.mubr.f32.gmra.mrb[10].mxu1 %v39_v24  ;;  %1021 = vmatprep.subr.bf16.mxu1 %v1135_v0  ;;  %v76_v24 = vld [vmem:[%s1989_s0 + $0x1f0] sm:$0xff] }
  0x58   :  { %466 = vmatmul.mubr.f32.gmra.mrb[10].mxu0 %v41_v23  ;;  %300 = vmatprep.mubr.f32.mxu1 %v45_v25  ;;  %v73_v23 = vld [vmem:[%s1989_s0 + $0x1d8] sm:$0xff]  ;;  %v82_v25 = vld [vmem:[%s1989_s0 + $0x220] sm:$0xff] }
  0x59   :  { %470 = vmatprep.mubr.f32.mxu0 %v47_v28  ;;  %1009 = vmatpush3.bf16.msra.mxu0 %v1008_v26  ;;  %v81_v26 = vld [vmem:[%s1989_s0 + $0x218] sm:$0xff]  ;;  %v78_v28 = vld [vmem:[%s1989_s0 + $0x200] sm:$0xff] }
  0x5a   :  { %1037 = vmatpush1.bf16.msra.mxu1 %v1256_v36  ;;  %1010 = vmatprep.subr.bf16.mxu0 %v1135_v0  ;;  %v51_v36 = vld [vmem:[%s1989_s0 + $0x128] sm:$0xff] }
  0x5b   :  { %301 = vmatmul.mubr.f32.gmra.mrb[12].mxu1 %v44_v32  ;;  %1022 = vmatprep.subr.bf16.mxu1 %v1135_v0  ;;  %v83_v32 = vld [vmem:[%s1989_s0 + $0x228] sm:$0xff] }
  0x5c   :  { %471 = vmatmul.mubr.f32.gmra.mrb[12].mxu0 %v46_v30  ;;  %305 = vmatprep.mubr.f32.mxu1 %v50_v33  ;;  %v92_v30 = vld [vmem:[%s1989_s0 + $0x270] sm:$0xff]  ;;  %v91_v33 = vld [vmem:[%s1989_s0 + $0x268] sm:$0xff] }
  0x5d   :  { %475 = vmatprep.mubr.f32.mxu0 %v52_v37  ;;  %1012 = vmatpush3.bf16.msra.mxu0 %v1011_v35  ;;  %v88_v35 = vld [vmem:[%s1989_s0 + $0x250] sm:$0xff]  ;;  %v97_v37 = vld [vmem:[%s1989_s0 + $0x298] sm:$0xff] }
  0x5e   :  { %1038 = vmatpush1.bf16.msra.mxu1 %v1279_v44  ;;  %1013 = vmatprep.subr.bf16.mxu0 %v1135_v0  ;;  %v60_v44 = vld [vmem:[%s1989_s0 + $0x170] sm:$0xff] }
  0x5f   :  { %306 = vmatmul.mubr.f32.gmra.mrb[14].mxu1 %v49_v40  ;;  %1023 = vmatprep.subr.bf16.mxu1 %v1135_v0  ;;  %v102_v40 = vld [vmem:[%s1989_s0 + $0x2c0] sm:$0xff] }
  0x60   :  { %476 = vmatmul.mubr.f32.gmra.mrb[14].mxu0 %v51_v36  ;;  %310 = vmatprep.mubr.f32.mxu1 %v55_v42  ;;  %v101_v36 = vld [vmem:[%s1989_s0 + $0x2b8] sm:$0xff]  ;;  %v98_v42 = vld [vmem:[%s1989_s0 + $0x2a0] sm:$0xff] }
  0x61   :  { %480 = vmatprep.mubr.f32.mxu0 %v57_v45  ;;  %1015 = vmatpush3.bf16.msra.mxu0 %v1014_v43  ;;  %v107_v43 = vld [vmem:[%s1989_s0 + $0x2e8] sm:$0xff]  ;;  %v106_v45 = vld [vmem:[%s1989_s0 + $0x2e0] sm:$0xff] }
  0x62   :  { %1039 = vmatpush1.bf16.msra.mxu1 %v1296_v50  ;;  %v67_v50 = vld [vmem:[%s1989_s0 + $0x1a8] sm:$0xff] }
  0x63   :  { %311 = vmatmul.mubr.f32.gmra.mrb[16].mxu1 %v54_v46  ;;  %1024 = vmatprep.subr.bf16.mxu1 %v1135_v0  ;;  %v103_v46 = vld [vmem:[%s1989_s0 + $0x2c8] sm:$0xff] }
  0x64   :  { %481 = vmatmul.mubr.f32.gmra.mrb[16].mxu0 %v56_v47  ;;  %315 = vmatprep.mubr.f32.mxu1 %v60_v44  ;;  %v112_v47 = vld [vmem:[%s1989_s0 + $0x310] sm:$0xff]  ;;  %v111_v44 = vld [vmem:[%s1989_s0 + $0x308] sm:$0xff] }
  0x65   :  { %485 = vmatprep.mubr.f32.mxu0 %v62_v48  ;;  %v108_v48 = vld [vmem:[%s1989_s0 + $0x2f0] sm:$0xff] }
  0x66   :  { %1040 = vmatpush1.bf16.msra.mxu1 %v1313_v56  ;;  %v69_v56 = vld [vmem:[%s1989_s0 + $0x1b8] sm:$0xff] }
  0x67   :  { %316 = vmatmul.mubr.f32.gmra.mrb[18].mxu1 %v59_v49  ;;  %1025 = vmatprep.subr.bf16.mxu1 %v1135_v0  ;;  %v117_v49 = vld [vmem:[%s1989_s0 + $0x338] sm:$0xff] }
  0x68   :  { %486 = vmatmul.mubr.f32.gmra.mrb[18].mxu0 %v61_v51  ;;  %320 = vmatprep.mubr.f32.mxu1 %v65_v52  ;;  %v116_v51 = vld [vmem:[%s1989_s0 + $0x330] sm:$0xff]  ;;  %v113_v52 = vld [vmem:[%s1989_s0 + $0x318] sm:$0xff] }
  0x69   :  { %490 = vmatprep.mubr.f32.mxu0 %v67_v50  ;;  %v118_v50 = vld [vmem:[%s1989_s0 + $0x340] sm:$0xff] }
  0x6a   :  { %1041 = vmatpush1.bf16.msra.mxu1 %v1330_v62  ;;  %v75_v62 = vld [vmem:[%s1989_s0 + $0x1e8] sm:$0xff] }
  0x6b   :  { %321 = vmatmul.mubr.f32.gmra.mrb[20].mxu1 %v64_v53  ;;  %1026 = vmatprep.subr.bf16.mxu1 %v1135_v0 }
  0x6c   :  { %491 = vmatmul.mubr.f32.gmra.mrb[20].mxu0 %v66_v54  ;;  %325 = vmatprep.mubr.f32.mxu1 %v70_v55 }
  0x6d   :  { %833 = vmatprep.mubr.msk.f32.mxu0 %vm1136_vm0, %v1137_v57 }
  0x6e   :  { %1042 = vmatpush1.bf16.msra.mxu1 %v1347_v5  ;;  %v80_v5 = vld [vmem:[%s1989_s0 + $0x210] sm:$0xff] }
  0x6f   :  { %326 = vmatmul.mubr.f32.gmra.mrb[22].mxu1 %v69_v56  ;;  %1027 = vmatprep.subr.bf16.mxu1 %v1135_v0 }
  0x70   :  { %834 = vmatmul.mubr.f32.vlgmr.msra.gmra.mrb[0].mxu0 %v18_v58  ;;  %330 = vmatprep.mubr.f32.mxu1 %v75_v62 }
  0x71   :  { %836 = vmatprep.mubr.msk.f32.mxu0 %vm1136_vm0, %v1137_v57 }
  0x72   :  { %1043 = vmatpush1.bf16.msra.mxu1 %v1364_v13  ;;  %v85_v13 = vld [vmem:[%s1989_s0 + $0x238] sm:$0xff] }
  0x73   :  { %331 = vmatmul.mubr.f32.gmra.mrb[24].mxu1 %v74_v8  ;;  %1028 = vmatprep.subr.bf16.mxu1 %v1135_v0 }
  0x74   :  { %837 = vmatmul.mubr.f32.gmra.mrb[2].mxu0 %v23_v59  ;;  %335 = vmatprep.mubr.f32.mxu1 %v80_v5 }
  0x75   :  { %839 = vmatprep.mubr.msk.f32.mxu0 %vm1136_vm0, %v1137_v57 }
  0x76   :  { %1044 = vmatpush1.bf16.msra.mxu1 %v1381_v20  ;;  %v90_v20 = vld [vmem:[%s1989_s0 + $0x260] sm:$0xff] }
  0x77   :  { %336 = vmatmul.mubr.f32.gmra.mrb[26].mxu1 %v79_v60  ;;  %1029 = vmatprep.subr.bf16.mxu1 %v1135_v0 }
  0x78   :  { %840 = vmatmul.mubr.f32.gmra.mrb[4].mxu0 %v28_v61  ;;  %340 = vmatprep.mubr.f32.mxu1 %v85_v13 }
  0x79   :  { %842 = vmatprep.mubr.msk.f32.mxu0 %vm1136_vm0, %v1137_v57 }
  0x7a   :  { %1045 = vmatpush1.bf16.msra.mxu1 %v1398_v27  ;;  %v95_v27 = vld [vmem:[%s1989_s0 + $0x288] sm:$0xff] }
  0x7b   :  { %341 = vmatmul.mubr.f32.gmra.mrb[28].mxu1 %v84_v63  ;;  %1030 = vmatprep.subr.bf16.mxu1 %v1135_v0 }
  0x7c   :  { %843 = vmatmul.mubr.f32.gmra.mrb[6].mxu0 %v33_v1  ;;  %345 = vmatprep.mubr.f32.mxu1 %v90_v20 }
  0x7d   :  { %845 = vmatprep.mubr.msk.f32.mxu0 %vm1136_vm0, %v1137_v57 }
  0x7e   :  { %1046 = vmatpush1.bf16.msra.mxu1 %v1415_v34  ;;  %v100_v34 = vld [vmem:[%s1989_s0 + $0x2b0] sm:$0xff] }
  0x7f   :  { %346 = vmatmul.mubr.f32.gmra.mrb[30].mxu1 %v89_v2  ;;  %1031 = vmatprep.subr.bf16.mxu1 %v1135_v0  ;;  %v99_v0 = vld [vmem:[%s1989_s0 + $0x2a8] sm:$0xff] }
  0x80   :  { %846 = vmatmul.mubr.f32.gmra.mrb[8].mxu0 %v38_v3  ;;  %350 = vmatprep.mubr.f32.mxu1 %v95_v27 }
  0x81   :  { %848 = vmatprep.mubr.msk.f32.mxu0 %vm1136_vm0, %v1137_v57 }
  0x82   :  { %1047 = vmatpush1.bf16.msra.mxu1 %v1432_v41  ;;  %v104_v41 = vld [vmem:[%s1989_s0 + $0x2d0] sm:$0xff] }
  0x83   :  { %351 = vmatmul.mubr.f32.gmra.mrb[32].mxu1 %v94_v4 }
  0x84   :  { %849 = vmatmul.mubr.f32.gmra.mrb[10].mxu0 %v43_v12  ;;  %355 = vmatprep.mubr.f32.mxu1 %v100_v34  ;;  %v1880_v34 = vld [vmem:[%s1990_s2] ss:$0 sm:$0xff] }
  0x85   :  { %851 = vmatprep.mubr.msk.f32.mxu0 %vm1136_vm0, %v1137_v57 }
  0x87   :  { %356 = vmatmul.mubr.f32.gmra.mrb[34].mxu1 %v99_v0 }
  0x88   :  { %852 = vmatmul.mubr.f32.gmra.mrb[12].mxu0 %v48_v6  ;;  %360 = vmatprep.mubr.f32.mxu1 %v105_v7 }
  0x89   :  { %854 = vmatprep.mubr.msk.f32.mxu0 %vm1136_vm0, %v1137_v57 }
  0x8b   :  { %361 = vmatmul.mubr.f32.gmra.mrb[36].mxu1 %v104_v41 }
  0x8c   :  { %855 = vmatmul.mubr.f32.gmra.mrb[14].mxu0 %v53_v9  ;;  %365 = vmatprep.mubr.f32.mxu1 %v110_v10 }
  0x8d   :  { %857 = vmatprep.mubr.msk.f32.mxu0 %vm1136_vm0, %v1137_v57 }
  0x8f   :  { %366 = vmatmul.mubr.f32.gmra.mrb[38].mxu1 %v109_v11 }
  0x90   :  { %858 = vmatmul.mubr.f32.gmra.mrb[16].mxu0 %v58_v14  ;;  %370 = vmatprep.mubr.f32.mxu1 %v115_v18 }
  0x91   :  { %860 = vmatprep.mubr.msk.f32.mxu0 %vm1136_vm0, %v1137_v57 }
  0x93   :  { %371 = vmatmul.mubr.f32.gmra.mrb[40].mxu1 %v114_v15 }
  0x94   :  { %861 = vmatmul.mubr.f32.gmra.mrb[18].mxu0 %v63_v16  ;;  %495 = vmatprep.mubr.f32.mxu1 %v72_v17 }
  0x95   :  { %863 = vmatprep.mubr.msk.f32.mxu0 %vm1136_vm0, %v1137_v57 }
  0x97   :  { %496 = vmatmul.mubr.f32.vlgmr.msra.gmra.mrb[22].mxu1 %v71_v19 }
  0x98   :  { %864 = vmatmul.mubr.f32.gmra.mrb[20].mxu0 %v68_v21  ;;  %500 = vmatprep.mubr.f32.mxu1 %v77_v22 }
  0x99   :  { %866 = vmatprep.mubr.msk.f32.mxu0 %vm1136_vm0, %v1137_v57 }
  0x9b   :  { %501 = vmatmul.mubr.f32.gmra.mrb[24].mxu1 %v76_v24 }
  0x9c   :  { %867 = vmatmul.mubr.f32.gmra.mrb[22].mxu0 %v73_v23  ;;  %505 = vmatprep.mubr.f32.mxu1 %v82_v25 }
  0x9d   :  { %869 = vmatprep.mubr.msk.f32.mxu0 %vm1136_vm0, %v1137_v57 }
  0x9f   :  { %506 = vmatmul.mubr.f32.gmra.mrb[26].mxu1 %v81_v26 }
  0xa0   :  { %870 = vmatmul.mubr.f32.gmra.mrb[24].mxu0 %v78_v28  ;;  %510 = vmatprep.mubr.f32.mxu1 %v87_v29 }
  0xa1   :  { %872 = vmatprep.mubr.msk.f32.mxu0 %vm1136_vm0, %v1137_v57 }
  0xa3   :  { %511 = vmatmul.mubr.f32.gmra.mrb[28].mxu1 %v86_v31 }
  0xa4   :  { %873 = vmatmul.mubr.f32.gmra.mrb[26].mxu0 %v83_v32  ;;  %515 = vmatprep.mubr.f32.mxu1 %v92_v30 }
  0xa5   :  { %875 = vmatprep.mubr.msk.f32.mxu0 %vm1136_vm0, %v1137_v57 }
  0xa7   :  { %516 = vmatmul.mubr.f32.gmra.mrb[30].mxu1 %v91_v33 }
  0xa8   :  { %876 = vmatmul.mubr.f32.gmra.mrb[28].mxu0 %v88_v35  ;;  %520 = vmatprep.mubr.f32.mxu1 %v97_v37 }
  0xa9   :  { %878 = vmatprep.mubr.msk.f32.mxu0 %vm1136_vm0, %v1137_v57 }
  0xab   :  { %521 = vmatmul.mubr.f32.gmra.mrb[32].mxu1 %v96_v38 }
  0xac   :  { %879 = vmatmul.mubr.f32.gmra.mrb[30].mxu0 %v93_v39  ;;  %525 = vmatprep.mubr.f32.mxu1 %v102_v40 }
  0xad   :  { %881 = vmatprep.mubr.msk.f32.mxu0 %vm1136_vm0, %v1137_v57 }
  0xaf   :  { %526 = vmatmul.mubr.f32.gmra.mrb[34].mxu1 %v101_v36 }
  0xb0   :  { %882 = vmatmul.mubr.f32.gmra.mrb[32].mxu0 %v98_v42  ;;  %530 = vmatprep.mubr.f32.mxu1 %v107_v43 }
  0xb1   :  { %884 = vmatprep.mubr.msk.f32.mxu0 %vm1136_vm0, %v1137_v57 }
  0xb3   :  { %531 = vmatmul.mubr.f32.gmra.mrb[36].mxu1 %v106_v45 }
  0xb4   :  { %885 = vmatmul.mubr.f32.gmra.mrb[34].mxu0 %v103_v46  ;;  %535 = vmatprep.mubr.f32.mxu1 %v112_v47 }
  0xb5   :  { %887 = vmatprep.mubr.msk.f32.mxu0 %vm1136_vm0, %v1137_v57 }
  0xb7   :  { %536 = vmatmul.mubr.f32.gmra.mrb[38].mxu1 %v111_v44 }
  0xb8   :  { %888 = vmatmul.mubr.f32.gmra.mrb[36].mxu0 %v108_v48  ;;  %540 = vmatprep.mubr.f32.mxu1 %v117_v49 }
  0xb9   :  { %890 = vmatprep.mubr.msk.f32.mxu0 %vm1136_vm0, %v1137_v57 }
  0xbb   :  { %541 = vmatmul.mubr.f32.gmra.mrb[40].mxu1 %v116_v51 }
  0xbc   :  { %891 = vmatmul.mubr.f32.gmra.mrb[38].mxu0 %v113_v52 }
  0xbd   :  { %893 = vmatprep.mubr.msk.f32.mxu0 %vm1136_vm0, %v1137_v57 }
  0xc0   :  { %894 = vmatmul.mubr.f32.gmra.mrb[40].mxu0 %v118_v50 }
 0x116   :  { %v272_v53 = vpop.f32.mrb[0].mxu1 }
 0x117   :  { %v274_v54 = vpop.f32.mrb[1].mxu1  ;;  %v273_v6 = vadd.f32 %v1880_v34, %v272_v53 }
 0x11a   :  { %v277_v55 = vpop.f32.mrb[2].mxu1 }
 0x11b   :  { %v279_v56 = vpop.f32.mrb[3].mxu1  ;;  %v278_v10 = vadd.f32 %v1880_v34, %v277_v55 }
 0x11e   :  { %v282_v58 = vpop.f32.mrb[4].mxu1 }
 0x11f   :  { %v284_v62 = vpop.f32.mrb[5].mxu1  ;;  %v283_v16 = vadd.f32 %v1880_v34, %v282_v58 }
 0x122   :  { %v287_v8 = vpop.f32.mrb[6].mxu1 }
 0x123   :  { %v289_v59 = vpop.f32.mrb[7].mxu1  ;;  %v288_v24 = vadd.f32 %v1880_v34, %v287_v8 }
 0x126   :  { %v292_v5 = vpop.f32.mrb[8].mxu1 }
 0x127   :  { %v294_v60 = vpop.f32.mrb[9].mxu1  ;;  %v293_v29 = vadd.f32 %v1880_v34, %v292_v5 }
 0x12a   :  { %v297_v61 = vpop.f32.mrb[10].mxu1 }
 0x12b   :  { %v299_v13 = vpop.f32.mrb[11].mxu1  ;;  %v298_v35 = vadd.f32 %v1880_v34, %v297_v61 }
 0x12e   :  { %v302_v63 = vpop.f32.mrb[12].mxu1 }
 0x12f   :  { %v304_v1 = vpop.f32.mrb[13].mxu1  ;;  %v303_v36 = vadd.f32 %v1880_v34, %v302_v63 }
 0x132   :  { %v307_v57 = vpop.f32.mrb[14].mxu1 }
 0x133   :  { %v309_v20 = vpop.f32.mrb[15].mxu1  ;;  %v308_v47 = vadd.f32 %v1880_v34, %v307_v57 }
 0x136   :  { %v312_v2 = vpop.f32.mrb[16].mxu1 }
 0x137   :  { %v314_v3 = vpop.f32.mrb[17].mxu1  ;;  %v313_v52 = vadd.f32 %v1880_v34, %v312_v2 }
 0x13a   :  { %v317_v27 = vpop.f32.mrb[18].mxu1 }
 0x13b   :  { %v319_v4 = vpop.f32.mrb[19].mxu1  ;;  %v318_v56 = vadd.f32 %v1880_v34, %v317_v27 }
 0x13e   :  { %v1875_v12 = vpop.f32.mrb[20].mxu1 }
 0x13f   :  { %v324_v0 = vpop.f32.mrb[21].mxu1  ;;  %v323_v5 = vadd.f32 %v1880_v34, %v1875_v12 }
 0x143   :  { %v612_v7 = vpop.f32.mrb[0].mxu0 }
 0x144   :  { %v1049_v41 = vadd.f32 %v612_v7, %v273_v6  ;;  %v835_v9 = vpop.f32.mrb[1].mxu0 }
 0x146   :  { %v716_v11 = vmax.f32 %v1049_v41, 0.0 }
 0x147   :  { %v617_v14 = vpop.f32.mrb[2].mxu0 }
 0x148   :  { %738 = vst.msk [vmem:[%s1991_s3] sm:$0xff] %vm737_vm1, %v716_v11  ;;  %v1051_v18 = vadd.f32 %v617_v14, %v278_v10  ;;  %v838_v15 = vpop.f32.mrb[3].mxu0 }
 0x14a   :  { %v717_v17 = vmax.f32 %v1051_v18, 0.0 }
 0x14b   :  { %v622_v19 = vpop.f32.mrb[4].mxu0 }
 0x14c   :  { %739 = vst.msk [vmem:[%s1991_s3 + $0x8] sm:$0xff] %vm737_vm1, %v717_v17  ;;  %v1053_v21 = vadd.f32 %v622_v19, %v283_v16  ;;  %v841_v22 = vpop.f32.mrb[5].mxu0 }
 0x14e   :  { %v718_v23 = vmax.f32 %v1053_v21, 0.0 }
 0x14f   :  { %v627_v25 = vpop.f32.mrb[6].mxu0 }
 0x150   :  { %740 = vst.msk [vmem:[%s1991_s3 + $0x10] sm:$0xff] %vm737_vm1, %v718_v23  ;;  %v1055_v26 = vadd.f32 %v627_v25, %v288_v24  ;;  %v844_v28 = vpop.f32.mrb[7].mxu0 }
 0x152   :  { %v719_v31 = vmax.f32 %v1055_v26, 0.0 }
 0x153   :  { %v632_v32 = vpop.f32.mrb[8].mxu0 }
 0x154   :  { %741 = vst.msk [vmem:[%s1991_s3 + $0x18] sm:$0xff] %vm737_vm1, %v719_v31  ;;  %v1057_v30 = vadd.f32 %v632_v32, %v293_v29  ;;  %v847_v33 = vpop.f32.mrb[9].mxu0 }
 0x156   :  { %v720_v37 = vmax.f32 %v1057_v30, 0.0 }
 0x157   :  { %v637_v38 = vpop.f32.mrb[10].mxu0 }
 0x158   :  { %742 = vst.msk [vmem:[%s1991_s3 + $0x20] sm:$0xff] %vm737_vm1, %v720_v37  ;;  %v1059_v39 = vadd.f32 %v637_v38, %v298_v35  ;;  %v850_v40 = vpop.f32.mrb[11].mxu0 }
 0x15a   :  { %v721_v42 = vmax.f32 %v1059_v39, 0.0 }
 0x15b   :  { %v642_v43 = vpop.f32.mrb[12].mxu0 }
 0x15c   :  { %743 = vst.msk [vmem:[%s1991_s3 + $0x28] sm:$0xff] %vm737_vm1, %v721_v42  ;;  %v1061_v45 = vadd.f32 %v642_v43, %v303_v36  ;;  %v853_v46 = vpop.f32.mrb[13].mxu0 }
 0x15e   :  { %v722_v44 = vmax.f32 %v1061_v45, 0.0 }
 0x15f   :  { %v647_v48 = vpop.f32.mrb[14].mxu0 }
 0x160   :  { %744 = vst.msk [vmem:[%s1991_s3 + $0x30] sm:$0xff] %vm737_vm1, %v722_v44  ;;  %v1063_v49 = vadd.f32 %v647_v48, %v308_v47  ;;  %v856_v51 = vpop.f32.mrb[15].mxu0 }
 0x162   :  { %v723_v50 = vmax.f32 %v1063_v49, 0.0 }
 0x163   :  { %v652_v53 = vpop.f32.mrb[16].mxu0 }
 0x164   :  { %745 = vst.msk [vmem:[%s1991_s3 + $0x38] sm:$0xff] %vm737_vm1, %v723_v50  ;;  %v1065_v54 = vadd.f32 %v652_v53, %v313_v52  ;;  %v859_v55 = vpop.f32.mrb[17].mxu0 }
 0x166   :  { %v724_v58 = vmax.f32 %v1065_v54, 0.0 }
 0x167   :  { %v657_v62 = vpop.f32.mrb[18].mxu0 }
 0x168   :  { %746 = vst.msk [vmem:[%s1991_s3 + $0x40] sm:$0xff] %vm737_vm1, %v724_v58  ;;  %v1067_v8 = vadd.f32 %v657_v62, %v318_v56  ;;  %v862_v59 = vpop.f32.mrb[19].mxu0 }
 0x16a   :  { %v725_v60 = vmax.f32 %v1067_v8, 0.0  ;;  %v497_v61 = vpop.f32.mrb[22].mxu1 }
 0x16b   :  { %v662_v13 = vpop.f32.mrb[20].mxu0  ;;  %v499_v63 = vpop.f32.mrb[23].mxu1  ;;  %v1070_v20 = vadd.f32 %v1880_v34, %v497_v61 }
 0x16c   :  { %747 = vst.msk [vmem:[%s1991_s3 + $0x48] sm:$0xff] %vm737_vm1, %v725_v60  ;;  %v1069_v1 = vadd.f32 %v662_v13, %v323_v5  ;;  %v865_v57 = vpop.f32.mrb[21].mxu0 }
 0x16e   :  { %v726_v2 = vmax.f32 %v1069_v1, 0.0  ;;  %v502_v3 = vpop.f32.mrb[24].mxu1 }
 0x16f   :  { %v667_v27 = vpop.f32.mrb[22].mxu0  ;;  %v504_v4 = vpop.f32.mrb[25].mxu1  ;;  %v1072_v6 = vadd.f32 %v1880_v34, %v502_v3 }
 0x170   :  { %748 = vst.msk [vmem:[%s1991_s3 + $0x50] sm:$0xff] %vm737_vm1, %v726_v2  ;;  %v1071_v12 = vadd.f32 %v1070_v20, %v667_v27  ;;  %v868_v0 = vpop.f32.mrb[23].mxu0 }
 0x172   :  { %v727_v7 = vmax.f32 %v1071_v12, 0.0  ;;  %v507_v41 = vpop.f32.mrb[26].mxu1 }
 0x173   :  { %v672_v9 = vpop.f32.mrb[24].mxu0  ;;  %v509_v10 = vpop.f32.mrb[27].mxu1  ;;  %v1074_v18 = vadd.f32 %v1880_v34, %v507_v41 }
 0x174   :  { %749 = vst.msk [vmem:[%s1991_s3 + $0x58] sm:$0xff] %vm737_vm1, %v727_v7  ;;  %v1073_v11 = vadd.f32 %v1072_v6, %v672_v9  ;;  %v871_v14 = vpop.f32.mrb[25].mxu0 }
 0x176   :  { %v728_v15 = vmax.f32 %v1073_v11, 0.0  ;;  %v512_v16 = vpop.f32.mrb[28].mxu1 }
 0x177   :  { %v677_v17 = vpop.f32.mrb[26].mxu0  ;;  %v514_v19 = vpop.f32.mrb[29].mxu1  ;;  %v1076_v24 = vadd.f32 %v1880_v34, %v512_v16 }
 0x178   :  { %750 = vst.msk [vmem:[%s1991_s3 + $0x60] sm:$0xff] %vm737_vm1, %v728_v15  ;;  %v1075_v21 = vadd.f32 %v1074_v18, %v677_v17  ;;  %v874_v22 = vpop.f32.mrb[27].mxu0 }
 0x17a   :  { %v729_v23 = vmax.f32 %v1075_v21, 0.0  ;;  %v517_v25 = vpop.f32.mrb[30].mxu1 }
 0x17b   :  { %v682_v26 = vpop.f32.mrb[28].mxu0  ;;  %v519_v28 = vpop.f32.mrb[31].mxu1  ;;  %v1078_v32 = vadd.f32 %v1880_v34, %v517_v25 }
 0x17c   :  { %751 = vst.msk [vmem:[%s1991_s3 + $0x68] sm:$0xff] %vm737_vm1, %v729_v23  ;;  %v1077_v29 = vadd.f32 %v1076_v24, %v682_v26  ;;  %v877_v31 = vpop.f32.mrb[29].mxu0 }
 0x17e   :  { %v730_v30 = vmax.f32 %v1077_v29, 0.0  ;;  %v522_v33 = vpop.f32.mrb[32].mxu1 }
 0x17f   :  { %v687_v35 = vpop.f32.mrb[30].mxu0  ;;  %v524_v37 = vpop.f32.mrb[33].mxu1  ;;  %v1080_v40 = vadd.f32 %v1880_v34, %v522_v33 }
 0x180   :  { %752 = vst.msk [vmem:[%s1991_s3 + $0x70] sm:$0xff] %vm737_vm1, %v730_v30  ;;  %v1079_v38 = vadd.f32 %v1078_v32, %v687_v35  ;;  %v880_v39 = vpop.f32.mrb[31].mxu0 }
 0x182   :  { %v731_v36 = vmax.f32 %v1079_v38, 0.0  ;;  %v527_v42 = vpop.f32.mrb[34].mxu1 }
 0x183   :  { %v692_v43 = vpop.f32.mrb[32].mxu0  ;;  %v529_v45 = vpop.f32.mrb[35].mxu1  ;;  %v1082_v44 = vadd.f32 %v1880_v34, %v527_v42 }
 0x184   :  { %753 = vst.msk [vmem:[%s1991_s3 + $0x78] sm:$0xff] %vm737_vm1, %v731_v36  ;;  %v1081_v46 = vadd.f32 %v1080_v40, %v692_v43  ;;  %v883_v47 = vpop.f32.mrb[33].mxu0 }
 0x186   :  { %v732_v48 = vmax.f32 %v1081_v46, 0.0  ;;  %v532_v49 = vpop.f32.mrb[36].mxu1 }
 0x187   :  { %v697_v51 = vpop.f32.mrb[34].mxu0  ;;  %v534_v52 = vpop.f32.mrb[37].mxu1  ;;  %v1084_v54 = vadd.f32 %v1880_v34, %v532_v49 }
 0x188   :  { %754 = vst.msk [vmem:[%s1991_s3 + $0x80] sm:$0xff] %vm737_vm1, %v732_v48  ;;  %v1083_v50 = vadd.f32 %v1082_v44, %v697_v51  ;;  %v886_v53 = vpop.f32.mrb[35].mxu0 }
 0x18a   :  { %v733_v55 = vmax.f32 %v1083_v50, 0.0  ;;  %v537_v56 = vpop.f32.mrb[38].mxu1 }
 0x18b   :  { %v702_v58 = vpop.f32.mrb[36].mxu0  ;;  %v539_v62 = vpop.f32.mrb[39].mxu1  ;;  %v1086_v5 = vadd.f32 %v1880_v34, %v537_v56 }
 0x18c   :  { %755 = vst.msk [vmem:[%s1991_s3 + $0x88] sm:$0xff] %vm737_vm1, %v733_v55  ;;  %v1085_v8 = vadd.f32 %v1084_v54, %v702_v58  ;;  %v889_v59 = vpop.f32.mrb[37].mxu0 }
 0x18e   :  { %v734_v60 = vmax.f32 %v1085_v8, 0.0  ;;  %v542_v61 = vpop.f32.mrb[40].mxu1 }
 0x18f   :  { %v707_v13 = vpop.f32.mrb[38].mxu0  ;;  %v544_v63 = vpop.f32.mrb[41].mxu1  ;;  %v1088_v20 = vadd.f32 %v1880_v34, %v542_v61 }
 0x190   :  { %756 = vst.msk [vmem:[%s1991_s3 + $0x90] sm:$0xff] %vm737_vm1, %v734_v60  ;;  %v1087_v1 = vadd.f32 %v1086_v5, %v707_v13  ;;  %v892_v57 = vpop.f32.mrb[39].mxu0 }
 0x192   :  { %v735_v2 = vmax.f32 %v1087_v1, 0.0 }
 0x193   :  { %v712_v3 = vpop.f32.mrb[40].mxu0 }
 0x194   :  { %757 = vst.msk [vmem:[%s1991_s3 + $0x98] sm:$0xff] %vm737_vm1, %v735_v2  ;;  %v1089_v27 = vadd.f32 %v1088_v20, %v712_v3  ;;  %v895_v4 = vpop.f32.mrb[41].mxu0 }
 0x196   :  { %v736_v12 = vmax.f32 %v1089_v27, 0.0 }
 0x198   :  { %758 = vst.msk [vmem:[%s1991_s3 + $0xa0] sm:$0xff] %vm737_vm1, %v736_v12 }

// kernel: myresnet_forward.16
= control target key start
LH: loop header
LB: loop body
LE: loop exit
PB: predicated region body
PF: predicated region fallthrough
CT: control target
= control target key end

     0   :  { %s1146_s1 = inlined_call_operand.vmem [shape: f32[1024,128], index: 1, kind: input, shape index: {}]   ;;  %s1147_s0 = inlined_call_operand.vmem [shape: f32[8,1024], index: 0, kind: input, shape index: {}]   ;;  %s1148_s2 = inlined_call_operand.vmem [shape: f32[1,128], index: 2, kind: input, shape index: {}]   ;;  %s1149_s3 = inlined_call_operand.vmem [shape: f32[8,128], index: 3, kind: output, shape index: {}]  }
   0x1   :  { %v38_v0 = vld [vmem:[%s1146_s1 + $0x80] sm:$0xff]  ;;  %v39_v1 = vld [vmem:[%s1146_s1 + $0x88] sm:$0xff]  ;;  %v40_v11 = vld [vmem:[%s1146_s1 + $0x90] sm:$0xff] }
   0x2   :  { %v22_v2 = vld [vmem:[%s1146_s1] sm:$0xff]  ;;  %v584_v3 = vpack.c.bf16 %v39_v1, %v38_v0  ;;  %v23_v4 = vld [vmem:[%s1146_s1 + $0x8] sm:$0xff]  ;;  %v41_v13 = vld [vmem:[%s1146_s1 + $0x98] sm:$0xff] }
   0x3   :  { %v70_v5 = vld [vmem:[%s1146_s1 + $0x180] sm:$0xff]  ;;  %v71_v6 = vld [vmem:[%s1146_s1 + $0x188] sm:$0xff]  ;;  %v586_v7 = vpack.c.bf16 %v23_v4, %v22_v2  ;;  %v24_v14 = vld [vmem:[%s1146_s1 + $0x10] sm:$0xff]  ;;  %v588_v16 = vpack.c.bf16 %v41_v13, %v40_v11 }
   0x4   :  { %v616_v8 = vpack.c.bf16 %v71_v6, %v70_v5  ;;  %v54_v9 = vld [vmem:[%s1146_s1 + $0x100] sm:$0xff]  ;;  %v55_v10 = vld [vmem:[%s1146_s1 + $0x108] sm:$0xff]  ;;  %585 = vmatprep.subr.bf16.mxu0 %v584_v3  ;;  %v25_v15 = vld [vmem:[%s1146_s1 + $0x18] sm:$0xff] }
   0x5   :  { %v618_v12 = vpack.c.bf16 %v55_v10, %v54_v9  ;;  %587 = vmatpush3.bf16.msra.mxu0 %v586_v7  ;;  %v590_v17 = vpack.c.bf16 %v25_v15, %v24_v14  ;;  %v72_v18 = vld [vmem:[%s1146_s1 + $0x190] sm:$0xff]  ;;  %v73_v19 = vld [vmem:[%s1146_s1 + $0x198] sm:$0xff]  ;;  %v42_v23 = vld [vmem:[%s1146_s1 + $0xa0] sm:$0xff] }
   0x6   :  { %617 = vmatprep.subr.bf16.mxu1 %v616_v8  ;;  %v56_v20 = vld [vmem:[%s1146_s1 + $0x110] sm:$0xff]  ;;  %v620_v21 = vpack.c.bf16 %v73_v19, %v72_v18  ;;  %v57_v22 = vld [vmem:[%s1146_s1 + $0x118] sm:$0xff]  ;;  %v43_v24 = vld [vmem:[%s1146_s1 + $0xa8] sm:$0xff]  ;;  %589 = vmatprep.subr.bf16.mxu0 %v588_v16 }
   0x7   :  { %619 = vmatpush3.bf16.msra.mxu1 %v618_v12  ;;  %v622_v25 = vpack.c.bf16 %v57_v22, %v56_v20  ;;  %v592_v26 = vpack.c.bf16 %v43_v24, %v42_v23  ;;  %v26_v27 = vld [vmem:[%s1146_s1 + $0x20] sm:$0xff]  ;;  %v27_v28 = vld [vmem:[%s1146_s1 + $0x28] sm:$0xff]  ;;  %v44_v35 = vld [vmem:[%s1146_s1 + $0xb0] sm:$0xff] }
   0x8   :  { %v74_v29 = vld [vmem:[%s1146_s1 + $0x1a0] sm:$0xff]  ;;  %621 = vmatprep.subr.bf16.mxu1 %v620_v21  ;;  %v75_v30 = vld [vmem:[%s1146_s1 + $0x1a8] sm:$0xff]  ;;  %v594_v33 = vpack.c.bf16 %v27_v28, %v26_v27  ;;  %v45_v36 = vld [vmem:[%s1146_s1 + $0xb8] sm:$0xff] }
   0x9   :  { %v58_v31 = vld [vmem:[%s1146_s1 + $0x120] sm:$0xff]  ;;  %v59_v32 = vld [vmem:[%s1146_s1 + $0x128] sm:$0xff]  ;;  %591 = vmatpush3.bf16.msra.mxu0 %v590_v17  ;;  %v624_v34 = vpack.c.bf16 %v75_v30, %v74_v29  ;;  %v28_v37 = vld [vmem:[%s1146_s1 + $0x30] sm:$0xff]  ;;  %v596_v39 = vpack.c.bf16 %v45_v36, %v44_v35 }
   0xa   :  { %593 = vmatprep.subr.bf16.mxu0 %v592_v26  ;;  %v626_v38 = vpack.c.bf16 %v59_v32, %v58_v31  ;;  %v29_v40 = vld [vmem:[%s1146_s1 + $0x38] sm:$0xff]  ;;  %v76_v41 = vld [vmem:[%s1146_s1 + $0x1b0] sm:$0xff]  ;;  %v46_v46 = vld [vmem:[%s1146_s1 + $0xc0] sm:$0xff] }
   0xb   :  { %623 = vmatpush3.bf16.msra.mxu1 %v622_v25  ;;  %v77_v42 = vld [vmem:[%s1146_s1 + $0x1b8] sm:$0xff]  ;;  %v60_v44 = vld [vmem:[%s1146_s1 + $0x130] sm:$0xff]  ;;  %v47_v47 = vld [vmem:[%s1146_s1 + $0xc8] sm:$0xff]  ;;  %v598_v48 = vpack.c.bf16 %v29_v40, %v28_v37 }
   0xc   :  { %625 = vmatprep.subr.bf16.mxu1 %v624_v34  ;;  %v628_v43 = vpack.c.bf16 %v77_v42, %v76_v41  ;;  %v61_v45 = vld [vmem:[%s1146_s1 + $0x138] sm:$0xff]  ;;  %v78_v49 = vld [vmem:[%s1146_s1 + $0x1c0] sm:$0xff]  ;;  %v79_v50 = vld [vmem:[%s1146_s1 + $0x1c8] sm:$0xff]  ;;  %v600_v52 = vpack.c.bf16 %v47_v47, %v46_v46 }
   0xd   :  { %595 = vmatpush3.bf16.msra.mxu0 %v594_v33  ;;  %v630_v51 = vpack.c.bf16 %v61_v45, %v60_v44  ;;  %v30_v53 = vld [vmem:[%s1146_s1 + $0x40] sm:$0xff]  ;;  %v31_v54 = vld [vmem:[%s1146_s1 + $0x48] sm:$0xff]  ;;  %v632_v56 = vpack.c.bf16 %v79_v50, %v78_v49  ;;  %v48_v58 = vld [vmem:[%s1146_s1 + $0xd0] sm:$0xff] }
   0xe   :  { %597 = vmatprep.subr.bf16.mxu0 %v596_v39  ;;  %v62_v55 = vld [vmem:[%s1146_s1 + $0x140] sm:$0xff]  ;;  %v63_v57 = vld [vmem:[%s1146_s1 + $0x148] sm:$0xff]  ;;  %v49_v59 = vld [vmem:[%s1146_s1 + $0xd8] sm:$0xff]  ;;  %v602_v62 = vpack.c.bf16 %v31_v54, %v30_v53 }
   0xf   :  { %627 = vmatpush3.bf16.msra.mxu1 %v626_v38  ;;  %v80_v60 = vld [vmem:[%s1146_s1 + $0x1d0] sm:$0xff]  ;;  %v81_v61 = vld [vmem:[%s1146_s1 + $0x1d8] sm:$0xff]  ;;  %v634_v63 = vpack.c.bf16 %v63_v57, %v62_v55  ;;  %v604_v0 = vpack.c.bf16 %v49_v59, %v48_v58  ;;  %v50_v6 = vld [vmem:[%s1146_s1 + $0xe0] sm:$0xff] }
  0x10   :  { %629 = vmatprep.subr.bf16.mxu1 %v628_v43  ;;  %v32_v1 = vld [vmem:[%s1146_s1 + $0x50] sm:$0xff]  ;;  %v33_v2 = vld [vmem:[%s1146_s1 + $0x58] sm:$0xff]  ;;  %v636_v4 = vpack.c.bf16 %v81_v61, %v80_v60  ;;  %v51_v7 = vld [vmem:[%s1146_s1 + $0xe8] sm:$0xff] }
  0x11   :  { %599 = vmatpush3.bf16.msra.mxu0 %v598_v48  ;;  %v64_v3 = vld [vmem:[%s1146_s1 + $0x150] sm:$0xff]  ;;  %v65_v5 = vld [vmem:[%s1146_s1 + $0x158] sm:$0xff]  ;;  %v82_v8 = vld [vmem:[%s1146_s1 + $0x1e0] sm:$0xff]  ;;  %v606_v10 = vpack.c.bf16 %v33_v2, %v32_v1  ;;  %v608_v14 = vpack.c.bf16 %v51_v7, %v50_v6 }
  0x12   :  { %601 = vmatprep.subr.bf16.mxu0 %v600_v52  ;;  %v83_v9 = vld [vmem:[%s1146_s1 + $0x1e8] sm:$0xff]  ;;  %v34_v11 = vld [vmem:[%s1146_s1 + $0x60] sm:$0xff]  ;;  %v638_v13 = vpack.c.bf16 %v65_v5, %v64_v3  ;;  %v52_v19 = vld [vmem:[%s1146_s1 + $0xf0] sm:$0xff] }
  0x13   :  { %631 = vmatpush3.bf16.msra.mxu1 %v630_v51  ;;  %v35_v12 = vld [vmem:[%s1146_s1 + $0x68] sm:$0xff]  ;;  %v66_v15 = vld [vmem:[%s1146_s1 + $0x160] sm:$0xff]  ;;  %v640_v18 = vpack.c.bf16 %v83_v9, %v82_v8  ;;  %v53_v20 = vld [vmem:[%s1146_s1 + $0xf8] sm:$0xff] }
  0x14   :  { %633 = vmatprep.subr.bf16.mxu1 %v632_v56  ;;  %v67_v16 = vld [vmem:[%s1146_s1 + $0x168] sm:$0xff]  ;;  %v17_v21 = vld [vmem:[%s1147_s0 + $0x18] sm:$0xff]  ;;  %v84_v22 = vld [vmem:[%s1146_s1 + $0x1f0] sm:$0xff]  ;;  %v610_v24 = vpack.c.bf16 %v35_v12, %v34_v11  ;;  %v612_v26 = vpack.c.bf16 %v53_v20, %v52_v19 }
  0x15   :  { %603 = vmatpush3.bf16.msra.mxu0 %v602_v62  ;;  %v15_v17 = vld [vmem:[%s1147_s0 + $0x8] sm:$0xff]  ;;  %v85_v23 = vld [vmem:[%s1146_s1 + $0x1f8] sm:$0xff]  ;;  %291 = vmatprep.mubr.f32.mxu1 %v17_v21  ;;  %v642_v25 = vpack.c.bf16 %v67_v16, %v66_v15  ;;  %v36_v27 = vld [vmem:[%s1146_s1 + $0x70] sm:$0xff] }
  0x16   :  { %605 = vmatprep.subr.bf16.mxu0 %v604_v0  ;;  %221 = vmatprep.mubr.f32.mxu0 %v15_v17  ;;  %v37_v28 = vld [vmem:[%s1146_s1 + $0x78] sm:$0xff]  ;;  %v68_v29 = vld [vmem:[%s1146_s1 + $0x170] sm:$0xff]  ;;  %v644_v30 = vpack.c.bf16 %v85_v23, %v84_v22  ;;  %v102_v32 = vld [vmem:[%s1146_s1 + $0x280] sm:$0xff] }
  0x17   :  { %635 = vmatpush3.bf16.msra.mxu1 %v634_v63  ;;  %v69_v31 = vld [vmem:[%s1146_s1 + $0x178] sm:$0xff]  ;;  %v103_v33 = vld [vmem:[%s1146_s1 + $0x288] sm:$0xff]  ;;  %v134_v34 = vld [vmem:[%s1146_s1 + $0x380] sm:$0xff]  ;;  %v614_v36 = vpack.c.bf16 %v37_v28, %v36_v27 }
  0x18   :  { %637 = vmatprep.subr.bf16.mxu1 %v636_v4  ;;  %v135_v35 = vld [vmem:[%s1146_s1 + $0x388] sm:$0xff]  ;;  %v646_v37 = vpack.c.bf16 %v69_v31, %v68_v29  ;;  %v648_v38 = vpack.c.bf16 %v103_v33, %v102_v32  ;;  %v86_v39 = vld [vmem:[%s1146_s1 + $0x200] sm:$0xff]  ;;  %v104_v44 = vld [vmem:[%s1146_s1 + $0x290] sm:$0xff] }
  0x19   :  { %607 = vmatpush3.bf16.msra.mxu0 %v606_v10  ;;  %v87_v40 = vld [vmem:[%s1146_s1 + $0x208] sm:$0xff]  ;;  %v118_v41 = vld [vmem:[%s1146_s1 + $0x300] sm:$0xff]  ;;  %v680_v42 = vpack.c.bf16 %v135_v35, %v134_v34  ;;  %v105_v45 = vld [vmem:[%s1146_s1 + $0x298] sm:$0xff] }
  0x1a   :  { %609 = vmatprep.subr.bf16.mxu0 %v608_v14  ;;  %v119_v43 = vld [vmem:[%s1146_s1 + $0x308] sm:$0xff]  ;;  %v136_v46 = vld [vmem:[%s1146_s1 + $0x390] sm:$0xff]  ;;  %v137_v47 = vld [vmem:[%s1146_s1 + $0x398] sm:$0xff]  ;;  %v650_v49 = vpack.c.bf16 %v87_v40, %v86_v39  ;;  %v652_v52 = vpack.c.bf16 %v105_v45, %v104_v44 }
  0x1b   :  { %639 = vmatpush3.bf16.msra.mxu1 %v638_v13  ;;  %v14_v48 = vld [vmem:[%s1147_s0] sm:$0xff]  ;;  %v16_v50 = vld [vmem:[%s1147_s0 + $0x10] sm:$0xff]  ;;  %v682_v51 = vpack.c.bf16 %v119_v43, %v118_v41  ;;  %v89_v54 = vld [vmem:[%s1146_s1 + $0x218] sm:$0xff]  ;;  %v684_v56 = vpack.c.bf16 %v137_v47, %v136_v46 }
  0x1c   :  { %641 = vmatprep.subr.bf16.mxu1 %v640_v18  ;;  %v88_v53 = vld [vmem:[%s1146_s1 + $0x210] sm:$0xff]  ;;  %v121_v57 = vld [vmem:[%s1146_s1 + $0x318] sm:$0xff]  ;;  %v106_v58 = vld [vmem:[%s1146_s1 + $0x2a0] sm:$0xff] }
  0x1d   :  { %611 = vmatpush3.bf16.msra.mxu0 %v610_v24  ;;  %v120_v55 = vld [vmem:[%s1146_s1 + $0x310] sm:$0xff]  ;;  %v107_v59 = vld [vmem:[%s1146_s1 + $0x2a8] sm:$0xff]  ;;  %v138_v60 = vld [vmem:[%s1146_s1 + $0x3a0] sm:$0xff]  ;;  %v654_v62 = vpack.c.bf16 %v89_v54, %v88_v53 }
  0x1e   :  { %613 = vmatprep.subr.bf16.mxu0 %v612_v26  ;;  %v139_v61 = vld [vmem:[%s1146_s1 + $0x3a8] sm:$0xff]  ;;  %v686_v63 = vpack.c.bf16 %v121_v57, %v120_v55  ;;  %v656_v0 = vpack.c.bf16 %v107_v59, %v106_v58  ;;  %v90_v1 = vld [vmem:[%s1146_s1 + $0x220] sm:$0xff]  ;;  %v108_v6 = vld [vmem:[%s1146_s1 + $0x2b0] sm:$0xff] }
  0x1f   :  { %643 = vmatpush3.bf16.msra.mxu1 %v642_v25  ;;  %v91_v2 = vld [vmem:[%s1146_s1 + $0x228] sm:$0xff]  ;;  %v122_v3 = vld [vmem:[%s1146_s1 + $0x320] sm:$0xff]  ;;  %v688_v4 = vpack.c.bf16 %v139_v61, %v138_v60  ;;  %v109_v7 = vld [vmem:[%s1146_s1 + $0x2b8] sm:$0xff] }
  0x20   :  { %645 = vmatprep.subr.bf16.mxu1 %v644_v30  ;;  %v123_v5 = vld [vmem:[%s1146_s1 + $0x328] sm:$0xff]  ;;  %v140_v8 = vld [vmem:[%s1146_s1 + $0x3b0] sm:$0xff]  ;;  %v141_v9 = vld [vmem:[%s1146_s1 + $0x3b8] sm:$0xff]  ;;  %v658_v10 = vpack.c.bf16 %v91_v2, %v90_v1  ;;  %v660_v12 = vpack.c.bf16 %v109_v7, %v108_v6 }
  0x21   :  { %615 = vmatpush3.bf16.msra.mxu0 %v614_v36  ;;  %v690_v11 = vpack.c.bf16 %v123_v5, %v122_v3  ;;  %v92_v13 = vld [vmem:[%s1146_s1 + $0x230] sm:$0xff]  ;;  %v93_v14 = vld [vmem:[%s1146_s1 + $0x238] sm:$0xff]  ;;  %v692_v16 = vpack.c.bf16 %v141_v9, %v140_v8  ;;  %v110_v18 = vld [vmem:[%s1146_s1 + $0x2c0] sm:$0xff] }
  0x22   :  { %649 = vmatprep.subr.bf16.mxu0 %v648_v38  ;;  %v124_v15 = vld [vmem:[%s1146_s1 + $0x330] sm:$0xff]  ;;  %v125_v17 = vld [vmem:[%s1146_s1 + $0x338] sm:$0xff]  ;;  %v111_v19 = vld [vmem:[%s1146_s1 + $0x2c8] sm:$0xff]  ;;  %v662_v22 = vpack.c.bf16 %v93_v14, %v92_v13 }
  0x23   :  { %647 = vmatpush3.bf16.msra.mxu1 %v646_v37  ;;  %v142_v20 = vld [vmem:[%s1146_s1 + $0x3c0] sm:$0xff]  ;;  %v143_v21 = vld [vmem:[%s1146_s1 + $0x3c8] sm:$0xff]  ;;  %v21_v24 = vld [vmem:[%s1147_s0 + $0x38] sm:$0xff]  ;;  %v694_v25 = vpack.c.bf16 %v125_v17, %v124_v15  ;;  %v664_v26 = vpack.c.bf16 %v111_v19, %v110_v18 }
  0x24   :  { %681 = vmatprep.subr.bf16.mxu1 %v680_v42  ;;  %222 = vmatmul.mubr.f32.vlgmr.msra.gmra.mrb[0].mxu0 %v14_v48  ;;  %v19_v23 = vld [vmem:[%s1147_s0 + $0x28] sm:$0xff]  ;;  %v94_v27 = vld [vmem:[%s1146_s1 + $0x240] sm:$0xff]  ;;  %v696_v30 = vpack.c.bf16 %v143_v21, %v142_v20  ;;  %v112_v32 = vld [vmem:[%s1146_s1 + $0x2d0] sm:$0xff] }
  0x25   :  { %651 = vmatpush3.bf16.msra.mxu0 %v650_v49  ;;  %v95_v28 = vld [vmem:[%s1146_s1 + $0x248] sm:$0xff]  ;;  %v126_v29 = vld [vmem:[%s1146_s1 + $0x340] sm:$0xff]  ;;  %v113_v33 = vld [vmem:[%s1146_s1 + $0x2d8] sm:$0xff]  ;;  %361 = vmatprep.mubr.f32.mxu0 %v19_v23 }
  0x26   :  { %292 = vmatmul.mubr.f32.vlgmr.msra.gmra.mrb[0].mxu1 %v16_v50  ;;  %653 = vmatprep.subr.bf16.mxu0 %v652_v52  ;;  %v127_v31 = vld [vmem:[%s1146_s1 + $0x348] sm:$0xff]  ;;  %v144_v34 = vld [vmem:[%s1146_s1 + $0x3d0] sm:$0xff]  ;;  %v145_v35 = vld [vmem:[%s1146_s1 + $0x3d8] sm:$0xff]  ;;  %v666_v36 = vpack.c.bf16 %v95_v28, %v94_v27  ;;  %v668_v38 = vpack.c.bf16 %v113_v33, %v112_v32 }
  0x27   :  { %683 = vmatpush3.bf16.msra.mxu1 %v682_v51  ;;  %431 = vmatprep.mubr.f32.mxu1 %v21_v24  ;;  %v698_v37 = vpack.c.bf16 %v127_v31, %v126_v29  ;;  %v96_v39 = vld [vmem:[%s1146_s1 + $0x250] sm:$0xff]  ;;  %v97_v40 = vld [vmem:[%s1146_s1 + $0x258] sm:$0xff]  ;;  %v700_v42 = vpack.c.bf16 %v145_v35, %v144_v34  ;;  %v114_v44 = vld [vmem:[%s1146_s1 + $0x2e0] sm:$0xff] }
  0x28   :  { %685 = vmatprep.subr.bf16.mxu1 %v684_v56  ;;  %v128_v41 = vld [vmem:[%s1146_s1 + $0x350] sm:$0xff]  ;;  %v129_v43 = vld [vmem:[%s1146_s1 + $0x358] sm:$0xff]  ;;  %v115_v45 = vld [vmem:[%s1146_s1 + $0x2e8] sm:$0xff]  ;;  %v670_v48 = vpack.c.bf16 %v97_v40, %v96_v39 }
  0x29   :  { %655 = vmatpush3.bf16.msra.mxu0 %v654_v62  ;;  %v146_v46 = vld [vmem:[%s1146_s1 + $0x3e0] sm:$0xff]  ;;  %v147_v47 = vld [vmem:[%s1146_s1 + $0x3e8] sm:$0xff]  ;;  %v702_v49 = vpack.c.bf16 %v129_v43, %v128_v41  ;;  %v672_v50 = vpack.c.bf16 %v115_v45, %v114_v44  ;;  %v116_v56 = vld [vmem:[%s1146_s1 + $0x2f0] sm:$0xff] }
  0x2a   :  { %657 = vmatprep.subr.bf16.mxu0 %v656_v0  ;;  %v98_v51 = vld [vmem:[%s1146_s1 + $0x260] sm:$0xff]  ;;  %v99_v52 = vld [vmem:[%s1146_s1 + $0x268] sm:$0xff]  ;;  %v704_v54 = vpack.c.bf16 %v147_v47, %v146_v46  ;;  %v117_v57 = vld [vmem:[%s1146_s1 + $0x2f8] sm:$0xff] }
  0x2b   :  { %687 = vmatpush3.bf16.msra.mxu1 %v686_v63  ;;  %v130_v53 = vld [vmem:[%s1146_s1 + $0x360] sm:$0xff]  ;;  %v131_v55 = vld [vmem:[%s1146_s1 + $0x368] sm:$0xff]  ;;  %v148_v58 = vld [vmem:[%s1146_s1 + $0x3f0] sm:$0xff]  ;;  %v674_v60 = vpack.c.bf16 %v99_v52, %v98_v51  ;;  %v676_v62 = vpack.c.bf16 %v117_v57, %v116_v56 }
  0x2c   :  { %689 = vmatprep.subr.bf16.mxu1 %v688_v4  ;;  %v149_v59 = vld [vmem:[%s1146_s1 + $0x3f8] sm:$0xff]  ;;  %v706_v61 = vpack.c.bf16 %v131_v55, %v130_v53  ;;  %v100_v63 = vld [vmem:[%s1146_s1 + $0x270] sm:$0xff]  ;;  %v18_v6 = vld [vmem:[%s1147_s0 + $0x20] sm:$0xff] }
  0x2d   :  { %659 = vmatpush3.bf16.msra.mxu0 %v658_v10  ;;  %v101_v0 = vld [vmem:[%s1146_s1 + $0x278] sm:$0xff]  ;;  %v708_v1 = vpack.c.bf16 %v149_v59, %v148_v58  ;;  %v132_v2 = vld [vmem:[%s1146_s1 + $0x370] sm:$0xff]  ;;  %v443_v9 = vld [vmem:[%s1148_s2] ss:$0 sm:$0xff] }
  0x2e   :  { %661 = vmatprep.subr.bf16.mxu0 %v660_v12  ;;  %v133_v3 = vld [vmem:[%s1146_s1 + $0x378] sm:$0xff]  ;;  %v678_v4 = vpack.c.bf16 %v101_v0, %v100_v63  ;;  %v20_v7 = vld [vmem:[%s1147_s0 + $0x30] sm:$0xff] }
  0x2f   :  { %691 = vmatpush3.bf16.msra.mxu1 %v690_v11  ;;  %v710_v5 = vpack.c.bf16 %v133_v3, %v132_v2 }
  0x30   :  { %693 = vmatprep.subr.bf16.mxu1 %v692_v16 }
  0x31   :  { %663 = vmatpush3.bf16.msra.mxu0 %v662_v22 }
  0x32   :  { %665 = vmatprep.subr.bf16.mxu0 %v664_v26 }
  0x33   :  { %695 = vmatpush3.bf16.msra.mxu1 %v694_v25 }
  0x34   :  { %697 = vmatprep.subr.bf16.mxu1 %v696_v30 }
  0x35   :  { %667 = vmatpush3.bf16.msra.mxu0 %v666_v36 }
  0x36   :  { %669 = vmatprep.subr.bf16.mxu0 %v668_v38 }
  0x37   :  { %699 = vmatpush3.bf16.msra.mxu1 %v698_v37 }
  0x38   :  { %701 = vmatprep.subr.bf16.mxu1 %v700_v42 }
  0x39   :  { %671 = vmatpush3.bf16.msra.mxu0 %v670_v48 }
  0x3a   :  { %673 = vmatprep.subr.bf16.mxu0 %v672_v50 }
  0x3b   :  { %703 = vmatpush3.bf16.msra.mxu1 %v702_v49 }
  0x3c   :  { %705 = vmatprep.subr.bf16.mxu1 %v704_v54 }
  0x3d   :  { %675 = vmatpush3.bf16.msra.mxu0 %v674_v60 }
  0x3e   :  { %677 = vmatprep.subr.bf16.mxu0 %v676_v62 }
  0x3f   :  { %707 = vmatpush3.bf16.msra.mxu1 %v706_v61 }
  0x40   :  { %709 = vmatprep.subr.bf16.mxu1 %v708_v1 }
  0x41   :  { %679 = vmatpush3.bf16.msra.mxu0 %v678_v4 }
  0x43   :  { %711 = vmatpush3.bf16.msra.mxu1 %v710_v5 }
  0x44   :  { %362 = vmatmul.mubr.f32.vlgmr.msra.gmra.mrb[2].mxu0 %v18_v6 }
  0x46   :  { %432 = vmatmul.mubr.f32.vlgmr.msra.gmra.mrb[2].mxu1 %v20_v7 }
  0xf7   :  { %v476_v8 = vpop.f32.mrb[0].mxu0 }
  0xf8   :  { %v477_v10 = vpop.f32.mrb[1].mxu0 }
  0xf9   :  { %v511_v11 = vpop.f32.mrb[0].mxu1  ;;  %v478_v12 = vadd.f32 %v477_v10, %v476_v8 }
  0xfa   :  { %v512_v13 = vpop.f32.mrb[1].mxu1 }
  0xfb   :  { %v513_v14 = vadd.f32 %v512_v13, %v511_v11  ;;  %v224_v15 = vadd.f32 %v478_v12, %v443_v9 }
  0xfd   :  { %v294_v16 = vadd.f32 %v513_v14, %v224_v15 }
 0x117   :  { %v546_v17 = vpop.f32.mrb[2].mxu0 }
 0x118   :  { %v547_v18 = vpop.f32.mrb[3].mxu0 }
 0x119   :  { %v581_v19 = vpop.f32.mrb[2].mxu1  ;;  %v548_v20 = vadd.f32 %v547_v18, %v546_v17 }
 0x11a   :  { %v582_v21 = vpop.f32.mrb[3].mxu1 }
 0x11b   :  { %v583_v22 = vadd.f32 %v582_v21, %v581_v19  ;;  %v364_v23 = vadd.f32 %v548_v20, %v294_v16 }
 0x11d   :  { %v434_v24 = vadd.f32 %v583_v22, %v364_v23 }
 0x11f   :  { %v437_v25 = vmax.f32 %v434_v24, 0.0 }
 0x121   :  { %438 = vst [vmem:[%s1149_s3] sm:$0xff] %v437_v25 }

// kernel: myresnet_forward.17
= control target key start
LH: loop header
LB: loop body
LE: loop exit
PB: predicated region body
PF: predicated region fallthrough
CT: control target
= control target key end

     0   :  { %v203_v0 = vmov 0.0|0.0   ;;  %vm204_vm0 = vmmov 0   ;;  %v205_v4 = vmov 0.0   ;;  %s283_s1 = inlined_call_operand.vmem [shape: f32[128,128], index: 1, kind: input, shape index: {}]   ;;  %s284_s0 = inlined_call_operand.vmem [shape: f32[8,128], index: 0, kind: input, shape index: {}]   ;;  %s285_s2 = inlined_call_operand.vmem [shape: f32[1,128], index: 2, kind: input, shape index: {}]   ;;  %s286_s3 = inlined_call_operand.vmem [shape: f32[8,128], index: 3, kind: output, shape index: {}]  }
   0x1   :  { %172 = vmatprep.subr.bf16.mxu0 %v203_v0  ;;  %v15_v1 = vld [vmem:[%s283_s1] sm:$0xff]  ;;  %v16_v2 = vld [vmem:[%s283_s1 + $0x8] sm:$0xff]  ;;  %v17_v3 = vld [vmem:[%s283_s1 + $0x10] sm:$0xff]  ;;  %169 = vmatprep.mubr.msk.f32.mxu0 %vm204_vm0, %v205_v4 }
   0x2   :  { %v173_v5 = vpack.c.bf16 %v16_v2, %v15_v1  ;;  %v18_v6 = vld [vmem:[%s283_s1 + $0x18] sm:$0xff]  ;;  %v19_v8 = vld [vmem:[%s283_s1 + $0x20] sm:$0xff]  ;;  %v20_v9 = vld [vmem:[%s283_s1 + $0x28] sm:$0xff] }
   0x3   :  { %v176_v7 = vpack.c.bf16 %v18_v6, %v17_v3  ;;  %v179_v10 = vpack.c.bf16 %v20_v9, %v19_v8  ;;  %v21_v11 = vld [vmem:[%s283_s1 + $0x30] sm:$0xff]  ;;  %v22_v12 = vld [vmem:[%s283_s1 + $0x38] sm:$0xff]  ;;  %v23_v14 = vld [vmem:[%s283_s1 + $0x40] sm:$0xff] }
   0x4   :  { %174 = vmatpush3.bf16.msra.mxu0 %v173_v5  ;;  %v182_v13 = vpack.c.bf16 %v22_v12, %v21_v11  ;;  %v24_v15 = vld [vmem:[%s283_s1 + $0x48] sm:$0xff]  ;;  %v25_v17 = vld [vmem:[%s283_s1 + $0x50] sm:$0xff]  ;;  %v26_v18 = vld [vmem:[%s283_s1 + $0x58] sm:$0xff] }
   0x5   :  { %175 = vmatprep.subr.bf16.mxu0 %v203_v0  ;;  %v185_v16 = vpack.c.bf16 %v24_v15, %v23_v14  ;;  %v188_v19 = vpack.c.bf16 %v26_v18, %v25_v17  ;;  %v27_v20 = vld [vmem:[%s283_s1 + $0x60] sm:$0xff]  ;;  %v28_v21 = vld [vmem:[%s283_s1 + $0x68] sm:$0xff]  ;;  %v29_v23 = vld [vmem:[%s283_s1 + $0x70] sm:$0xff] }
   0x6   :  { %v191_v22 = vpack.c.bf16 %v28_v21, %v27_v20  ;;  %v30_v24 = vld [vmem:[%s283_s1 + $0x78] sm:$0xff]  ;;  %v14_v26 = vld [vmem:[%s284_s0] sm:$0xff] }
   0x7   :  { %v194_v25 = vpack.c.bf16 %v30_v24, %v29_v23  ;;  %v119_v27 = vld [vmem:[%s285_s2] ss:$0 sm:$0xff] }
   0x8   :  { %177 = vmatpush3.bf16.msra.mxu0 %v176_v7 }
   0x9   :  { %178 = vmatprep.subr.bf16.mxu0 %v203_v0 }
   0xc   :  { %180 = vmatpush3.bf16.msra.mxu0 %v179_v10 }
   0xd   :  { %181 = vmatprep.subr.bf16.mxu0 %v203_v0 }
  0x10   :  { %183 = vmatpush3.bf16.msra.mxu0 %v182_v13 }
  0x11   :  { %184 = vmatprep.subr.bf16.mxu0 %v203_v0 }
  0x14   :  { %186 = vmatpush3.bf16.msra.mxu0 %v185_v16 }
  0x15   :  { %187 = vmatprep.subr.bf16.mxu0 %v203_v0 }
  0x18   :  { %189 = vmatpush3.bf16.msra.mxu0 %v188_v19 }
  0x19   :  { %190 = vmatprep.subr.bf16.mxu0 %v203_v0 }
  0x1c   :  { %192 = vmatpush3.bf16.msra.mxu0 %v191_v22 }
  0x1d   :  { %193 = vmatprep.subr.bf16.mxu0 %v203_v0 }
  0x20   :  { %195 = vmatpush3.bf16.msra.mxu0 %v194_v25 }
  0x23   :  { %170 = vmatmul.mubr.f32.vlgmr.msra.gmra.mrb[0].mxu0 %v14_v26 }
  0xf6   :  { %v104_v28 = vpop.f32.mrb[0].mxu0 }
  0xf7   :  { %v105_v29 = vadd.f32 %v119_v27, %v104_v28  ;;  %v171_v30 = vpop.f32.mrb[1].mxu0 }
  0xf9   :  { %v108_v31 = vsub.f32 0.0, %v105_v29 }
  0xfb   :  { %v109_v32 = vmul.f32 1.442695, %v108_v31 }
  0xfd   :  { %199 = vpow2.f32 %v109_v32 }
 0x107   :  { %v200_v33 = vpop.eup %199 }
 0x108   :  { %v111_v34 = vadd.f32 1.0, %v200_v33 }
 0x10a   :  { %201 = vrcp.f32 %v111_v34 }
 0x114   :  { %v202_v35 = vpop.eup %201 }
 0x115   :  { %114 = vst [vmem:[%s286_s3] sm:$0xff] %v202_v35 }

</bundles_post_ra>
